<compile_context>
chip_gen: v5e
topology: v5e:2x2
jax: 0.10.0
libtpu: 0.0.40
codegen_flags: <defaults>
</compile_context>

<pallas_src>
import functools

import numpy as np
import jax
import jax.numpy as jnp
from jax.experimental import pallas as pl
from jax.experimental.pallas import tpu as pltpu

LANES = 128      # pad channels to a full lane width
SUBLANES = 8


def _round_up(x, m):
    return (x + m - 1) // m * m


def _m_decoder_kernel(x_ref, w_ref, m_ref, o_ref, canvas_ref, *,
                      n_layers, wp, front, back, npr, cpad):
    """Fused n_layers x (conv3x3 + relu6) for one batch element.

    x_ref:      (1, npr, cpad)             flattened, spatially+channel padded image
    w_ref:      (n_layers, 9, cpad, cpad)  packed weights (tap-major, Cin x Cout)
    m_ref:      (npr, 1)                   1.0 on interior pixels, 0.0 on padding ring
    o_ref:      (1, npr, cpad)             flattened padded output canvas
    canvas_ref: (front + npr + back, cpad) VMEM scratch holding the live activation
    """
    # Zero only the halo margins; the interior npr block is fully overwritten
    # by the (already ring-zero-padded) input written right below.
    canvas_ref[pl.ds(0, front), :] = jnp.zeros((front, cpad), jnp.float32)
    canvas_ref[pl.ds(front + npr, back), :] = jnp.zeros((back, cpad), jnp.float32)
    canvas_ref[pl.ds(front, npr), :] = x_ref[0]

    mask = m_ref[...]                                   # (npr, 1) f32

    for layer in range(n_layers):
        acc = None
        tap = 0
        for dh in (-1, 0, 1):
            for dw in (-1, 0, 1):
                s = dh * wp + dw                        # flat-canvas tap offset (static)
                shifted = canvas_ref[pl.ds(front + s, npr), :]   # (npr, cpad)
                part = jnp.dot(shifted, w_ref[layer, tap],
                               preferred_element_type=jnp.float32)
                acc = part if acc is None else acc + part
                tap += 1
        act = jnp.clip(acc, 0.0, 6.0)                   # relu6 in f32
        if layer + 1 < n_layers:
            # Re-zero the padding ring (and rounding rows) before the next conv.
            canvas_ref[pl.ds(front, npr), :] = act * mask        # stays in VMEM
        else:
            # Ring is cropped in the wrapper; store lane-dense without masking.
            o_ref[0] = act.astype(o_ref.dtype)


def m_decoder_forward(x_nchw, weights_hwio):
    """M_Decoder forward.  x_nchw: (N, Cin, H, W) f32; weights: list of HWIO tensors."""
    N, Cin, H, W = x_nchw.shape
    n_layers = len(weights_hwio)
    Cout = weights_hwio[-1].shape[-1]

    Hp, Wp = H + 2, W + 2
    NP = Hp * Wp                          # flattened padded canvas length
    NPR = _round_up(NP, SUBLANES)         # rounded up to a sublane multiple
    CPAD = LANES
    MAXSHIFT = Wp + 1                     # largest |tap offset| = Wp + 1
    FRONT = _round_up(MAXSHIFT, SUBLANES)
    BACK = _round_up(MAXSHIFT, SUBLANES)
    CANVAS_ROWS = FRONT + NPR + BACK

    assert Cin <= CPAD and Cout <= CPAD
    for w in weights_hwio:
        assert w.shape[0] == 3 and w.shape[1] == 3
        assert w.shape[2] <= CPAD and w.shape[3] <= CPAD

    # ---- pack inputs once (wrapper-side glue; tiny at these shapes) ----
    # NCHW -> NHWC, zero-pad H/W by 1, zero-pad channels to 128, flatten H*W.
    x = jnp.transpose(x_nchw, (0, 2, 3, 1)).astype(jnp.float32)
    x = jnp.pad(x, ((0, 0), (1, 1), (1, 1), (0, CPAD - Cin)))
    x = x.reshape(N, NP, CPAD)
    x = jnp.pad(x, ((0, 0), (0, NPR - NP), (0, 0)))            # (N, NPR, CPAD)

    # Pack all layer weights as (n_layers, 9, CPAD, CPAD), zero-padded channels.
    packed = []
    for w in weights_hwio:
        cin, cout = w.shape[2], w.shape[3]
        w_full = jnp.zeros((3, 3, CPAD, CPAD), jnp.float32)
        w_full = w_full.at[:, :, :cin, :cout].set(w.astype(jnp.float32))
        packed.append(w_full.reshape(9, CPAD, CPAD))
    w_packed = jnp.stack(packed, axis=0)                       # (L, 9, CPAD, CPAD)

    # Interior mask over the flattened padded canvas (host constant).
    flat = np.arange(NP)
    r, c = flat // Wp, flat % Wp
    m = np.zeros((NPR, 1), np.float32)
    m[:NP, 0] = ((r >= 1) & (r <= H) & (c >= 1) & (c <= W)).astype(np.float32)
    mask = jnp.asarray(m)

    kernel = functools.partial(
        _m_decoder_kernel, n_layers=n_layers, wp=Wp,
        front=FRONT, back=BACK, npr=NPR, cpad=CPAD)

    out = pl.pallas_call(
        kernel,
        out_shape=jax.ShapeDtypeStruct((N, NPR, CPAD), jnp.float32),
        grid_spec=pltpu.PrefetchScalarGridSpec(
            num_scalar_prefetch=0,
            grid=(N,),
            in_specs=[
                pl.BlockSpec((1, NPR, CPAD), lambda n: (n, 0, 0)),
                pl.BlockSpec((n_layers, 9, CPAD, CPAD), lambda n: (0, 0, 0, 0)),
                pl.BlockSpec((NPR, 1), lambda n: (0, 0)),
            ],
            out_specs=pl.BlockSpec((1, NPR, CPAD), lambda n: (n, 0, 0)),
            scratch_shapes=[pltpu.VMEM((CANVAS_ROWS, CPAD), jnp.float32)],
        ),
        compiler_params=pltpu.CompilerParams(
            dimension_semantics=("parallel",),
        ),
    )(x, w_packed, mask)

    # Unpack: drop rounding rows, un-flatten, crop padding ring + channel padding.
    out = out[:, :NP, :].reshape(N, Hp, Wp, CPAD)[:, 1:H + 1, 1:W + 1, :Cout]
    return jnp.transpose(out, (0, 3, 1, 2))                    # NHWC -> NCHW


def _reference_forward(x_nchw, weights_hwio):
    """Pure-JAX reference (lax conv) for a correctness check."""
    x = x_nchw
    for w in weights_hwio:
        w_oihw = jnp.transpose(w, (3, 2, 0, 1))                # HWIO -> OIHW
        x = jax.lax.conv_general_dilated(
            x, w_oihw, window_strides=(1, 1), padding=((1, 1), (1, 1)),
            dimension_numbers=("NCHW", "OIHW", "NCHW"),
        )
        x = jnp.clip(x, 0.0, 6.0)
    return x


if __name__ == "__main__":
    # Small shapes consistent with M_Decoder(input_channels=4, output_channels=8)
    N, Cin, Cout, H, W = 2, 4, 8, 16, 16

    key = jax.random.PRNGKey(0)
    kx, k0, k1, k2 = jax.random.split(key, 4)

    x = jax.random.normal(kx, (N, Cin, H, W), dtype=jnp.float32)

    # Deterministic weight init (HWIO), one per ConvBnRelu2d layer.
    w0 = 0.1 * jax.random.normal(k0, (3, 3, Cin, Cout), dtype=jnp.float32)
    w1 = 0.1 * jax.random.normal(k1, (3, 3, Cout, Cout), dtype=jnp.float32)
    w2 = 0.1 * jax.random.normal(k2, (3, 3, Cout, Cout), dtype=jnp.float32)
    weights = [w0, w1, w2]

    out = jax.block_until_ready(m_decoder_forward(x, weights))
    ref = jax.block_until_ready(_reference_forward(x, weights))

    assert out.shape == (N, Cout, H, W)
    assert jnp.allclose(out, ref, atol=1e-4, rtol=1e-4)

    print("KERNEL_OK")
</pallas_src>

<mosaic_0001>
module attributes {stable_mosaic.version = 11 : i64} {
  func.func @_m_decoder_kernel(%arg0: i32, %arg1: memref<1x328x128xf32, #tpu.memory_space<vmem>>, %arg2: memref<3x9x128x128xf32, #tpu.memory_space<vmem>>, %arg3: memref<328x1xf32, #tpu.memory_space<vmem>>, %arg4: memref<1x328x128xf32, #tpu.memory_space<vmem>>, %arg5: memref<376x128xf32, #tpu.memory_space<vmem>>) attributes {dimension_semantics = [#tpu.dimension_semantics<parallel>], iteration_bounds = array<i64: 2>, scalar_prefetch = 0 : i64, scratch_operands = 1 : i64, tpu.core_type = #tpu.core_type<tc>, window_params = [{transform_indices = @transform_0, window_bounds = array<i64: 1, 328, 128>}, {pipeline_mode = #tpu.pipeline_mode<synchronous>, transform_indices = @transform_1, window_bounds = array<i64: 3, 9, 128, 128>}, {pipeline_mode = #tpu.pipeline_mode<synchronous>, transform_indices = @transform_2, window_bounds = array<i64: 328, 1>}, {transform_indices = @transform_3, window_bounds = array<i64: 1, 328, 128>}]} {
    %cst = arith.constant 0.000000e+00 : f32
    %0 = vector.broadcast %cst : f32 to vector<24x128xf32>
    %c0 = arith.constant 0 : index
    %c0_0 = arith.constant 0 : index
    %1 = vector.load %arg5[%c0, %c0_0] : memref<376x128xf32, #tpu.memory_space<vmem>>, vector<24x128xf32>
    tpu.vector_store %arg5[%c0, %c0_0], %0 {strides = array<i32>} : memref<376x128xf32, #tpu.memory_space<vmem>>, vector<24x128xf32>,
    %cst_1 = arith.constant 0.000000e+00 : f32
    %2 = vector.broadcast %cst_1 : f32 to vector<24x128xf32>
    %c352 = arith.constant 352 : index
    %c0_2 = arith.constant 0 : index
    %3 = vector.load %arg5[%c352, %c0_2] : memref<376x128xf32, #tpu.memory_space<vmem>>, vector<24x128xf32>
    tpu.vector_store %arg5[%c352, %c0_2], %2 {strides = array<i32>} : memref<376x128xf32, #tpu.memory_space<vmem>>, vector<24x128xf32>,
    %c0_3 = arith.constant 0 : index
    %c0_4 = arith.constant 0 : index
    %c0_5 = arith.constant 0 : index
    %4 = vector.load %arg1[%c0_3, %c0_4, %c0_5] : memref<1x328x128xf32, #tpu.memory_space<vmem>>, vector<1x328x128xf32>
    %5 = vector.shape_cast %4 : vector<1x328x128xf32> to vector<328x128xf32>
    %c24 = arith.constant 24 : index
    %c0_6 = arith.constant 0 : index
    %6 = vector.load %arg5[%c24, %c0_6] : memref<376x128xf32, #tpu.memory_space<vmem>>, vector<328x128xf32>
    tpu.vector_store %arg5[%c24, %c0_6], %5 {strides = array<i32>} : memref<376x128xf32, #tpu.memory_space<vmem>>, vector<328x128xf32>,
    %c0_7 = arith.constant 0 : index
    %c0_8 = arith.constant 0 : index
    %7 = vector.load %arg3[%c0_7, %c0_8] : memref<328x1xf32, #tpu.memory_space<vmem>>, vector<328x1xf32>
    %c5 = arith.constant 5 : index
    %c0_9 = arith.constant 0 : index
    %8 = vector.load %arg5[%c5, %c0_9] : memref<376x128xf32, #tpu.memory_space<vmem>>, vector<328x128xf32>
    %c0_10 = arith.constant 0 : index
    %c0_11 = arith.constant 0 : index
    %c0_12 = arith.constant 0 : index
    %c0_13 = arith.constant 0 : index
    %9 = vector.load %arg2[%c0_10, %c0_11, %c0_12, %c0_13] : memref<3x9x128x128xf32, #tpu.memory_space<vmem>>, vector<1x1x128x128xf32>
    %10 = vector.shape_cast %9 : vector<1x1x128x128xf32> to vector<128x128xf32>
    %cst_14 = arith.constant dense<0.000000e+00> : vector<328x128xf32>
    %11 = tpu.matmul %8, %10, %cst_14 {dimension_numbers = #tpu.dot_dimension_numbers<[1], [0], [0], [1], [0, 0, 1, 1], [], []>} : vector<328x128xf32>, vector<128x128xf32>, vector<328x128xf32> -> vector<328x128xf32>
    %c6 = arith.constant 6 : index
    %c0_15 = arith.constant 0 : index
    %12 = vector.load %arg5[%c6, %c0_15] : memref<376x128xf32, #tpu.memory_space<vmem>>, vector<328x128xf32>
    %c0_16 = arith.constant 0 : index
    %c1 = arith.constant 1 : index
    %c0_17 = arith.constant 0 : index
    %c0_18 = arith.constant 0 : index
    %13 = vector.load %arg2[%c0_16, %c1, %c0_17, %c0_18] : memref<3x9x128x128xf32, #tpu.memory_space<vmem>>, vector<1x1x128x128xf32>
    %14 = vector.shape_cast %13 : vector<1x1x128x128xf32> to vector<128x128xf32>
    %cst_19 = arith.constant dense<0.000000e+00> : vector<328x128xf32>
    %15 = tpu.matmul %12, %14, %cst_19 {dimension_numbers = #tpu.dot_dimension_numbers<[1], [0], [0], [1], [0, 0, 1, 1], [], []>} : vector<328x128xf32>, vector<128x128xf32>, vector<328x128xf32> -> vector<328x128xf32>
    %16 = arith.addf %11, %15 : vector<328x128xf32>
    %c7 = arith.constant 7 : index
    %c0_20 = arith.constant 0 : index
    %17 = vector.load %arg5[%c7, %c0_20] : memref<376x128xf32, #tpu.memory_space<vmem>>, vector<328x128xf32>
    %c0_21 = arith.constant 0 : index
    %c2 = arith.constant 2 : index
    %c0_22 = arith.constant 0 : index
    %c0_23 = arith.constant 0 : index
    %18 = vector.load %arg2[%c0_21, %c2, %c0_22, %c0_23] : memref<3x9x128x128xf32, #tpu.memory_space<vmem>>, vector<1x1x128x128xf32>
    %19 = vector.shape_cast %18 : vector<1x1x128x128xf32> to vector<128x128xf32>
    %cst_24 = arith.constant dense<0.000000e+00> : vector<328x128xf32>
    %20 = tpu.matmul %17, %19, %cst_24 {dimension_numbers = #tpu.dot_dimension_numbers<[1], [0], [0], [1], [0, 0, 1, 1], [], []>} : vector<328x128xf32>, vector<128x128xf32>, vector<328x128xf32> -> vector<328x128xf32>
    %21 = arith.addf %16, %20 : vector<328x128xf32>
    %c23 = arith.constant 23 : index
    %c0_25 = arith.constant 0 : index
    %22 = vector.load %arg5[%c23, %c0_25] : memref<376x128xf32, #tpu.memory_space<vmem>>, vector<328x128xf32>
    %c0_26 = arith.constant 0 : index
    %c3 = arith.constant 3 : index
    %c0_27 = arith.constant 0 : index
    %c0_28 = arith.constant 0 : index
    %23 = vector.load %arg2[%c0_26, %c3, %c0_27, %c0_28] : memref<3x9x128x128xf32, #tpu.memory_space<vmem>>, vector<1x1x128x128xf32>
    %24 = vector.shape_cast %23 : vector<1x1x128x128xf32> to vector<128x128xf32>
    %cst_29 = arith.constant dense<0.000000e+00> : vector<328x128xf32>
    %25 = tpu.matmul %22, %24, %cst_29 {dimension_numbers = #tpu.dot_dimension_numbers<[1], [0], [0], [1], [0, 0, 1, 1], [], []>} : vector<328x128xf32>, vector<128x128xf32>, vector<328x128xf32> -> vector<328x128xf32>
    %26 = arith.addf %21, %25 : vector<328x128xf32>
    %c24_30 = arith.constant 24 : index
    %c0_31 = arith.constant 0 : index
    %27 = vector.load %arg5[%c24_30, %c0_31] : memref<376x128xf32, #tpu.memory_space<vmem>>, vector<328x128xf32>
    %c0_32 = arith.constant 0 : index
    %c4 = arith.constant 4 : index
    %c0_33 = arith.constant 0 : index
    %c0_34 = arith.constant 0 : index
    %28 = vector.load %arg2[%c0_32, %c4, %c0_33, %c0_34] : memref<3x9x128x128xf32, #tpu.memory_space<vmem>>, vector<1x1x128x128xf32>
    %29 = vector.shape_cast %28 : vector<1x1x128x128xf32> to vector<128x128xf32>
    %cst_35 = arith.constant dense<0.000000e+00> : vector<328x128xf32>
    %30 = tpu.matmul %27, %29, %cst_35 {dimension_numbers = #tpu.dot_dimension_numbers<[1], [0], [0], [1], [0, 0, 1, 1], [], []>} : vector<328x128xf32>, vector<128x128xf32>, vector<328x128xf32> -> vector<328x128xf32>
    %31 = arith.addf %26, %30 : vector<328x128xf32>
    %c25 = arith.constant 25 : index
    %c0_36 = arith.constant 0 : index
    %32 = vector.load %arg5[%c25, %c0_36] : memref<376x128xf32, #tpu.memory_space<vmem>>, vector<328x128xf32>
    %c0_37 = arith.constant 0 : index
    %c5_38 = arith.constant 5 : index
    %c0_39 = arith.constant 0 : index
    %c0_40 = arith.constant 0 : index
    %33 = vector.load %arg2[%c0_37, %c5_38, %c0_39, %c0_40] : memref<3x9x128x128xf32, #tpu.memory_space<vmem>>, vector<1x1x128x128xf32>
    %34 = vector.shape_cast %33 : vector<1x1x128x128xf32> to vector<128x128xf32>
    %cst_41 = arith.constant dense<0.000000e+00> : vector<328x128xf32>
    %35 = tpu.matmul %32, %34, %cst_41 {dimension_numbers = #tpu.dot_dimension_numbers<[1], [0], [0], [1], [0, 0, 1, 1], [], []>} : vector<328x128xf32>, vector<128x128xf32>, vector<328x128xf32> -> vector<328x128xf32>
    %36 = arith.addf %31, %35 : vector<328x128xf32>
    %c41 = arith.constant 41 : index
    %c0_42 = arith.constant 0 : index
    %37 = vector.load %arg5[%c41, %c0_42] : memref<376x128xf32, #tpu.memory_space<vmem>>, vector<328x128xf32>
    %c0_43 = arith.constant 0 : index
    %c6_44 = arith.constant 6 : index
    %c0_45 = arith.constant 0 : index
    %c0_46 = arith.constant 0 : index
    %38 = vector.load %arg2[%c0_43, %c6_44, %c0_45, %c0_46] : memref<3x9x128x128xf32, #tpu.memory_space<vmem>>, vector<1x1x128x128xf32>
    %39 = vector.shape_cast %38 : vector<1x1x128x128xf32> to vector<128x128xf32>
    %cst_47 = arith.constant dense<0.000000e+00> : vector<328x128xf32>
    %40 = tpu.matmul %37, %39, %cst_47 {dimension_numbers = #tpu.dot_dimension_numbers<[1], [0], [0], [1], [0, 0, 1, 1], [], []>} : vector<328x128xf32>, vector<128x128xf32>, vector<328x128xf32> -> vector<328x128xf32>
    %41 = arith.addf %36, %40 : vector<328x128xf32>
    %c42 = arith.constant 42 : index
    %c0_48 = arith.constant 0 : index
    %42 = vector.load %arg5[%c42, %c0_48] : memref<376x128xf32, #tpu.memory_space<vmem>>, vector<328x128xf32>
    %c0_49 = arith.constant 0 : index
    %c7_50 = arith.constant 7 : index
    %c0_51 = arith.constant 0 : index
    %c0_52 = arith.constant 0 : index
    %43 = vector.load %arg2[%c0_49, %c7_50, %c0_51, %c0_52] : memref<3x9x128x128xf32, #tpu.memory_space<vmem>>, vector<1x1x128x128xf32>
    %44 = vector.shape_cast %43 : vector<1x1x128x128xf32> to vector<128x128xf32>
    %cst_53 = arith.constant dense<0.000000e+00> : vector<328x128xf32>
    %45 = tpu.matmul %42, %44, %cst_53 {dimension_numbers = #tpu.dot_dimension_numbers<[1], [0], [0], [1], [0, 0, 1, 1], [], []>} : vector<328x128xf32>, vector<128x128xf32>, vector<328x128xf32> -> vector<328x128xf32>
    %46 = arith.addf %41, %45 : vector<328x128xf32>
    %c43 = arith.constant 43 : index
    %c0_54 = arith.constant 0 : index
    %47 = vector.load %arg5[%c43, %c0_54] : memref<376x128xf32, #tpu.memory_space<vmem>>, vector<328x128xf32>
    %c0_55 = arith.constant 0 : index
    %c8 = arith.constant 8 : index
    %c0_56 = arith.constant 0 : index
    %c0_57 = arith.constant 0 : index
    %48 = vector.load %arg2[%c0_55, %c8, %c0_56, %c0_57] : memref<3x9x128x128xf32, #tpu.memory_space<vmem>>, vector<1x1x128x128xf32>
    %49 = vector.shape_cast %48 : vector<1x1x128x128xf32> to vector<128x128xf32>
    %cst_58 = arith.constant dense<0.000000e+00> : vector<328x128xf32>
    %50 = tpu.matmul %47, %49, %cst_58 {dimension_numbers = #tpu.dot_dimension_numbers<[1], [0], [0], [1], [0, 0, 1, 1], [], []>} : vector<328x128xf32>, vector<128x128xf32>, vector<328x128xf32> -> vector<328x128xf32>
    %51 = arith.addf %46, %50 : vector<328x128xf32>
    %cst_59 = arith.constant 0.000000e+00 : f32
    %cst_60 = arith.constant 6.000000e+00 : f32
    %52 = vector.broadcast %cst_59 : f32 to vector<328x128xf32>
    %53 = arith.maximumf %52, %51 : vector<328x128xf32>
    %54 = vector.broadcast %cst_60 : f32 to vector<328x128xf32>
    %55 = arith.minimumf %54, %53 : vector<328x128xf32>
    %56 = vector.broadcast %7 : vector<328x1xf32> to vector<328x128xf32>
    %57 = arith.mulf %55, %56 : vector<328x128xf32>
    %c24_61 = arith.constant 24 : index
    %c0_62 = arith.constant 0 : index
    %58 = vector.load %arg5[%c24_61, %c0_62] : memref<376x128xf32, #tpu.memory_space<vmem>>, vector<328x128xf32>
    tpu.vector_store %arg5[%c24_61, %c0_62], %57 {strides = array<i32>} : memref<376x128xf32, #tpu.memory_space<vmem>>, vector<328x128xf32>,
    %c5_63 = arith.constant 5 : index
    %c0_64 = arith.constant 0 : index
    %59 = vector.load %arg5[%c5_63, %c0_64] : memref<376x128xf32, #tpu.memory_space<vmem>>, vector<328x128xf32>
    %c1_65 = arith.constant 1 : index
    %c0_66 = arith.constant 0 : index
    %c0_67 = arith.constant 0 : index
    %c0_68 = arith.constant 0 : index
    %60 = vector.load %arg2[%c1_65, %c0_66, %c0_67, %c0_68] : memref<3x9x128x128xf32, #tpu.memory_space<vmem>>, vector<1x1x128x128xf32>
    %61 = vector.shape_cast %60 : vector<1x1x128x128xf32> to vector<128x128xf32>
    %cst_69 = arith.constant dense<0.000000e+00> : vector<328x128xf32>
    %62 = tpu.matmul %59, %61, %cst_69 {dimension_numbers = #tpu.dot_dimension_numbers<[1], [0], [0], [1], [0, 0, 1, 1], [], []>} : vector<328x128xf32>, vector<128x128xf32>, vector<328x128xf32> -> vector<328x128xf32>
    %c6_70 = arith.constant 6 : index
    %c0_71 = arith.constant 0 : index
    %63 = vector.load %arg5[%c6_70, %c0_71] : memref<376x128xf32, #tpu.memory_space<vmem>>, vector<328x128xf32>
    %c1_72 = arith.constant 1 : index
    %c1_73 = arith.constant 1 : index
    %c0_74 = arith.constant 0 : index
    %c0_75 = arith.constant 0 : index
    %64 = vector.load %arg2[%c1_72, %c1_73, %c0_74, %c0_75] : memref<3x9x128x128xf32, #tpu.memory_space<vmem>>, vector<1x1x128x128xf32>
    %65 = vector.shape_cast %64 : vector<1x1x128x128xf32> to vector<128x128xf32>
    %cst_76 = arith.constant dense<0.000000e+00> : vector<328x128xf32>
    %66 = tpu.matmul %63, %65, %cst_76 {dimension_numbers = #tpu.dot_dimension_numbers<[1], [0], [0], [1], [0, 0, 1, 1], [], []>} : vector<328x128xf32>, vector<128x128xf32>, vector<328x128xf32> -> vector<328x128xf32>
    %67 = arith.addf %62, %66 : vector<328x128xf32>
    %c7_77 = arith.constant 7 : index
    %c0_78 = arith.constant 0 : index
    %68 = vector.load %arg5[%c7_77, %c0_78] : memref<376x128xf32, #tpu.memory_space<vmem>>, vector<328x128xf32>
    %c1_79 = arith.constant 1 : index
    %c2_80 = arith.constant 2 : index
    %c0_81 = arith.constant 0 : index
    %c0_82 = arith.constant 0 : index
    %69 = vector.load %arg2[%c1_79, %c2_80, %c0_81, %c0_82] : memref<3x9x128x128xf32, #tpu.memory_space<vmem>>, vector<1x1x128x128xf32>
    %70 = vector.shape_cast %69 : vector<1x1x128x128xf32> to vector<128x128xf32>
    %cst_83 = arith.constant dense<0.000000e+00> : vector<328x128xf32>
    %71 = tpu.matmul %68, %70, %cst_83 {dimension_numbers = #tpu.dot_dimension_numbers<[1], [0], [0], [1], [0, 0, 1, 1], [], []>} : vector<328x128xf32>, vector<128x128xf32>, vector<328x128xf32> -> vector<328x128xf32>
    %72 = arith.addf %67, %71 : vector<328x128xf32>
    %c23_84 = arith.constant 23 : index
    %c0_85 = arith.constant 0 : index
    %73 = vector.load %arg5[%c23_84, %c0_85] : memref<376x128xf32, #tpu.memory_space<vmem>>, vector<328x128xf32>
    %c1_86 = arith.constant 1 : index
    %c3_87 = arith.constant 3 : index
    %c0_88 = arith.constant 0 : index
    %c0_89 = arith.constant 0 : index
    %74 = vector.load %arg2[%c1_86, %c3_87, %c0_88, %c0_89] : memref<3x9x128x128xf32, #tpu.memory_space<vmem>>, vector<1x1x128x128xf32>
    %75 = vector.shape_cast %74 : vector<1x1x128x128xf32> to vector<128x128xf32>
    %cst_90 = arith.constant dense<0.000000e+00> : vector<328x128xf32>
    %76 = tpu.matmul %73, %75, %cst_90 {dimension_numbers = #tpu.dot_dimension_numbers<[1], [0], [0], [1], [0, 0, 1, 1], [], []>} : vector<328x128xf32>, vector<128x128xf32>, vector<328x128xf32> -> vector<328x128xf32>
    %77 = arith.addf %72, %76 : vector<328x128xf32>
    %c24_91 = arith.constant 24 : index
    %c0_92 = arith.constant 0 : index
    %78 = vector.load %arg5[%c24_91, %c0_92] : memref<376x128xf32, #tpu.memory_space<vmem>>, vector<328x128xf32>
    %c1_93 = arith.constant 1 : index
    %c4_94 = arith.constant 4 : index
    %c0_95 = arith.constant 0 : index
    %c0_96 = arith.constant 0 : index
    %79 = vector.load %arg2[%c1_93, %c4_94, %c0_95, %c0_96] : memref<3x9x128x128xf32, #tpu.memory_space<vmem>>, vector<1x1x128x128xf32>
    %80 = vector.shape_cast %79 : vector<1x1x128x128xf32> to vector<128x128xf32>
    %cst_97 = arith.constant dense<0.000000e+00> : vector<328x128xf32>
    %81 = tpu.matmul %78, %80, %cst_97 {dimension_numbers = #tpu.dot_dimension_numbers<[1], [0], [0], [1], [0, 0, 1, 1], [], []>} : vector<328x128xf32>, vector<128x128xf32>, vector<328x128xf32> -> vector<328x128xf32>
    %82 = arith.addf %77, %81 : vector<328x128xf32>
    %c25_98 = arith.constant 25 : index
    %c0_99 = arith.constant 0 : index
    %83 = vector.load %arg5[%c25_98, %c0_99] : memref<376x128xf32, #tpu.memory_space<vmem>>, vector<328x128xf32>
    %c1_100 = arith.constant 1 : index
    %c5_101 = arith.constant 5 : index
    %c0_102 = arith.constant 0 : index
    %c0_103 = arith.constant 0 : index
    %84 = vector.load %arg2[%c1_100, %c5_101, %c0_102, %c0_103] : memref<3x9x128x128xf32, #tpu.memory_space<vmem>>, vector<1x1x128x128xf32>
    %85 = vector.shape_cast %84 : vector<1x1x128x128xf32> to vector<128x128xf32>
    %cst_104 = arith.constant dense<0.000000e+00> : vector<328x128xf32>
    %86 = tpu.matmul %83, %85, %cst_104 {dimension_numbers = #tpu.dot_dimension_numbers<[1], [0], [0], [1], [0, 0, 1, 1], [], []>} : vector<328x128xf32>, vector<128x128xf32>, vector<328x128xf32> -> vector<328x128xf32>
    %87 = arith.addf %82, %86 : vector<328x128xf32>
    %c41_105 = arith.constant 41 : index
    %c0_106 = arith.constant 0 : index
    %88 = vector.load %arg5[%c41_105, %c0_106] : memref<376x128xf32, #tpu.memory_space<vmem>>, vector<328x128xf32>
    %c1_107 = arith.constant 1 : index
    %c6_108 = arith.constant 6 : index
    %c0_109 = arith.constant 0 : index
    %c0_110 = arith.constant 0 : index
    %89 = vector.load %arg2[%c1_107, %c6_108, %c0_109, %c0_110] : memref<3x9x128x128xf32, #tpu.memory_space<vmem>>, vector<1x1x128x128xf32>
    %90 = vector.shape_cast %89 : vector<1x1x128x128xf32> to vector<128x128xf32>
    %cst_111 = arith.constant dense<0.000000e+00> : vector<328x128xf32>
    %91 = tpu.matmul %88, %90, %cst_111 {dimension_numbers = #tpu.dot_dimension_numbers<[1], [0], [0], [1], [0, 0, 1, 1], [], []>} : vector<328x128xf32>, vector<128x128xf32>, vector<328x128xf32> -> vector<328x128xf32>
    %92 = arith.addf %87, %91 : vector<328x128xf32>
    %c42_112 = arith.constant 42 : index
    %c0_113 = arith.constant 0 : index
    %93 = vector.load %arg5[%c42_112, %c0_113] : memref<376x128xf32, #tpu.memory_space<vmem>>, vector<328x128xf32>
    %c1_114 = arith.constant 1 : index
    %c7_115 = arith.constant 7 : index
    %c0_116 = arith.constant 0 : index
    %c0_117 = arith.constant 0 : index
    %94 = vector.load %arg2[%c1_114, %c7_115, %c0_116, %c0_117] : memref<3x9x128x128xf32, #tpu.memory_space<vmem>>, vector<1x1x128x128xf32>
    %95 = vector.shape_cast %94 : vector<1x1x128x128xf32> to vector<128x128xf32>
    %cst_118 = arith.constant dense<0.000000e+00> : vector<328x128xf32>
    %96 = tpu.matmul %93, %95, %cst_118 {dimension_numbers = #tpu.dot_dimension_numbers<[1], [0], [0], [1], [0, 0, 1, 1], [], []>} : vector<328x128xf32>, vector<128x128xf32>, vector<328x128xf32> -> vector<328x128xf32>
    %97 = arith.addf %92, %96 : vector<328x128xf32>
    %c43_119 = arith.constant 43 : index
    %c0_120 = arith.constant 0 : index
    %98 = vector.load %arg5[%c43_119, %c0_120] : memref<376x128xf32, #tpu.memory_space<vmem>>, vector<328x128xf32>
    %c1_121 = arith.constant 1 : index
    %c8_122 = arith.constant 8 : index
    %c0_123 = arith.constant 0 : index
    %c0_124 = arith.constant 0 : index
    %99 = vector.load %arg2[%c1_121, %c8_122, %c0_123, %c0_124] : memref<3x9x128x128xf32, #tpu.memory_space<vmem>>, vector<1x1x128x128xf32>
    %100 = vector.shape_cast %99 : vector<1x1x128x128xf32> to vector<128x128xf32>
    %cst_125 = arith.constant dense<0.000000e+00> : vector<328x128xf32>
    %101 = tpu.matmul %98, %100, %cst_125 {dimension_numbers = #tpu.dot_dimension_numbers<[1], [0], [0], [1], [0, 0, 1, 1], [], []>} : vector<328x128xf32>, vector<128x128xf32>, vector<328x128xf32> -> vector<328x128xf32>
    %102 = arith.addf %97, %101 : vector<328x128xf32>
    %cst_126 = arith.constant 0.000000e+00 : f32
    %cst_127 = arith.constant 6.000000e+00 : f32
    %103 = vector.broadcast %cst_126 : f32 to vector<328x128xf32>
    %104 = arith.maximumf %103, %102 : vector<328x128xf32>
    %105 = vector.broadcast %cst_127 : f32 to vector<328x128xf32>
    %106 = arith.minimumf %105, %104 : vector<328x128xf32>
    %107 = vector.broadcast %7 : vector<328x1xf32> to vector<328x128xf32>
    %108 = arith.mulf %106, %107 : vector<328x128xf32>
    %c24_128 = arith.constant 24 : index
    %c0_129 = arith.constant 0 : index
    %109 = vector.load %arg5[%c24_128, %c0_129] : memref<376x128xf32, #tpu.memory_space<vmem>>, vector<328x128xf32>
    tpu.vector_store %arg5[%c24_128, %c0_129], %108 {strides = array<i32>} : memref<376x128xf32, #tpu.memory_space<vmem>>, vector<328x128xf32>,
    %c5_130 = arith.constant 5 : index
    %c0_131 = arith.constant 0 : index
    %110 = vector.load %arg5[%c5_130, %c0_131] : memref<376x128xf32, #tpu.memory_space<vmem>>, vector<328x128xf32>
    %c2_132 = arith.constant 2 : index
    %c0_133 = arith.constant 0 : index
    %c0_134 = arith.constant 0 : index
    %c0_135 = arith.constant 0 : index
    %111 = vector.load %arg2[%c2_132, %c0_133, %c0_134, %c0_135] : memref<3x9x128x128xf32, #tpu.memory_space<vmem>>, vector<1x1x128x128xf32>
    %112 = vector.shape_cast %111 : vector<1x1x128x128xf32> to vector<128x128xf32>
    %cst_136 = arith.constant dense<0.000000e+00> : vector<328x128xf32>
    %113 = tpu.matmul %110, %112, %cst_136 {dimension_numbers = #tpu.dot_dimension_numbers<[1], [0], [0], [1], [0, 0, 1, 1], [], []>} : vector<328x128xf32>, vector<128x128xf32>, vector<328x128xf32> -> vector<328x128xf32>
    %c6_137 = arith.constant 6 : index
    %c0_138 = arith.constant 0 : index
    %114 = vector.load %arg5[%c6_137, %c0_138] : memref<376x128xf32, #tpu.memory_space<vmem>>, vector<328x128xf32>
    %c2_139 = arith.constant 2 : index
    %c1_140 = arith.constant 1 : index
    %c0_141 = arith.constant 0 : index
    %c0_142 = arith.constant 0 : index
    %115 = vector.load %arg2[%c2_139, %c1_140, %c0_141, %c0_142] : memref<3x9x128x128xf32, #tpu.memory_space<vmem>>, vector<1x1x128x128xf32>
    %116 = vector.shape_cast %115 : vector<1x1x128x128xf32> to vector<128x128xf32>
    %cst_143 = arith.constant dense<0.000000e+00> : vector<328x128xf32>
    %117 = tpu.matmul %114, %116, %cst_143 {dimension_numbers = #tpu.dot_dimension_numbers<[1], [0], [0], [1], [0, 0, 1, 1], [], []>} : vector<328x128xf32>, vector<128x128xf32>, vector<328x128xf32> -> vector<328x128xf32>
    %118 = arith.addf %113, %117 : vector<328x128xf32>
    %c7_144 = arith.constant 7 : index
    %c0_145 = arith.constant 0 : index
    %119 = vector.load %arg5[%c7_144, %c0_145] : memref<376x128xf32, #tpu.memory_space<vmem>>, vector<328x128xf32>
    %c2_146 = arith.constant 2 : index
    %c2_147 = arith.constant 2 : index
    %c0_148 = arith.constant 0 : index
    %c0_149 = arith.constant 0 : index
    %120 = vector.load %arg2[%c2_146, %c2_147, %c0_148, %c0_149] : memref<3x9x128x128xf32, #tpu.memory_space<vmem>>, vector<1x1x128x128xf32>
    %121 = vector.shape_cast %120 : vector<1x1x128x128xf32> to vector<128x128xf32>
    %cst_150 = arith.constant dense<0.000000e+00> : vector<328x128xf32>
    %122 = tpu.matmul %119, %121, %cst_150 {dimension_numbers = #tpu.dot_dimension_numbers<[1], [0], [0], [1], [0, 0, 1, 1], [], []>} : vector<328x128xf32>, vector<128x128xf32>, vector<328x128xf32> -> vector<328x128xf32>
    %123 = arith.addf %118, %122 : vector<328x128xf32>
    %c23_151 = arith.constant 23 : index
    %c0_152 = arith.constant 0 : index
    %124 = vector.load %arg5[%c23_151, %c0_152] : memref<376x128xf32, #tpu.memory_space<vmem>>, vector<328x128xf32>
    %c2_153 = arith.constant 2 : index
    %c3_154 = arith.constant 3 : index
    %c0_155 = arith.constant 0 : index
    %c0_156 = arith.constant 0 : index
    %125 = vector.load %arg2[%c2_153, %c3_154, %c0_155, %c0_156] : memref<3x9x128x128xf32, #tpu.memory_space<vmem>>, vector<1x1x128x128xf32>
    %126 = vector.shape_cast %125 : vector<1x1x128x128xf32> to vector<128x128xf32>
    %cst_157 = arith.constant dense<0.000000e+00> : vector<328x128xf32>
    %127 = tpu.matmul %124, %126, %cst_157 {dimension_numbers = #tpu.dot_dimension_numbers<[1], [0], [0], [1], [0, 0, 1, 1], [], []>} : vector<328x128xf32>, vector<128x128xf32>, vector<328x128xf32> -> vector<328x128xf32>
    %128 = arith.addf %123, %127 : vector<328x128xf32>
    %c24_158 = arith.constant 24 : index
    %c0_159 = arith.constant 0 : index
    %129 = vector.load %arg5[%c24_158, %c0_159] : memref<376x128xf32, #tpu.memory_space<vmem>>, vector<328x128xf32>
    %c2_160 = arith.constant 2 : index
    %c4_161 = arith.constant 4 : index
    %c0_162 = arith.constant 0 : index
    %c0_163 = arith.constant 0 : index
    %130 = vector.load %arg2[%c2_160, %c4_161, %c0_162, %c0_163] : memref<3x9x128x128xf32, #tpu.memory_space<vmem>>, vector<1x1x128x128xf32>
    %131 = vector.shape_cast %130 : vector<1x1x128x128xf32> to vector<128x128xf32>
    %cst_164 = arith.constant dense<0.000000e+00> : vector<328x128xf32>
    %132 = tpu.matmul %129, %131, %cst_164 {dimension_numbers = #tpu.dot_dimension_numbers<[1], [0], [0], [1], [0, 0, 1, 1], [], []>} : vector<328x128xf32>, vector<128x128xf32>, vector<328x128xf32> -> vector<328x128xf32>
    %133 = arith.addf %128, %132 : vector<328x128xf32>
    %c25_165 = arith.constant 25 : index
    %c0_166 = arith.constant 0 : index
    %134 = vector.load %arg5[%c25_165, %c0_166] : memref<376x128xf32, #tpu.memory_space<vmem>>, vector<328x128xf32>
    %c2_167 = arith.constant 2 : index
    %c5_168 = arith.constant 5 : index
    %c0_169 = arith.constant 0 : index
    %c0_170 = arith.constant 0 : index
    %135 = vector.load %arg2[%c2_167, %c5_168, %c0_169, %c0_170] : memref<3x9x128x128xf32, #tpu.memory_space<vmem>>, vector<1x1x128x128xf32>
    %136 = vector.shape_cast %135 : vector<1x1x128x128xf32> to vector<128x128xf32>
    %cst_171 = arith.constant dense<0.000000e+00> : vector<328x128xf32>
    %137 = tpu.matmul %134, %136, %cst_171 {dimension_numbers = #tpu.dot_dimension_numbers<[1], [0], [0], [1], [0, 0, 1, 1], [], []>} : vector<328x128xf32>, vector<128x128xf32>, vector<328x128xf32> -> vector<328x128xf32>
    %138 = arith.addf %133, %137 : vector<328x128xf32>
    %c41_172 = arith.constant 41 : index
    %c0_173 = arith.constant 0 : index
    %139 = vector.load %arg5[%c41_172, %c0_173] : memref<376x128xf32, #tpu.memory_space<vmem>>, vector<328x128xf32>
    %c2_174 = arith.constant 2 : index
    %c6_175 = arith.constant 6 : index
    %c0_176 = arith.constant 0 : index
    %c0_177 = arith.constant 0 : index
    %140 = vector.load %arg2[%c2_174, %c6_175, %c0_176, %c0_177] : memref<3x9x128x128xf32, #tpu.memory_space<vmem>>, vector<1x1x128x128xf32>
    %141 = vector.shape_cast %140 : vector<1x1x128x128xf32> to vector<128x128xf32>
    %cst_178 = arith.constant dense<0.000000e+00> : vector<328x128xf32>
    %142 = tpu.matmul %139, %141, %cst_178 {dimension_numbers = #tpu.dot_dimension_numbers<[1], [0], [0], [1], [0, 0, 1, 1], [], []>} : vector<328x128xf32>, vector<128x128xf32>, vector<328x128xf32> -> vector<328x128xf32>
    %143 = arith.addf %138, %142 : vector<328x128xf32>
    %c42_179 = arith.constant 42 : index
    %c0_180 = arith.constant 0 : index
    %144 = vector.load %arg5[%c42_179, %c0_180] : memref<376x128xf32, #tpu.memory_space<vmem>>, vector<328x128xf32>
    %c2_181 = arith.constant 2 : index
    %c7_182 = arith.constant 7 : index
    %c0_183 = arith.constant 0 : index
    %c0_184 = arith.constant 0 : index
    %145 = vector.load %arg2[%c2_181, %c7_182, %c0_183, %c0_184] : memref<3x9x128x128xf32, #tpu.memory_space<vmem>>, vector<1x1x128x128xf32>
    %146 = vector.shape_cast %145 : vector<1x1x128x128xf32> to vector<128x128xf32>
    %cst_185 = arith.constant dense<0.000000e+00> : vector<328x128xf32>
    %147 = tpu.matmul %144, %146, %cst_185 {dimension_numbers = #tpu.dot_dimension_numbers<[1], [0], [0], [1], [0, 0, 1, 1], [], []>} : vector<328x128xf32>, vector<128x128xf32>, vector<328x128xf32> -> vector<328x128xf32>
    %148 = arith.addf %143, %147 : vector<328x128xf32>
    %c43_186 = arith.constant 43 : index
    %c0_187 = arith.constant 0 : index
    %149 = vector.load %arg5[%c43_186, %c0_187] : memref<376x128xf32, #tpu.memory_space<vmem>>, vector<328x128xf32>
    %c2_188 = arith.constant 2 : index
    %c8_189 = arith.constant 8 : index
    %c0_190 = arith.constant 0 : index
    %c0_191 = arith.constant 0 : index
    %150 = vector.load %arg2[%c2_188, %c8_189, %c0_190, %c0_191] : memref<3x9x128x128xf32, #tpu.memory_space<vmem>>, vector<1x1x128x128xf32>
    %151 = vector.shape_cast %150 : vector<1x1x128x128xf32> to vector<128x128xf32>
    %cst_192 = arith.constant dense<0.000000e+00> : vector<328x128xf32>
    %152 = tpu.matmul %149, %151, %cst_192 {dimension_numbers = #tpu.dot_dimension_numbers<[1], [0], [0], [1], [0, 0, 1, 1], [], []>} : vector<328x128xf32>, vector<128x128xf32>, vector<328x128xf32> -> vector<328x128xf32>
    %153 = arith.addf %148, %152 : vector<328x128xf32>
    %cst_193 = arith.constant 0.000000e+00 : f32
    %cst_194 = arith.constant 6.000000e+00 : f32
    %154 = vector.broadcast %cst_193 : f32 to vector<328x128xf32>
    %155 = arith.maximumf %154, %153 : vector<328x128xf32>
    %156 = vector.broadcast %cst_194 : f32 to vector<328x128xf32>
    %157 = arith.minimumf %156, %155 : vector<328x128xf32>
    %c0_195 = arith.constant 0 : index
    %c0_196 = arith.constant 0 : index
    %c0_197 = arith.constant 0 : index
    %158 = vector.load %arg4[%c0_195, %c0_196, %c0_197] : memref<1x328x128xf32, #tpu.memory_space<vmem>>, vector<1x328x128xf32>
    %159 = vector.shape_cast %158 : vector<1x328x128xf32> to vector<328x128xf32>
    %160 = vector.shape_cast %157 : vector<328x128xf32> to vector<1x328x128xf32>
    tpu.vector_store %arg4[%c0_195, %c0_196, %c0_197], %160 {strides = array<i32>} : memref<1x328x128xf32, #tpu.memory_space<vmem>>, vector<1x328x128xf32>,
    return
  }
  func.func @transform_0(%arg0: i32) -> (i32, i32, i32) {
    %c0_i32 = arith.constant 0 : i32
    %c0_i32_0 = arith.constant 0 : i32
    %c0_i32_1 = arith.constant 0 : i32
    return %arg0, %c0_i32, %c0_i32_0 : i32, i32, i32
  }
  func.func @transform_1(%arg0: i32) -> (i32, i32, i32, i32) {
    %c0_i32 = arith.constant 0 : i32
    %c0_i32_0 = arith.constant 0 : i32
    %c0_i32_1 = arith.constant 0 : i32
    %c0_i32_2 = arith.constant 0 : i32
    %c0_i32_3 = arith.constant 0 : i32
    return %c0_i32, %c0_i32_0, %c0_i32_1, %c0_i32_2 : i32, i32, i32, i32
  }
  func.func @transform_2(%arg0: i32) -> (i32, i32) {
    %c0_i32 = arith.constant 0 : i32
    %c0_i32_0 = arith.constant 0 : i32
    %c0_i32_1 = arith.constant 0 : i32
    return %c0_i32, %c0_i32_0 : i32, i32
  }
  func.func @transform_3(%arg0: i32) -> (i32, i32, i32) {
    %c0_i32 = arith.constant 0 : i32
    %c0_i32_0 = arith.constant 0 : i32
    %c0_i32_1 = arith.constant 0 : i32
    return %arg0, %c0_i32, %c0_i32_0 : i32, i32, i32
  }
}

</mosaic_0001>

<bundles_post_ra>
// kernel: tpu_custom_call.1
= control target key start
LH: loop header
LB: loop body
LE: loop exit
PB: predicated region body
PF: predicated region fallthrough
CT: control target
= control target key end

     0   :  { %8 = vsyncpa [#allocation4], 0  ;;  %s10896_s0 = inlined_call_operand.hbm [shape: f32[2,328,128], index: 0, kind: input, shape index: {}]   ;;  %s10897_s1 = inlined_call_operand.hbm [shape: f32[3,9,128,128], index: 1, kind: input, shape index: {}]   ;;  %s10898_s2 = inlined_call_operand.vmem [shape: f32[328,1], index: 2, kind: input, shape index: {}]   ;;  %s10899_s3 = inlined_call_operand.hbm [shape: f32[2,328,128], index: 3, kind: output, shape index: {}]  }
   0x1   :  { %10 = vsyncpa [#allocation4 + $0x1], 0 }
   0x2   :  { %11 = vsyncpa [#allocation7], 0 }
   0x3   :  { %12 = vsyncpa [#allocation5], 0 }
   0x4   :  { %14 = vsyncpa [#allocation5 + $0x1], 0  ;;  %s7585_s12 = smov 0   ;;  %s7587_s13 = smov 0  }
   0x5   :  { %s7589_s14 = smov 0   ;;  %s7591_s15 = smov 0  }
   0x6 LB: > { %s7606_s16 = sadd.s32 4294967295, %s7556_s15   ;;  %s7298_s17 = sadd.s32 4294967294, %s7556_s15   ;;  %s7556_s15 = sphi %s7591_s15, %s11672_s15   ;;  %s7552_s14 = sphi %s7589_s14, %s11671_s14   ;;  %s7548_s13 = sphi %s7587_s13, %s11670_s13   ;;  %s7544_s12 = sphi %s7585_s12, %s11669_s12  }
   0x7   : > { %p40_p0 = scmp.ne.s32.totalorder %s7548_s13, %s7544_s12  ;;  %p41_p1 = scmp.eq.s32.totalorder %s7606_s16, 0 }
   0x8   : > { %p106_p2 = scmp.eq.s32.totalorder %s7606_s16, 1  ;;  %p112_p3 = scmp.eq.s32.totalorder %s7298_s17, 1 }
   0x9   : > { %p7615_p4 = por %p41_p1, %p40_p0  ;;  %p7299_p5 = scmp.ge.s32.totalorder %s7556_s15, 1 }
   0xa   : > { %p7620_p6 = por %p112_p3, %p40_p0  ;;  %p119_p7 = scmp.lt.s32.totalorder %s7556_s15, 3 }
   0xb   : > { %s130_s22 = sshll.u32 %s10897_s1, 4  ;;  %s7558_s24 = smov [#allocation6]   ;;  %s131_s22 = int_to_ptr.hbm [resolvable:$true] %s130_s22 }
   0xc   : > { %p7628_p8 = pnand %p7299_p5, %p119_p7  ;;  %s132_s25 = sshll.u32 %s7558_s24, 4  ;;  %s133_s25 = int_to_ptr.vmem [resolvable:$true] %s132_s25 }
   0xd   : > { %s7638_s26 = sadd.s32 1, %s7556_s15   ;;  %s10900_s27 = smov 128  }
   0xe   : > { %p7368_p9 = pneg %p7628_p8  ;;  %s7560_s28 = smov 8  }
   0xf   : > { %s24_s29 = ssub.s32 %s7556_s15, %s7638_s26  ;;  %s27_s30 = sadd.s32 1, %s7552_s14 }
  0x10   : > { %p7369_p10 = pnand %p7368_p9, %p41_p1  ;;  %p25_p12 = scmp.eq.s32.totalorder %s24_s29, 0 }
  0x11   : > { %p34_p13 = scmp.ne.s32.totalorder %s7552_s14, %s7548_s13  ;;  %p35_p0 = scmp.eq.s32.totalorder %s7556_s15, 0 }
  0x12   : > { %7371 = dma.hbm_to_vmem [thread:$0]  (!%p7369_p10), %s131_s22, 55296, %s133_s25, [#allocation7], %s10900_s27, %s10900_s27, %s7560_s28  }
  0x13   : > { %p7381_p3 = scmp.lt.s32.totalorder %s7556_s15, 2  ;;  %p36_p5 = por %p35_p0, %p34_p13 }
  0x14   : > { %s7651_s4 = scalar_select %p25_p12, %s7552_s14, %s27_s30  }
  0x15   : > { %p7655_p7 = por %p106_p2, %p34_p13  ;;  %s149_s6 = sand.u32 1, %s7552_s14  }
  0x16   : > { %s7357_s7 = smul.u32 328, %s7556_s15  ;;  %p7664_p9 = pnand %p7381_p3, %p36_p5 }
  0x17   : > { %s7356_s8 = smul.u32 328, %s149_s6  ;;  %s150_s24 = scalar_lea.sflag [#allocation4], %s149_s6 }
  0x18   : > { %s158_s11 = scalar_lea.hbm %s10896_s0, %s7357_s7  ;;  %p7460_p10 = pneg %p7664_p9 }
  0x19   : > { %s159_s20 = sshll.u32 %s158_s11, 4  ;;  %s153_s21 = scalar_lea.vmem [#allocation3], %s7356_s8  ;;  %s160_s20 = int_to_ptr.hbm [resolvable:$true] %s159_s20 }
  0x1a   : > { %s161_s22 = sshll.u32 %s153_s21, 4  ;;  %s7456_s25 = sshra.s32 %s160_s20, 4  ;;  %s162_s22 = int_to_ptr.vmem [resolvable:$true] %s161_s22  ;;  %s7457_s25 = int_to_ptr.hbm [resolvable:$true] %s7456_s25 }
  0x1b   : > { %s7458_s29 = scalar_lea.hbm %s7457_s25, 328  ;;  %s7463_s9 = scalar_lea.hbm %s10896_s0, 656 }
  0x1c   : > { %p7459_p2 = scmp.ne.s32.totalorder %s7457_s25, %s7458_s29  ;;  %p7464_p0 = scmp.lt.s32.totalorder %s7457_s25, %s10896_s0 }
  0x1d   : > { %p7465_p3 = scmp.lt.s32.totalorder %s7463_s9, %s7458_s29 }
  0x1e   : > { %p7461_p12 = pnand %p7460_p10, %p7459_p2 }
  0x1f   : > { %p7466_p5 = por %p7465_p3, %p7464_p0 }
  0x20   : > { %p7462_p13 = pneg %p7461_p12 }
  0x22   : > { %p7467_p11 = pnand %p7466_p5, %p7462_p13 }
  0x24   : > { %7470 = shalt.err (!%p7467_p11)
}
  0x25   : > { %s10959_s6 = smov 128   ;;  %173 = sbr.rel (%p7628_p8) target bundleno = 2686 (0xa7e), region = 32 }
  0x26   : > { %7375 = dma.hbm_to_vmem [thread:$0]  (!%p7664_p9), %s160_s20, 5248, %s162_s22, %s150_s24, %s10959_s6, %s10959_s6, %s7560_s28  }
  0x2a   : > { %s7684_s8 = sand.u32 1, %s7548_s13  }
  0x2b   : > { %s7358_s27 = smul.u32 328, %s7684_s8  ;;  %s176_s11 = scalar_lea.sflag [#allocation4], %s7684_s8 }
  0x2d   : > { %s7690_s21 = scalar_lea.vmem [#allocation3], %s7358_s27 }
  0x2e   : > { %7531 = dma.done.wait (%p7615_p4), %s176_s11, 5248  }
  0x2f   : > { %7533 = vsyncadd (%p7615_p4), %s176_s11, 4294962048 }
  0x30   : > { %7535 = dma.done.wait (%p41_p1), [#allocation7], 55296  }
  0x31   : > { %7537 = vsyncadd (%p41_p1), [#allocation7], 4294912000  ;;  %v7561_v0 = vmov 0.0   ;;  %v451_v1 = vld [vmem:[#allocation6 + $0xf8] sm:$0xff]  ;;  %v450_v4 = vld [vmem:[#allocation6 + $0xf0] sm:$0xff]  ;;  %s10693_s17 = scalar_lea.vmem [#allocation8], %s7358_s27 }
  0x32   : > { %208 = vst [vmem:[#allocation2] sm:$0xff] %v7561_v0  ;;  %v7700_v2 = vld [vmem:[#allocation6 + $0x78] sm:$0xff]  ;;  %452 = vmatpush.msra.mxu0 %v451_v1  ;;  %7308 = vmatpush.msra.mxu3 %v451_v1  ;;  %v7704_v5 = vld [vmem:[#allocation6 + $0x70] sm:$0xff]  ;;  %v449_v7 = vld [vmem:[#allocation6 + $0xe8] sm:$0xff]  ;;  %s7359_s27 = smul.u32 328, %s7606_s16  ;;  %s7212_s25 = sshll.u32 %s10693_s17, 4  ;;  %s7213_s25 = int_to_ptr.vmem [resolvable:$true] %s7212_s25 }
  0x33   : > { %209 = vst [vmem:[#allocation2 + $0x8] sm:$0xff] %v7561_v0  ;;  %v7702_v3 = vld [vmem:[#allocation6 + $0x178] sm:$0xff]  ;;  %v7706_v6 = vld [vmem:[#allocation6 + $0x170] sm:$0xff]  ;;  %592 = vmatpush.msra.mxu1 %v7700_v2  ;;  %v7710_v8 = vld [vmem:[#allocation6 + $0x68] sm:$0xff]  ;;  %s7200_s16 = scalar_lea.sflag [#allocation5], %s7684_s8  ;;  %s7506_s10 = scalar_lea.hbm %s10899_s3, 656 }
  0x34   : > { %210 = vst [vmem:[#allocation2 + $0x10] sm:$0xff] %v7561_v0  ;;  %790 = vmatpush.msra.mxu2 %v7702_v3  ;;  %453 = vmatpush.msra.mxu0 %v450_v4  ;;  %v7712_v9 = vld [vmem:[#allocation6 + $0x168] sm:$0xff]  ;;  %v448_v10 = vld [vmem:[#allocation6 + $0xe0] sm:$0xff]  ;;  %v447_v13 = vld [vmem:[#allocation6 + $0xd8] sm:$0xff]  ;;  %s7211_s24 = scalar_lea.hbm %s10899_s3, %s7359_s27 }
  0x35   : > { %211 = vst [vmem:[#allocation2 + $0x160] sm:$0xff] %v7561_v0  ;;  %7309 = vmatpush.msra.mxu3 %v450_v4  ;;  %593 = vmatpush.msra.mxu1 %v7704_v5  ;;  %v7716_v11 = vld [vmem:[#allocation6 + $0x60] sm:$0xff]  ;;  %v7722_v14 = vld [vmem:[#allocation6 + $0x58] sm:$0xff]  ;;  %v446_v16 = vld [vmem:[#allocation6 + $0xd0] sm:$0xff]  ;;  %s7214_s29 = sshll.u32 %s7211_s24, 4  ;;  %s7215_s29 = int_to_ptr.hbm [resolvable:$true] %s7214_s29 }
  0x36   : > { %212 = vst [vmem:[#allocation2 + $0x168] sm:$0xff] %v7561_v0  ;;  %791 = vmatpush.msra.mxu2 %v7706_v6  ;;  %454 = vmatpush.msra.mxu0 %v449_v7  ;;  %v7718_v12 = vld [vmem:[#allocation6 + $0x160] sm:$0xff]  ;;  %v7724_v15 = vld [vmem:[#allocation6 + $0x158] sm:$0xff]  ;;  %v7728_v17 = vld [vmem:[#allocation6 + $0x50] sm:$0xff] }
  0x37   : > { %213 = vst [vmem:[#allocation2 + $0x170] sm:$0xff] %v7561_v0  ;;  %7310 = vmatpush.msra.mxu3 %v449_v7  ;;  %594 = vmatpush.msra.mxu1 %v7710_v8  ;;  %v7730_v18 = vld [vmem:[#allocation6 + $0x150] sm:$0xff]  ;;  %v445_v19 = vld [vmem:[#allocation6 + $0xc8] sm:$0xff]  ;;  %v444_v22 = vld [vmem:[#allocation6 + $0xc0] sm:$0xff] }
  0x38   : > { %792 = vmatpush.msra.mxu2 %v7712_v9  ;;  %455 = vmatpush.msra.mxu0 %v448_v10  ;;  %v7734_v20 = vld [vmem:[#allocation6 + $0x48] sm:$0xff]  ;;  %v7740_v23 = vld [vmem:[#allocation6 + $0x40] sm:$0xff]  ;;  %v443_v25 = vld [vmem:[#allocation6 + $0xb8] sm:$0xff] }
  0x39   : > { %7311 = vmatpush.msra.mxu3 %v448_v10  ;;  %595 = vmatpush.msra.mxu1 %v7716_v11  ;;  %v7736_v21 = vld [vmem:[#allocation6 + $0x148] sm:$0xff]  ;;  %v7742_v24 = vld [vmem:[#allocation6 + $0x140] sm:$0xff]  ;;  %v7746_v26 = vld [vmem:[#allocation6 + $0x38] sm:$0xff] }
  0x3a   : > { %793 = vmatpush.msra.mxu2 %v7718_v12  ;;  %456 = vmatpush.msra.mxu0 %v447_v13  ;;  %v7748_v27 = vld [vmem:[#allocation6 + $0x138] sm:$0xff]  ;;  %v442_v28 = vld [vmem:[#allocation6 + $0xb0] sm:$0xff]  ;;  %v441_v33 = vld [vmem:[#allocation6 + $0xa8] sm:$0xff] }
  0x3b   : > { %7312 = vmatpush.msra.mxu3 %v447_v13  ;;  %596 = vmatpush.msra.mxu1 %v7722_v14  ;;  %v242_v29 = vld [vmem:[%s7690_s21 + $0xe0] sm:$0xff]  ;;  %v243_v30 = vld [vmem:[%s7690_s21 + $0xe8] sm:$0xff]  ;;  %v7760_v34 = vld [vmem:[#allocation6 + $0x28] sm:$0xff] }
  0x3c   : > { %794 = vmatpush.msra.mxu2 %v7724_v15  ;;  %457 = vmatpush.msra.mxu0 %v446_v16  ;;  %v7754_v31 = vld [vmem:[#allocation6 + $0x30] sm:$0xff]  ;;  %283 = vst [vmem:[#allocation2 + $0xf8] sm:$0xff] %v242_v29  ;;  %v244_v35 = vld [vmem:[%s7690_s21 + $0xf0] sm:$0xff]  ;;  %v215_v40 = vld [vmem:[%s7690_s21 + $0x8] sm:$0xff] }
  0x3d   : > { %7313 = vmatpush.msra.mxu3 %v446_v16  ;;  %597 = vmatpush.msra.mxu1 %v7728_v17  ;;  %v7756_v32 = vld [vmem:[#allocation6 + $0x130] sm:$0xff]  ;;  %284 = vst [vmem:[#allocation2 + $0x100] sm:$0xff] %v243_v30  ;;  %v7763_v36 = vld [vmem:[#allocation6 + $0x128] sm:$0xff]  ;;  %v440_v39 = vld [vmem:[#allocation6 + $0xa0] sm:$0xff] }
  0x3e   : > { %795 = vmatpush.msra.mxu2 %v7730_v18  ;;  %458 = vmatpush.msra.mxu0 %v445_v19  ;;  %285 = vst [vmem:[#allocation2 + $0x108] sm:$0xff] %v244_v35  ;;  %v214_v37 = vld [vmem:[%s7690_s21] sm:$0xff]  ;;  %v245_v38 = vld [vmem:[%s7690_s21 + $0xf8] sm:$0xff]  ;;  %v7771_v42 = vld [vmem:[#allocation6 + $0x20] sm:$0xff] }
  0x3f   : > { %7314 = vmatpush.msra.mxu3 %v445_v19  ;;  %598 = vmatpush.msra.mxu1 %v7734_v20  ;;  %255 = vst [vmem:[#allocation2 + $0x18] sm:$0xff] %v214_v37  ;;  %v246_v41 = vld [vmem:[%s7690_s21 + $0x100] sm:$0xff]  ;;  %v7773_v43 = vld [vmem:[#allocation6 + $0x120] sm:$0xff]  ;;  %v437_v50 = vld [vmem:[#allocation6 + $0x88] sm:$0xff] }
  0x40   : > { %796 = vmatpush.msra.mxu2 %v7736_v21  ;;  %459 = vmatpush.msra.mxu0 %v444_v22  ;;  %286 = vst [vmem:[#allocation2 + $0x110] sm:$0xff] %v245_v38  ;;  %v439_v44 = vld [vmem:[#allocation6 + $0x98] sm:$0xff]  ;;  %v438_v47 = vld [vmem:[#allocation6 + $0x90] sm:$0xff]  ;;  %v216_v51 = vld [vmem:[%s7690_s21 + $0x10] sm:$0xff] }
  0x41   : > { %7315 = vmatpush.msra.mxu3 %v444_v22  ;;  %599 = vmatpush.msra.mxu1 %v7740_v23  ;;  %256 = vst [vmem:[#allocation2 + $0x20] sm:$0xff] %v215_v40  ;;  %v7777_v45 = vld [vmem:[#allocation6 + $0x18] sm:$0xff]  ;;  %v7783_v48 = vld [vmem:[#allocation6 + $0x10] sm:$0xff]  ;;  %v7791_v53 = vld [vmem:[#allocation6 + $0x8] sm:$0xff] }
  0x42   : > { %797 = vmatpush.msra.mxu2 %v7742_v24  ;;  %460 = vmatpush.msra.mxu0 %v443_v25  ;;  %v7779_v46 = vld [vmem:[#allocation6 + $0x118] sm:$0xff]  ;;  %287 = vst [vmem:[#allocation2 + $0x118] sm:$0xff] %v246_v41  ;;  %v7785_v49 = vld [vmem:[#allocation6 + $0x110] sm:$0xff]  ;;  %v7793_v54 = vld [vmem:[#allocation6 + $0x108] sm:$0xff] }
  0x43   : > { %7316 = vmatpush.msra.mxu3 %v443_v25  ;;  %600 = vmatpush.msra.mxu1 %v7746_v26  ;;  %v247_v52 = vld [vmem:[%s7690_s21 + $0x108] sm:$0xff]  ;;  %257 = vst [vmem:[#allocation2 + $0x28] sm:$0xff] %v216_v51  ;;  %v1266_v63 = vld [vmem:[#allocation6 + $0x270] sm:$0xff]  ;;  %v248_v1 = vld [vmem:[%s7690_s21 + $0x110] sm:$0xff] }
  0x44   : > { %798 = vmatpush.msra.mxu2 %v7748_v27  ;;  %461 = vmatpush.msra.mxu0 %v442_v28  ;;  %v436_v55 = vld [vmem:[#allocation6 + $0x80] sm:$0xff]  ;;  %288 = vst [vmem:[#allocation2 + $0x120] sm:$0xff] %v247_v52  ;;  %v425_v59 = vld [vmem:[#allocation2 + $0xfe] sm:$0xff]  ;;  %v1265_v4 = vld [vmem:[#allocation6 + $0x268] sm:$0xff] }
  0x45   : > { %7317 = vmatpush.msra.mxu3 %v442_v28  ;;  %601 = vmatpush.msra.mxu1 %v7754_v31  ;;  %v7797_v56 = vld [vmem:[#allocation6] sm:$0xff]  ;;  %v1267_v62 = vld [vmem:[#allocation6 + $0x278] sm:$0xff]  ;;  %v217_v0 = vld [vmem:[%s7690_s21 + $0x18] sm:$0xff]  ;;  %289 = vst [vmem:[#allocation2 + $0x128] sm:$0xff] %v248_v1 }
  0x46   : > { %799 = vmatpush.msra.mxu2 %v7756_v32  ;;  %462 = vmatpush.msra.mxu0 %v441_v33  ;;  %v7799_v57 = vld [vmem:[#allocation6 + $0x100] sm:$0xff]  ;;  %258 = vst [vmem:[#allocation2 + $0x30] sm:$0xff] %v217_v0  ;;  %v249_v16 = vld [vmem:[%s7690_s21 + $0x118] sm:$0xff] }
  0x47   : > { %7318 = vmatpush.msra.mxu3 %v441_v33  ;;  %602 = vmatpush.msra.mxu1 %v7760_v34  ;;  %v394_v58 = vld [vmem:[#allocation2 + $0x6] sm:$0xff]  ;;  %v395_v7 = vld [vmem:[#allocation2 + $0xe] sm:$0xff]  ;;  %290 = vst [vmem:[#allocation2 + $0x130] sm:$0xff] %v249_v16  ;;  %v734_v25 = vld [vmem:[#allocation2 + $0x17] sm:$0xff] }
  0x48   : > { %800 = vmatpush.msra.mxu2 %v7763_v36  ;;  %463 = vmatpush.msra.mxu0 %v440_v39  ;;  %v337_v60 = vld [vmem:[#allocation2 + $0x5] sm:$0xff]  ;;  %v338_v13 = vld [vmem:[#allocation2 + $0xd] sm:$0xff]  ;;  %v340_v29 = vld [vmem:[#allocation2 + $0x1d] sm:$0xff] }
  0x49   : > { %7319 = vmatpush.msra.mxu3 %v440_v39  ;;  %603 = vmatpush.msra.mxu1 %v7771_v42  ;;  %v732_v61 = vld [vmem:[#allocation2 + $0x7] sm:$0xff]  ;;  %v397_v28 = vld [vmem:[#allocation2 + $0x1e] sm:$0xff] }
  0x4a   : > { %801 = vmatpush.msra.mxu2 %v7773_v43  ;;  %464 = vmatpush.msra.mxu0 %v439_v44  ;;  %v426_v10 = vld [vmem:[#allocation2 + $0x106] sm:$0xff]  ;;  %v427_v22 = vld [vmem:[#allocation2 + $0x10e] sm:$0xff] }
  0x4b   : > { %7320 = vmatpush.msra.mxu3 %v439_v44  ;;  %604 = vmatpush.msra.mxu1 %v7777_v45  ;;  %v1264_v19 = vld [vmem:[#allocation6 + $0x260] sm:$0xff]  ;;  %v221_v38 = vld [vmem:[%s7690_s21 + $0x38] sm:$0xff]  ;;  %v1506_v16 = vld [vmem:[#allocation6 + $0x2f8] sm:$0xff] }
  0x4c   : > { %802 = vmatpush.msra.mxu2 %v7779_v46  ;;  %465 = vmatpush.msra.mxu0 %v438_v47  ;;  %v251_v30 = vld [vmem:[%s7690_s21 + $0x128] sm:$0xff]  ;;  %v252_v39 = vld [vmem:[%s7690_s21 + $0x130] sm:$0xff]  ;;  %262 = vst [vmem:[#allocation2 + $0x50] sm:$0xff] %v221_v38 }
  0x4d   : > { %7321 = vmatpush.msra.mxu3 %v438_v47  ;;  %605 = vmatpush.msra.mxu1 %v7783_v48  ;;  %292 = vst [vmem:[#allocation2 + $0x140] sm:$0xff] %v251_v30  ;;  %v398_v33 = vld [vmem:[#allocation2 + $0x26] sm:$0xff]  ;;  %v399_v40 = vld [vmem:[#allocation2 + $0x2e] sm:$0xff] }
  0x4e   : > { %803 = vmatpush.msra.mxu2 %v7785_v49  ;;  %466 = vmatpush.msra.mxu0 %v437_v50  ;;  %v341_v35 = vld [vmem:[#allocation2 + $0x25] sm:$0xff]  ;;  %293 = vst [vmem:[#allocation2 + $0x148] sm:$0xff] %v252_v39  ;;  %v737_v44 = vld [vmem:[#allocation2 + $0x2f] sm:$0xff] }
  0x4f   : > { %7322 = vmatpush.msra.mxu3 %v437_v50  ;;  %606 = vmatpush.msra.mxu1 %v7791_v53  ;;  %v736_v37 = vld [vmem:[#allocation2 + $0x27] sm:$0xff] }
  0x50   : > { %804 = vmatpush.msra.mxu2 %v7793_v54  ;;  %467 = vmatpush.msra.mxu0 %v436_v55  ;;  %v430_v41 = vld [vmem:[#allocation2 + $0x126] sm:$0xff]  ;;  %v431_v47 = vld [vmem:[#allocation2 + $0x12e] sm:$0xff] }
  0x51   : > { %7323 = vmatpush.msra.mxu3 %v436_v55  ;;  %607 = vmatpush.msra.mxu1 %v7797_v56  ;;  %v231_v30 = vld [vmem:[%s7690_s21 + $0x88] sm:$0xff] }
  0x52   : > { %805 = vmatpush.msra.mxu2 %v7799_v57  ;;  %468 = vmatmul.f32.vlgmr.msra.gmra.mxu0 %v394_v58  ;;  %v368_v58 = vld [vmem:[#allocation2 + $0xfd] sm:$0xff]  ;;  %272 = vst [vmem:[#allocation2 + $0xa0] sm:$0xff] %v231_v30 }
  0x53   : > { %561 = vmatmul.f32.vlgmr.msra.gmra.mxu3 %v425_v59  ;;  %608 = vmatmul.f32.vlgmr.msra.gmra.mxu1 %v337_v60 }
  0x54   : > { %7324 = vmatpush.msrb.mxu3 %v7700_v2  ;;  %806 = vmatmul.f32.vlgmr.msra.gmra.mxu2 %v732_v61  ;;  %v733_v2 = vld [vmem:[#allocation2 + $0xf] sm:$0xff] }
  0x55   : > { %1268 = vmatpush.msrb.mxu0 %v1267_v62  ;;  %v227_v61 = vld [vmem:[%s7690_s21 + $0x68] sm:$0xff]  ;;  %1507 = vmatpush.msrb.mxu1 %v1506_v16 }
  0x56   : > { %7325 = vmatpush.msrb.mxu3 %v7704_v5  ;;  %v218_v5 = vld [vmem:[%s7690_s21 + $0x20] sm:$0xff]  ;;  %268 = vst [vmem:[#allocation2 + $0x80] sm:$0xff] %v227_v61 }
  0x57   : > { %1269 = vmatpush.msrb.mxu0 %v1266_v63  ;;  %259 = vst [vmem:[#allocation2 + $0x38] sm:$0xff] %v218_v5  ;;  %v369_v63 = vld [vmem:[#allocation2 + $0x105] sm:$0xff] }
  0x58   : > { %7326 = vmatpush.msrb.mxu3 %v7710_v8  ;;  %v396_v8 = vld [vmem:[#allocation2 + $0x16] sm:$0xff]  ;;  %v1255_v16 = vld [vmem:[#allocation6 + $0x218] sm:$0xff] }
  0x59   : > { %1270 = vmatpush.msrb.mxu0 %v1265_v4  ;;  %v228_v4 = vld [vmem:[%s7690_s21 + $0x70] sm:$0xff] }
  0x5a   : > { %7327 = vmatpush.msrb.mxu3 %v7716_v11  ;;  %471 = vmatmul.f32.gmra.mxu0 %v395_v7  ;;  %v339_v11 = vld [vmem:[#allocation2 + $0x15] sm:$0xff]  ;;  %269 = vst [vmem:[#allocation2 + $0x88] sm:$0xff] %v228_v4  ;;  %v1259_v7 = vld [vmem:[#allocation6 + $0x238] sm:$0xff] }
  0x5b   : > { %564 = vmatmul.f32.gmra.mxu3 %v426_v10  ;;  %611 = vmatmul.f32.gmra.mxu1 %v338_v13  ;;  %v370_v13 = vld [vmem:[#allocation2 + $0x10d] sm:$0xff] }
  0x5c   : > { %7328 = vmatpush.msrb.mxu3 %v7722_v14  ;;  %809 = vmatmul.f32.gmra.mxu2 %v733_v2  ;;  %v219_v14 = vld [vmem:[%s7690_s21 + $0x28] sm:$0xff] }
  0x5d   : > { %1271 = vmatpush.msrb.mxu0 %v1264_v19  ;;  %260 = vst [vmem:[#allocation2 + $0x40] sm:$0xff] %v219_v14  ;;  %v229_v19 = vld [vmem:[%s7690_s21 + $0x78] sm:$0xff]  ;;  %v230_v14 = vld [vmem:[%s7690_s21 + $0x80] sm:$0xff] }
  0x5e   : > { %7329 = vmatpush.msrb.mxu3 %v7728_v17  ;;  %v250_v17 = vld [vmem:[%s7690_s21 + $0x120] sm:$0xff]  ;;  %270 = vst [vmem:[#allocation2 + $0x90] sm:$0xff] %v229_v19 }
  0x5f   : > { %291 = vst [vmem:[#allocation2 + $0x138] sm:$0xff] %v250_v17 }
  0x60   : > { %7330 = vmatpush.msrb.mxu3 %v7734_v20  ;;  %v428_v20 = vld [vmem:[#allocation2 + $0x116] sm:$0xff]  ;;  %271 = vst [vmem:[#allocation2 + $0x98] sm:$0xff] %v230_v14 }
  0x61   : > { %v410_v39 = vld [vmem:[#allocation2 + $0x86] sm:$0xff] }
  0x62   : > { %7331 = vmatpush.msrb.mxu3 %v7740_v23  ;;  %474 = vmatmul.f32.gmra.mxu0 %v396_v8  ;;  %v735_v23 = vld [vmem:[#allocation2 + $0x1f] sm:$0xff] }
  0x63   : > { %567 = vmatmul.f32.gmra.mxu3 %v427_v22  ;;  %614 = vmatmul.f32.gmra.mxu1 %v339_v11  ;;  %v371_v22 = vld [vmem:[#allocation2 + $0x115] sm:$0xff] }
  0x64   : > { %7332 = vmatpush.msrb.mxu3 %v7746_v26  ;;  %812 = vmatmul.f32.gmra.mxu2 %v734_v25  ;;  %v220_v26 = vld [vmem:[%s7690_s21 + $0x30] sm:$0xff]  ;;  %v739_v50 = vld [vmem:[#allocation2 + $0x3f] sm:$0xff] }
  0x65   : > { %261 = vst [vmem:[#allocation2 + $0x48] sm:$0xff] %v220_v26  ;;  %v1505_v26 = vld [vmem:[#allocation6 + $0x2f0] sm:$0xff] }
  0x66   : > { %7333 = vmatpush.msrb.mxu3 %v7754_v31  ;;  %v1263_v31 = vld [vmem:[#allocation6 + $0x258] sm:$0xff]  ;;  %1508 = vmatpush.msrb.mxu1 %v1505_v26 }
  0x67   : > { %1272 = vmatpush.msrb.mxu0 %v1263_v31  ;;  %v433_v51 = vld [vmem:[#allocation2 + $0x13e] sm:$0xff] }
  0x68   : > { %7334 = vmatpush.msrb.mxu3 %v7760_v34  ;;  %v429_v34 = vld [vmem:[#allocation2 + $0x11e] sm:$0xff] }
  0x69   : > { %v356_v4 = vld [vmem:[#allocation2 + $0x9d] sm:$0xff] }
  0x6a   : > { %7335 = vmatpush.msrb.mxu3 %v7771_v42  ;;  %477 = vmatmul.f32.gmra.mxu0 %v397_v28  ;;  %v342_v42 = vld [vmem:[#allocation2 + $0x2d] sm:$0xff]  ;;  %v372_v28 = vld [vmem:[#allocation2 + $0x11d] sm:$0xff] }
  0x6b   : > { %570 = vmatmul.f32.gmra.mxu3 %v428_v20  ;;  %617 = vmatmul.f32.gmra.mxu1 %v340_v29  ;;  %v1258_v29 = vld [vmem:[#allocation6 + $0x230] sm:$0xff] }
  0x6c   : > { %7336 = vmatpush.msrb.mxu3 %v7777_v45  ;;  %815 = vmatmul.f32.gmra.mxu2 %v735_v23  ;;  %v1262_v45 = vld [vmem:[#allocation6 + $0x250] sm:$0xff]  ;;  %v403_v52 = vld [vmem:[#allocation2 + $0x4e] sm:$0xff] }
  0x6d   : > { %1273 = vmatpush.msrb.mxu0 %v1262_v45  ;;  %v346_v55 = vld [vmem:[#allocation2 + $0x4d] sm:$0xff] }
  0x6e   : > { %7337 = vmatpush.msrb.mxu3 %v7783_v48  ;;  %v738_v48 = vld [vmem:[#allocation2 + $0x37] sm:$0xff] }
  0x6f   : > { %v1504_v45 = vld [vmem:[#allocation6 + $0x2e8] sm:$0xff] }
  0x70   : > { %7338 = vmatpush.msrb.mxu3 %v7791_v53  ;;  %v434_v53 = vld [vmem:[#allocation2 + $0x146] sm:$0xff]  ;;  %1509 = vmatpush.msrb.mxu1 %v1504_v45 }
  0x72   : > { %7339 = vmatpush.msrb.mxu3 %v7797_v56  ;;  %480 = vmatmul.f32.gmra.mxu0 %v398_v33  ;;  %v1260_v56 = vld [vmem:[#allocation6 + $0x240] sm:$0xff] }
  0x73   : > { %573 = vmatmul.f32.gmra.mxu3 %v429_v34  ;;  %620 = vmatmul.f32.gmra.mxu1 %v341_v35  ;;  %v373_v33 = vld [vmem:[#allocation2 + $0x125] sm:$0xff] }
  0x74   : > { %7340 = vmatpush.msra.mxu3 %v7702_v3  ;;  %818 = vmatmul.f32.gmra.mxu2 %v736_v37  ;;  %v222_v3 = vld [vmem:[%s7690_s21 + $0x40] sm:$0xff]  ;;  %v232_v37 = vld [vmem:[%s7690_s21 + $0x90] sm:$0xff] }
  0x75   : > { %263 = vst [vmem:[#allocation2 + $0x58] sm:$0xff] %v222_v3  ;;  %v748_v3 = vld [vmem:[#allocation2 + $0x87] sm:$0xff] }
  0x76   : > { %7341 = vmatpush.msra.mxu3 %v7706_v6  ;;  %v400_v6 = vld [vmem:[#allocation2 + $0x36] sm:$0xff]  ;;  %273 = vst [vmem:[#allocation2 + $0xa8] sm:$0xff] %v232_v37  ;;  %v1021_v37 = vld [vmem:[#allocation6 + $0x1c0] sm:$0xff] }
  0x78   : > { %7342 = vmatpush.msra.mxu3 %v7712_v9  ;;  %v343_v9 = vld [vmem:[#allocation2 + $0x35] sm:$0xff] }
  0x7a   : > { %7343 = vmatpush.msra.mxu3 %v7718_v12  ;;  %483 = vmatmul.f32.gmra.mxu0 %v399_v40  ;;  %v223_v12 = vld [vmem:[%s7690_s21 + $0x48] sm:$0xff] }
  0x7b   : > { %576 = vmatmul.f32.gmra.mxu3 %v430_v41  ;;  %623 = vmatmul.f32.gmra.mxu1 %v342_v42  ;;  %264 = vst [vmem:[#allocation2 + $0x60] sm:$0xff] %v223_v12  ;;  %v374_v40 = vld [vmem:[#allocation2 + $0x12d] sm:$0xff]  ;;  %v353_v42 = vld [vmem:[#allocation2 + $0x85] sm:$0xff] }
  0x7c   : > { %7344 = vmatpush.msra.mxu3 %v7724_v15  ;;  %821 = vmatmul.f32.gmra.mxu2 %v737_v44  ;;  %v401_v15 = vld [vmem:[#allocation2 + $0x3e] sm:$0xff]  ;;  %v347_v59 = vld [vmem:[#allocation2 + $0x55] sm:$0xff] }
  0x7d   : > { %v742_v60 = vld [vmem:[#allocation2 + $0x57] sm:$0xff]  ;;  %v357_v14 = vld [vmem:[#allocation2 + $0xa5] sm:$0xff] }
  0x7e   : > { %7345 = vmatpush.msra.mxu3 %v7730_v18  ;;  %v432_v18 = vld [vmem:[#allocation2 + $0x136] sm:$0xff] }
  0x7f   : > { %v1257_v44 = vld [vmem:[#allocation6 + $0x228] sm:$0xff] }
  0x80   : > { %7346 = vmatpush.msra.mxu3 %v7736_v21  ;;  %v344_v21 = vld [vmem:[#allocation2 + $0x3d] sm:$0xff] }
  0x82   : > { %7347 = vmatpush.msra.mxu3 %v7742_v24  ;;  %486 = vmatmul.f32.gmra.mxu0 %v400_v6  ;;  %v224_v24 = vld [vmem:[%s7690_s21 + $0x50] sm:$0xff]  ;;  %v405_v62 = vld [vmem:[#allocation2 + $0x5e] sm:$0xff] }
  0x83   : > { %579 = vmatmul.f32.gmra.mxu3 %v431_v47  ;;  %626 = vmatmul.f32.gmra.mxu1 %v343_v9  ;;  %265 = vst [vmem:[#allocation2 + $0x68] sm:$0xff] %v224_v24  ;;  %v348_v0 = vld [vmem:[#allocation2 + $0x5d] sm:$0xff]  ;;  %v749_v24 = vld [vmem:[#allocation2 + $0x8f] sm:$0xff] }
  0x84   : > { %7348 = vmatpush.msra.mxu3 %v7748_v27  ;;  %824 = vmatmul.f32.gmra.mxu2 %v738_v48  ;;  %v1261_v27 = vld [vmem:[#allocation6 + $0x248] sm:$0xff]  ;;  %v743_v1 = vld [vmem:[#allocation2 + $0x5f] sm:$0xff] }
  0x85   : > { %1274 = vmatpush.msrb.mxu0 %v1261_v27  ;;  %v1028_v6 = vld [vmem:[#allocation6 + $0x1f8] sm:$0xff]  ;;  %v233_v47 = vld [vmem:[%s7690_s21 + $0x98] sm:$0xff] }
  0x86   : > { %7349 = vmatpush.msra.mxu3 %v7756_v32  ;;  %v402_v32 = vld [vmem:[#allocation2 + $0x46] sm:$0xff]  ;;  %274 = vst [vmem:[#allocation2 + $0xb0] sm:$0xff] %v233_v47  ;;  %v1027_v27 = vld [vmem:[#allocation6 + $0x1f0] sm:$0xff] }
  0x87   : > { %1275 = vmatpush.msrb.mxu0 %v1260_v56  ;;  %v750_v56 = vld [vmem:[#allocation2 + $0x97] sm:$0xff] }
  0x88   : > { %7350 = vmatpush.msra.mxu3 %v7763_v36  ;;  %v345_v36 = vld [vmem:[#allocation2 + $0x45] sm:$0xff] }
  0x89   : > { %1276 = vmatpush.msrb.mxu0 %v1259_v7  ;;  %v1024_v7 = vld [vmem:[#allocation6 + $0x1d8] sm:$0xff] }
  0x8a   : > { %7351 = vmatpush.msra.mxu3 %v7773_v43  ;;  %489 = vmatmul.f32.gmra.mxu0 %v401_v15  ;;  %v740_v43 = vld [vmem:[#allocation2 + $0x47] sm:$0xff] }
  0x8b   : > { %582 = vmatmul.f32.gmra.mxu3 %v432_v18  ;;  %629 = vmatmul.f32.gmra.mxu1 %v344_v21  ;;  %v406_v10 = vld [vmem:[#allocation2 + $0x66] sm:$0xff]  ;;  %v411_v15 = vld [vmem:[#allocation2 + $0x8e] sm:$0xff] }
  0x8c   : > { %7352 = vmatpush.msra.mxu3 %v7779_v46  ;;  %827 = vmatmul.f32.gmra.mxu2 %v739_v50  ;;  %v225_v46 = vld [vmem:[%s7690_s21 + $0x58] sm:$0xff]  ;;  %v349_v2 = vld [vmem:[#allocation2 + $0x65] sm:$0xff] }
  0x8d   : > { %266 = vst [vmem:[#allocation2 + $0x70] sm:$0xff] %v225_v46  ;;  %v744_v5 = vld [vmem:[#allocation2 + $0x67] sm:$0xff]  ;;  %1277 = vmatpush.msrb.mxu0 %v1258_v29  ;;  %v375_v18 = vld [vmem:[#allocation2 + $0x135] sm:$0xff] }
  0x8e   : > { %7353 = vmatpush.msra.mxu3 %v7785_v49  ;;  %v741_v49 = vld [vmem:[#allocation2 + $0x4f] sm:$0xff] }
  0x8f   : > { %1278 = vmatpush.msrb.mxu0 %v1257_v44  ;;  %v354_v50 = vld [vmem:[#allocation2 + $0x8d] sm:$0xff]  ;;  %v1020_v44 = vld [vmem:[#allocation6 + $0x1b8] sm:$0xff] }
  0x90   : > { %7354 = vmatpush.msra.mxu3 %v7793_v54  ;;  %v226_v54 = vld [vmem:[%s7690_s21 + $0x60] sm:$0xff]  ;;  %v237_v29 = vld [vmem:[%s7690_s21 + $0xb8] sm:$0xff] }
  0x91   : > { %267 = vst [vmem:[#allocation2 + $0x78] sm:$0xff] %v226_v54  ;;  %v1256_v54 = vld [vmem:[#allocation6 + $0x220] sm:$0xff] }
  0x92   : > { %7355 = vmatpush.msra.mxu3 %v7799_v57  ;;  %492 = vmatmul.f32.gmra.mxu0 %v402_v32  ;;  %v404_v57 = vld [vmem:[#allocation2 + $0x56] sm:$0xff]  ;;  %278 = vst [vmem:[#allocation2 + $0xd0] sm:$0xff] %v237_v29  ;;  %v1016_v29 = vld [vmem:[#allocation6 + $0x198] sm:$0xff] }
  0x93   : > { %585 = vmatmul.f32.gmra.mxu3 %v433_v51  ;;  %632 = vmatmul.f32.gmra.mxu1 %v345_v36  ;;  %v234_v32 = vld [vmem:[%s7690_s21 + $0xa0] sm:$0xff]  ;;  %v1026_v36 = vld [vmem:[#allocation6 + $0x1e8] sm:$0xff] }
  0x94   : > { %830 = vmatmul.f32.gmra.mxu2 %v740_v43  ;;  %v407_v8 = vld [vmem:[#allocation2 + $0x6e] sm:$0xff]  ;;  %275 = vst [vmem:[#allocation2 + $0xb8] sm:$0xff] %v234_v32  ;;  %1279 = vmatpush.msrb.mxu0 %v1256_v54  ;;  %v1019_v32 = vld [vmem:[#allocation6 + $0x1b0] sm:$0xff] }
  0x95   : > { %v350_v11 = vld [vmem:[#allocation2 + $0x6d] sm:$0xff] }
  0x96   : > { %v745_v25 = vld [vmem:[#allocation2 + $0x6f] sm:$0xff]  ;;  %1280 = vmatpush.msrb.mxu0 %v1255_v16 }
  0x98   : > { %v408_v17 = vld [vmem:[#allocation2 + $0x76] sm:$0xff]  ;;  %v409_v31 = vld [vmem:[#allocation2 + $0x7e] sm:$0xff] }
  0x99   : > { %v351_v20 = vld [vmem:[#allocation2 + $0x75] sm:$0xff]  ;;  %v352_v34 = vld [vmem:[#allocation2 + $0x7d] sm:$0xff] }
  0x9a   : > { %495 = vmatmul.f32.gmra.mxu0 %v403_v52  ;;  %v746_v23 = vld [vmem:[#allocation2 + $0x77] sm:$0xff]  ;;  %v747_v35 = vld [vmem:[#allocation2 + $0x7f] sm:$0xff] }
  0x9b   : > { %588 = vmatmul.f32.gmra.mxu3 %v434_v53  ;;  %635 = vmatmul.f32.gmra.mxu1 %v346_v55  ;;  %v412_v52 = vld [vmem:[#allocation2 + $0x96] sm:$0xff] }
  0x9c   : > { %833 = vmatmul.f32.gmra.mxu2 %v741_v49  ;;  %v376_v53 = vld [vmem:[#allocation2 + $0x13d] sm:$0xff]  ;;  %v355_v49 = vld [vmem:[#allocation2 + $0x95] sm:$0xff] }
  0x9d   : > { %v416_v47 = vld [vmem:[#allocation2 + $0xb6] sm:$0xff] }
  0xa2   : > { %498 = vmatmul.f32.gmra.mxu0 %v404_v57  ;;  %v1503_v57 = vld [vmem:[#allocation6 + $0x2e0] sm:$0xff] }
  0xa3   : > { %701 = vmatmul.f32.vlgmr.msrb.gmra.mxu3 %v368_v58  ;;  %638 = vmatmul.f32.gmra.mxu1 %v347_v59  ;;  %v1025_v58 = vld [vmem:[#allocation6 + $0x1e0] sm:$0xff] }
  0xa4   : > { %836 = vmatmul.f32.gmra.mxu2 %v742_v60  ;;  %1029 = vmatpush.msrb.mxu3 %v1028_v6  ;;  %v235_v59 = vld [vmem:[%s7690_s21 + $0xa8] sm:$0xff] }
  0xa5   : > { %1510 = vmatpush.msrb.mxu1 %v1503_v57  ;;  %276 = vst [vmem:[#allocation2 + $0xc0] sm:$0xff] %v235_v59  ;;  %v766_v57 = vld [vmem:[#allocation2 + $0x117] sm:$0xff] }
  0xa6   : > { %1030 = vmatpush.msrb.mxu3 %v1027_v27  ;;  %v754_v27 = vld [vmem:[#allocation2 + $0xb7] sm:$0xff] }
  0xa8   : > { %1031 = vmatpush.msrb.mxu3 %v1026_v36  ;;  %v1018_v36 = vld [vmem:[#allocation6 + $0x1a8] sm:$0xff] }
  0xaa   : > { %501 = vmatmul.f32.gmra.mxu0 %v405_v62  ;;  %1032 = vmatpush.msrb.mxu3 %v1025_v58 }
  0xab   : > { %704 = vmatmul.f32.gmra.mxu3 %v369_v63  ;;  %641 = vmatmul.f32.gmra.mxu1 %v348_v0  ;;  %v413_v63 = vld [vmem:[#allocation2 + $0x9e] sm:$0xff] }
  0xac   : > { %839 = vmatmul.f32.gmra.mxu2 %v743_v1  ;;  %v377_v0 = vld [vmem:[#allocation2 + $0x145] sm:$0xff]  ;;  %1033 = vmatpush.msrb.mxu3 %v1024_v7  ;;  %v360_v59 = vld [vmem:[#allocation2 + $0xbd] sm:$0xff] }
  0xb2   : > { %504 = vmatmul.f32.gmra.mxu0 %v406_v10  ;;  %v751_v10 = vld [vmem:[#allocation2 + $0x9f] sm:$0xff] }
  0xb3   : > { %707 = vmatmul.f32.gmra.mxu3 %v370_v13  ;;  %644 = vmatmul.f32.gmra.mxu1 %v349_v2  ;;  %v236_v13 = vld [vmem:[%s7690_s21 + $0xb0] sm:$0xff] }
  0xb4   : > { %842 = vmatmul.f32.gmra.mxu2 %v744_v5  ;;  %277 = vst [vmem:[#allocation2 + $0xc8] sm:$0xff] %v236_v13  ;;  %v1023_v5 = vld [vmem:[#allocation6 + $0x1d0] sm:$0xff]  ;;  %v1745_v13 = vld [vmem:[#allocation6 + $0x378] sm:$0xff] }
  0xb5   : > { %1034 = vmatpush.msrb.mxu3 %v1023_v5  ;;  %1746 = vmatpush.msrb.mxu2 %v1745_v13  ;;  %v1744_v5 = vld [vmem:[#allocation6 + $0x370] sm:$0xff] }
  0xb6   : > { %v1736_v13 = vld [vmem:[#allocation6 + $0x330] sm:$0xff] }
  0xb7   : > { %1747 = vmatpush.msrb.mxu2 %v1744_v5 }
  0xba   : > { %507 = vmatmul.f32.gmra.mxu0 %v407_v8 }
  0xbb   : > { %710 = vmatmul.f32.gmra.mxu3 %v371_v22  ;;  %647 = vmatmul.f32.gmra.mxu1 %v350_v11  ;;  %v414_v22 = vld [vmem:[#allocation2 + $0xa6] sm:$0xff] }
  0xbc   : > { %845 = vmatmul.f32.gmra.mxu2 %v745_v25  ;;  %v763_v11 = vld [vmem:[#allocation2 + $0xff] sm:$0xff] }
  0xc2   : > { %510 = vmatmul.f32.gmra.mxu0 %v408_v17  ;;  %v1502_v17 = vld [vmem:[#allocation6 + $0x2d8] sm:$0xff] }
  0xc3   : > { %713 = vmatmul.f32.gmra.mxu3 %v372_v28  ;;  %650 = vmatmul.f32.gmra.mxu1 %v351_v20  ;;  %v752_v28 = vld [vmem:[#allocation2 + $0xa7] sm:$0xff]  ;;  %v1022_v20 = vld [vmem:[#allocation6 + $0x1c8] sm:$0xff] }
  0xc4   : > { %848 = vmatmul.f32.gmra.mxu2 %v746_v23  ;;  %1511 = vmatpush.msrb.mxu1 %v1502_v17  ;;  %v767_v17 = vld [vmem:[#allocation2 + $0x11f] sm:$0xff] }
  0xc5   : > { %1035 = vmatpush.msrb.mxu3 %v1022_v20  ;;  %v1500_v20 = vld [vmem:[#allocation6 + $0x2c8] sm:$0xff] }
  0xc7   : > { %1036 = vmatpush.msrb.mxu3 %v1021_v37  ;;  %v1015_v37 = vld [vmem:[#allocation6 + $0x190] sm:$0xff] }
  0xc9   : > { %1037 = vmatpush.msrb.mxu3 %v1020_v44  ;;  %v241_v44 = vld [vmem:[%s7690_s21 + $0xd8] sm:$0xff] }
  0xca   : > { %513 = vmatmul.f32.gmra.mxu0 %v409_v31  ;;  %v415_v31 = vld [vmem:[#allocation2 + $0xae] sm:$0xff]  ;;  %282 = vst [vmem:[#allocation2 + $0xf0] sm:$0xff] %v241_v44 }
  0xcb   : > { %716 = vmatmul.f32.gmra.mxu3 %v373_v33  ;;  %653 = vmatmul.f32.gmra.mxu1 %v352_v34  ;;  %v764_v33 = vld [vmem:[#allocation2 + $0x107] sm:$0xff]  ;;  %v1496_v44 = vld [vmem:[#allocation6 + $0x2a8] sm:$0xff] }
  0xcc   : > { %851 = vmatmul.f32.gmra.mxu2 %v747_v35  ;;  %v358_v35 = vld [vmem:[#allocation2 + $0xad] sm:$0xff]  ;;  %1038 = vmatpush.msrb.mxu3 %v1019_v32 }
  0xcd   : > { %v362_v32 = vld [vmem:[#allocation2 + $0xcd] sm:$0xff] }
  0xce   : > { %1039 = vmatpush.msrb.mxu3 %v1018_v36  ;;  %v1739_v36 = vld [vmem:[#allocation6 + $0x348] sm:$0xff] }
  0xcf   : > { %v7858_v38 = vpop.f32.mrf.mxu0 }
  0xd0   : > { %v7860_v41 = vpop.f32.mrf.mxu1 }
  0xd2   : > { %516 = vmatmul.f32.gmra.mxu0 %v410_v39  ;;  %v753_v39 = vld [vmem:[#allocation2 + $0xaf] sm:$0xff] }
  0xd3   : > { %719 = vmatmul.f32.gmra.mxu3 %v374_v40  ;;  %656 = vmatmul.f32.gmra.mxu1 %v353_v42  ;;  %v238_v40 = vld [vmem:[%s7690_s21 + $0xc0] sm:$0xff] }
  0xd4   : > { %854 = vmatmul.f32.gmra.mxu2 %v748_v3  ;;  %279 = vst [vmem:[#allocation2 + $0xd8] sm:$0xff] %v238_v40  ;;  %v1254_v3 = vld [vmem:[#allocation6 + $0x210] sm:$0xff] }
  0xd5   : > { %1281 = vmatpush.msrb.mxu0 %v1254_v3  ;;  %v1740_v3 = vld [vmem:[#allocation6 + $0x350] sm:$0xff] }
  0xd6   : > { %v7863_v9 = vpop.f32.mrf.mxu3 }
  0xd7   : > { %v7865_v48 = vpop.f32.mrf.mxu2  ;;  %v7867_v12 = vpop.f32.mrf.mxu0 }
  0xd8   : > { %v7869_v21 = vpop.f32.mrf.mxu1 }
  0xda   : > { %519 = vmatmul.f32.gmra.mxu0 %v411_v15  ;;  %v765_v15 = vld [vmem:[#allocation2 + $0x10f] sm:$0xff] }
  0xdb   : > { %722 = vmatmul.f32.gmra.mxu3 %v375_v18  ;;  %659 = vmatmul.f32.gmra.mxu1 %v354_v50  ;;  %v359_v50 = vld [vmem:[#allocation2 + $0xb5] sm:$0xff] }
  0xdc   : > { %857 = vmatmul.f32.gmra.mxu2 %v749_v24  ;;  %v1501_v24 = vld [vmem:[#allocation6 + $0x2d0] sm:$0xff] }
  0xdd   : > { %1512 = vmatpush.msrb.mxu1 %v1501_v24  ;;  %v768_v24 = vld [vmem:[#allocation2 + $0x127] sm:$0xff] }
  0xde   : > { %v7872_v51 = vpop.f32.mrf.mxu3 }
  0xdf   : > { %v7874_v43 = vpop.f32.mrf.mxu2  ;;  %v7876_v46 = vpop.f32.mrf.mxu0  ;;  %1513 = vmatpush.msrb.mxu1 %v1500_v20 }
  0xe0   : > { %v7878_v55 = vpop.f32.mrf.mxu1 }
  0xe2   : > { %522 = vmatmul.f32.gmra.mxu0 %v412_v52  ;;  %v239_v52 = vld [vmem:[%s7690_s21 + $0xc8] sm:$0xff] }
  0xe3   : > { %725 = vmatmul.f32.gmra.mxu3 %v376_v53  ;;  %662 = vmatmul.f32.gmra.mxu1 %v355_v49  ;;  %280 = vst [vmem:[#allocation2 + $0xe0] sm:$0xff] %v239_v52  ;;  %v757_v52 = vld [vmem:[#allocation2 + $0xcf] sm:$0xff] }
  0xe4   : > { %860 = vmatmul.f32.gmra.mxu2 %v750_v56  ;;  %v417_v56 = vld [vmem:[#allocation2 + $0xbe] sm:$0xff] }
  0xe6   : > { %v7881_v60 = vpop.f32.mrf.mxu3 }
  0xe7   : > { %v7883_v61 = vpop.f32.mrf.mxu2  ;;  %v7885_v62 = vpop.f32.mrf.mxu0 }
  0xe8   : > { %v7887_v1 = vpop.f32.mrf.mxu1 }
  0xea   : > { %525 = vmatmul.f32.gmra.mxu0 %v413_v63  ;;  %v755_v63 = vld [vmem:[#allocation2 + $0xbf] sm:$0xff] }
  0xeb   : > { %728 = vmatmul.f32.gmra.mxu3 %v377_v0  ;;  %665 = vmatmul.f32.gmra.mxu1 %v356_v4  ;;  %v1017_v0 = vld [vmem:[#allocation6 + $0x1a0] sm:$0xff] }
  0xec   : > { %863 = vmatmul.f32.gmra.mxu2 %v751_v10  ;;  %1040 = vmatpush.msrb.mxu3 %v1017_v0  ;;  %v240_v4 = vld [vmem:[%s7690_s21 + $0xd0] sm:$0xff]  ;;  %v1737_v0 = vld [vmem:[#allocation6 + $0x338] sm:$0xff] }
  0xed   : > { %281 = vst [vmem:[#allocation2 + $0xe8] sm:$0xff] %v240_v4  ;;  %v1253_v10 = vld [vmem:[#allocation6 + $0x208] sm:$0xff] }
  0xee   : > { %v7890_v2 = vpop.f32.mrf.mxu3  ;;  %1282 = vmatpush.msrb.mxu0 %v1253_v10  ;;  %1041 = vmatpush.msrb.mxu3 %v1016_v29  ;;  %v1498_v10 = vld [vmem:[#allocation6 + $0x2b8] sm:$0xff]  ;;  %v363_v29 = vld [vmem:[#allocation2 + $0xd5] sm:$0xff] }
  0xef   : > { %v7892_v19 = vpop.f32.mrf.mxu2  ;;  %v7894_v8 = vpop.f32.mrf.mxu0 }
  0xf0   : > { %v7896_v25 = vpop.f32.mrf.mxu1  ;;  %1042 = vmatpush.msrb.mxu3 %v1015_v37  ;;  %v1497_v37 = vld [vmem:[#allocation6 + $0x2b0] sm:$0xff] }
  0xf2   : > { %528 = vmatmul.f32.gmra.mxu0 %v414_v22 }
  0xf3   : > { %899 = vmatmul.f32.vlgmr.msra.gmra.mxu3 %v763_v11  ;;  %668 = vmatmul.f32.gmra.mxu1 %v357_v14  ;;  %v418_v11 = vld [vmem:[#allocation2 + $0xc6] sm:$0xff] }
  0xf4   : > { %866 = vmatmul.f32.gmra.mxu2 %v752_v28  ;;  %v361_v14 = vld [vmem:[#allocation2 + $0xc5] sm:$0xff] }
  0xf6   : > { %v7899_v23 = vpop.f32.mrf.mxu3 }
  0xf7   : > { %v7901_v26 = vpop.f32.mrf.mxu2  ;;  %v7903_v30 = vpop.f32.mrf.mxu0 }
  0xf8   : > { %v7905_v34 = vpop.f32.mrf.mxu1 }
  0xfa   : > { %531 = vmatmul.f32.gmra.mxu0 %v415_v31  ;;  %v1743_v31 = vld [vmem:[#allocation6 + $0x368] sm:$0xff] }
  0xfb   : > { %902 = vmatmul.f32.gmra.mxu3 %v764_v33  ;;  %671 = vmatmul.f32.gmra.mxu1 %v358_v35  ;;  %v756_v33 = vld [vmem:[#allocation2 + $0xc7] sm:$0xff] }
  0xfc   : > { %869 = vmatmul.f32.gmra.mxu2 %v753_v39  ;;  %v1742_v35 = vld [vmem:[#allocation6 + $0x360] sm:$0xff]  ;;  %v1741_v39 = vld [vmem:[#allocation6 + $0x358] sm:$0xff] }
  0xfd   : > { %1748 = vmatpush.msrb.mxu2 %v1743_v31  ;;  %v1013_v31 = vld [vmem:[#allocation6 + $0x180] sm:$0xff] }
  0xfe   : > { %v7908_v42 = vpop.f32.mrf.mxu3 }
  0xff   : > { %v7910_v45 = vpop.f32.mrf.mxu2  ;;  %v7912_v6 = vpop.f32.mrf.mxu0  ;;  %1749 = vmatpush.msrb.mxu2 %v1742_v35  ;;  %v758_v35 = vld [vmem:[#allocation2 + $0xd7] sm:$0xff] }
 0x100   : > { %v7914_v18 = vpop.f32.mrf.mxu1 }
 0x101   : > { %1750 = vmatpush.msrb.mxu2 %v1741_v39  ;;  %v1734_v39 = vld [vmem:[#allocation6 + $0x320] sm:$0xff] }
 0x102   : > { %534 = vmatmul.f32.gmra.mxu0 %v416_v47 }
 0x103   : > { %905 = vmatmul.f32.gmra.mxu3 %v765_v15  ;;  %674 = vmatmul.f32.gmra.mxu1 %v359_v50  ;;  %v419_v50 = vld [vmem:[#allocation2 + $0xce] sm:$0xff] }
 0x104   : > { %872 = vmatmul.f32.gmra.mxu2 %v754_v27 }
 0x105   : > { %1751 = vmatpush.msrb.mxu2 %v1740_v3  ;;  %v1984_v3 = vld [vmem:[#allocation6 + $0x3f8] sm:$0xff] }
 0x106   : > { %v7917_v53 = vpop.f32.mrf.mxu3 }
 0x107   : > { %v7919_v49 = vpop.f32.mrf.mxu2  ;;  %v7921_v54 = vpop.f32.mrf.mxu0  ;;  %1752 = vmatpush.msrb.mxu2 %v1739_v36  ;;  %v1732_v36 = vld [vmem:[#allocation6 + $0x310] sm:$0xff] }
 0x108   : > { %v7923_v58 = vpop.f32.mrf.mxu1 }
 0x10a   : > { %537 = vmatmul.f32.gmra.mxu0 %v417_v56  ;;  %v1014_v56 = vld [vmem:[#allocation6 + $0x188] sm:$0xff] }
 0x10b   : > { %908 = vmatmul.f32.gmra.mxu3 %v766_v57  ;;  %677 = vmatmul.f32.gmra.mxu1 %v360_v59  ;;  %v1738_v57 = vld [vmem:[#allocation6 + $0x340] sm:$0xff] }
 0x10c   : > { %875 = vmatmul.f32.gmra.mxu2 %v755_v63  ;;  %1043 = vmatpush.msrb.mxu3 %v1014_v56  ;;  %v1252_v59 = vld [vmem:[#allocation6 + $0x200] sm:$0xff] }
 0x10d   : > { %v1499_v63 = vld [vmem:[#allocation6 + $0x2c0] sm:$0xff]  ;;  %1753 = vmatpush.msrb.mxu2 %v1738_v57  ;;  %1283 = vmatpush.msrb.mxu0 %v1252_v59  ;;  %v421_v57 = vld [vmem:[#allocation2 + $0xde] sm:$0xff] }
 0x10e   : > { %v7926_v7 = vpop.f32.mrf.mxu3  ;;  %1514 = vmatpush.msrb.mxu1 %v1499_v63  ;;  %1044 = vmatpush.msrb.mxu3 %v1013_v31  ;;  %v770_v59 = vld [vmem:[#allocation2 + $0x137] sm:$0xff]  ;;  %v2223_v31 = vld [vmem:[#allocation6 + $0x478] sm:$0xff] }
 0x10f   : > { %v7928_v16 = vpop.f32.mrf.mxu2  ;;  %v7930_v22 = vpop.f32.mrf.mxu0  ;;  %1754 = vmatpush.msrb.mxu2 %v1737_v0  ;;  %v364_v0 = vld [vmem:[#allocation2 + $0xdd] sm:$0xff]  ;;  %2224 = vmatpush.msra.mxu0 %v2223_v31  ;;  %v761_v31 = vld [vmem:[#allocation2 + $0xef] sm:$0xff] }
 0x110   : > { %v7932_v28 = vpop.f32.mrf.mxu1  ;;  %1515 = vmatpush.msrb.mxu1 %v1498_v10  ;;  %1985 = vmatpush.msra.mxu3 %v1984_v3  ;;  %v1731_v10 = vld [vmem:[#allocation6 + $0x308] sm:$0xff]  ;;  %v771_v3 = vld [vmem:[#allocation2 + $0x13f] sm:$0xff] }
 0x111   : > { %1755 = vmatpush.msrb.mxu2 %v1736_v13  ;;  %v759_v13 = vld [vmem:[#allocation2 + $0xdf] sm:$0xff] }
 0x112   : > { %540 = vmatmul.f32.gmra.mxu0 %v418_v11  ;;  %1516 = vmatpush.msrb.mxu1 %v1497_v37 }
 0x113   : > { %911 = vmatmul.f32.gmra.mxu3 %v767_v17  ;;  %680 = vmatmul.f32.gmra.mxu1 %v361_v14  ;;  %v420_v14 = vld [vmem:[#allocation2 + $0xd6] sm:$0xff] }
 0x114   : > { %878 = vmatmul.f32.gmra.mxu2 %v756_v33  ;;  %v769_v17 = vld [vmem:[#allocation2 + $0x12f] sm:$0xff]  ;;  %1517 = vmatpush.msrb.mxu1 %v1496_v44  ;;  %v422_v44 = vld [vmem:[#allocation2 + $0xe6] sm:$0xff] }
 0x115   : > { %v1735_v33 = vld [vmem:[#allocation6 + $0x328] sm:$0xff] }
 0x116   : > { %v7934_v40 = vpop.f32.mrf.mxu3  ;;  %1756 = vmatpush.msrb.mxu2 %v1735_v33 }
 0x117   : > { %v7937_v47 = vpop.f32.mrf.mxu2  ;;  %v7939_v15 = vpop.f32.mrf.mxu0 }
 0x118   : > { %v7941_v27 = vpop.f32.mrf.mxu1  ;;  %1757 = vmatpush.msrb.mxu2 %v1734_v39 }
 0x11a   : > { %543 = vmatmul.f32.gmra.mxu0 %v419_v50  ;;  %v1733_v50 = vld [vmem:[#allocation6 + $0x318] sm:$0xff] }
 0x11b   : > { %914 = vmatmul.f32.gmra.mxu3 %v768_v24  ;;  %683 = vmatmul.f32.gmra.mxu1 %v362_v32  ;;  %v1495_v32 = vld [vmem:[#allocation6 + $0x2a0] sm:$0xff] }
 0x11c   : > { %881 = vmatmul.f32.gmra.mxu2 %v757_v52  ;;  %1518 = vmatpush.msrb.mxu1 %v1495_v32  ;;  %v365_v32 = vld [vmem:[#allocation2 + $0xe5] sm:$0xff] }
 0x11d   : > { %1758 = vmatpush.msrb.mxu2 %v1733_v50 }
 0x11e   : > { %v7943_v4 = vpop.f32.mrf.mxu3 }
 0x11f   : > { %v7945_v5 = vpop.f32.mrf.mxu2  ;;  %v7947_v11 = vpop.f32.mrf.mxu0  ;;  %1759 = vmatpush.msrb.mxu2 %v1732_v36  ;;  %v760_v36 = vld [vmem:[#allocation2 + $0xe7] sm:$0xff] }
 0x120   : > { %10960 = vst [vmem:[#allocation12_spill] sm:$0xff] %v7947_v11  ;;  %v7949_v20 = vpop.f32.mrf.mxu1  ;;  %v1216_v11 = vld [vmem:[#allocation2 + $0x48] sm:$0xff] }
 0x121   : > { %10961 = vst [vmem:[#allocation13_spill] sm:$0xff] %v7949_v20  ;;  %1760 = vmatpush.msrb.mxu2 %v1731_v10  ;;  %v2220_v20 = vld [vmem:[#allocation6 + $0x460] sm:$0xff] }
 0x122   : > { %546 = vmatmul.f32.gmra.mxu0 %v420_v14  ;;  %v1494_v14 = vld [vmem:[#allocation6 + $0x298] sm:$0xff] }
 0x123   : > { %917 = vmatmul.f32.gmra.mxu3 %v769_v17  ;;  %686 = vmatmul.f32.gmra.mxu1 %v363_v29  ;;  %v1730_v17 = vld [vmem:[#allocation6 + $0x300] sm:$0xff]  ;;  %v1493_v29 = vld [vmem:[#allocation6 + $0x290] sm:$0xff] }
 0x124   : > { %884 = vmatmul.f32.gmra.mxu2 %v758_v35  ;;  %1519 = vmatpush.msrb.mxu1 %v1494_v14  ;;  %v1492_v35 = vld [vmem:[#allocation6 + $0x288] sm:$0xff]  ;;  %v772_v14 = vld [vmem:[#allocation2 + $0x147] sm:$0xff] }
 0x125   : > { %1761 = vmatpush.msrb.mxu2 %v1730_v17 }
 0x126   : > { %v7951_v24 = vpop.f32.mrf.mxu3  ;;  %1520 = vmatpush.msrb.mxu1 %v1493_v29  ;;  %v366_v29 = vld [vmem:[#allocation2 + $0xed] sm:$0xff] }
 0x127   : > { %v7953_v52 = vpop.f32.mrf.mxu2  ;;  %v7955_v56 = vpop.f32.mrf.mxu0 }
 0x128   : > { %10962 = vst [vmem:[#allocation14_spill] sm:$0xff] %v7953_v52  ;;  %v7957_v63 = vpop.f32.mrf.mxu1  ;;  %1521 = vmatpush.msrb.mxu1 %v1492_v35  ;;  %v1983_v35 = vld [vmem:[#allocation6 + $0x3f0] sm:$0xff]  ;;  %v1692_v52 = vld [vmem:[#allocation2 + $0x49] sm:$0xff] }
 0x129   : > { %10963 = vst [vmem:[#allocation15_spill] sm:$0xff] %v7955_v56  ;;  %1986 = vmatpush.msra.mxu3 %v1983_v35  ;;  %v1210_v35 = vld [vmem:[#allocation2 + $0x18] sm:$0xff]  ;;  %v1981_v56 = vld [vmem:[#allocation6 + $0x3e0] sm:$0xff] }
 0x12a   : > { %10964 = vst [vmem:[#allocation16_spill] sm:$0xff] %v7957_v63  ;;  %549 = vmatmul.f32.gmra.mxu0 %v421_v57  ;;  %v1491_v57 = vld [vmem:[#allocation6 + $0x280] sm:$0xff]  ;;  %v1690_v63 = vld [vmem:[#allocation2 + $0x39] sm:$0xff] }
 0x12b   : > { %920 = vmatmul.f32.gmra.mxu3 %v770_v59  ;;  %689 = vmatmul.f32.gmra.mxu1 %v364_v0 }
 0x12c   : > { %887 = vmatmul.f32.gmra.mxu2 %v759_v13  ;;  %1522 = vmatpush.msrb.mxu1 %v1491_v57  ;;  %v423_v13 = vld [vmem:[#allocation2 + $0xee] sm:$0xff]  ;;  %v971_v57 = vld [vmem:[#allocation2 + $0x17] sm:$0xff] }
 0x12e   : > { %v7959_v33 = vpop.f32.mrf.mxu3 }
 0x12f   : > { %v7961_v37 = vpop.f32.mrf.mxu2  ;;  %v7963_v39 = vpop.f32.mrf.mxu0 }
 0x130   : > { %10965 = vst [vmem:[#allocation17_spill] sm:$0xff] %v7961_v37  ;;  %v7965_v50 = vpop.f32.mrf.mxu1 }
 0x131   : > { %10966 = vst [vmem:[#allocation18_spill] sm:$0xff] %v7963_v39  ;;  %v1450_v39 = vld [vmem:[#allocation2 + $0x21] sm:$0xff] }
 0x132   : > { %10967 = vst [vmem:[#allocation19_spill] sm:$0xff] %v7965_v50  ;;  %552 = vmatmul.f32.gmra.mxu0 %v422_v44  ;;  %v2222_v50 = vld [vmem:[#allocation6 + $0x470] sm:$0xff] }
 0x133   : > { %923 = vmatmul.f32.gmra.mxu3 %v771_v3  ;;  %692 = vmatmul.f32.gmra.mxu1 %v365_v32 }
 0x134   : > { %890 = vmatmul.f32.gmra.mxu2 %v760_v36  ;;  %v424_v36 = vld [vmem:[#allocation2 + $0xf6] sm:$0xff]  ;;  %2225 = vmatpush.msra.mxu0 %v2222_v50 }
 0x136   : > { %v7967_v59 = vpop.f32.mrf.mxu3 }
 0x137   : > { %v7969_v0 = vpop.f32.mrf.mxu2  ;;  %v7971_v10 = vpop.f32.mrf.mxu0 }
 0x138   : > { %10968 = vst [vmem:[#allocation20_spill] sm:$0xff] %v7969_v0  ;;  %v7973_v17 = vpop.f32.mrf.mxu1  ;;  %v367_v0 = vld [vmem:[#allocation2 + $0xf5] sm:$0xff] }
 0x139   : > { %10969 = vst [vmem:[#allocation21_spill] sm:$0xff] %v7971_v10 }
 0x13a   : > { %10970 = vst [vmem:[#allocation22_spill] sm:$0xff] %v7973_v17  ;;  %555 = vmatmul.f32.gmra.mxu0 %v423_v13  ;;  %v7983_v17 = vld [vmem:[#allocation2 + $0xf7] sm:$0xff] }
 0x13b   : > { %926 = vmatmul.f32.gmra.mxu3 %v772_v14  ;;  %695 = vmatmul.f32.gmra.mxu1 %v366_v29  ;;  %10974 = vst [vmem:[#allocation26_spill] sm:$0xff] %v7983_v17 }
 0x13c   : > { %893 = vmatmul.f32.gmra.mxu2 %v761_v31  ;;  %v972_v31 = vld [vmem:[#allocation2 + $0x1f] sm:$0xff] }
 0x13e   : > { %v7975_v44 = vpop.f32.mrf.mxu3 }
 0x13f   : > { %v7977_v3 = vpop.f32.mrf.mxu2  ;;  %v7979_v32 = vpop.f32.mrf.mxu0 }
 0x140   : > { %10971 = vst [vmem:[#allocation23_spill] sm:$0xff] %v7977_v3  ;;  %v7981_v10 = vpop.f32.mrf.mxu1  ;;  %v1688_v3 = vld [vmem:[#allocation2 + $0x29] sm:$0xff] }
 0x141   : > { %10972 = vst [vmem:[#allocation24_spill] sm:$0xff] %v7979_v32 }
 0x142   : > { %10973 = vst [vmem:[#allocation25_spill] sm:$0xff] %v7981_v10  ;;  %558 = vmatmul.f32.gmra.mxu0 %v424_v36  ;;  %v1449_v10 = vld [vmem:[#allocation2 + $0x19] sm:$0xff] }
 0x143   : > { %1045 = vmatmul.f32.vlgmr.msrb.gmra.mxu3 %v971_v57  ;;  %698 = vmatmul.f32.gmra.mxu1 %v367_v0  ;;  %v1982_v0 = vld [vmem:[#allocation6 + $0x3e8] sm:$0xff] }
 0x144   : > { %896 = vmatmul.f32.gmra.mxu2 %v7983_v17  ;;  %1987 = vmatpush.msra.mxu3 %v1982_v0 }
 0x146   : > { %v7986_v13 = vpop.f32.mrf.mxu3  ;;  %1988 = vmatpush.msra.mxu3 %v1981_v56 }
 0x147   : > { %v7988_v14 = vpop.f32.mrf.mxu2  ;;  %v7990_v29 = vpop.f32.mrf.mxu0 }
 0x148   : > { %10975 = vst [vmem:[#allocation27_spill] sm:$0xff] %v7988_v14  ;;  %v7992_v32 = vpop.f32.mrf.mxu1  ;;  %v973_v14 = vld [vmem:[#allocation2 + $0x27] sm:$0xff] }
 0x149   : > { %10976 = vst [vmem:[#allocation28_spill] sm:$0xff] %v7990_v29  ;;  %v1211_v29 = vld [vmem:[#allocation2 + $0x20] sm:$0xff] }
 0x14a   : > { %10977 = vst [vmem:[#allocation29_spill] sm:$0xff] %v7992_v32  ;;  %1284 = vmatmul.f32.vlgmr.msrb.gmra.mxu0 %v1210_v35  ;;  %v1689_v32 = vld [vmem:[#allocation2 + $0x31] sm:$0xff] }
 0x14b   : > { %1048 = vmatmul.f32.gmra.mxu3 %v972_v31  ;;  %1523 = vmatmul.f32.vlgmr.msrb.gmra.mxu1 %v1449_v10  ;;  %v2221_v10 = vld [vmem:[#allocation6 + $0x468] sm:$0xff] }
 0x14c   : > { %1762 = vmatmul.f32.vlgmr.msrb.gmra.mxu2 %v1688_v3  ;;  %2226 = vmatpush.msra.mxu0 %v2221_v10  ;;  %v975_v10 = vld [vmem:[#allocation2 + $0x37] sm:$0xff] }
 0x14e   : > { %v7994_v50 = vpop.f32.mrf.mxu3  ;;  %2227 = vmatpush.msra.mxu0 %v2220_v20  ;;  %v1980_v20 = vld [vmem:[#allocation6 + $0x3d8] sm:$0xff] }
 0x14f   : > { %v7996_v36 = vpop.f32.mrf.mxu2  ;;  %v7998_v57 = vpop.f32.mrf.mxu0  ;;  %1989 = vmatpush.msra.mxu3 %v1980_v20 }
 0x150   : > { %10978 = vst [vmem:[#allocation30_spill] sm:$0xff] %v7996_v36  ;;  %v8000_v17 = vpop.f32.mrf.mxu1  ;;  %v974_v36 = vld [vmem:[#allocation2 + $0x2f] sm:$0xff] }
 0x151   : > { %10979 = vst [vmem:[#allocation31_spill] sm:$0xff] %v7998_v57  ;;  %v1212_v57 = vld [vmem:[#allocation2 + $0x28] sm:$0xff] }
 0x152   : > { %10980 = vst [vmem:[#allocation32_spill] sm:$0xff] %v8000_v17  ;;  %1287 = vmatmul.f32.gmra.mxu0 %v1211_v29  ;;  %v1213_v17 = vld [vmem:[#allocation2 + $0x30] sm:$0xff] }
 0x153   : > { %1051 = vmatmul.f32.gmra.mxu3 %v973_v14  ;;  %1526 = vmatmul.f32.gmra.mxu1 %v1450_v39 }
 0x154   : > { %1765 = vmatmul.f32.gmra.mxu2 %v1689_v32 }
 0x156   : > { %v8002_v31 = vpop.f32.mrf.mxu3 }
 0x157   : > { %v8004_v35 = vpop.f32.mrf.mxu2  ;;  %v8006_v0 = vpop.f32.mrf.mxu0 }
 0x158   : > { %10981 = vst [vmem:[#allocation33_spill] sm:$0xff] %v8004_v35  ;;  %v8008_v37 = vpop.f32.mrf.mxu1 }
 0x159   : > { %10982 = vst [vmem:[#allocation34_spill] sm:$0xff] %v8006_v0  ;;  %v1691_v0 = vld [vmem:[#allocation2 + $0x41] sm:$0xff] }
 0x15a   : > { %10983 = vst [vmem:[#allocation35_spill] sm:$0xff] %v8008_v37  ;;  %1290 = vmatmul.f32.gmra.mxu0 %v1212_v57  ;;  %v1214_v37 = vld [vmem:[#allocation2 + $0x38] sm:$0xff] }
 0x15b   : > { %1054 = vmatmul.f32.gmra.mxu3 %v974_v36  ;;  %1529 = vmatmul.f32.gmra.mxu1 %v1688_v3 }
 0x15c   : > { %1768 = vmatmul.f32.gmra.mxu2 %v1690_v63 }
 0x15e   : > { %v8010_v14 = vpop.f32.mrf.mxu3 }
 0x15f   : > { %v8012_v39 = vpop.f32.mrf.mxu2  ;;  %v8014_v29 = vpop.f32.mrf.mxu0 }
 0x160   : > { %10984 = vst [vmem:[#allocation36_spill] sm:$0xff] %v8012_v39  ;;  %v8016_v35 = vpop.f32.mrf.mxu1  ;;  %v976_v39 = vld [vmem:[#allocation2 + $0x3f] sm:$0xff] }
 0x161   : > { %10985 = vst [vmem:[#allocation37_spill] sm:$0xff] %v8014_v29 }
 0x162   : > { %10986 = vst [vmem:[#allocation38_spill] sm:$0xff] %v8016_v35  ;;  %1293 = vmatmul.f32.gmra.mxu0 %v1213_v17  ;;  %v1693_v35 = vld [vmem:[#allocation2 + $0x51] sm:$0xff] }
 0x163   : > { %1057 = vmatmul.f32.gmra.mxu3 %v975_v10  ;;  %1532 = vmatmul.f32.gmra.mxu1 %v1689_v32  ;;  %v977_v10 = vld [vmem:[#allocation2 + $0x47] sm:$0xff] }
 0x164   : > { %1771 = vmatmul.f32.gmra.mxu2 %v1691_v0 }
 0x166   : > { %v8018_v36 = vpop.f32.mrf.mxu3 }
 0x167   : > { %v8020_v3 = vpop.f32.mrf.mxu2  ;;  %v8022_v57 = vpop.f32.mrf.mxu0 }
 0x168   : > { %10987 = vst [vmem:[#allocation39_spill] sm:$0xff] %v8020_v3  ;;  %v8024_v29 = vpop.f32.mrf.mxu1  ;;  %v1215_v3 = vld [vmem:[#allocation2 + $0x40] sm:$0xff] }
 0x169   : > { %10988 = vst [vmem:[#allocation40_spill] sm:$0xff] %v8022_v57 }
 0x16a   : > { %10989 = vst [vmem:[#allocation41_spill] sm:$0xff] %v8024_v29  ;;  %1296 = vmatmul.f32.gmra.mxu0 %v1214_v37  ;;  %v703_v37 = vadd.f32 %v7951_v24, %v7863_v9  ;;  %v978_v29 = vld [vmem:[#allocation2 + $0x4f] sm:$0xff]  ;;  %v706_v9 = vadd.f32 %v7959_v33, %v7872_v51  ;;  %v2219_v24 = vld [vmem:[#allocation6 + $0x458] sm:$0xff]  ;;  %v709_v51 = vadd.f32 %v7967_v59, %v7881_v60 }
 0x16b   : > { %1060 = vmatmul.f32.gmra.mxu3 %v976_v39  ;;  %1535 = vmatmul.f32.gmra.mxu1 %v1690_v63  ;;  %v712_v60 = vadd.f32 %v7975_v44, %v7890_v2  ;;  %v715_v2 = vadd.f32 %v7986_v13, %v7899_v23 }
 0x16c   : > { %1774 = vmatmul.f32.gmra.mxu2 %v1692_v52  ;;  %2228 = vmatpush.msra.mxu0 %v2219_v24  ;;  %v980_v24 = vld [vmem:[#allocation2 + $0x5f] sm:$0xff] }
 0x16e   : > { %v8026_v17 = vpop.f32.mrf.mxu3 }
 0x16f   : > { %v8028_v56 = vpop.f32.mrf.mxu2  ;;  %v8030_v32 = vpop.f32.mrf.mxu0 }
 0x170   : > { %10990 = vst [vmem:[#allocation42_spill] sm:$0xff] %v8028_v56  ;;  %v8032_v57 = vpop.f32.mrf.mxu1 }
 0x171   : > { %10991 = vst [vmem:[#allocation43_spill] sm:$0xff] %v8030_v32 }
 0x172   : > { %10992 = vst [vmem:[#allocation44_spill] sm:$0xff] %v8032_v57  ;;  %1299 = vmatmul.f32.gmra.mxu0 %v1215_v3 }
 0x173   : > { %1063 = vmatmul.f32.gmra.mxu3 %v977_v10  ;;  %1538 = vmatmul.f32.gmra.mxu1 %v1691_v0  ;;  %v1694_v10 = vld [vmem:[#allocation2 + $0x59] sm:$0xff] }
 0x174   : > { %1777 = vmatmul.f32.gmra.mxu2 %v1693_v35 }
 0x176   : > { %v900_v63 = vpop.f32.mrf.mxu3 }
 0x177   : > { %v8036_v39 = vadd.f32 %v900_v63, %v703_v37  ;;  %v8038_v56 = vpop.f32.mrf.mxu2  ;;  %v8040_v32 = vpop.f32.mrf.mxu0  ;;  %v979_v63 = vld [vmem:[#allocation2 + $0x57] sm:$0xff] }
 0x178   : > { %v8042_v57 = vpop.f32.mrf.mxu1 }
 0x179   : > { %10993 = vst [vmem:[#allocation45_spill] sm:$0xff] %v8036_v39  ;;  %v1217_v39 = vld [vmem:[#allocation2 + $0x50] sm:$0xff] }
 0x17a   : > { %10994 = vst [vmem:[#allocation46_spill] sm:$0xff] %v8042_v57  ;;  %1302 = vmatmul.f32.gmra.mxu0 %v1216_v11 }
 0x17b   : > { %1066 = vmatmul.f32.gmra.mxu3 %v978_v29  ;;  %1541 = vmatmul.f32.gmra.mxu1 %v1692_v52  ;;  %v1695_v29 = vld [vmem:[#allocation2 + $0x61] sm:$0xff] }
 0x17c   : > { %1780 = vmatmul.f32.gmra.mxu2 %v1694_v10 }
 0x17e   : > { %v903_v0 = vpop.f32.mrf.mxu3 }
 0x17f   : > { %v8046_v3 = vadd.f32 %v903_v0, %v706_v9  ;;  %v8048_v37 = vpop.f32.mrf.mxu2  ;;  %v8050_v20 = vpop.f32.mrf.mxu0  ;;  %v1218_v0 = vld [vmem:[#allocation2 + $0x58] sm:$0xff] }
 0x180   : > { %10996 = vst [vmem:[#allocation48_spill] sm:$0xff] %v8050_v20  ;;  %v8052_v57 = vpop.f32.mrf.mxu1  ;;  %v1979_v20 = vld [vmem:[#allocation6 + $0x3d0] sm:$0xff] }
 0x181   : > { %10995 = vst [vmem:[#allocation47_spill] sm:$0xff] %v8046_v3  ;;  %1990 = vmatpush.msra.mxu3 %v1979_v20 }
 0x182   : > { %10997 = vst [vmem:[#allocation49_spill] sm:$0xff] %v8052_v57  ;;  %1305 = vmatmul.f32.gmra.mxu0 %v1217_v39  ;;  %v1696_v57 = vld [vmem:[#allocation2 + $0x69] sm:$0xff] }
 0x183   : > { %1069 = vmatmul.f32.gmra.mxu3 %v979_v63  ;;  %1544 = vmatmul.f32.gmra.mxu1 %v1693_v35 }
 0x184   : > { %1783 = vmatmul.f32.gmra.mxu2 %v1695_v29 }
 0x186   : > { %v906_v11 = vpop.f32.mrf.mxu3 }
 0x187   : > { %v8056_v52 = vadd.f32 %v906_v11, %v709_v51  ;;  %v8058_v33 = vpop.f32.mrf.mxu2  ;;  %v8060_v9 = vpop.f32.mrf.mxu0  ;;  %v981_v51 = vld [vmem:[#allocation2 + $0x67] sm:$0xff] }
 0x188   : > { %v8062_v3 = vpop.f32.mrf.mxu1  ;;  %v1219_v11 = vld [vmem:[#allocation2 + $0x60] sm:$0xff] }
 0x189   : > { %10998 = vst [vmem:[#allocation50_spill] sm:$0xff] %v8056_v52 }
 0x18a   : > { %10999 = vst [vmem:[#allocation51_spill] sm:$0xff] %v8062_v3  ;;  %1308 = vmatmul.f32.gmra.mxu0 %v1218_v0  ;;  %v1697_v3 = vld [vmem:[#allocation2 + $0x71] sm:$0xff] }
 0x18b   : > { %1072 = vmatmul.f32.gmra.mxu3 %v980_v24  ;;  %1547 = vmatmul.f32.gmra.mxu1 %v1694_v10  ;;  %v2218_v24 = vld [vmem:[#allocation6 + $0x450] sm:$0xff] }
 0x18c   : > { %1786 = vmatmul.f32.gmra.mxu2 %v1696_v57  ;;  %2229 = vmatpush.msra.mxu0 %v2218_v24  ;;  %v983_v24 = vld [vmem:[#allocation2 + $0x77] sm:$0xff] }
 0x18e   : > { %v909_v59 = vpop.f32.mrf.mxu3 }
 0x18f   : > { %v8066_v35 = vadd.f32 %v909_v59, %v712_v60  ;;  %v8068_v39 = vpop.f32.mrf.mxu2  ;;  %v8070_v63 = vpop.f32.mrf.mxu0  ;;  %v982_v60 = vld [vmem:[#allocation2 + $0x6f] sm:$0xff] }
 0x190   : > { %v8072_v52 = vpop.f32.mrf.mxu1  ;;  %v1220_v59 = vld [vmem:[#allocation2 + $0x68] sm:$0xff] }
 0x191   : > { %11000 = vst [vmem:[#allocation52_spill] sm:$0xff] %v8066_v35 }
 0x192   : > { %11001 = vst [vmem:[#allocation53_spill] sm:$0xff] %v8072_v52  ;;  %1311 = vmatmul.f32.gmra.mxu0 %v1219_v11  ;;  %v1698_v52 = vld [vmem:[#allocation2 + $0x79] sm:$0xff] }
 0x193   : > { %1075 = vmatmul.f32.gmra.mxu3 %v981_v51  ;;  %1550 = vmatmul.f32.gmra.mxu1 %v1695_v29  ;;  %v718_v29 = vadd.f32 %v7994_v50, %v7908_v42  ;;  %v721_v42 = vadd.f32 %v8002_v31, %v7917_v53  ;;  %v724_v53 = vadd.f32 %v8010_v14, %v7926_v7  ;;  %v1977_v7 = vld [vmem:[#allocation6 + $0x3c0] sm:$0xff] }
 0x194   : > { %1789 = vmatmul.f32.gmra.mxu2 %v1697_v3 }
 0x196   : > { %v912_v44 = vpop.f32.mrf.mxu3 }
 0x197   : > { %v8076_v10 = vadd.f32 %v912_v44, %v715_v2  ;;  %v8078_v20 = vpop.f32.mrf.mxu2  ;;  %v8080_v0 = vpop.f32.mrf.mxu0  ;;  %v1221_v2 = vld [vmem:[#allocation2 + $0x70] sm:$0xff] }
 0x198   : > { %v8082_v35 = vpop.f32.mrf.mxu1 }
 0x199   : > { %11002 = vst [vmem:[#allocation54_spill] sm:$0xff] %v8076_v10  ;;  %v1978_v10 = vld [vmem:[#allocation6 + $0x3c8] sm:$0xff] }
 0x19a   : > { %11003 = vst [vmem:[#allocation55_spill] sm:$0xff] %v8082_v35  ;;  %1314 = vmatmul.f32.gmra.mxu0 %v1220_v59  ;;  %v1699_v35 = vld [vmem:[#allocation2 + $0x81] sm:$0xff]  ;;  %1991 = vmatpush.msra.mxu3 %v1978_v10 }
 0x19b   : > { %1078 = vmatmul.f32.gmra.mxu3 %v982_v60  ;;  %1553 = vmatmul.f32.gmra.mxu1 %v1696_v57  ;;  %v2889_v10 = vld [vmem:[#allocation6 + $0x578] sm:$0xff] }
 0x19c   : > { %1792 = vmatmul.f32.gmra.mxu2 %v1698_v52  ;;  %2890 = vmatpush.msra.mxu1 %v2889_v10 }
 0x19d   : > { %1992 = vmatpush.msra.mxu3 %v1977_v7 }
 0x19e   : > { %v915_v23 = vpop.f32.mrf.mxu3 }
 0x19f   : > { %v8086_v13 = vadd.f32 %v915_v23, %v718_v29  ;;  %v8088_v51 = vpop.f32.mrf.mxu2  ;;  %v8090_v11 = vpop.f32.mrf.mxu0  ;;  %v984_v29 = vld [vmem:[#allocation2 + $0x7f] sm:$0xff] }
 0x1a0   : > { %v8092_v44 = vpop.f32.mrf.mxu1  ;;  %v1222_v23 = vld [vmem:[#allocation2 + $0x78] sm:$0xff] }
 0x1a1   : > { %11004 = vst [vmem:[#allocation56_spill] sm:$0xff] %v8086_v13 }
 0x1a2   : > { %11005 = vst [vmem:[#allocation57_spill] sm:$0xff] %v8092_v44  ;;  %1317 = vmatmul.f32.gmra.mxu0 %v1221_v2  ;;  %v2217_v44 = vld [vmem:[#allocation6 + $0x448] sm:$0xff] }
 0x1a3   : > { %1081 = vmatmul.f32.gmra.mxu3 %v983_v24  ;;  %1556 = vmatmul.f32.gmra.mxu1 %v1697_v3  ;;  %v1700_v24 = vld [vmem:[#allocation2 + $0x89] sm:$0xff] }
 0x1a4   : > { %1795 = vmatmul.f32.gmra.mxu2 %v1699_v35  ;;  %2230 = vmatpush.msra.mxu0 %v2217_v44  ;;  %v1701_v44 = vld [vmem:[#allocation2 + $0x91] sm:$0xff] }
 0x1a6   : > { %v918_v50 = vpop.f32.mrf.mxu3 }
 0x1a7   : > { %v8096_v57 = vadd.f32 %v918_v50, %v721_v42  ;;  %v8098_v60 = vpop.f32.mrf.mxu2  ;;  %v8100_v59 = vpop.f32.mrf.mxu0  ;;  %v985_v50 = vld [vmem:[#allocation2 + $0x87] sm:$0xff] }
 0x1a8   : > { %v8102_v13 = vpop.f32.mrf.mxu1 }
 0x1a9   : > { %11006 = vst [vmem:[#allocation58_spill] sm:$0xff] %v8096_v57  ;;  %v1223_v57 = vld [vmem:[#allocation2 + $0x80] sm:$0xff] }
 0x1aa   : > { %11007 = vst [vmem:[#allocation59_spill] sm:$0xff] %v8102_v13  ;;  %1320 = vmatmul.f32.gmra.mxu0 %v1222_v23 }
 0x1ab   : > { %1084 = vmatmul.f32.gmra.mxu3 %v984_v29  ;;  %1559 = vmatmul.f32.gmra.mxu1 %v1698_v52  ;;  %v727_v52 = vadd.f32 %v8018_v36, %v7934_v40  ;;  %v730_v40 = vadd.f32 %v8026_v17, %v7943_v4  ;;  %v2216_v36 = vld [vmem:[#allocation6 + $0x440] sm:$0xff]  ;;  %v610_v4 = vadd.f32 %v7860_v41, %v7858_v38 }
 0x1ac   : > { %1798 = vmatmul.f32.gmra.mxu2 %v1700_v24  ;;  %2231 = vmatpush.msra.mxu0 %v2216_v36  ;;  %v613_v38 = vadd.f32 %v7869_v21, %v7867_v12  ;;  %v616_v12 = vadd.f32 %v7878_v55, %v7876_v46  ;;  %v1706_v46 = vld [vmem:[#allocation2 + $0xb9] sm:$0xff]  ;;  %v619_v55 = vadd.f32 %v7887_v1, %v7885_v62  ;;  %v1707_v62 = vld [vmem:[#allocation2 + $0xc1] sm:$0xff] }
 0x1ad   : > { %v930_v17 = vadd.f32 %v7865_v48, %v610_v4  ;;  %v622_v1 = vadd.f32 %v7896_v25, %v7894_v8  ;;  %v2886_v8 = vld [vmem:[#allocation6 + $0x560] sm:$0xff] }
 0x1ae   : > { %v921_v31 = vpop.f32.mrf.mxu3  ;;  %v931_v48 = vadd.f32 %v7874_v43, %v613_v38  ;;  %v2887_v43 = vld [vmem:[#allocation6 + $0x568] sm:$0xff] }
 0x1af   : > { %v8106_v3 = vadd.f32 %v921_v31, %v724_v53  ;;  %v8108_v2 = vpop.f32.mrf.mxu2  ;;  %v8110_v42 = vpop.f32.mrf.mxu0  ;;  %v986_v53 = vld [vmem:[#allocation2 + $0x8f] sm:$0xff] }
 0x1b0   : > { %v8112_v13 = vpop.f32.mrf.mxu1  ;;  %v1224_v31 = vld [vmem:[#allocation2 + $0x88] sm:$0xff] }
 0x1b1   : > { %11008 = vst [vmem:[#allocation60_spill] sm:$0xff] %v8106_v3  ;;  %v990_v38 = vld [vmem:[#allocation2 + $0xaf] sm:$0xff] }
 0x1b2   : > { %11009 = vst [vmem:[#allocation61_spill] sm:$0xff] %v8112_v13  ;;  %1323 = vmatmul.f32.gmra.mxu0 %v1223_v57  ;;  %v1705_v13 = vld [vmem:[#allocation2 + $0xb1] sm:$0xff]  ;;  %v1708_v25 = vld [vmem:[#allocation2 + $0xc9] sm:$0xff] }
 0x1b3   : > { %1087 = vmatmul.f32.gmra.mxu3 %v985_v50  ;;  %1562 = vmatmul.f32.gmra.mxu1 %v1699_v35  ;;  %v1702_v50 = vld [vmem:[#allocation2 + $0x99] sm:$0xff] }
 0x1b4   : > { %1801 = vmatmul.f32.gmra.mxu2 %v1701_v44 }
 0x1b6   : > { %v924_v14 = vpop.f32.mrf.mxu3 }
 0x1b7   : > { %v8116_v29 = vadd.f32 %v924_v14, %v727_v52  ;;  %v8118_v23 = vpop.f32.mrf.mxu2  ;;  %v8120_v10 = vpop.f32.mrf.mxu0  ;;  %v987_v14 = vld [vmem:[#allocation2 + $0x97] sm:$0xff] }
 0x1b8   : > { %11011 = vst [vmem:[#allocation63_spill] sm:$0xff] %v8118_v23  ;;  %v8122_v3 = vpop.f32.mrf.mxu1  ;;  %v2215_v23 = vld [vmem:[#allocation6 + $0x438] sm:$0xff] }
 0x1b9   : > { %11010 = vst [vmem:[#allocation62_spill] sm:$0xff] %v8116_v29  ;;  %v1225_v29 = vld [vmem:[#allocation2 + $0x90] sm:$0xff]  ;;  %2232 = vmatpush.msra.mxu0 %v2215_v23 }
 0x1ba   : > { %11012 = vst [vmem:[#allocation64_spill] sm:$0xff] %v8120_v10  ;;  %1326 = vmatmul.f32.gmra.mxu0 %v1224_v31  ;;  %v1703_v31 = vld [vmem:[#allocation2 + $0xa1] sm:$0xff]  ;;  %v1704_v10 = vld [vmem:[#allocation2 + $0xa9] sm:$0xff] }
 0x1bb   : > { %11013 = vst [vmem:[#allocation65_spill] sm:$0xff] %v8122_v3  ;;  %1090 = vmatmul.f32.gmra.mxu3 %v986_v53  ;;  %1565 = vmatmul.f32.gmra.mxu1 %v1700_v24  ;;  %v2888_v53 = vld [vmem:[#allocation6 + $0x570] sm:$0xff] }
 0x1bc   : > { %1804 = vmatmul.f32.gmra.mxu2 %v1702_v50  ;;  %2891 = vmatpush.msra.mxu1 %v2888_v53 }
 0x1be   : > { %v927_v35 = vpop.f32.mrf.mxu3  ;;  %2892 = vmatpush.msra.mxu1 %v2887_v43  ;;  %v2214_v43 = vld [vmem:[#allocation6 + $0x430] sm:$0xff] }
 0x1bf   : > { %v8126_v57 = vadd.f32 %v927_v35, %v730_v40  ;;  %v8128_v52 = vpop.f32.mrf.mxu2  ;;  %v8130_v7 = vpop.f32.mrf.mxu0  ;;  %2233 = vmatpush.msra.mxu0 %v2214_v43 }
 0x1c0   : > { %11015 = vst [vmem:[#allocation67_spill] sm:$0xff] %v8128_v52  ;;  %v8132_v3 = vpop.f32.mrf.mxu1  ;;  %v1976_v52 = vld [vmem:[#allocation6 + $0x3b8] sm:$0xff]  ;;  %2893 = vmatpush.msra.mxu1 %v2886_v8 }
 0x1c1   : > { %11014 = vst [vmem:[#allocation66_spill] sm:$0xff] %v8126_v57  ;;  %v988_v57 = vld [vmem:[#allocation2 + $0x9f] sm:$0xff]  ;;  %1993 = vmatpush.msra.mxu3 %v1976_v52 }
 0x1c2   : > { %11016 = vst [vmem:[#allocation68_spill] sm:$0xff] %v8130_v7  ;;  %1329 = vmatmul.f32.gmra.mxu0 %v1225_v29  ;;  %v1226_v7 = vld [vmem:[#allocation2 + $0x98] sm:$0xff] }
 0x1c3   : > { %11017 = vst [vmem:[#allocation69_spill] sm:$0xff] %v8132_v3  ;;  %1093 = vmatmul.f32.gmra.mxu3 %v987_v14  ;;  %1568 = vmatmul.f32.gmra.mxu1 %v1701_v44 }
 0x1c4   : > { %1807 = vmatmul.f32.gmra.mxu2 %v1703_v31 }
 0x1c6   : > { %v1046_v24 = vpop.f32.mrf.mxu3 }
 0x1c7   : > { %v1169_v40 = vadd.f32 %v1046_v24, %v930_v17  ;;  %v8137_v36 = vpop.f32.mrf.mxu2  ;;  %v1285_v35 = vpop.f32.mrf.mxu0  ;;  %v989_v17 = vld [vmem:[#allocation2 + $0xa7] sm:$0xff] }
 0x1c8   : > { %11018 = vst [vmem:[#allocation70_spill] sm:$0xff] %v8137_v36  ;;  %v1524_v3 = vpop.f32.mrf.mxu1  ;;  %v1227_v24 = vld [vmem:[#allocation2 + $0xa0] sm:$0xff] }
 0x1c9   : > { %v1408_v41 = vadd.f32 %v1285_v35, %v1169_v40 }
 0x1ca   : > { %1332 = vmatmul.f32.gmra.mxu0 %v1226_v7 }
 0x1cb   : > { %1096 = vmatmul.f32.gmra.mxu3 %v988_v57  ;;  %1571 = vmatmul.f32.gmra.mxu1 %v1702_v50  ;;  %v1647_v29 = vadd.f32 %v1524_v3, %v1408_v41  ;;  %v932_v3 = vadd.f32 %v7883_v61, %v616_v12  ;;  %v1228_v41 = vld [vmem:[#allocation2 + $0xa8] sm:$0xff]  ;;  %v933_v61 = vadd.f32 %v7892_v19, %v619_v55 }
 0x1cc   : > { %1810 = vmatmul.f32.gmra.mxu2 %v1704_v10  ;;  %v934_v19 = vadd.f32 %v7901_v26, %v622_v1 }
 0x1ce   : > { %v1049_v44 = vpop.f32.mrf.mxu3 }
 0x1cf   : > { %v1170_v14 = vadd.f32 %v1049_v44, %v931_v48  ;;  %v1763_v53 = vpop.f32.mrf.mxu2  ;;  %v1288_v4 = vpop.f32.mrf.mxu0 }
 0x1d0   : > { %v8142_v36 = vadd.f32 %v1763_v53, %v1647_v29  ;;  %v1527_v52 = vpop.f32.mrf.mxu1 }
 0x1d1   : > { %v1409_v21 = vadd.f32 %v1288_v4, %v1170_v14 }
 0x1d2   : > { %1335 = vmatmul.f32.gmra.mxu0 %v1227_v24  ;;  %v991_v24 = vld [vmem:[#allocation2 + $0xb7] sm:$0xff] }
 0x1d3   : > { %1099 = vmatmul.f32.gmra.mxu3 %v989_v17  ;;  %1574 = vmatmul.f32.gmra.mxu1 %v1703_v31  ;;  %v1648_v57 = vadd.f32 %v1527_v52, %v1409_v21  ;;  %v1975_v31 = vld [vmem:[#allocation6 + $0x3b0] sm:$0xff]  ;;  %v1229_v52 = vld [vmem:[#allocation2 + $0xb0] sm:$0xff] }
 0x1d4   : > { %1813 = vmatmul.f32.gmra.mxu2 %v1705_v13  ;;  %1994 = vmatpush.msra.mxu3 %v1975_v31 }
 0x1d6   : > { %v1052_v50 = vpop.f32.mrf.mxu3 }
 0x1d7   : > { %v1171_v7 = vadd.f32 %v1052_v50, %v932_v3  ;;  %v1766_v40 = vpop.f32.mrf.mxu2  ;;  %v1291_v35 = vpop.f32.mrf.mxu0 }
 0x1d8   : > { %v8147_v23 = vadd.f32 %v1766_v40, %v1648_v57  ;;  %v1530_v48 = vpop.f32.mrf.mxu1 }
 0x1d9   : > { %v1410_v44 = vadd.f32 %v1291_v35, %v1171_v7  ;;  %v992_v35 = vld [vmem:[#allocation2 + $0xbf] sm:$0xff] }
 0x1da   : > { %1338 = vmatmul.f32.gmra.mxu0 %v1228_v41 }
 0x1db   : > { %1102 = vmatmul.f32.gmra.mxu3 %v990_v38  ;;  %1577 = vmatmul.f32.gmra.mxu1 %v1704_v10  ;;  %v1649_v14 = vadd.f32 %v1530_v48, %v1410_v44  ;;  %v1230_v38 = vld [vmem:[#allocation2 + $0xb8] sm:$0xff] }
 0x1dc   : > { %1816 = vmatmul.f32.gmra.mxu2 %v1706_v46 }
 0x1de   : > { %v1055_v29 = vpop.f32.mrf.mxu3 }
 0x1df   : > { %v1172_v53 = vadd.f32 %v1055_v29, %v933_v61  ;;  %v1769_v4 = vpop.f32.mrf.mxu2  ;;  %v1294_v17 = vpop.f32.mrf.mxu0 }
 0x1e0   : > { %v8152_v12 = vadd.f32 %v1769_v4, %v1649_v14  ;;  %v1533_v21 = vpop.f32.mrf.mxu1  ;;  %v1231_v4 = vld [vmem:[#allocation2 + $0xc0] sm:$0xff] }
 0x1e1   : > { %v1411_v10 = vadd.f32 %v1294_v17, %v1172_v53  ;;  %v993_v53 = vld [vmem:[#allocation2 + $0xc7] sm:$0xff] }
 0x1e2   : > { %1341 = vmatmul.f32.gmra.mxu0 %v1229_v52  ;;  %v1974_v52 = vld [vmem:[#allocation6 + $0x3a8] sm:$0xff] }
 0x1e3   : > { %1105 = vmatmul.f32.gmra.mxu3 %v991_v24  ;;  %1580 = vmatmul.f32.gmra.mxu1 %v1705_v13  ;;  %v1650_v50 = vadd.f32 %v1533_v21, %v1411_v10  ;;  %v625_v13 = vadd.f32 %v7905_v34, %v7903_v30  ;;  %v1709_v21 = vld [vmem:[#allocation2 + $0xd1] sm:$0xff]  ;;  %v628_v30 = vadd.f32 %v7914_v18, %v7912_v6 }
 0x1e4   : > { %1819 = vmatmul.f32.gmra.mxu2 %v1707_v62  ;;  %1995 = vmatpush.msra.mxu3 %v1974_v52  ;;  %v631_v6 = vadd.f32 %v7923_v58, %v7921_v54  ;;  %v1711_v54 = vld [vmem:[#allocation2 + $0xe1] sm:$0xff]  ;;  %v634_v58 = vadd.f32 %v7932_v28, %v7930_v22  ;;  %v1712_v22 = vld [vmem:[#allocation2 + $0xe9] sm:$0xff]  ;;  %v637_v28 = vadd.f32 %v7941_v27, %v7939_v15  ;;  %v2884_v15 = vld [vmem:[#allocation6 + $0x550] sm:$0xff] }
 0x1e5   : > { %v935_v55 = vadd.f32 %v7910_v45, %v625_v13  ;;  %v936_v45 = vadd.f32 %v7919_v49, %v628_v30  ;;  %v996_v30 = vld [vmem:[#allocation2 + $0xdf] sm:$0xff]  ;;  %v1713_v27 = vld [vmem:[#allocation2 + $0xf1] sm:$0xff] }
 0x1e6   : > { %v1058_v3 = vpop.f32.mrf.mxu3  ;;  %v937_v49 = vadd.f32 %v7928_v16, %v631_v6  ;;  %v938_v16 = vadd.f32 %v7937_v47, %v634_v58  ;;  %v939_v47 = vadd.f32 %v7945_v5, %v637_v28  ;;  %v1236_v58 = vld [vmem:[#allocation2 + $0xe8] sm:$0xff] }
 0x1e7   : > { %v1173_v57 = vadd.f32 %v1058_v3, %v934_v19  ;;  %v1772_v7 = vpop.f32.mrf.mxu2  ;;  %v1297_v40 = vpop.f32.mrf.mxu0  ;;  %v994_v3 = vld [vmem:[#allocation2 + $0xcf] sm:$0xff] }
 0x1e8   : > { %v8157_v41 = vadd.f32 %v1772_v7, %v1650_v50  ;;  %v1536_v48 = vpop.f32.mrf.mxu1  ;;  %v1232_v50 = vld [vmem:[#allocation2 + $0xc8] sm:$0xff] }
 0x1e9   : > { %v1412_v26 = vadd.f32 %v1297_v40, %v1173_v57  ;;  %v2213_v40 = vld [vmem:[#allocation6 + $0x428] sm:$0xff] }
 0x1ea   : > { %1344 = vmatmul.f32.gmra.mxu0 %v1230_v38 }
 0x1eb   : > { %1108 = vmatmul.f32.gmra.mxu3 %v992_v35  ;;  %1583 = vmatmul.f32.gmra.mxu1 %v1706_v46  ;;  %v1651_v61 = vadd.f32 %v1536_v48, %v1412_v26  ;;  %v1710_v35 = vld [vmem:[#allocation2 + $0xd9] sm:$0xff] }
 0x1ec   : > { %1822 = vmatmul.f32.gmra.mxu2 %v1708_v25  ;;  %2234 = vmatpush.msra.mxu0 %v2213_v40  ;;  %v1235_v40 = vld [vmem:[#allocation2 + $0xe0] sm:$0xff] }
 0x1ee   : > { %v1061_v44 = vpop.f32.mrf.mxu3 }
 0x1ef   : > { %v1174_v31 = vadd.f32 %v1061_v44, %v935_v55  ;;  %v1775_v29 = vpop.f32.mrf.mxu2  ;;  %v1300_v14 = vpop.f32.mrf.mxu0  ;;  %v995_v55 = vld [vmem:[#allocation2 + $0xd7] sm:$0xff] }
 0x1f0   : > { %v8162_v17 = vadd.f32 %v1775_v29, %v1651_v61  ;;  %v1539_v24 = vpop.f32.mrf.mxu1  ;;  %v1233_v44 = vld [vmem:[#allocation2 + $0xd0] sm:$0xff]  ;;  %v1973_v29 = vld [vmem:[#allocation6 + $0x3a0] sm:$0xff] }
 0x1f1   : > { %v1413_v34 = vadd.f32 %v1300_v14, %v1174_v31  ;;  %1996 = vmatpush.msra.mxu3 %v1973_v29  ;;  %v1972_v29 = vld [vmem:[#allocation6 + $0x398] sm:$0xff] }
 0x1f2   : > { %1347 = vmatmul.f32.gmra.mxu0 %v1231_v4 }
 0x1f3   : > { %1111 = vmatmul.f32.gmra.mxu3 %v993_v53  ;;  %1586 = vmatmul.f32.gmra.mxu1 %v1707_v62  ;;  %v1652_v1 = vadd.f32 %v1539_v24, %v1413_v34  ;;  %v2885_v62 = vld [vmem:[#allocation6 + $0x558] sm:$0xff]  ;;  %v1234_v34 = vld [vmem:[#allocation2 + $0xd8] sm:$0xff] }
 0x1f4   : > { %1825 = vmatmul.f32.gmra.mxu2 %v1709_v21  ;;  %2894 = vmatpush.msra.mxu1 %v2885_v62 }
 0x1f5   : > { %1997 = vmatpush.msra.mxu3 %v1972_v29  ;;  %v1716_v29 = vld [vmem:[#allocation2 + $0x109] sm:$0xff] }
 0x1f6   : > { %v1064_v46 = vpop.f32.mrf.mxu3  ;;  %2895 = vmatpush.msra.mxu1 %v2884_v15 }
 0x1f7   : > { %v1175_v10 = vadd.f32 %v1064_v46, %v936_v45  ;;  %v1778_v19 = vpop.f32.mrf.mxu2  ;;  %v1303_v43 = vpop.f32.mrf.mxu0 }
 0x1f8   : > { %v8167_v57 = vadd.f32 %v1778_v19, %v1652_v1  ;;  %v1542_v7 = vpop.f32.mrf.mxu1  ;;  %v2212_v1 = vld [vmem:[#allocation6 + $0x420] sm:$0xff] }
 0x1f9   : > { %v1414_v18 = vadd.f32 %v1303_v43, %v1175_v10  ;;  %2235 = vmatpush.msra.mxu0 %v2212_v1 }
 0x1fa   : > { %1350 = vmatmul.f32.gmra.mxu0 %v1232_v50 }
 0x1fb   : > { %1114 = vmatmul.f32.gmra.mxu3 %v994_v3  ;;  %1589 = vmatmul.f32.gmra.mxu1 %v1708_v25  ;;  %v1653_v48 = vadd.f32 %v1542_v7, %v1414_v18  ;;  %v997_v7 = vld [vmem:[#allocation2 + $0xe7] sm:$0xff] }
 0x1fc   : > { %1828 = vmatmul.f32.gmra.mxu2 %v1710_v35 }
 0x1fe   : > { %v1067_v38 = vpop.f32.mrf.mxu3 }
 0x1ff   : > { %v1176_v8 = vadd.f32 %v1067_v38, %v937_v49  ;;  %v1781_v13 = vpop.f32.mrf.mxu2  ;;  %v1306_v26 = vpop.f32.mrf.mxu0  ;;  %v11019_v49 = vld [vmem:[#allocation12_spill] sm:$0xff]  ;;  %v11021_v38 = vld [vmem:[#allocation14_spill] sm:$0xff] }
 0x200   : > { %v8172_v61 = vadd.f32 %v1781_v13, %v1653_v48  ;;  %v1545_v31 = vpop.f32.mrf.mxu1 }
 0x201   : > { %v1415_v25 = vadd.f32 %v1306_v26, %v1176_v8 }
 0x202   : > { %1353 = vmatmul.f32.gmra.mxu0 %v1233_v44 }
 0x203   : > { %1117 = vmatmul.f32.gmra.mxu3 %v995_v55  ;;  %1592 = vmatmul.f32.gmra.mxu1 %v1709_v21  ;;  %v1654_v53 = vadd.f32 %v1545_v31, %v1415_v25  ;;  %v998_v31 = vld [vmem:[#allocation2 + $0xef] sm:$0xff] }
 0x204   : > { %1831 = vmatmul.f32.gmra.mxu2 %v1711_v54 }
 0x206   : > { %v1070_v14 = vpop.f32.mrf.mxu3 }
 0x207   : > { %v1177_v4 = vadd.f32 %v1070_v14, %v938_v16  ;;  %v1784_v24 = vpop.f32.mrf.mxu2  ;;  %v1309_v52 = vpop.f32.mrf.mxu0  ;;  %v1714_v14 = vld [vmem:[#allocation2 + $0xf9] sm:$0xff] }
 0x208   : > { %v8177_v45 = vadd.f32 %v1784_v24, %v1654_v53  ;;  %v1548_v46 = vpop.f32.mrf.mxu1  ;;  %v11022_v53 = vld [vmem:[#allocation15_spill] sm:$0xff] }
 0x209   : > { %v1416_v21 = vadd.f32 %v1309_v52, %v1177_v4  ;;  %v11023_v4 = vld [vmem:[#allocation16_spill] sm:$0xff]  ;;  %v7562_v52 = vmov 0  }
 0x20a   : > { %1356 = vmatmul.f32.gmra.mxu0 %v1234_v34  ;;  %v643_v24 = vadd.f32 %v11023_v4, %v11022_v53  ;;  %7423 = vset.pattern.permute.xlu0 %v7562_v52  ;;  %v11029_v53 = vld [vmem:[#allocation21_spill] sm:$0xff]  ;;  %v11030_v4 = vld [vmem:[#allocation22_spill] sm:$0xff] }
 0x20b   : > { %1120 = vmatmul.f32.gmra.mxu3 %v996_v30  ;;  %1595 = vmatmul.f32.gmra.mxu1 %v1710_v35  ;;  %v1655_v19 = vadd.f32 %v1548_v46, %v1416_v21  ;;  %v11020_v35 = vld [vmem:[#allocation13_spill] sm:$0xff] }
 0x20c   : > { %1834 = vmatmul.f32.gmra.mxu2 %v1712_v22  ;;  %v640_v62 = vadd.f32 %v11020_v35, %v11019_v49  ;;  %v11024_v30 = vld [vmem:[#allocation17_spill] sm:$0xff]  ;;  %7424 = vset.pattern.permute.xlu1 %v7562_v52  ;;  %v11027_v49 = vld [vmem:[#allocation26_spill] sm:$0xff]  ;;  %v11028_v35 = vld [vmem:[#allocation20_spill] sm:$0xff] }
 0x20d   : > { %v941_v34 = vadd.f32 %v11024_v30, %v643_v24  ;;  %v296_v46 = vld [vmem:[%s10898_s2] sm:$0xff]  ;;  %7425 = vset.pattern.permute.xlu2 %v7562_v52  ;;  %v649_v24 = vadd.f32 %v11030_v4, %v11029_v53  ;;  %v11031_v52 = vld [vmem:[#allocation23_spill] sm:$0xff]  ;;  %v2210_v53 = vld [vmem:[#allocation6 + $0x410] sm:$0xff] }
 0x20e   : > { %v1073_v10 = vpop.f32.mrf.mxu3  ;;  %v940_v48 = vadd.f32 %v11021_v38, %v640_v62  ;;  %2489 = vperm.xlu0 %7423, %v296_v46   ;;  %v2883_v38 = vld [vmem:[#allocation6 + $0x548] sm:$0xff]  ;;  %v2882_v4 = vld [vmem:[#allocation6 + $0x540] sm:$0xff] }
 0x20f   : > { %v1178_v43 = vadd.f32 %v1073_v10, %v939_v47  ;;  %v1787_v3 = vpop.f32.mrf.mxu2  ;;  %v1312_v50 = vpop.f32.mrf.mxu0  ;;  %2896 = vmatpush.msra.mxu1 %v2883_v38  ;;  %v943_v30 = vadd.f32 %v11031_v52, %v649_v24  ;;  %v302_v46 = vld [vmem:[%s10898_s2 + $0x30] sm:$0xff]  ;;  %v299_v38 = vld [vmem:[%s10898_s2 + $0x18] sm:$0xff]  ;;  %v11036_v52 = vld [vmem:[#allocation29_spill] sm:$0xff] }
 0x210   : > { %v8182_v6 = vadd.f32 %v1787_v3, %v1655_v19  ;;  %v1551_v18 = vpop.f32.mrf.mxu1  ;;  %v1237_v19 = vld [vmem:[#allocation2 + $0xf0] sm:$0xff]  ;;  %v2211_v3 = vld [vmem:[#allocation6 + $0x418] sm:$0xff] }
 0x211   : > { %v1417_v5 = vadd.f32 %v1312_v50, %v1178_v43  ;;  %v1715_v50 = vld [vmem:[#allocation2 + $0x101] sm:$0xff]  ;;  %2236 = vmatpush.msra.mxu0 %v2211_v3  ;;  %v1718_v24 = vld [vmem:[#allocation2 + $0x119] sm:$0xff]  ;;  %2897 = vmatpush.msra.mxu1 %v2882_v4 }
 0x212   : > { %1359 = vmatmul.f32.gmra.mxu0 %v1235_v40  ;;  %v11026_v40 = vld [vmem:[#allocation19_spill] sm:$0xff] }
 0x213   : > { %1123 = vmatmul.f32.gmra.mxu3 %v997_v7  ;;  %1598 = vmatmul.f32.gmra.mxu1 %v1711_v54  ;;  %v1656_v13 = vadd.f32 %v1551_v18, %v1417_v5  ;;  %v11025_v7 = vld [vmem:[#allocation18_spill] sm:$0xff] }
 0x214   : > { %1837 = vmatmul.f32.gmra.mxu2 %v1713_v27  ;;  %v646_v18 = vadd.f32 %v11026_v40, %v11025_v7  ;;  %v297_v5 = vld [vmem:[%s10898_s2 + $0x8] sm:$0xff]  ;;  %v1971_v7 = vld [vmem:[#allocation6 + $0x390] sm:$0xff]  ;;  %2237 = vmatpush.msra.mxu0 %v2210_v53 }
 0x215   : > { %v1717_v40 = vld [vmem:[#allocation2 + $0x111] sm:$0xff]  ;;  %1998 = vmatpush.msra.mxu3 %v1971_v7 }
 0x216   : > { %v1076_v8 = vpop.f32.mrf.mxu3  ;;  %v942_v62 = vadd.f32 %v11028_v35, %v646_v18  ;;  %2494 = vperm.xlu0 %7423, %v297_v5   ;;  %v11032_v18 = vld [vmem:[#allocation24_spill] sm:$0xff] }
 0x217   : > { %v1179_v26 = vadd.f32 %v1076_v8, %v940_v48  ;;  %v1790_v55 = vpop.f32.mrf.mxu2  ;;  %v1315_v44 = vpop.f32.mrf.mxu0  ;;  %v1003_v7 = vld [vmem:[#allocation2 + $0x117] sm:$0xff] }
 0x218   : > { %v8187_v25 = vadd.f32 %v1790_v55, %v1656_v13  ;;  %v1554_v16 = vpop.f32.mrf.mxu1 }
 0x219   : > { %v1418_v54 = vadd.f32 %v1315_v44, %v1179_v26  ;;  %v1000_v44 = vld [vmem:[#allocation2 + $0xff] sm:$0xff] }
 0x21a   : > { %1362 = vmatmul.f32.gmra.mxu0 %v1236_v58 }
 0x21b   : > { %1126 = vmatmul.f32.gmra.mxu3 %v998_v31  ;;  %1601 = vmatmul.f32.gmra.mxu1 %v1712_v22  ;;  %v1657_v21 = vadd.f32 %v1554_v16, %v1418_v54  ;;  %v1238_v31 = vld [vmem:[#allocation2 + $0xf8] sm:$0xff]  ;;  %v2831_v16 = vld [vmem:[#allocation6 + $0x4f8] sm:$0xff] }
 0x21c   : > { %1840 = vmatmul.f32.gmra.mxu2 %v1714_v14 }
 0x21d   : > { %3030 = vmatpush.msra.mxu2 %v2831_v16 }
 0x21e   : > { %v1079_v28 = vpop.f32.mrf.mxu3  ;;  %2519 = vperm.xlu0 %7423, %v302_v46   ;;  %v11037_v46 = vld [vmem:[#allocation30_spill] sm:$0xff] }
 0x21f   : > { %v1180_v47 = vadd.f32 %v1079_v28, %v941_v34  ;;  %v1793_v1 = vpop.f32.mrf.mxu2  ;;  %v1318_v10 = vpop.f32.mrf.mxu0  ;;  %v298_v34 = vld [vmem:[%s10898_s2 + $0x10] sm:$0xff] }
 0x220   : > { %v8195_v43 = vadd.f32 %v1793_v1, %v1657_v21  ;;  %v1557_v22 = vpop.f32.mrf.mxu1  ;;  %2499 = vperm.xlu1 %7424, %v298_v34  }
 0x221   : > { %v1419_v15 = vadd.f32 %v1318_v10, %v1180_v47 }
 0x222   : > { %1365 = vmatmul.f32.gmra.mxu0 %v1237_v19  ;;  %v1001_v19 = vld [vmem:[#allocation2 + $0x107] sm:$0xff] }
 0x223   : > { %1129 = vmatmul.f32.gmra.mxu3 %v11027_v49  ;;  %1604 = vmatmul.f32.gmra.mxu1 %v1713_v27  ;;  %v1658_v8 = vadd.f32 %v1557_v22, %v1419_v15  ;;  %v11033_v15 = vld [vmem:[#allocation25_spill] sm:$0xff] }
 0x224   : > { %1843 = vmatmul.f32.gmra.mxu2 %v1715_v50  ;;  %v652_v49 = vadd.f32 %v11033_v15, %v11032_v18  ;;  %v1241_v18 = vld [vmem:[#allocation2 + $0x110] sm:$0xff] }
 0x226   : > { %v1082_v48 = vpop.f32.mrf.mxu3 }
 0x227   : > { %v1181_v13 = vadd.f32 %v1082_v48, %v942_v62  ;;  %v1796_v26 = vpop.f32.mrf.mxu2  ;;  %v1321_v55 = vpop.f32.mrf.mxu0  ;;  %v11034_v62 = vld [vmem:[#allocation27_spill] sm:$0xff]  ;;  %v305_v48 = vld [vmem:[%s10898_s2 + $0x48] sm:$0xff] }
 0x228   : > { %v8204_v58 = vadd.f32 %v1796_v26, %v1658_v8  ;;  %v1560_v27 = vpop.f32.mrf.mxu1  ;;  %v944_v5 = vadd.f32 %v11034_v62, %v652_v49  ;;  %2504 = vperm.xlu1 %7424, %v299_v38   ;;  %2534 = vperm.xlu0 %7423, %v305_v48   ;;  %v11038_v62 = vld [vmem:[#allocation31_spill] sm:$0xff] }
 0x229   : > { %v1420_v54 = vadd.f32 %v1321_v55, %v1181_v13 }
 0x22a   : > { %1368 = vmatmul.f32.gmra.mxu0 %v1238_v31  ;;  %v1002_v31 = vld [vmem:[#allocation2 + $0x10f] sm:$0xff] }
 0x22b   : > { %1132 = vmatmul.f32.gmra.mxu3 %v1000_v44  ;;  %1607 = vmatmul.f32.gmra.mxu1 %v1714_v14  ;;  %v1659_v21 = vadd.f32 %v1560_v27, %v1420_v54  ;;  %v1239_v14 = vld [vmem:[#allocation2 + $0x100] sm:$0xff]  ;;  %v11035_v54 = vld [vmem:[#allocation28_spill] sm:$0xff] }
 0x22c   : > { %1846 = vmatmul.f32.gmra.mxu2 %v1716_v29 }
 0x22e   : > { %v1085_v28 = vpop.f32.mrf.mxu3 }
 0x22f   : > { %v1182_v47 = vadd.f32 %v1085_v28, %v943_v30  ;;  %v1799_v1 = vpop.f32.mrf.mxu2  ;;  %v1324_v10 = vpop.f32.mrf.mxu0  ;;  %v655_v30 = vadd.f32 %v11036_v52, %v11035_v54  ;;  %v1004_v54 = vld [vmem:[#allocation2 + $0x11f] sm:$0xff] }
 0x230   : > { %v8215_v22 = vadd.f32 %v1799_v1, %v1659_v21  ;;  %v1563_v3 = vpop.f32.mrf.mxu1  ;;  %v303_v21 = vld [vmem:[%s10898_s2 + $0x38] sm:$0xff] }
 0x231   : > { %v1421_v35 = vadd.f32 %v1324_v10, %v1182_v47  ;;  %v945_v28 = vadd.f32 %v11037_v46, %v655_v30  ;;  %v308_v47 = vld [vmem:[%s10898_s2 + $0x60] sm:$0xff]  ;;  %v2830_v1 = vld [vmem:[#allocation6 + $0x4f0] sm:$0xff]  ;;  %2524 = vperm.xlu1 %7424, %v303_v21   ;;  %v11041_v46 = vld [vmem:[#allocation34_spill] sm:$0xff] }
 0x232   : > { %1371 = vmatmul.f32.gmra.mxu0 %v1239_v14  ;;  %2549 = vperm.xlu0 %7423, %v308_v47   ;;  %v1242_v52 = vld [vmem:[#allocation2 + $0x118] sm:$0xff] }
 0x233   : > { %1135 = vmatmul.f32.gmra.mxu3 %v1001_v19  ;;  %1610 = vmatmul.f32.gmra.mxu1 %v1715_v50  ;;  %v1660_v13 = vadd.f32 %v1563_v3, %v1421_v35  ;;  %v1240_v50 = vld [vmem:[#allocation2 + $0x108] sm:$0xff] }
 0x234   : > { %1849 = vmatmul.f32.gmra.mxu2 %v1717_v40  ;;  %v1719_v35 = vld [vmem:[#allocation2 + $0x121] sm:$0xff] }
 0x235   : > { %3031 = vmatpush.msra.mxu2 %v2830_v1  ;;  %v2209_v1 = vld [vmem:[#allocation6 + $0x408] sm:$0xff] }
 0x236   : > { %v1088_v8 = vpop.f32.mrf.mxu3  ;;  %2238 = vmatpush.msra.mxu0 %v2209_v1  ;;  %v1722_v1 = vld [vmem:[#allocation2 + $0x139] sm:$0xff] }
 0x237   : > { %v1183_v26 = vadd.f32 %v1088_v8, %v944_v5  ;;  %v1802_v55 = vpop.f32.mrf.mxu2  ;;  %v1327_v44 = vpop.f32.mrf.mxu0  ;;  %v11039_v5 = vld [vmem:[#allocation32_spill] sm:$0xff]  ;;  %v1970_v8 = vld [vmem:[#allocation6 + $0x388] sm:$0xff] }
 0x238   : > { %v8226_v27 = vadd.f32 %v1802_v55, %v1660_v13  ;;  %v1566_v16 = vpop.f32.mrf.mxu1  ;;  %v658_v38 = vadd.f32 %v11039_v5, %v11038_v62  ;;  %1999 = vmatpush.msra.mxu3 %v1970_v8  ;;  %v8242_v13 = vld [vmem:[%s7690_s21 + $0x138] sm:$0xff]  ;;  %v1243_v8 = vld [vmem:[#allocation2 + $0x120] sm:$0xff] }
 0x239   : > { %v1422_v34 = vadd.f32 %v1327_v44, %v1183_v26  ;;  %v11040_v26 = vld [vmem:[#allocation33_spill] sm:$0xff]  ;;  %v306_v44 = vld [vmem:[%s10898_s2 + $0x50] sm:$0xff]  ;;  %294 = vst [vmem:[#allocation2 + $0x150] sm:$0xff] %v8242_v13 }
 0x23a   : > { %1374 = vmatmul.f32.gmra.mxu0 %v1240_v50  ;;  %v946_v55 = vadd.f32 %v11040_v26, %v658_v38  ;;  %2539 = vperm.xlu1 %7424, %v306_v44   ;;  %v1721_v44 = vld [vmem:[#allocation2 + $0x131] sm:$0xff] }
 0x23b   : > { %1138 = vmatmul.f32.gmra.mxu3 %v1002_v31  ;;  %1613 = vmatmul.f32.gmra.mxu1 %v1716_v29  ;;  %v1661_v19 = vadd.f32 %v1566_v16, %v1422_v34  ;;  %v311_v31 = vld [vmem:[%s10898_s2 + $0x78] sm:$0xff]  ;;  %v1720_v34 = vld [vmem:[#allocation2 + $0x129] sm:$0xff] }
 0x23c   : > { %1852 = vmatmul.f32.gmra.mxu2 %v1718_v24  ;;  %2564 = vperm.xlu0 %7423, %v311_v31   ;;  %v11044_v31 = vld [vmem:[#allocation37_spill] sm:$0xff] }
 0x23e   : > { %v1091_v10 = vpop.f32.mrf.mxu3 }
 0x23f   : > { %v1184_v14 = vadd.f32 %v1091_v10, %v945_v28  ;;  %v1805_v29 = vpop.f32.mrf.mxu2  ;;  %v1330_v3 = vpop.f32.mrf.mxu0  ;;  %v11042_v28 = vld [vmem:[#allocation35_spill] sm:$0xff] }
 0x240   : > { %v8237_v15 = vadd.f32 %v1805_v29, %v1661_v19  ;;  %v1569_v49 = vpop.f32.mrf.mxu1  ;;  %v661_v21 = vadd.f32 %v11042_v28, %v11041_v46  ;;  %v8257_v19 = vld [vmem:[%s7690_s21 + $0x140] sm:$0xff]  ;;  %s7500_s21 = sshra.s32 %s7215_s29, 4  ;;  %s7501_s21 = int_to_ptr.hbm [resolvable:$true] %s7500_s21 }
 0x241   : > { %v1423_v48 = vadd.f32 %v1330_v3, %v1184_v14  ;;  %v11043_v14 = vld [vmem:[#allocation36_spill] sm:$0xff]  ;;  %v309_v3 = vld [vmem:[%s10898_s2 + $0x68] sm:$0xff]  ;;  %295 = vst [vmem:[#allocation2 + $0x158] sm:$0xff] %v8257_v19  ;;  %s7502_s30 = scalar_lea.hbm %s7501_s21, 328  ;;  %p7507_p11 = scmp.lt.s32.totalorder %s7501_s21, %s10899_s3 }
 0x242   : > { %1377 = vmatmul.f32.gmra.mxu0 %v1241_v18  ;;  %v947_v29 = vadd.f32 %v11043_v14, %v661_v21  ;;  %v2881_v18 = vld [vmem:[#allocation6 + $0x538] sm:$0xff]  ;;  %2554 = vperm.xlu1 %7424, %v309_v3   ;;  %v1006_v21 = vld [vmem:[#allocation2 + $0x12f] sm:$0xff]  ;;  %p7503_p1 = scmp.ne.s32.totalorder %s7501_s21, %s7502_s30  ;;  %p7508_p9 = scmp.lt.s32.totalorder %s7506_s10, %s7502_s30 }
 0x243   : > { %1141 = vmatmul.f32.gmra.mxu3 %v1003_v7  ;;  %1616 = vmatmul.f32.gmra.mxu1 %v1717_v40  ;;  %v1662_v40 = vadd.f32 %v1569_v49, %v1423_v48  ;;  %v314_v7 = vld [vmem:[%s10898_s2 + $0x90] sm:$0xff]  ;;  %v1005_v48 = vld [vmem:[#allocation2 + $0x127] sm:$0xff] }
 0x244   : > { %1855 = vmatmul.f32.gmra.mxu2 %v1719_v35  ;;  %2579 = vperm.xlu0 %7423, %v314_v7   ;;  %v11048_v14 = vld [vmem:[#allocation41_spill] sm:$0xff]  ;;  %v11049_v3 = vld [vmem:[#allocation42_spill] sm:$0xff]  ;;  %p7504_p4 = pnand %p7503_p1, %p7655_p7  ;;  %p7509_p2 = por %p7508_p9, %p7507_p11 }
 0x245   : > { %2898 = vmatpush.msra.mxu1 %v2881_v18  ;;  %v300_v18 = vld [vmem:[%s10898_s2 + $0x20] sm:$0xff] }
 0x246   : > { %v1094_v50 = vpop.f32.mrf.mxu3  ;;  %2509 = vperm.xlu2 %7425, %v300_v18   ;;  %p7505_p8 = pneg %p7504_p4 }
 0x247   : > { %v1185_v16 = vadd.f32 %v1094_v50, %v946_v55  ;;  %v1808_v53 = vpop.f32.mrf.mxu2  ;;  %v1333_v4 = vpop.f32.mrf.mxu0  ;;  %v2829_v55 = vld [vmem:[#allocation6 + $0x4e8] sm:$0xff]  ;;  %v11045_v50 = vld [vmem:[#allocation38_spill] sm:$0xff] }
 0x248   : > { %v8252_v30 = vadd.f32 %v1808_v53, %v1662_v40  ;;  %v1572_v10 = vpop.f32.mrf.mxu1  ;;  %3032 = vmatpush.msra.mxu2 %v2829_v55  ;;  %v664_v40 = vadd.f32 %v11045_v50, %v11044_v31  ;;  %v1245_v55 = vld [vmem:[#allocation2 + $0x130] sm:$0xff]  ;;  %v2208_v31 = vld [vmem:[#allocation6 + $0x400] sm:$0xff]  ;;  %p7510_p10 = pnand %p7509_p2, %p7505_p8 }
 0x249   : > { %v1424_v47 = vadd.f32 %v1333_v4, %v1185_v16  ;;  %v11046_v16 = vld [vmem:[#allocation39_spill] sm:$0xff]  ;;  %v312_v4 = vld [vmem:[%s10898_s2 + $0x80] sm:$0xff]  ;;  %2239 = vmatpush.msra.mxu0 %v2208_v31 }
 0x24a   : > { %1380 = vmatmul.f32.gmra.mxu0 %v1242_v52  ;;  %v948_v53 = vadd.f32 %v11046_v16, %v664_v40  ;;  %2569 = vperm.xlu1 %7424, %v312_v4   ;;  %v1723_v50 = vld [vmem:[#allocation2 + $0x141] sm:$0xff]  ;;  %v11050_v40 = vld [vmem:[#allocation43_spill] sm:$0xff]  ;;  %v11051_v16 = vld [vmem:[#allocation44_spill] sm:$0xff] }
 0x24b   : > { %1144 = vmatmul.f32.gmra.mxu3 %v1004_v54  ;;  %1619 = vmatmul.f32.gmra.mxu1 %v1718_v24  ;;  %v1663_v24 = vadd.f32 %v1572_v10, %v1424_v47  ;;  %v317_v54 = vld [vmem:[%s10898_s2 + $0xa8] sm:$0xff]  ;;  %v11047_v10 = vld [vmem:[#allocation40_spill] sm:$0xff]  ;;  %v1247_v31 = vld [vmem:[#allocation2 + $0x140] sm:$0xff] }
 0x24c   : > { %1858 = vmatmul.f32.gmra.mxu2 %v1720_v34  ;;  %2594 = vperm.xlu0 %7423, %v317_v54   ;;  %v1969_v47 = vld [vmem:[#allocation6 + $0x380] sm:$0xff]  ;;  %v2880_v4 = vld [vmem:[#allocation6 + $0x530] sm:$0xff] }
 0x24d   : > { %2000 = vmatpush.msra.mxu3 %v1969_v47  ;;  %2899 = vmatpush.msra.mxu1 %v2880_v4 }
 0x24e   : > { %v1097_v49 = vpop.f32.mrf.mxu3 }
 0x24f   : > { %v8267_v62 = vadd.f32 %v1097_v49, %v947_v29  ;;  %v1811_v5 = vpop.f32.mrf.mxu2  ;;  %v8269_v38 = vpop.f32.mrf.mxu0  ;;  %v667_v29 = vadd.f32 %v11048_v14, %v11047_v10  ;;  %v315_v49 = vld [vmem:[%s10898_s2 + $0x98] sm:$0xff] }
 0x250   : > { %v8271_v26 = vadd.f32 %v1811_v5, %v1663_v24  ;;  %v320_v24 = vld [vmem:[%s10898_s2 + $0xc0] sm:$0xff] }
 0x251   : > { %v949_v7 = vadd.f32 %v11049_v3, %v667_v29  ;;  %v1008_v14 = vld [vmem:[#allocation2 + $0x13f] sm:$0xff]  ;;  %v1724_v3 = vld [vmem:[#allocation2 + $0x149] sm:$0xff] }
 0x252   : > { %1383 = vmatmul.f32.gmra.mxu0 %v1243_v8  ;;  %2584 = vperm.xlu1 %7424, %v315_v49   ;;  %v1007_v8 = vld [vmem:[#allocation2 + $0x137] sm:$0xff] }
 0x253   : > { %1147 = vmatmul.f32.gmra.mxu3 %v1005_v48  ;;  %1622 = vmatmul.f32.gmra.mxu1 %v1719_v35  ;;  %v1244_v35 = vld [vmem:[#allocation2 + $0x128] sm:$0xff]  ;;  %v1246_v29 = vld [vmem:[#allocation2 + $0x138] sm:$0xff] }
 0x254   : > { %1861 = vmatmul.f32.gmra.mxu2 %v1721_v44  ;;  %2609 = vperm.xlu0 %7423, %v320_v24   ;;  %v304_v24 = vld [vmem:[%s10898_s2 + $0x40] sm:$0xff] }
 0x256   : > { %v1100_v52 = vpop.f32.mrf.mxu3 }
 0x257   : > { %v8282_v46 = vadd.f32 %v1100_v52, %v948_v53  ;;  %v8284_v28 = vpop.f32.mrf.mxu0  ;;  %v670_v53 = vadd.f32 %v11051_v16, %v11050_v40  ;;  %v301_v52 = vld [vmem:[%s10898_s2 + $0x28] sm:$0xff]  ;;  %v1725_v40 = vld [vmem:[#allocation2 + $0x151] sm:$0xff] }
 0x258   : > { %2514 = vperm.xlu2 %7425, %v301_v52   ;;  %v11053_v16 = vld [vmem:[#allocation48_spill] sm:$0xff]  ;;  %v324_v52 = vld [vmem:[%s10898_s2 + $0xe0] sm:$0xff] }
 0x259   : > { %v950_v54 = vadd.f32 %v8038_v56, %v670_v53  ;;  %v11054_v53 = vld [vmem:[#allocation49_spill] sm:$0xff] }
 0x25a   : > { %1386 = vmatmul.f32.gmra.mxu0 %v1244_v35  ;;  %v323_v35 = vld [vmem:[%s10898_s2 + $0xd8] sm:$0xff]  ;;  %v676_v4 = vadd.f32 %v11054_v53, %v11053_v16  ;;  %v1727_v53 = vld [vmem:[#allocation2 + $0x161] sm:$0xff] }
 0x25b   : > { %1150 = vmatmul.f32.gmra.mxu3 %v1006_v21  ;;  %1625 = vmatmul.f32.gmra.mxu1 %v1720_v34  ;;  %v318_v21 = vld [vmem:[%s10898_s2 + $0xb0] sm:$0xff] }
 0x25c   : > { %1864 = vmatmul.f32.gmra.mxu2 %v1722_v1  ;;  %2599 = vperm.xlu1 %7424, %v318_v21   ;;  %v329_v21 = vld [vmem:[%s10898_s2 + $0x108] sm:$0xff] }
 0x25d   : > { %2624 = vperm.xlu0 %7423, %v323_v35   ;;  %v952_v35 = vadd.f32 %v8058_v33, %v676_v4  ;;  %v310_v33 = vld [vmem:[%s10898_s2 + $0x70] sm:$0xff]  ;;  %v11056_v4 = vld [vmem:[#allocation53_spill] sm:$0xff] }
 0x25e   : > { %v1103_v5 = vpop.f32.mrf.mxu3 }
 0x25f   : > { %v8298_v48 = vadd.f32 %v1103_v5, %v949_v7  ;;  %v8300_v34 = vpop.f32.mrf.mxu0  ;;  %v11052_v7 = vld [vmem:[#allocation46_spill] sm:$0xff] }
 0x260   : > { %v673_v18 = vadd.f32 %v11052_v7, %v8040_v32  ;;  %v321_v5 = vld [vmem:[%s10898_s2 + $0xc8] sm:$0xff]  ;;  %2529 = vperm.xlu2 %7425, %v304_v24   ;;  %v2879_v7 = vld [vmem:[#allocation6 + $0x528] sm:$0xff] }
 0x261   : > { %2900 = vmatpush.msra.mxu1 %v2879_v7  ;;  %v11055_v24 = vld [vmem:[#allocation51_spill] sm:$0xff] }
 0x262   : > { %1389 = vmatmul.f32.gmra.mxu0 %v1245_v55  ;;  %v951_v49 = vadd.f32 %v8048_v37, %v673_v18  ;;  %v2827_v18 = vld [vmem:[#allocation6 + $0x4d8] sm:$0xff] }
 0x263   : > { %1153 = vmatmul.f32.gmra.mxu3 %v1007_v8  ;;  %1628 = vmatmul.f32.gmra.mxu1 %v1721_v44  ;;  %v2828_v44 = vld [vmem:[#allocation6 + $0x4e0] sm:$0xff]  ;;  %v326_v8 = vld [vmem:[%s10898_s2 + $0xf0] sm:$0xff] }
 0x264   : > { %1867 = vmatmul.f32.gmra.mxu2 %v1723_v50  ;;  %2614 = vperm.xlu1 %7424, %v321_v5   ;;  %v679_v5 = vadd.f32 %v11055_v24, %v8060_v9  ;;  %v333_v24 = vld [vmem:[%s10898_s2 + $0x128] sm:$0xff] }
 0x265   : > { %3033 = vmatpush.msra.mxu2 %v2828_v44  ;;  %2639 = vperm.xlu0 %7423, %v326_v8   ;;  %v327_v8 = vld [vmem:[%s10898_s2 + $0xf8] sm:$0xff] }
 0x266   : > { %v1106_v47 = vpop.f32.mrf.mxu3 }
 0x267   : > { %v8314_v10 = vadd.f32 %v1106_v47, %v950_v54  ;;  %v8316_v56 = vpop.f32.mrf.mxu0  ;;  %v307_v54 = vld [vmem:[%s10898_s2 + $0x58] sm:$0xff]  ;;  %3034 = vmatpush.msra.mxu2 %v2827_v18  ;;  %v2878_v18 = vld [vmem:[#allocation6 + $0x520] sm:$0xff] }
 0x268   : > { %2544 = vperm.xlu2 %7425, %v307_v54   ;;  %v682_v54 = vadd.f32 %v11056_v4, %v8070_v63  ;;  %2901 = vmatpush.msra.mxu1 %v2878_v18  ;;  %v1930_v18 = vld [vmem:[#allocation2 + $0x42] sm:$0xff] }
 0x26a   : > { %1392 = vmatmul.f32.gmra.mxu0 %v1246_v29  ;;  %v1248_v29 = vld [vmem:[#allocation2 + $0x148] sm:$0xff] }
 0x26b   : > { %1156 = vmatmul.f32.gmra.mxu3 %v1008_v14  ;;  %1631 = vmatmul.f32.gmra.mxu1 %v1722_v1  ;;  %v1009_v1 = vld [vmem:[#allocation2 + $0x147] sm:$0xff] }
 0x26c   : > { %1870 = vmatmul.f32.gmra.mxu2 %v1724_v3  ;;  %2629 = vperm.xlu1 %7424, %v324_v52   ;;  %v330_v52 = vld [vmem:[%s10898_s2 + $0x110] sm:$0xff] }
 0x26d   : > { %2654 = vperm.xlu0 %7423, %v329_v21   ;;  %v335_v21 = vld [vmem:[%s10898_s2 + $0x138] sm:$0xff] }
 0x26e   : > { %v1109_v55 = vpop.f32.mrf.mxu3 }
 0x26f   : > { %v8330_v32 = vadd.f32 %v1109_v55, %v951_v49  ;;  %v8332_v37 = vpop.f32.mrf.mxu0  ;;  %v1726_v49 = vld [vmem:[#allocation2 + $0x159] sm:$0xff] }
 0x270   : > { %v332_v55 = vld [vmem:[%s10898_s2 + $0x120] sm:$0xff]  ;;  %2559 = vperm.xlu2 %7425, %v310_v33  }
 0x272   : > { %1395 = vmatmul.f32.gmra.mxu0 %v1247_v31 }
 0x273   : > { %1159 = vmatmul.f32.gmra.mxu3 %v1009_v1  ;;  %1634 = vmatmul.f32.gmra.mxu1 %v1723_v50  ;;  %v1010_v50 = vld [vmem:[#allocation2 + $0x14f] sm:$0xff]  ;;  %v953_v1 = vadd.f32 %v8068_v39, %v679_v5 }
 0x274   : > { %1873 = vmatmul.f32.gmra.mxu2 %v1725_v40  ;;  %2644 = vperm.xlu1 %7424, %v327_v8   ;;  %v313_v39 = vld [vmem:[%s10898_s2 + $0x88] sm:$0xff] }
 0x275   : > { %2669 = vperm.xlu0 %7423, %v332_v55   ;;  %v2166_v8 = vld [vmem:[#allocation2 + $0x2b] sm:$0xff]  ;;  %v2826_v55 = vld [vmem:[#allocation6 + $0x4d0] sm:$0xff] }
 0x276   : > { %v1112_v47 = vpop.f32.mrf.mxu3  ;;  %3035 = vmatpush.msra.mxu2 %v2826_v55 }
 0x277   : > { %v8346_v44 = vadd.f32 %v1112_v47, %v952_v35  ;;  %v8348_v14 = vpop.f32.mrf.mxu0  ;;  %v954_v35 = vadd.f32 %v8078_v20, %v682_v54  ;;  %v316_v20 = vld [vmem:[%s10898_s2 + $0xa0] sm:$0xff] }
 0x278   : > { %2574 = vperm.xlu2 %7425, %v313_v39  }
 0x27a   : > { %1398 = vmatmul.f32.gmra.mxu0 %v1248_v29  ;;  %v11057_v29 = vld [vmem:[#allocation55_spill] sm:$0xff] }
 0x27b   : > { %1162 = vmatmul.f32.gmra.mxu3 %v1010_v50  ;;  %1637 = vmatmul.f32.gmra.mxu1 %v1724_v3  ;;  %v1011_v3 = vld [vmem:[#allocation2 + $0x157] sm:$0xff]  ;;  %v1728_v50 = vld [vmem:[#allocation2 + $0x169] sm:$0xff]  ;;  %v685_v7 = vadd.f32 %v11057_v29, %v8080_v0 }
 0x27c   : > { %1876 = vmatmul.f32.gmra.mxu2 %v1726_v49  ;;  %2659 = vperm.xlu1 %7424, %v330_v52   ;;  %v2167_v52 = vld [vmem:[#allocation2 + $0x33] sm:$0xff] }
 0x27d   : > { %2684 = vperm.xlu0 %7423, %v335_v21   ;;  %v955_v5 = vadd.f32 %v8088_v51, %v685_v7  ;;  %v319_v51 = vld [vmem:[%s10898_s2 + $0xb8] sm:$0xff]  ;;  %v11063_v21 = vld [vmem:[#allocation59_spill] sm:$0xff] }
 0x27e   : > { %v1115_v31 = vpop.f32.mrf.mxu3 }
 0x27f   : > { %v8362_v9 = vadd.f32 %v1115_v31, %v953_v1  ;;  %v8364_v16 = vpop.f32.mrf.mxu0  ;;  %v11060_v1 = vld [vmem:[#allocation57_spill] sm:$0xff] }
 0x280   : > { %2589 = vperm.xlu2 %7425, %v316_v20   ;;  %v688_v31 = vadd.f32 %v11060_v1, %v8090_v11  ;;  %v1929_v11 = vld [vmem:[#allocation2 + $0x3a] sm:$0xff] }
 0x281   : > { %v2168_v20 = vld [vmem:[#allocation2 + $0x3b] sm:$0xff] }
 0x282   : > { %1401 = vmatmul.f32.gmra.mxu0 %v8242_v13 }
 0x283   : > { %1165 = vmatmul.f32.gmra.mxu3 %v1011_v3  ;;  %1640 = vmatmul.f32.gmra.mxu1 %v1725_v40  ;;  %v1927_v40 = vld [vmem:[#allocation2 + $0x2a] sm:$0xff]  ;;  %v336_v3 = vld [vmem:[%s10898_s2 + $0x140] sm:$0xff] }
 0x284   : > { %1879 = vmatmul.f32.gmra.mxu2 %v1727_v53  ;;  %2674 = vperm.xlu1 %7424, %v333_v24   ;;  %v956_v53 = vadd.f32 %v8098_v60, %v688_v31  ;;  %v2877_v24 = vld [vmem:[#allocation6 + $0x518] sm:$0xff] }
 0x285   : > { %2902 = vmatpush.msra.mxu1 %v2877_v24 }
 0x286   : > { %v1118_v63 = vpop.f32.mrf.mxu3 }
 0x287   : > { %v8379_v13 = vadd.f32 %v1118_v63, %v954_v35  ;;  %v8381_v47 = vpop.f32.mrf.mxu0  ;;  %v691_v35 = vadd.f32 %v11063_v21, %v8100_v59  ;;  %v322_v63 = vld [vmem:[%s10898_s2 + $0xd0] sm:$0xff]  ;;  %v11066_v59 = vld [vmem:[#allocation61_spill] sm:$0xff] }
 0x288   : > { %2604 = vperm.xlu2 %7425, %v319_v51   ;;  %v328_v21 = vld [vmem:[%s10898_s2 + $0x100] sm:$0xff] }
 0x289   : > { %v957_v60 = vadd.f32 %v8108_v2, %v691_v35  ;;  %v325_v2 = vld [vmem:[%s10898_s2 + $0xe8] sm:$0xff]  ;;  %v11072_v35 = vld [vmem:[#allocation67_spill] sm:$0xff] }
 0x28a   : > { %1404 = vmatmul.f32.gmra.mxu0 %v8257_v19 }
 0x28b   : > { %2001 = vmatmul.f32.vlgmr.msra.gmra.mxu3 %v1927_v40  ;;  %1643 = vmatmul.f32.gmra.mxu1 %v1726_v49  ;;  %v1928_v49 = vld [vmem:[#allocation2 + $0x32] sm:$0xff]  ;;  %v8415_v40 = vpop.f32.mrf.mxu1 }
 0x28c   : > { %1882 = vmatmul.f32.gmra.mxu2 %v1728_v50  ;;  %2689 = vperm.xlu1 %7424, %v336_v3  }
 0x28e   : > { %v1121_v33 = vpop.f32.mrf.mxu3 }
 0x28f   : > { %v8393_v0 = vadd.f32 %v1121_v33, %v955_v5  ;;  %v8395_v19 = vpop.f32.mrf.mxu0  ;;  %v694_v5 = vadd.f32 %v11066_v59, %v8110_v42  ;;  %v2825_v33 = vld [vmem:[#allocation6 + $0x4c8] sm:$0xff] }
 0x290   : > { %11059 = vst [vmem:[#allocation13_spill] sm:$0xff] %v8395_v19  ;;  %2619 = vperm.xlu2 %7425, %v322_v63   ;;  %3036 = vmatpush.msra.mxu2 %v2825_v33  ;;  %v1931_v42 = vld [vmem:[#allocation2 + $0x4a] sm:$0xff]  ;;  %v1932_v59 = vld [vmem:[#allocation2 + $0x52] sm:$0xff] }
 0x291   : > { %11058 = vst [vmem:[#allocation12_spill] sm:$0xff] %v8393_v0  ;;  %v11075_v33 = vld [vmem:[#allocation68_spill] sm:$0xff] }
 0x292   : > { %2240 = vmatmul.f32.vlgmr.msra.gmra.mxu0 %v2166_v8  ;;  %v11067_v8 = vld [vmem:[#allocation63_spill] sm:$0xff] }
 0x293   : > { %2004 = vmatmul.f32.gmra.mxu3 %v1928_v49  ;;  %v8424_v49 = vpop.f32.mrf.mxu2  ;;  %v958_v55 = vadd.f32 %v11067_v8, %v694_v5  ;;  %v8430_v1 = vpop.f32.mrf.mxu1  ;;  %v2170_v5 = vld [vmem:[#allocation2 + $0x4b] sm:$0xff] }
 0x296   : > { %v1124_v4 = vpop.f32.mrf.mxu3 }
 0x297   : > { %v8406_v54 = vadd.f32 %v1124_v4, %v956_v53  ;;  %v8408_v39 = vpop.f32.mrf.mxu0  ;;  %v2169_v53 = vld [vmem:[#allocation2 + $0x43] sm:$0xff]  ;;  %v11070_v4 = vld [vmem:[#allocation64_spill] sm:$0xff] }
 0x298   : > { %11062 = vst [vmem:[#allocation15_spill] sm:$0xff] %v8408_v39  ;;  %2634 = vperm.xlu2 %7425, %v325_v2   ;;  %v11076_v2 = vld [vmem:[#allocation69_spill] sm:$0xff] }
 0x299   : > { %11061 = vst [vmem:[#allocation14_spill] sm:$0xff] %v8406_v54  ;;  %v700_v8 = vadd.f32 %v11076_v2, %v11075_v33  ;;  %v11080_v2 = vld [vmem:[#allocation45_spill] sm:$0xff]  ;;  %v2817_v54 = vld [vmem:[#allocation6 + $0x488] sm:$0xff] }
 0x29a   : > { %2243 = vmatmul.f32.gmra.mxu0 %v2167_v52  ;;  %v2177_v39 = vld [vmem:[#allocation2 + $0x83] sm:$0xff] }
 0x29b   : > { %2007 = vmatmul.f32.gmra.mxu3 %v1929_v11  ;;  %v11071_v11 = vld [vmem:[#allocation65_spill] sm:$0xff] }
 0x29c   : > { %v697_v52 = vadd.f32 %v11071_v11, %v11070_v4 }
 0x29e   : > { %v1127_v50 = vpop.f32.mrf.mxu3  ;;  %v959_v63 = vadd.f32 %v11072_v35, %v697_v52  ;;  %v1933_v35 = vld [vmem:[#allocation2 + $0x5a] sm:$0xff] }
 0x29f   : > { %v8418_v29 = vadd.f32 %v1127_v50, %v957_v60  ;;  %v8420_v7 = vpop.f32.mrf.mxu0  ;;  %v8442_v60 = vpop.f32.mrf.mxu2 }
 0x2a0   : > { %11065 = vst [vmem:[#allocation17_spill] sm:$0xff] %v8420_v7  ;;  %2649 = vperm.xlu2 %7425, %v328_v21  }
 0x2a1   : > { %11064 = vst [vmem:[#allocation16_spill] sm:$0xff] %v8418_v29 }
 0x2a2   : > { %2246 = vmatmul.f32.gmra.mxu0 %v2168_v20  ;;  %v8446_v20 = vpop.f32.mrf.mxu1 }
 0x2a3   : > { %2010 = vmatmul.f32.gmra.mxu3 %v1930_v18 }
 0x2a6   : > { %v1130_v31 = vpop.f32.mrf.mxu3 }
 0x2a7   : > { %v8432_v51 = vadd.f32 %v1130_v31, %v958_v55  ;;  %v8434_v3 = vpop.f32.mrf.mxu0  ;;  %v331_v55 = vld [vmem:[%s10898_s2 + $0x118] sm:$0xff]  ;;  %v8458_v52 = vpop.f32.mrf.mxu2 }
 0x2a8   : > { %11069 = vst [vmem:[#allocation19_spill] sm:$0xff] %v8434_v3  ;;  %v2876_v31 = vld [vmem:[#allocation6 + $0x510] sm:$0xff]  ;;  %2664 = vperm.xlu2 %7425, %v331_v55  }
 0x2a9   : > { %11068 = vst [vmem:[#allocation18_spill] sm:$0xff] %v8432_v51  ;;  %2903 = vmatpush.msra.mxu1 %v2876_v31  ;;  %v1934_v31 = vld [vmem:[#allocation2 + $0x62] sm:$0xff]  ;;  %v1937_v3 = vld [vmem:[#allocation2 + $0x7a] sm:$0xff] }
 0x2aa   : > { %2249 = vmatmul.f32.gmra.mxu0 %v2169_v53  ;;  %v2175_v51 = vld [vmem:[#allocation2 + $0x73] sm:$0xff] }
 0x2ab   : > { %2013 = vmatmul.f32.gmra.mxu3 %v1931_v42  ;;  %v11077_v42 = vld [vmem:[#allocation70_spill] sm:$0xff] }
 0x2ac   : > { %v960_v53 = vadd.f32 %v11077_v42, %v700_v8  ;;  %v2172_v42 = vld [vmem:[#allocation2 + $0x5b] sm:$0xff] }
 0x2ae   : > { %v1133_v50 = vpop.f32.mrf.mxu3 }
 0x2af   : > { %v8444_v18 = vadd.f32 %v1133_v50, %v959_v63  ;;  %v8448_v24 = vpop.f32.mrf.mxu0  ;;  %v2171_v63 = vld [vmem:[#allocation2 + $0x53] sm:$0xff]  ;;  %v2824_v50 = vld [vmem:[#allocation6 + $0x4c0] sm:$0xff] }
 0x2b0   : > { %11074 = vst [vmem:[#allocation20_spill] sm:$0xff] %v8448_v24  ;;  %3037 = vmatpush.msra.mxu2 %v2824_v50 }
 0x2b1   : > { %11073 = vst [vmem:[#allocation26_spill] sm:$0xff] %v8444_v18 }
 0x2b2   : > { %2252 = vmatmul.f32.gmra.mxu0 %v2170_v5  ;;  %v334_v5 = vld [vmem:[%s10898_s2 + $0x130] sm:$0xff] }
 0x2b3   : > { %2016 = vmatmul.f32.gmra.mxu3 %v1932_v59  ;;  %v8462_v59 = vpop.f32.mrf.mxu1  ;;  %2679 = vperm.xlu2 %7425, %v334_v5   ;;  %v1935_v5 = vld [vmem:[#allocation2 + $0x6a] sm:$0xff] }
 0x2b6   : > { %v1136_v4 = vpop.f32.mrf.mxu3 }
 0x2b7   : > { %v8456_v11 = vadd.f32 %v1136_v4, %v960_v53  ;;  %v8460_v21 = vpop.f32.mrf.mxu0  ;;  %v8472_v53 = vpop.f32.mrf.mxu2 }
 0x2b8   : > { %11079 = vst [vmem:[#allocation22_spill] sm:$0xff] %v8460_v21 }
 0x2b9   : > { %11078 = vst [vmem:[#allocation21_spill] sm:$0xff] %v8456_v11  ;;  %v2173_v11 = vld [vmem:[#allocation2 + $0x63] sm:$0xff] }
 0x2ba   : > { %2255 = vmatmul.f32.gmra.mxu0 %v2171_v63  ;;  %v11083_v63 = vld [vmem:[#allocation47_spill] sm:$0xff] }
 0x2bb   : > { %2019 = vmatmul.f32.gmra.mxu3 %v1933_v35  ;;  %v8474_v4 = vpop.f32.mrf.mxu1 }
 0x2be   : > { %v1139_v33 = vpop.f32.mrf.mxu3 }
 0x2bf   : > { %v8468_v8 = vadd.f32 %v1139_v33, %v11080_v2  ;;  %v8470_v55 = vpop.f32.mrf.mxu0  ;;  %v2875_v33 = vld [vmem:[#allocation6 + $0x508] sm:$0xff]  ;;  %v2823_v2 = vld [vmem:[#allocation6 + $0x4b8] sm:$0xff] }
 0x2c0   : > { %11082 = vst [vmem:[#allocation24_spill] sm:$0xff] %v8470_v55  ;;  %2904 = vmatpush.msra.mxu1 %v2875_v33  ;;  %v8481_v55 = vpop.f32.mrf.mxu2  ;;  %3038 = vmatpush.msra.mxu2 %v2823_v2 }
 0x2c1   : > { %11081 = vst [vmem:[#allocation23_spill] sm:$0xff] %v8468_v8  ;;  %v11086_v8 = vld [vmem:[#allocation50_spill] sm:$0xff] }
 0x2c2   : > { %2258 = vmatmul.f32.gmra.mxu0 %v2172_v42 }
 0x2c3   : > { %2022 = vmatmul.f32.gmra.mxu3 %v1934_v31  ;;  %v8483_v31 = vpop.f32.mrf.mxu1 }
 0x2c6   : > { %v1142_v35 = vpop.f32.mrf.mxu3 }
 0x2c7   : > { %v8477_v50 = vadd.f32 %v1142_v35, %v11083_v63  ;;  %v8479_v21 = vpop.f32.mrf.mxu0  ;;  %v1936_v63 = vld [vmem:[#allocation2 + $0x72] sm:$0xff] }
 0x2c8   : > { %11085 = vst [vmem:[#allocation27_spill] sm:$0xff] %v8479_v21  ;;  %v2174_v21 = vld [vmem:[#allocation2 + $0x6b] sm:$0xff] }
 0x2c9   : > { %11084 = vst [vmem:[#allocation25_spill] sm:$0xff] %v8477_v50  ;;  %v8490_v50 = vpop.f32.mrf.mxu2 }
 0x2ca   : > { %2261 = vmatmul.f32.gmra.mxu0 %v2173_v11  ;;  %v11089_v11 = vld [vmem:[#allocation52_spill] sm:$0xff] }
 0x2cb   : > { %2025 = vmatmul.f32.gmra.mxu3 %v1935_v5  ;;  %v8495_v18 = vpop.f32.mrf.mxu1 }
 0x2ce   : > { %v1145_v42 = vpop.f32.mrf.mxu3 }
 0x2cf   : > { %v8486_v24 = vadd.f32 %v1145_v42, %v11086_v8  ;;  %v8488_v35 = vpop.f32.mrf.mxu0  ;;  %v2874_v8 = vld [vmem:[#allocation6 + $0x500] sm:$0xff] }
 0x2d0   : > { %11088 = vst [vmem:[#allocation29_spill] sm:$0xff] %v8488_v35  ;;  %2905 = vmatpush.msra.mxu1 %v2874_v8  ;;  %v11092_v35 = vld [vmem:[#allocation54_spill] sm:$0xff] }
 0x2d1   : > { %11087 = vst [vmem:[#allocation28_spill] sm:$0xff] %v8486_v24  ;;  %v8502_v24 = vpop.f32.mrf.mxu2 }
 0x2d2   : > { %2264 = vmatmul.f32.gmra.mxu0 %v2174_v21  ;;  %v2822_v21 = vld [vmem:[#allocation6 + $0x4b0] sm:$0xff] }
 0x2d3   : > { %2028 = vmatmul.f32.gmra.mxu3 %v1936_v63  ;;  %3039 = vmatpush.msra.mxu2 %v2822_v21  ;;  %v3227_v21 = vld [vmem:[#allocation6 + $0x5f8] sm:$0xff] }
 0x2d4   : > { %3228 = vmatpush.msrb.mxu3 %v3227_v21  ;;  %v2832_v21 = vld [vmem:[#allocation2 + $0x6] sm:$0xff] }
 0x2d5   : > { %2906 = vmatmul.f32.vlgmr.msra.gmra.mxu1 %v2832_v21  ;;  %v11108_v21 = vld [vmem:[#allocation62_spill] sm:$0xff] }
 0x2d6   : > { %v1148_v5 = vpop.f32.mrf.mxu3 }
 0x2d7   : > { %v8493_v33 = vadd.f32 %v1148_v5, %v11089_v11  ;;  %v8497_v2 = vpop.f32.mrf.mxu0  ;;  %v1938_v5 = vld [vmem:[#allocation2 + $0x82] sm:$0xff] }
 0x2d8   : > { %11091 = vst [vmem:[#allocation31_spill] sm:$0xff] %v8497_v2  ;;  %v2176_v11 = vld [vmem:[#allocation2 + $0x7b] sm:$0xff]  ;;  %v8506_v2 = vpop.f32.mrf.mxu1 }
 0x2d9   : > { %11090 = vst [vmem:[#allocation30_spill] sm:$0xff] %v8493_v33  ;;  %v2821_v33 = vld [vmem:[#allocation6 + $0x4a8] sm:$0xff]  ;;  %v8513_v19 = vpop.f32.mrf.mxu2 }
 0x2da   : > { %2267 = vmatmul.f32.gmra.mxu0 %v2175_v51  ;;  %3040 = vmatpush.msra.mxu2 %v2821_v33  ;;  %v2820_v51 = vld [vmem:[#allocation6 + $0x4a0] sm:$0xff] }
 0x2db   : > { %2031 = vmatmul.f32.gmra.mxu3 %v1937_v3  ;;  %v2819_v3 = vld [vmem:[#allocation6 + $0x498] sm:$0xff]  ;;  %v2816_v33 = vld [vmem:[#allocation6 + $0x480] sm:$0xff] }
 0x2dc   : > { %3041 = vmatpush.msra.mxu2 %v2820_v51 }
 0x2de   : > { %v1151_v42 = vpop.f32.mrf.mxu3  ;;  %3042 = vmatpush.msra.mxu2 %v2819_v3  ;;  %v11099_v3 = vld [vmem:[#allocation58_spill] sm:$0xff] }
 0x2df   : > { %v8500_v63 = vadd.f32 %v1151_v42, %v11092_v35  ;;  %v8504_v7 = vpop.f32.mrf.mxu0  ;;  %v11095_v35 = vld [vmem:[#allocation56_spill] sm:$0xff] }
 0x2e0   : > { %11094 = vst [vmem:[#allocation33_spill] sm:$0xff] %v8504_v7  ;;  %v1939_v7 = vld [vmem:[#allocation2 + $0x8a] sm:$0xff] }
 0x2e1   : > { %11093 = vst [vmem:[#allocation32_spill] sm:$0xff] %v8500_v63  ;;  %v2818_v63 = vld [vmem:[#allocation6 + $0x490] sm:$0xff] }
 0x2e2   : > { %2270 = vmatmul.f32.gmra.mxu0 %v2176_v11  ;;  %3043 = vmatpush.msra.mxu2 %v2818_v63  ;;  %v2774_v11 = vld [vmem:[#allocation2 + $0x5] sm:$0xff]  ;;  %v1940_v63 = vld [vmem:[#allocation2 + $0x92] sm:$0xff] }
 0x2e3   : > { %2034 = vmatmul.f32.gmra.mxu3 %v1938_v5  ;;  %v8515_v5 = vpop.f32.mrf.mxu1 }
 0x2e4   : > { %3044 = vmatpush.msra.mxu2 %v2817_v54  ;;  %11098 = vst [vmem:[#allocation36_spill] sm:$0xff] %v8515_v5  ;;  %v8522_v54 = vpop.f32.mrf.mxu2  ;;  %v3705_v5 = vld [vmem:[#allocation6 + $0x6f8] sm:$0xff] }
 0x2e5   : > { %11102 = vst [vmem:[#allocation39_spill] sm:$0xff] %v8522_v54  ;;  %3706 = vmatpush.msrb.mxu1 %v3705_v5 }
 0x2e6   : > { %v1154_v8 = vpop.f32.mrf.mxu3  ;;  %3045 = vmatpush.msra.mxu2 %v2816_v33 }
 0x2e7   : > { %v8509_v42 = vadd.f32 %v1154_v8, %v11095_v35  ;;  %v8511_v29 = vpop.f32.mrf.mxu0  ;;  %3046 = vmatmul.f32.vlgmr.msra.gmra.mxu2 %v2774_v11  ;;  %v11104_v11 = vld [vmem:[#allocation60_spill] sm:$0xff] }
 0x2e8   : > { %11097 = vst [vmem:[#allocation35_spill] sm:$0xff] %v8511_v29  ;;  %v2178_v29 = vld [vmem:[#allocation2 + $0x8b] sm:$0xff] }
 0x2e9   : > { %11096 = vst [vmem:[#allocation34_spill] sm:$0xff] %v8509_v42  ;;  %v3466_v42 = vld [vmem:[#allocation6 + $0x678] sm:$0xff] }
 0x2ea   : > { %2273 = vmatmul.f32.gmra.mxu0 %v2177_v39  ;;  %v2775_v39 = vld [vmem:[#allocation2 + $0xd] sm:$0xff] }
 0x2eb   : > { %2037 = vmatmul.f32.gmra.mxu3 %v1939_v7  ;;  %3467 = vmatpush.msrb.mxu0 %v3466_v42  ;;  %v8524_v7 = vpop.f32.mrf.mxu1  ;;  %v2833_v42 = vld [vmem:[#allocation2 + $0xe] sm:$0xff] }
 0x2ec   : > { %11103 = vst [vmem:[#allocation40_spill] sm:$0xff] %v8524_v7  ;;  %2909 = vmatmul.f32.gmra.mxu1 %v2833_v42 }
 0x2ee   : > { %v1157_v51 = vpop.f32.mrf.mxu3 }
 0x2ef   : > { %v8518_v8 = vadd.f32 %v1157_v51, %v11099_v3  ;;  %v8520_v35 = vpop.f32.mrf.mxu0  ;;  %3049 = vmatmul.f32.gmra.mxu2 %v2775_v39 }
 0x2f0   : > { %11101 = vst [vmem:[#allocation38_spill] sm:$0xff] %v8520_v35  ;;  %v1941_v35 = vld [vmem:[#allocation2 + $0x9a] sm:$0xff] }
 0x2f1   : > { %11100 = vst [vmem:[#allocation37_spill] sm:$0xff] %v8518_v8  ;;  %v2179_v8 = vld [vmem:[#allocation2 + $0x93] sm:$0xff] }
 0x2f2   : > { %2276 = vmatmul.f32.gmra.mxu0 %v2178_v29  ;;  %v8531_v29 = vpop.f32.mrf.mxu2 }
 0x2f3   : > { %2040 = vmatmul.f32.gmra.mxu3 %v1940_v63  ;;  %11107 = vst [vmem:[#allocation43_spill] sm:$0xff] %v8531_v29  ;;  %v8536_v7 = vpop.f32.mrf.mxu1 }
 0x2f4   : > { %11110 = vst [vmem:[#allocation46_spill] sm:$0xff] %v8536_v7  ;;  %v3704_v7 = vld [vmem:[#allocation6 + $0x6f0] sm:$0xff] }
 0x2f5   : > { %3707 = vmatpush.msrb.mxu1 %v3704_v7 }
 0x2f6   : > { %v1160_v33 = vpop.f32.mrf.mxu3 }
 0x2f7   : > { %v8527_v51 = vadd.f32 %v1160_v33, %v11104_v11  ;;  %v8529_v3 = vpop.f32.mrf.mxu0  ;;  %v1942_v11 = vld [vmem:[#allocation2 + $0xa2] sm:$0xff] }
 0x2f8   : > { %11106 = vst [vmem:[#allocation42_spill] sm:$0xff] %v8529_v3  ;;  %v2180_v3 = vld [vmem:[#allocation2 + $0x9b] sm:$0xff] }
 0x2f9   : > { %11105 = vst [vmem:[#allocation41_spill] sm:$0xff] %v8527_v51  ;;  %v3226_v51 = vld [vmem:[#allocation6 + $0x5f0] sm:$0xff] }
 0x2fa   : > { %2279 = vmatmul.f32.gmra.mxu0 %v2179_v8  ;;  %3229 = vmatpush.msrb.mxu3 %v3226_v51  ;;  %v8543_v42 = vpop.f32.mrf.mxu2 }
 0x2fb   : > { %2043 = vmatmul.f32.gmra.mxu3 %v1941_v35  ;;  %v11112_v35 = vld [vmem:[#allocation66_spill] sm:$0xff]  ;;  %11114 = vst [vmem:[#allocation51_spill] sm:$0xff] %v8543_v42  ;;  %v8547_v54 = vpop.f32.mrf.mxu1 }
 0x2fc   : > { %11116 = vst [vmem:[#allocation55_spill] sm:$0xff] %v8547_v54  ;;  %v2183_v54 = vld [vmem:[#allocation2 + $0xb3] sm:$0xff] }
 0x2fe   : > { %v1163_v63 = vpop.f32.mrf.mxu3 }
 0x2ff   : > { %v8534_v39 = vadd.f32 %v1163_v63, %v11108_v21  ;;  %v8538_v33 = vpop.f32.mrf.mxu0  ;;  %v1943_v63 = vld [vmem:[#allocation2 + $0xaa] sm:$0xff] }
 0x300   : > { %11111 = vst [vmem:[#allocation48_spill] sm:$0xff] %v8538_v33  ;;  %v2181_v21 = vld [vmem:[#allocation2 + $0xa3] sm:$0xff] }
 0x301   : > { %11109 = vst [vmem:[#allocation44_spill] sm:$0xff] %v8534_v39  ;;  %v3465_v39 = vld [vmem:[#allocation6 + $0x670] sm:$0xff] }
 0x302   : > { %2282 = vmatmul.f32.gmra.mxu0 %v2180_v3  ;;  %v8550_v33 = vpop.f32.mrf.mxu2 }
 0x303   : > { %2046 = vmatmul.f32.gmra.mxu3 %v1942_v11  ;;  %3468 = vmatpush.msrb.mxu0 %v3465_v39  ;;  %11117 = vst [vmem:[#allocation57_spill] sm:$0xff] %v8550_v33  ;;  %v8554_v0 = vpop.f32.mrf.mxu1 }
 0x306   : > { %v1166_v5 = vpop.f32.mrf.mxu3 }
 0x307   : > { %v8541_v8 = vadd.f32 %v1166_v5, %v11112_v35  ;;  %v8545_v29 = vpop.f32.mrf.mxu0  ;;  %v1944_v5 = vld [vmem:[#allocation2 + $0xb2] sm:$0xff] }
 0x308   : > { %11115 = vst [vmem:[#allocation53_spill] sm:$0xff] %v8545_v29  ;;  %v2182_v35 = vld [vmem:[#allocation2 + $0xab] sm:$0xff]  ;;  %v8552_v29 = vpop.permute.xlu0 %2489 }
 0x309   : > { %11113 = vst [vmem:[#allocation49_spill] sm:$0xff] %v8541_v8 }
 0x30a   : > { %2285 = vmatmul.f32.gmra.mxu0 %v2181_v21  ;;  %11118 = vst [vmem:[#allocation59_spill] sm:$0xff] %v8552_v29 }
 0x30b   : > { %2049 = vmatmul.f32.gmra.mxu3 %v1943_v63 }
 0x30e   : > { %v2002_v51 = vpop.f32.mrf.mxu3 }
 0x30f   : > { %v2125_v3 = vadd.f32 %v2002_v51, %v8142_v36  ;;  %v2241_v11 = vpop.f32.mrf.mxu0  ;;  %v1945_v51 = vld [vmem:[#allocation2 + $0xba] sm:$0xff] }
 0x311   : > { %v2364_v8 = vadd.f32 %v2241_v11, %v2125_v3  ;;  %v3225_v11 = vld [vmem:[#allocation6 + $0x5e8] sm:$0xff] }
 0x312   : > { %2288 = vmatmul.f32.gmra.mxu0 %v2182_v35  ;;  %3230 = vmatpush.msrb.mxu3 %v3225_v11  ;;  %v8562_v35 = vpop.f32.mrf.mxu1  ;;  %v2184_v11 = vld [vmem:[#allocation2 + $0xbb] sm:$0xff] }
 0x313   : > { %v2405_v42 = vmax.f32 %v2364_v8, 0.0  ;;  %2052 = vmatmul.f32.gmra.mxu3 %v1944_v5  ;;  %v8558_v8 = vpop.f32.mrf.mxu2  ;;  %v8560_v5 = vpop.permute.xlu0 %2494  ;;  %11120 = vst [vmem:[#allocation63_spill] sm:$0xff] %v8562_v35 }
 0x314   : > { %11119 = vst [vmem:[#allocation61_spill] sm:$0xff] %v8560_v5  ;;  %v8566_v35 = vpop.permute.xlu1 %2499 }
 0x315   : > { %v2446_v39 = vmin.f32 %v2405_v42, 6.0  ;;  %11121 = vst [vmem:[#allocation64_spill] sm:$0xff] %v8566_v35 }
 0x316   : > { %v2005_v7 = vpop.f32.mrf.mxu3 }
 0x317   : > { %v2692_v63 = vmul.f32 %v8552_v29, %v2446_v39  ;;  %v2126_v21 = vadd.f32 %v2005_v7, %v8147_v23  ;;  %v2244_v36 = vpop.f32.mrf.mxu0  ;;  %v1946_v29 = vld [vmem:[#allocation2 + $0xc2] sm:$0xff] }
 0x319   : > { %2733 = vst [vmem:[#allocation2 + $0x18] sm:$0xff] %v2692_v63  ;;  %v2365_v3 = vadd.f32 %v2244_v36, %v2126_v21 }
 0x31a   : > { %2291 = vmatmul.f32.gmra.mxu0 %v2183_v54  ;;  %v3464_v54 = vld [vmem:[#allocation6 + $0x668] sm:$0xff] }
 0x31b   : > { %v2406_v33 = vmax.f32 %v2365_v3, 0.0  ;;  %2055 = vmatmul.f32.gmra.mxu3 %v1945_v51  ;;  %v3703_v3 = vld [vmem:[#allocation6 + $0x6e8] sm:$0xff]  ;;  %3469 = vmatpush.msrb.mxu0 %v3464_v54 }
 0x31c   : > { %3708 = vmatpush.msrb.mxu1 %v3703_v3  ;;  %v2185_v3 = vld [vmem:[#allocation2 + $0xc3] sm:$0xff] }
 0x31d   : > { %v2447_v42 = vmin.f32 %v2406_v33, 6.0 }
 0x31e   : > { %v2008_v39 = vpop.f32.mrf.mxu3 }
 0x31f   : > { %v2693_v23 = vmul.f32 %v8560_v5, %v2447_v42  ;;  %v2127_v7 = vadd.f32 %v2008_v39, %v8152_v12  ;;  %v2247_v63 = vpop.f32.mrf.mxu0  ;;  %v8568_v12 = vpop.f32.mrf.mxu2 }
 0x320   : > { %v2834_v21 = vld [vmem:[#allocation2 + $0x16] sm:$0xff]  ;;  %11122 = vst [vmem:[#allocation65_spill] sm:$0xff] %v8568_v12 }
 0x321   : > { %v2776_v36 = vld [vmem:[#allocation2 + $0x15] sm:$0xff]  ;;  %2734 = vst [vmem:[#allocation2 + $0x20] sm:$0xff] %v2693_v23  ;;  %v2366_v51 = vadd.f32 %v2247_v63, %v2127_v7  ;;  %2912 = vmatmul.f32.gmra.mxu1 %v2834_v21  ;;  %v1947_v7 = vld [vmem:[#allocation2 + $0xca] sm:$0xff]  ;;  %v8572_v63 = vpop.f32.mrf.mxu1 }
 0x322   : > { %3052 = vmatmul.f32.gmra.mxu2 %v2776_v36  ;;  %2294 = vmatmul.f32.gmra.mxu0 %v2184_v11  ;;  %11123 = vst [vmem:[#allocation67_spill] sm:$0xff] %v8572_v63  ;;  %v3224_v11 = vld [vmem:[#allocation6 + $0x5e0] sm:$0xff]  ;;  %v1948_v63 = vld [vmem:[#allocation2 + $0xd2] sm:$0xff] }
 0x323   : > { %v2407_v33 = vmax.f32 %v2366_v51, 0.0  ;;  %2058 = vmatmul.f32.gmra.mxu3 %v1946_v29 }
 0x324   : > { %3231 = vmatpush.msrb.mxu3 %v3224_v11 }
 0x325   : > { %v2448_v42 = vmin.f32 %v2407_v33, 6.0 }
 0x326   : > { %v2011_v39 = vpop.f32.mrf.mxu3 }
 0x327   : > { %v2694_v5 = vmul.f32 %v8566_v35, %v2448_v42  ;;  %v2128_v23 = vadd.f32 %v2011_v39, %v8157_v41  ;;  %v2250_v21 = vpop.f32.mrf.mxu0  ;;  %v8574_v42 = vpop.permute.xlu1 %2504 }
 0x328   : > { %v2835_v36 = vld [vmem:[#allocation2 + $0x1e] sm:$0xff]  ;;  %11124 = vst [vmem:[#allocation68_spill] sm:$0xff] %v8574_v42  ;;  %v8578_v12 = vpop.f32.mrf.mxu2 }
 0x329   : > { %v2777_v54 = vld [vmem:[#allocation2 + $0x1d] sm:$0xff]  ;;  %2735 = vst [vmem:[#allocation2 + $0x28] sm:$0xff] %v2694_v5  ;;  %v2367_v29 = vadd.f32 %v2250_v21, %v2128_v23  ;;  %2915 = vmatmul.f32.gmra.mxu1 %v2835_v36  ;;  %v2186_v36 = vld [vmem:[#allocation2 + $0xcb] sm:$0xff] }
 0x32a   : > { %3055 = vmatmul.f32.gmra.mxu2 %v2777_v54  ;;  %2297 = vmatmul.f32.gmra.mxu0 %v2185_v3  ;;  %v3702_v3 = vld [vmem:[#allocation6 + $0x6e0] sm:$0xff] }
 0x32b   : > { %v2408_v51 = vmax.f32 %v2367_v29, 0.0  ;;  %2061 = vmatmul.f32.gmra.mxu3 %v1947_v7  ;;  %v3463_v7 = vld [vmem:[#allocation6 + $0x660] sm:$0xff]  ;;  %v8580_v29 = vpop.f32.mrf.mxu1  ;;  %3709 = vmatpush.msrb.mxu1 %v3702_v3 }
 0x32c   : > { %11125 = vst [vmem:[#allocation69_spill] sm:$0xff] %v8580_v29  ;;  %3470 = vmatpush.msrb.mxu0 %v3463_v7 }
 0x32d   : > { %v2449_v33 = vmin.f32 %v2408_v51, 6.0 }
 0x32e   : > { %v2014_v41 = vpop.f32.mrf.mxu3 }
 0x32f   : > { %v2695_v39 = vmul.f32 %v8574_v42, %v2449_v33  ;;  %v2129_v35 = vadd.f32 %v2014_v41, %v8162_v17  ;;  %v2253_v5 = vpop.f32.mrf.mxu0  ;;  %v8582_v17 = vpop.permute.xlu2 %2509  ;;  %v2187_v42 = vld [vmem:[#allocation2 + $0xd3] sm:$0xff] }
 0x330   : > { %v2836_v23 = vld [vmem:[#allocation2 + $0x26] sm:$0xff]  ;;  %11126 = vst [vmem:[#allocation70_spill] sm:$0xff] %v8582_v17 }
 0x331   : > { %v2778_v21 = vld [vmem:[#allocation2 + $0x25] sm:$0xff]  ;;  %2736 = vst [vmem:[#allocation2 + $0x30] sm:$0xff] %v2695_v39  ;;  %v2368_v54 = vadd.f32 %v2253_v5, %v2129_v35  ;;  %2918 = vmatmul.f32.gmra.mxu1 %v2836_v23  ;;  %v1949_v35 = vld [vmem:[#allocation2 + $0xda] sm:$0xff] }
 0x332   : > { %3058 = vmatmul.f32.gmra.mxu2 %v2778_v21  ;;  %2300 = vmatmul.f32.gmra.mxu0 %v2186_v36 }
 0x333   : > { %v2409_v11 = vmax.f32 %v2368_v54, 0.0  ;;  %2064 = vmatmul.f32.gmra.mxu3 %v1948_v63  ;;  %v8586_v54 = vpop.f32.mrf.mxu2  ;;  %v8588_v36 = vpop.f32.mrf.mxu1 }
 0x335   : > { %v2450_v51 = vmin.f32 %v2409_v11, 6.0 }
 0x336   : > { %v2017_v33 = vpop.f32.mrf.mxu3 }
 0x337   : > { %v2696_v41 = vmul.f32 %v8582_v17, %v2450_v51  ;;  %v2130_v39 = vadd.f32 %v2017_v33, %v8167_v57  ;;  %v2256_v5 = vpop.f32.mrf.mxu0  ;;  %v8590_v3 = vpop.permute.xlu2 %2514  ;;  %v1950_v33 = vld [vmem:[#allocation2 + $0xe2] sm:$0xff] }
 0x338   : > { %v2837_v23 = vld [vmem:[#allocation2 + $0x2e] sm:$0xff]  ;;  %11127 = vst [vmem:[#allocation45_spill] sm:$0xff] %v8590_v3  ;;  %v8602_v17 = vpop.permute.xlu1 %2524 }
 0x339   : > { %v2779_v21 = vld [vmem:[#allocation2 + $0x2d] sm:$0xff]  ;;  %2737 = vst [vmem:[#allocation2 + $0x38] sm:$0xff] %v2696_v41  ;;  %v2369_v29 = vadd.f32 %v2256_v5, %v2130_v39  ;;  %2921 = vmatmul.f32.gmra.mxu1 %v2837_v23  ;;  %v2188_v23 = vld [vmem:[#allocation2 + $0xdb] sm:$0xff] }
 0x33a   : > { %3061 = vmatmul.f32.gmra.mxu2 %v2779_v21  ;;  %2303 = vmatmul.f32.gmra.mxu0 %v2187_v42  ;;  %v3223_v42 = vld [vmem:[#allocation6 + $0x5d8] sm:$0xff]  ;;  %11129 = vst [vmem:[#allocation50_spill] sm:$0xff] %v8602_v17 }
 0x33b   : > { %v2410_v63 = vmax.f32 %v2369_v29, 0.0  ;;  %2067 = vmatmul.f32.gmra.mxu3 %v1949_v35  ;;  %v8594_v35 = vpop.f32.mrf.mxu2 }
 0x33c   : > { %3232 = vmatpush.msrb.mxu3 %v3223_v42  ;;  %v2189_v42 = vld [vmem:[#allocation2 + $0xe3] sm:$0xff] }
 0x33d   : > { %v2451_v7 = vmin.f32 %v2410_v63, 6.0  ;;  %v8596_v63 = vpop.permute.xlu0 %2519 }
 0x33e   : > { %v2020_v57 = vpop.f32.mrf.mxu3  ;;  %11128 = vst [vmem:[#allocation47_spill] sm:$0xff] %v8596_v63 }
 0x33f   : > { %v2697_v11 = vmul.f32 %v8590_v3, %v2451_v7  ;;  %v2131_v51 = vadd.f32 %v2020_v57, %v8172_v61  ;;  %v2259_v41 = vpop.f32.mrf.mxu0  ;;  %v8598_v61 = vpop.f32.mrf.mxu1 }
 0x340   : > { %v2838_v39 = vld [vmem:[#allocation2 + $0x36] sm:$0xff] }
 0x341   : > { %v2780_v5 = vld [vmem:[#allocation2 + $0x35] sm:$0xff]  ;;  %2738 = vst [vmem:[#allocation2 + $0x40] sm:$0xff] %v2697_v11  ;;  %v2370_v21 = vadd.f32 %v2259_v41, %v2131_v51  ;;  %2924 = vmatmul.f32.gmra.mxu1 %v2838_v39  ;;  %v1951_v51 = vld [vmem:[#allocation2 + $0xea] sm:$0xff] }
 0x342   : > { %3064 = vmatmul.f32.gmra.mxu2 %v2780_v5  ;;  %2306 = vmatmul.f32.gmra.mxu0 %v2188_v23  ;;  %v3462_v23 = vld [vmem:[#allocation6 + $0x658] sm:$0xff] }
 0x343   : > { %v2411_v29 = vmax.f32 %v2370_v21, 0.0  ;;  %2070 = vmatmul.f32.gmra.mxu3 %v1950_v33  ;;  %v3701_v21 = vld [vmem:[#allocation6 + $0x6d8] sm:$0xff]  ;;  %3471 = vmatpush.msrb.mxu0 %v3462_v23 }
 0x344   : > { %3710 = vmatpush.msrb.mxu1 %v3701_v21  ;;  %v2190_v21 = vld [vmem:[#allocation2 + $0xeb] sm:$0xff] }
 0x345   : > { %v2452_v7 = vmin.f32 %v2411_v29, 6.0 }
 0x346   : > { %v2023_v57 = vpop.f32.mrf.mxu3 }
 0x347   : > { %v2698_v3 = vmul.f32 %v8596_v63, %v2452_v7  ;;  %v2132_v11 = vadd.f32 %v2023_v57, %v8177_v45  ;;  %v2262_v41 = vpop.f32.mrf.mxu0  ;;  %v8604_v45 = vpop.f32.mrf.mxu2 }
 0x348   : > { %v2839_v39 = vld [vmem:[#allocation2 + $0x3e] sm:$0xff]  ;;  %11130 = vst [vmem:[#allocation52_spill] sm:$0xff] %v8604_v45 }
 0x349   : > { %v2781_v5 = vld [vmem:[#allocation2 + $0x3d] sm:$0xff]  ;;  %2739 = vst [vmem:[#allocation2 + $0x48] sm:$0xff] %v2698_v3  ;;  %v2371_v33 = vadd.f32 %v2262_v41, %v2132_v11  ;;  %2927 = vmatmul.f32.gmra.mxu1 %v2839_v39  ;;  %v1952_v11 = vld [vmem:[#allocation2 + $0xf2] sm:$0xff]  ;;  %v8608_v41 = vpop.f32.mrf.mxu1 }
 0x34a   : > { %3067 = vmatmul.f32.gmra.mxu2 %v2781_v5  ;;  %2309 = vmatmul.f32.gmra.mxu0 %v2189_v42  ;;  %11131 = vst [vmem:[#allocation54_spill] sm:$0xff] %v8608_v41  ;;  %v3222_v42 = vld [vmem:[#allocation6 + $0x5d0] sm:$0xff] }
 0x34b   : > { %v2412_v29 = vmax.f32 %v2371_v33, 0.0  ;;  %2073 = vmatmul.f32.gmra.mxu3 %v1951_v51  ;;  %v1953_v41 = vld [vmem:[#allocation2 + $0xfa] sm:$0xff] }
 0x34c   : > { %3233 = vmatpush.msrb.mxu3 %v3222_v42 }
 0x34d   : > { %v2453_v7 = vmin.f32 %v2412_v29, 6.0 }
 0x34e   : > { %v2026_v57 = vpop.f32.mrf.mxu3 }
 0x34f   : > { %v2699_v63 = vmul.f32 %v8602_v17, %v2453_v7  ;;  %v2133_v3 = vadd.f32 %v2026_v57, %v8182_v6  ;;  %v2265_v39 = vpop.f32.mrf.mxu0  ;;  %v8610_v7 = vpop.permute.xlu2 %2529 }
 0x350   : > { %v2840_v5 = vld [vmem:[#allocation2 + $0x46] sm:$0xff]  ;;  %11132 = vst [vmem:[#allocation56_spill] sm:$0xff] %v8610_v7  ;;  %v8614_v45 = vpop.f32.mrf.mxu2 }
 0x351   : > { %v2782_v23 = vld [vmem:[#allocation2 + $0x45] sm:$0xff]  ;;  %2740 = vst [vmem:[#allocation2 + $0x50] sm:$0xff] %v2699_v63  ;;  %v2372_v51 = vadd.f32 %v2265_v39, %v2133_v3  ;;  %2930 = vmatmul.f32.gmra.mxu1 %v2840_v5  ;;  %v2191_v5 = vld [vmem:[#allocation2 + $0xf3] sm:$0xff] }
 0x352   : > { %3070 = vmatmul.f32.gmra.mxu2 %v2782_v23  ;;  %2312 = vmatmul.f32.gmra.mxu0 %v2190_v21  ;;  %v8616_v21 = vpop.f32.mrf.mxu1 }
 0x353   : > { %v2413_v33 = vmax.f32 %v2372_v51, 0.0  ;;  %2076 = vmatmul.f32.gmra.mxu3 %v1952_v11  ;;  %v3461_v11 = vld [vmem:[#allocation6 + $0x650] sm:$0xff] }
 0x354   : > { %3472 = vmatpush.msrb.mxu0 %v3461_v11 }
 0x355   : > { %v2454_v29 = vmin.f32 %v2413_v33, 6.0 }
 0x356   : > { %v2029_v6 = vpop.f32.mrf.mxu3 }
 0x357   : > { %v2700_v57 = vmul.f32 %v8610_v7, %v2454_v29  ;;  %v2134_v17 = vadd.f32 %v2029_v6, %v8187_v25  ;;  %v2268_v63 = vpop.f32.mrf.mxu0  ;;  %v8618_v25 = vpop.permute.xlu0 %2534  ;;  %v1954_v7 = vld [vmem:[#allocation2 + $0x102] sm:$0xff] }
 0x358   : > { %v2841_v3 = vld [vmem:[#allocation2 + $0x4e] sm:$0xff]  ;;  %11133 = vst [vmem:[#allocation58_spill] sm:$0xff] %v8618_v25 }
 0x359   : > { %v2783_v39 = vld [vmem:[#allocation2 + $0x4d] sm:$0xff]  ;;  %2741 = vst [vmem:[#allocation2 + $0x58] sm:$0xff] %v2700_v57  ;;  %v2373_v23 = vadd.f32 %v2268_v63, %v2134_v17  ;;  %2933 = vmatmul.f32.gmra.mxu1 %v2841_v3  ;;  %v2192_v3 = vld [vmem:[#allocation2 + $0xfb] sm:$0xff] }
 0x35a   : > { %3073 = vmatmul.f32.gmra.mxu2 %v2783_v39  ;;  %2315 = vmatmul.f32.gmra.mxu0 %v2191_v5  ;;  %v8624_v11 = vpop.f32.mrf.mxu1 }
 0x35b   : > { %v2414_v51 = vmax.f32 %v2373_v23, 0.0  ;;  %2079 = vmatmul.f32.gmra.mxu3 %v1953_v41  ;;  %v3700_v23 = vld [vmem:[#allocation6 + $0x6d0] sm:$0xff]  ;;  %v8622_v41 = vpop.f32.mrf.mxu2 }
 0x35c   : > { %3711 = vmatpush.msrb.mxu1 %v3700_v23 }
 0x35d   : > { %v2455_v42 = vmin.f32 %v2414_v51, 6.0 }
 0x35e   : > { %v2032_v33 = vpop.f32.mrf.mxu3 }
 0x35f   : > { %v2701_v29 = vmul.f32 %v8618_v25, %v2455_v42  ;;  %v2135_v6 = vadd.f32 %v2032_v33, %v8195_v43  ;;  %v2271_v57 = vpop.f32.mrf.mxu0  ;;  %v8626_v43 = vpop.permute.xlu1 %2539  ;;  %v2193_v25 = vld [vmem:[#allocation2 + $0x103] sm:$0xff] }
 0x360   : > { %v2842_v17 = vld [vmem:[#allocation2 + $0x56] sm:$0xff]  ;;  %11134 = vst [vmem:[#allocation60_spill] sm:$0xff] %v8626_v43 }
 0x361   : > { %v2784_v63 = vld [vmem:[#allocation2 + $0x55] sm:$0xff]  ;;  %2742 = vst [vmem:[#allocation2 + $0x60] sm:$0xff] %v2701_v29  ;;  %v2374_v39 = vadd.f32 %v2271_v57, %v2135_v6  ;;  %2936 = vmatmul.f32.gmra.mxu1 %v2842_v17  ;;  %v1955_v6 = vld [vmem:[#allocation2 + $0x10a] sm:$0xff] }
 0x362   : > { %3076 = vmatmul.f32.gmra.mxu2 %v2784_v63  ;;  %2318 = vmatmul.f32.gmra.mxu0 %v2192_v3 }
 0x363   : > { %v2415_v5 = vmax.f32 %v2374_v39, 0.0  ;;  %2082 = vmatmul.f32.gmra.mxu3 %v1954_v7  ;;  %v3221_v7 = vld [vmem:[#allocation6 + $0x5c8] sm:$0xff]  ;;  %v8630_v39 = vpop.f32.mrf.mxu2 }
 0x364   : > { %3234 = vmatpush.msrb.mxu3 %v3221_v7  ;;  %11135 = vst [vmem:[#allocation62_spill] sm:$0xff] %v8630_v39  ;;  %v2194_v7 = vld [vmem:[#allocation2 + $0x10b] sm:$0xff]  ;;  %v3944_v39 = vld [vmem:[#allocation6 + $0x778] sm:$0xff] }
 0x365   : > { %v2456_v51 = vmin.f32 %v2415_v5, 6.0  ;;  %v8632_v5 = vpop.permute.xlu2 %2544  ;;  %3945 = vmatpush.msrb.mxu2 %v3944_v39  ;;  %v3220_v39 = vld [vmem:[#allocation6 + $0x5c0] sm:$0xff] }
 0x366   : > { %v2035_v42 = vpop.f32.mrf.mxu3  ;;  %11136 = vst [vmem:[#allocation66_spill] sm:$0xff] %v8632_v5  ;;  %3235 = vmatpush.msrb.mxu3 %v3220_v39 }
 0x367   : > { %v2702_v33 = vmul.f32 %v8626_v43, %v2456_v51  ;;  %v2136_v29 = vadd.f32 %v2035_v42, %v8204_v58  ;;  %v2274_v57 = vpop.f32.mrf.mxu0  ;;  %v8634_v58 = vpop.f32.mrf.mxu1 }
 0x368   : > { %v2843_v17 = vld [vmem:[#allocation2 + $0x5e] sm:$0xff] }
 0x369   : > { %v2785_v63 = vld [vmem:[#allocation2 + $0x5d] sm:$0xff]  ;;  %2743 = vst [vmem:[#allocation2 + $0x68] sm:$0xff] %v2702_v33  ;;  %v2375_v23 = vadd.f32 %v2274_v57, %v2136_v29  ;;  %2939 = vmatmul.f32.gmra.mxu1 %v2843_v17  ;;  %v1956_v29 = vld [vmem:[#allocation2 + $0x112] sm:$0xff] }
 0x36a   : > { %3079 = vmatmul.f32.gmra.mxu2 %v2785_v63  ;;  %2321 = vmatmul.f32.gmra.mxu0 %v2193_v25  ;;  %v3460_v25 = vld [vmem:[#allocation6 + $0x648] sm:$0xff] }
 0x36b   : > { %v2416_v3 = vmax.f32 %v2375_v23, 0.0  ;;  %2085 = vmatmul.f32.gmra.mxu3 %v1955_v6  ;;  %v3699_v23 = vld [vmem:[#allocation6 + $0x6c8] sm:$0xff]  ;;  %3473 = vmatpush.msrb.mxu0 %v3460_v25 }
 0x36c   : > { %3712 = vmatpush.msrb.mxu1 %v3699_v23 }
 0x36d   : > { %v2457_v51 = vmin.f32 %v2416_v3, 6.0 }
 0x36e   : > { %v2038_v42 = vpop.f32.mrf.mxu3 }
 0x36f   : > { %v2703_v43 = vmul.f32 %v8632_v5, %v2457_v51  ;;  %v2137_v33 = vadd.f32 %v2038_v42, %v8215_v22  ;;  %v2277_v57 = vpop.f32.mrf.mxu0  ;;  %v8638_v51 = vpop.permute.xlu0 %2549 }
 0x370   : > { %v2844_v17 = vld [vmem:[#allocation2 + $0x66] sm:$0xff]  ;;  %11137 = vst [vmem:[#allocation71_spill] sm:$0xff] %v8638_v51  ;;  %v8640_v42 = vpop.f32.mrf.mxu2 }
 0x371   : > { %v2786_v63 = vld [vmem:[#allocation2 + $0x65] sm:$0xff]  ;;  %2744 = vst [vmem:[#allocation2 + $0x70] sm:$0xff] %v2703_v43  ;;  %v2376_v6 = vadd.f32 %v2277_v57, %v2137_v33  ;;  %2942 = vmatmul.f32.gmra.mxu1 %v2844_v17  ;;  %v1957_v57 = vld [vmem:[#allocation2 + $0x11a] sm:$0xff]  ;;  %v8644_v17 = vpop.f32.mrf.mxu1 }
 0x372   : > { %3082 = vmatmul.f32.gmra.mxu2 %v2786_v63  ;;  %2324 = vmatmul.f32.gmra.mxu0 %v2194_v7  ;;  %11138 = vst [vmem:[#allocation72_spill] sm:$0xff] %v8640_v42 }
 0x373   : > { %v2417_v3 = vmax.f32 %v2376_v6, 0.0  ;;  %2088 = vmatmul.f32.gmra.mxu3 %v1956_v29  ;;  %11139 = vst [vmem:[#allocation73_spill] sm:$0xff] %v8644_v17  ;;  %v2195_v6 = vld [vmem:[#allocation2 + $0x113] sm:$0xff]  ;;  %v1958_v17 = vld [vmem:[#allocation2 + $0x122] sm:$0xff] }
 0x375   : > { %v2458_v22 = vmin.f32 %v2417_v3, 6.0 }
 0x376   : > { %v2041_v5 = vpop.f32.mrf.mxu3 }
 0x377   : > { %v2704_v43 = vmul.f32 %v8638_v51, %v2458_v22  ;;  %v2138_v33 = vadd.f32 %v2041_v5, %v8226_v27  ;;  %v2280_v63 = vpop.f32.mrf.mxu0  ;;  %v8646_v22 = vpop.permute.xlu1 %2554 }
 0x378   : > { %v2845_v25 = vld [vmem:[#allocation2 + $0x6e] sm:$0xff]  ;;  %11140 = vst [vmem:[#allocation74_spill] sm:$0xff] %v8646_v22  ;;  %v8650_v42 = vpop.f32.mrf.mxu2 }
 0x379   : > { %v2787_v23 = vld [vmem:[#allocation2 + $0x6d] sm:$0xff]  ;;  %2745 = vst [vmem:[#allocation2 + $0x78] sm:$0xff] %v2704_v43  ;;  %v2377_v29 = vadd.f32 %v2280_v63, %v2138_v33  ;;  %2945 = vmatmul.f32.gmra.mxu1 %v2845_v25  ;;  %v2196_v25 = vld [vmem:[#allocation2 + $0x11b] sm:$0xff] }
 0x37a   : > { %3085 = vmatmul.f32.gmra.mxu2 %v2787_v23  ;;  %2327 = vmatmul.f32.gmra.mxu0 %v2195_v6  ;;  %v8652_v6 = vpop.f32.mrf.mxu1 }
 0x37b   : > { %v2418_v7 = vmax.f32 %v2377_v29, 0.0  ;;  %2091 = vmatmul.f32.gmra.mxu3 %v1957_v57  ;;  %v3459_v57 = vld [vmem:[#allocation6 + $0x640] sm:$0xff] }
 0x37c   : > { %3474 = vmatpush.msrb.mxu0 %v3459_v57 }
 0x37d   : > { %v2459_v3 = vmin.f32 %v2418_v7, 6.0 }
 0x37e   : > { %v2044_v27 = vpop.f32.mrf.mxu3 }
 0x37f   : > { %v2705_v5 = vmul.f32 %v8646_v22, %v2459_v3  ;;  %v2139_v51 = vadd.f32 %v2044_v27, %v8237_v15  ;;  %v2283_v43 = vpop.f32.mrf.mxu0  ;;  %v8654_v15 = vpop.permute.xlu2 %2559  ;;  %v1959_v22 = vld [vmem:[#allocation2 + $0x12a] sm:$0xff] }
 0x380   : > { %v2846_v33 = vld [vmem:[#allocation2 + $0x76] sm:$0xff]  ;;  %11141 = vst [vmem:[#allocation75_spill] sm:$0xff] %v8654_v15 }
 0x381   : > { %v2788_v63 = vld [vmem:[#allocation2 + $0x75] sm:$0xff]  ;;  %2746 = vst [vmem:[#allocation2 + $0x80] sm:$0xff] %v2705_v5  ;;  %v2378_v23 = vadd.f32 %v2283_v43, %v2139_v51  ;;  %2948 = vmatmul.f32.gmra.mxu1 %v2846_v33  ;;  %v2197_v33 = vld [vmem:[#allocation2 + $0x123] sm:$0xff] }
 0x382   : > { %3088 = vmatmul.f32.gmra.mxu2 %v2788_v63  ;;  %2330 = vmatmul.f32.gmra.mxu0 %v2196_v25  ;;  %v8658_v25 = vpop.f32.mrf.mxu2  ;;  %v8660_v57 = vpop.f32.mrf.mxu1 }
 0x383   : > { %v2419_v29 = vmax.f32 %v2378_v23, 0.0  ;;  %2094 = vmatmul.f32.gmra.mxu3 %v1958_v17  ;;  %v3698_v23 = vld [vmem:[#allocation6 + $0x6c0] sm:$0xff]  ;;  %v3943_v17 = vld [vmem:[#allocation6 + $0x770] sm:$0xff]  ;;  %11142 = vst [vmem:[#allocation76_spill] sm:$0xff] %v8660_v57 }
 0x384   : > { %3713 = vmatpush.msrb.mxu1 %v3698_v23  ;;  %3946 = vmatpush.msrb.mxu2 %v3943_v17  ;;  %v2198_v23 = vld [vmem:[#allocation2 + $0x12b] sm:$0xff] }
 0x385   : > { %v2460_v39 = vmin.f32 %v2419_v29, 6.0 }
 0x386   : > { %v2047_v7 = vpop.f32.mrf.mxu3 }
 0x387   : > { %v2706_v3 = vmul.f32 %v8654_v15, %v2460_v39  ;;  %v2140_v27 = vadd.f32 %v2047_v7, %v8252_v30  ;;  %v2286_v5 = vpop.f32.mrf.mxu0  ;;  %v8662_v39 = vpop.permute.xlu0 %2564 }
 0x388   : > { %v2847_v51 = vld [vmem:[#allocation2 + $0x7e] sm:$0xff]  ;;  %11143 = vst [vmem:[#allocation77_spill] sm:$0xff] %v8662_v39 }
 0x389   : > { %v2789_v43 = vld [vmem:[#allocation2 + $0x7d] sm:$0xff]  ;;  %2747 = vst [vmem:[#allocation2 + $0x88] sm:$0xff] %v2706_v3  ;;  %v2379_v63 = vadd.f32 %v2286_v5, %v2140_v27  ;;  %2951 = vmatmul.f32.gmra.mxu1 %v2847_v51  ;;  %v1425_v3 = vadd.f32 %v8269_v38, %v8267_v62  ;;  %v1960_v51 = vld [vmem:[#allocation2 + $0x132] sm:$0xff] }
 0x38a   : > { %3091 = vmatmul.f32.gmra.mxu2 %v2789_v43  ;;  %2333 = vmatmul.f32.gmra.mxu0 %v2197_v33  ;;  %v8668_v33 = vpop.f32.mrf.mxu2  ;;  %v8671_v38 = vpop.f32.mrf.mxu1 }
 0x38b   : > { %v2420_v29 = vmax.f32 %v2379_v63, 0.0  ;;  %2097 = vmatmul.f32.gmra.mxu3 %v1959_v22  ;;  %v3219_v22 = vld [vmem:[#allocation6 + $0x5b8] sm:$0xff]  ;;  %v1664_v17 = vadd.f32 %v8415_v40, %v1425_v3 }
 0x38c   : > { %3236 = vmatpush.msrb.mxu3 %v3219_v22 }
 0x38d   : > { %v2461_v30 = vmin.f32 %v2420_v29, 6.0 }
 0x38e   : > { %v2050_v7 = vpop.f32.mrf.mxu3 }
 0x38f   : > { %v2707_v27 = vmul.f32 %v8662_v39, %v2461_v30  ;;  %v2141_v5 = vadd.f32 %v2050_v7, %v8271_v26  ;;  %v2289_v43 = vpop.f32.mrf.mxu0  ;;  %v1903_v26 = vadd.f32 %v8424_v49, %v1664_v17  ;;  %v8674_v30 = vpop.permute.xlu1 %2569  ;;  %v3458_v49 = vld [vmem:[#allocation6 + $0x638] sm:$0xff] }
 0x390   : > { %v2848_v15 = vld [vmem:[#allocation2 + $0x86] sm:$0xff]  ;;  %11144 = vst [vmem:[#allocation78_spill] sm:$0xff] %v8674_v30  ;;  %3475 = vmatpush.msrb.mxu0 %v3458_v49 }
 0x391   : > { %v2790_v57 = vld [vmem:[#allocation2 + $0x85] sm:$0xff]  ;;  %2748 = vst [vmem:[#allocation2 + $0x90] sm:$0xff] %v2707_v27  ;;  %v2380_v63 = vadd.f32 %v2289_v43, %v2141_v5  ;;  %2954 = vmatmul.f32.gmra.mxu1 %v2848_v15  ;;  %v1426_v15 = vadd.f32 %v8284_v28, %v8282_v46  ;;  %v1961_v5 = vld [vmem:[#allocation2 + $0x13a] sm:$0xff] }
 0x392   : > { %3094 = vmatmul.f32.gmra.mxu2 %v2790_v57  ;;  %2336 = vmatmul.f32.gmra.mxu0 %v2198_v23  ;;  %v8680_v46 = vpop.f32.mrf.mxu2 }
 0x393   : > { %v2421_v62 = vmax.f32 %v2380_v63, 0.0  ;;  %2100 = vmatmul.f32.gmra.mxu3 %v1960_v51  ;;  %v2199_v51 = vld [vmem:[#allocation2 + $0x133] sm:$0xff]  ;;  %v3697_v63 = vld [vmem:[#allocation6 + $0x6b8] sm:$0xff]  ;;  %v1665_v22 = vadd.f32 %v8430_v1, %v1426_v15 }
 0x394   : > { %3714 = vmatpush.msrb.mxu1 %v3697_v63  ;;  %v8690_v63 = vpop.permute.xlu0 %2579 }
 0x395   : > { %v2462_v29 = vmin.f32 %v2421_v62, 6.0  ;;  %v1904_v28 = vadd.f32 %v8442_v60, %v1665_v22  ;;  %v8683_v62 = vpop.permute.xlu2 %2574  ;;  %v3942_v60 = vld [vmem:[#allocation6 + $0x768] sm:$0xff]  ;;  %11146 = vst [vmem:[#allocation80_spill] sm:$0xff] %v8690_v63 }
 0x396   : > { %v2053_v7 = vpop.f32.mrf.mxu3  ;;  %11145 = vst [vmem:[#allocation79_spill] sm:$0xff] %v8683_v62  ;;  %3947 = vmatpush.msrb.mxu2 %v3942_v60 }
 0x397   : > { %v2708_v57 = vmul.f32 %v8674_v30, %v2462_v29  ;;  %v2142_v27 = vadd.f32 %v2053_v7, %v1903_v26  ;;  %v2292_v43 = vpop.f32.mrf.mxu0 }
 0x398   : > { %v2849_v40 = vld [vmem:[#allocation2 + $0x8e] sm:$0xff] }
 0x399   : > { %v2791_v3 = vld [vmem:[#allocation2 + $0x8d] sm:$0xff]  ;;  %2749 = vst [vmem:[#allocation2 + $0x98] sm:$0xff] %v2708_v57  ;;  %v2381_v23 = vadd.f32 %v2292_v43, %v2142_v27  ;;  %2957 = vmatmul.f32.gmra.mxu1 %v2849_v40  ;;  %v1427_v57 = vadd.f32 %v8300_v34, %v8298_v48  ;;  %v1962_v40 = vld [vmem:[#allocation2 + $0x142] sm:$0xff] }
 0x39a   : > { %3097 = vmatmul.f32.gmra.mxu2 %v2791_v3  ;;  %2339 = vmatmul.f32.gmra.mxu0 %v2199_v51  ;;  %v2200_v3 = vld [vmem:[#allocation2 + $0x13b] sm:$0xff] }
 0x39b   : > { %v2422_v17 = vmax.f32 %v2381_v23, 0.0  ;;  %2103 = vmatmul.f32.gmra.mxu3 %v1961_v5  ;;  %v1666_v23 = vadd.f32 %v8446_v20, %v1427_v57  ;;  %v1963_v20 = vld [vmem:[#allocation2 + $0x14a] sm:$0xff]  ;;  %v3218_v57 = vld [vmem:[#allocation6 + $0x5b0] sm:$0xff] }
 0x39c   : > { %3237 = vmatpush.msrb.mxu3 %v3218_v57  ;;  %v3214_v57 = vld [vmem:[#allocation6 + $0x590] sm:$0xff] }
 0x39d   : > { %v2463_v26 = vmin.f32 %v2422_v17, 6.0  ;;  %v1905_v34 = vadd.f32 %v8458_v52, %v1666_v23  ;;  %v8699_v23 = vpop.permute.xlu1 %2584 }
 0x39e   : > { %v2056_v29 = vpop.f32.mrf.mxu3  ;;  %v2913_v7 = vpop.f32.mrf.mxu1  ;;  %11147 = vst [vmem:[#allocation81_spill] sm:$0xff] %v8699_v23 }
 0x39f   : > { %v2709_v27 = vmul.f32 %v8683_v62, %v2463_v26  ;;  %v2143_v43 = vadd.f32 %v2056_v29, %v1904_v28  ;;  %v2295_v1 = vpop.f32.mrf.mxu0  ;;  %v1428_v29 = vadd.f32 %v8316_v56, %v8314_v10  ;;  %v3216_v10 = vld [vmem:[#allocation6 + $0x5a0] sm:$0xff]  ;;  %v8966_v62 = vld [vmem:[#allocation2 + $0x59] sm:$0xff] }
 0x3a0   : > { %v2850_v15 = vld [vmem:[#allocation2 + $0x96] sm:$0xff] }
 0x3a1   : > { %v2792_v5 = vld [vmem:[#allocation2 + $0x95] sm:$0xff]  ;;  %2750 = vst [vmem:[#allocation2 + $0xa0] sm:$0xff] %v2709_v27  ;;  %v2382_v51 = vadd.f32 %v2295_v1, %v2143_v43  ;;  %2960 = vmatmul.f32.gmra.mxu1 %v2850_v15 }
 0x3a2   : > { %3100 = vmatmul.f32.gmra.mxu2 %v2792_v5  ;;  %2342 = vmatmul.f32.gmra.mxu0 %v2200_v3  ;;  %v2201_v5 = vld [vmem:[#allocation2 + $0x143] sm:$0xff]  ;;  %v1667_v3 = vadd.f32 %v8462_v59, %v1428_v29  ;;  %v1429_v59 = vadd.f32 %v8332_v37, %v8330_v32  ;;  %v3456_v32 = vld [vmem:[#allocation6 + $0x628] sm:$0xff] }
 0x3a3   : > { %v2423_v49 = vmax.f32 %v2382_v51, 0.0  ;;  %2106 = vmatmul.f32.gmra.mxu3 %v1962_v40 }
 0x3a4   : > { %v1906_v60 = vadd.f32 %v8472_v53, %v1667_v3  ;;  %v1668_v37 = vadd.f32 %v8474_v4, %v1429_v59  ;;  %v1430_v4 = vadd.f32 %v8348_v14, %v8346_v44  ;;  %v3451_v44 = vld [vmem:[#allocation6 + $0x600] sm:$0xff] }
 0x3a5   : > { %v3053_v48 = vpop.f32.mrf.mxu2  ;;  %v2464_v22 = vmin.f32 %v2423_v49, 6.0 }
 0x3a6   : > { %v8692_v17 = vadd.f32 %v3053_v48, %v2913_v7  ;;  %v2059_v28 = vpop.f32.mrf.mxu3  ;;  %v2916_v26 = vpop.f32.mrf.mxu1  ;;  %v3217_v7 = vld [vmem:[#allocation6 + $0x5a8] sm:$0xff] }
 0x3a7   : > { %v2710_v27 = vmul.f32 %v8690_v63, %v2464_v22  ;;  %v2144_v43 = vadd.f32 %v2059_v28, %v1905_v34  ;;  %v2298_v40 = vpop.f32.mrf.mxu0  ;;  %3238 = vmatpush.msrb.mxu3 %v3217_v7  ;;  %v3215_v34 = vld [vmem:[#allocation6 + $0x598] sm:$0xff]  ;;  %v3213_v7 = vld [vmem:[#allocation6 + $0x588] sm:$0xff]  ;;  %v3656_v63 = vld [vmem:[#allocation2 + $0x58] sm:$0xff] }
 0x3a8   : > { %v2851_v1 = vld [vmem:[#allocation2 + $0x9e] sm:$0xff] }
 0x3a9   : > { %v2793_v15 = vld [vmem:[#allocation2 + $0x9d] sm:$0xff]  ;;  %2751 = vst [vmem:[#allocation2 + $0xa8] sm:$0xff] %v2710_v27  ;;  %v2383_v52 = vadd.f32 %v2298_v40, %v2144_v43  ;;  %2963 = vmatmul.f32.gmra.mxu1 %v2851_v1  ;;  %3239 = vmatpush.msrb.mxu3 %v3216_v10  ;;  %v1964_v43 = vld [vmem:[#allocation2 + $0x152] sm:$0xff]  ;;  %v3455_v10 = vld [vmem:[#allocation6 + $0x620] sm:$0xff] }
 0x3aa   : > { %3103 = vmatmul.f32.gmra.mxu2 %v2793_v15  ;;  %2345 = vmatmul.f32.gmra.mxu0 %v2201_v5  ;;  %v2202_v15 = vld [vmem:[#allocation2 + $0x14b] sm:$0xff]  ;;  %v3696_v5 = vld [vmem:[#allocation6 + $0x6b0] sm:$0xff] }
 0x3ab   : > { %v2424_v51 = vmax.f32 %v2383_v52, 0.0  ;;  %2109 = vmatmul.f32.gmra.mxu3 %v1963_v20  ;;  %v3457_v20 = vld [vmem:[#allocation6 + $0x630] sm:$0xff]  ;;  %v3941_v52 = vld [vmem:[#allocation6 + $0x760] sm:$0xff]  ;;  %3715 = vmatpush.msrb.mxu1 %v3696_v5  ;;  %v1669_v5 = vadd.f32 %v8483_v31, %v1430_v4 }
 0x3ac   : > { %3240 = vmatpush.msrb.mxu3 %v3215_v34  ;;  %3476 = vmatpush.msrb.mxu0 %v3457_v20 }
 0x3ad   : > { %v3056_v56 = vpop.f32.mrf.mxu2  ;;  %v2465_v49 = vmin.f32 %v2424_v51, 6.0  ;;  %3948 = vmatpush.msrb.mxu2 %v3941_v52  ;;  %v3212_v51 = vld [vmem:[#allocation6 + $0x580] sm:$0xff] }
 0x3ae   : > { %v8701_v48 = vadd.f32 %v3056_v56, %v2916_v26  ;;  %v2062_v22 = vpop.f32.mrf.mxu3  ;;  %v2919_v28 = vpop.f32.mrf.mxu1  ;;  %3241 = vmatpush.msrb.mxu3 %v3214_v57  ;;  %3477 = vmatpush.msrb.mxu0 %v3456_v32  ;;  %v1965_v57 = vld [vmem:[#allocation2 + $0x15a] sm:$0xff] }
 0x3af   : > { %v2711_v29 = vmul.f32 %v8699_v23, %v2465_v49  ;;  %v2145_v27 = vadd.f32 %v2062_v22, %v1906_v60  ;;  %v2301_v40 = vpop.f32.mrf.mxu0  ;;  %v1907_v60 = vadd.f32 %v8481_v55, %v1668_v37  ;;  %v8708_v49 = vpop.permute.xlu2 %2589 }
 0x3b0   : > { %v2852_v53 = vld [vmem:[#allocation2 + $0xa6] sm:$0xff]  ;;  %3242 = vmatpush.msrb.mxu3 %v3213_v7  ;;  %11148 = vst [vmem:[#allocation82_spill] sm:$0xff] %v8708_v49  ;;  %3478 = vmatpush.msrb.mxu0 %v3455_v10  ;;  %v1908_v7 = vadd.f32 %v8490_v50, %v1669_v5  ;;  %v8717_v32 = vpop.permute.xlu0 %2594 }
 0x3b1   : > { %v2794_v1 = vld [vmem:[#allocation2 + $0xa5] sm:$0xff]  ;;  %2752 = vst [vmem:[#allocation2 + $0xb0] sm:$0xff] %v2711_v29  ;;  %v2384_v26 = vadd.f32 %v2301_v40, %v2145_v27  ;;  %2966 = vmatmul.f32.gmra.mxu1 %v2852_v53  ;;  %v3453_v40 = vld [vmem:[#allocation6 + $0x610] sm:$0xff] }
 0x3b2   : > { %3106 = vmatmul.f32.gmra.mxu2 %v2794_v1  ;;  %2348 = vmatmul.f32.gmra.mxu0 %v2202_v15  ;;  %v3454_v29 = vld [vmem:[#allocation6 + $0x618] sm:$0xff]  ;;  %v2203_v15 = vld [vmem:[#allocation2 + $0x153] sm:$0xff]  ;;  %11149 = vst [vmem:[#allocation83_spill] sm:$0xff] %v8717_v32 }
 0x3b3   : > { %v2425_v3 = vmax.f32 %v2384_v26, 0.0  ;;  %2112 = vmatmul.f32.gmra.mxu3 %v1964_v43  ;;  %3479 = vmatpush.msrb.mxu0 %v3454_v29  ;;  %v3452_v26 = vld [vmem:[#allocation6 + $0x608] sm:$0xff] }
 0x3b4   : > { %3243 = vmatpush.msrb.mxu3 %v3212_v51 }
 0x3b5   : > { %v3059_v56 = vpop.f32.mrf.mxu2  ;;  %v2466_v34 = vmin.f32 %v2425_v3, 6.0  ;;  %3480 = vmatpush.msrb.mxu0 %v3453_v40  ;;  %v8726_v40 = vpop.permute.xlu1 %2599 }
 0x3b6   : > { %v8710_v22 = vadd.f32 %v3059_v56, %v2919_v28  ;;  %v2065_v27 = vpop.f32.mrf.mxu3  ;;  %v2922_v20 = vpop.f32.mrf.mxu1  ;;  %v1431_v56 = vadd.f32 %v8364_v16, %v8362_v9  ;;  %11150 = vst [vmem:[#allocation84_spill] sm:$0xff] %v8726_v40 }
 0x3b7   : > { %v2712_v59 = vmul.f32 %v8708_v49, %v2466_v34  ;;  %v2146_v43 = vadd.f32 %v2065_v27, %v1907_v60  ;;  %v2304_v53 = vpop.f32.mrf.mxu0  ;;  %3481 = vmatpush.msrb.mxu0 %v3452_v26  ;;  %v1966_v34 = vld [vmem:[#allocation2 + $0x162] sm:$0xff]  ;;  %v8956_v49 = vld [vmem:[#allocation2 + $0x51] sm:$0xff] }
 0x3b8   : > { %v2853_v55 = vld [vmem:[#allocation2 + $0xae] sm:$0xff] }
 0x3b9   : > { %v2795_v1 = vld [vmem:[#allocation2 + $0xad] sm:$0xff]  ;;  %2753 = vst [vmem:[#allocation2 + $0xb8] sm:$0xff] %v2712_v59  ;;  %v2385_v28 = vadd.f32 %v2304_v53, %v2146_v43  ;;  %2969 = vmatmul.f32.gmra.mxu1 %v2853_v55  ;;  %3482 = vmatpush.msrb.mxu0 %v3451_v44  ;;  %v2204_v59 = vld [vmem:[#allocation2 + $0x15b] sm:$0xff]  ;;  %v1670_v43 = vadd.f32 %v8495_v18, %v1431_v56  ;;  %v8735_v56 = vpop.permute.xlu2 %2604 }
 0x3ba   : > { %3109 = vmatmul.f32.gmra.mxu2 %v2795_v1  ;;  %2351 = vmatmul.f32.gmra.mxu0 %v2203_v15  ;;  %v1967_v18 = vld [vmem:[#allocation2 + $0x16a] sm:$0xff]  ;;  %11151 = vst [vmem:[#allocation85_spill] sm:$0xff] %v8735_v56 }
 0x3bb   : > { %v2426_v52 = vmax.f32 %v2385_v28, 0.0  ;;  %2115 = vmatmul.f32.gmra.mxu3 %v1965_v57  ;;  %v1909_v16 = vadd.f32 %v8502_v24, %v1670_v43  ;;  %v1432_v28 = vadd.f32 %v8381_v47, %v8379_v13 }
 0x3bd   : > { %v3062_v14 = vpop.f32.mrf.mxu2  ;;  %v2467_v37 = vmin.f32 %v2426_v52, 6.0 }
 0x3be   : > { %v8719_v3 = vadd.f32 %v3062_v14, %v2922_v20  ;;  %v2068_v51 = vpop.f32.mrf.mxu3  ;;  %v2925_v10 = vpop.f32.mrf.mxu1  ;;  %v3695_v20 = vld [vmem:[#allocation6 + $0x6a8] sm:$0xff] }
 0x3bf   : > { %v2713_v31 = vmul.f32 %v8717_v32, %v2467_v37  ;;  %v2147_v60 = vadd.f32 %v2068_v51, %v1908_v7  ;;  %v2307_v29 = vpop.f32.mrf.mxu0  ;;  %3716 = vmatpush.msrb.mxu1 %v3695_v20  ;;  %v2205_v7 = vld [vmem:[#allocation2 + $0x163] sm:$0xff]  ;;  %v1671_v51 = vadd.f32 %v8506_v2, %v1432_v28  ;;  %v2206_v2 = vld [vmem:[#allocation2 + $0x16b] sm:$0xff] }
 0x3c0   : > { %v2854_v27 = vld [vmem:[#allocation2 + $0xb6] sm:$0xff]  ;;  %v3940_v37 = vld [vmem:[#allocation6 + $0x758] sm:$0xff] }
 0x3c1   : > { %v2796_v4 = vld [vmem:[#allocation2 + $0xb5] sm:$0xff]  ;;  %2754 = vst [vmem:[#allocation2 + $0xc0] sm:$0xff] %v2713_v31  ;;  %v2386_v50 = vadd.f32 %v2307_v29, %v2147_v60  ;;  %2972 = vmatmul.f32.gmra.mxu1 %v2854_v27  ;;  %3949 = vmatpush.msrb.mxu2 %v3940_v37  ;;  %v1910_v47 = vadd.f32 %v8513_v19, %v1671_v51 }
 0x3c2   : > { %3112 = vmatmul.f32.gmra.mxu2 %v2796_v4  ;;  %2354 = vmatmul.f32.gmra.mxu0 %v2204_v59  ;;  %v11152_v27 = vld [vmem:[#allocation12_spill] sm:$0xff]  ;;  %v11153_v4 = vld [vmem:[#allocation13_spill] sm:$0xff]  ;;  %v11158_v37 = vld [vmem:[#allocation15_spill] sm:$0xff] }
 0x3c3   : > { %v2427_v57 = vmax.f32 %v2386_v50, 0.0  ;;  %2118 = vmatmul.f32.gmra.mxu3 %v1966_v34  ;;  %v1433_v59 = vadd.f32 %v11153_v4, %v11152_v27  ;;  %v3171_v27 = vld [vmem:[#allocation2 + $0xf] sm:$0xff] }
 0x3c5   : > { %v3065_v9 = vpop.f32.mrf.mxu2  ;;  %v2468_v53 = vmin.f32 %v2427_v57, 6.0 }
 0x3c6   : > { %v8728_v55 = vadd.f32 %v3065_v9, %v2925_v10  ;;  %v2071_v1 = vpop.f32.mrf.mxu3  ;;  %v2928_v15 = vpop.f32.mrf.mxu1 }
 0x3c7   : > { %v2714_v26 = vmul.f32 %v8726_v40, %v2468_v53  ;;  %v2148_v5 = vadd.f32 %v2071_v1, %v1909_v16  ;;  %v2310_v52 = vpop.f32.mrf.mxu0  ;;  %v3170_v16 = vld [vmem:[#allocation2 + $0x7] sm:$0xff]  ;;  %v11154_v53 = vld [vmem:[#allocation36_spill] sm:$0xff] }
 0x3c8   : > { %v2855_v44 = vld [vmem:[#allocation2 + $0xbe] sm:$0xff]  ;;  %v1672_v1 = vadd.f32 %v11154_v53, %v1433_v59  ;;  %v3694_v59 = vld [vmem:[#allocation6 + $0x6a0] sm:$0xff] }
 0x3c9   : > { %v2797_v14 = vld [vmem:[#allocation2 + $0xbd] sm:$0xff]  ;;  %2755 = vst [vmem:[#allocation2 + $0xc8] sm:$0xff] %v2714_v26  ;;  %v2387_v24 = vadd.f32 %v2310_v52, %v2148_v5  ;;  %2975 = vmatmul.f32.gmra.mxu1 %v2855_v44  ;;  %v11155_v26 = vld [vmem:[#allocation39_spill] sm:$0xff] }
 0x3ca   : > { %3115 = vmatmul.f32.gmra.mxu2 %v2797_v14  ;;  %2357 = vmatmul.f32.gmra.mxu0 %v2205_v7  ;;  %v1911_v5 = vadd.f32 %v11155_v26, %v1672_v1  ;;  %v11162_v26 = vld [vmem:[#allocation16_spill] sm:$0xff] }
 0x3cb   : > { %v2428_v10 = vmax.f32 %v2387_v24, 0.0  ;;  %2121 = vmatmul.f32.gmra.mxu3 %v1967_v18  ;;  %v8744_v18 = vpop.permute.xlu0 %2609  ;;  %v11157_v24 = vld [vmem:[#allocation14_spill] sm:$0xff]  ;;  %3717 = vmatpush.msrb.mxu1 %v3694_v59 }
 0x3cc   : > { %11156 = vst [vmem:[#allocation12_spill] sm:$0xff] %v8744_v18  ;;  %v1434_v51 = vadd.f32 %v11158_v37, %v11157_v24 }
 0x3cd   : > { %v3068_v13 = vpop.f32.mrf.mxu2  ;;  %v2469_v31 = vmin.f32 %v2428_v10, 6.0 }
 0x3ce   : > { %v8737_v60 = vadd.f32 %v3068_v13, %v2928_v15  ;;  %v2074_v34 = vpop.f32.mrf.mxu3  ;;  %v2931_v29 = vpop.f32.mrf.mxu1 }
 0x3cf   : > { %v2715_v50 = vmul.f32 %v8735_v56, %v2469_v31  ;;  %v2149_v20 = vadd.f32 %v2074_v34, %v1910_v47  ;;  %v2313_v43 = vpop.f32.mrf.mxu0  ;;  %v8946_v56 = vld [vmem:[#allocation2 + $0x49] sm:$0xff] }
 0x3d0   : > { %v2856_v57 = vld [vmem:[#allocation2 + $0xc6] sm:$0xff] }
 0x3d1   : > { %v2798_v9 = vld [vmem:[#allocation2 + $0xc5] sm:$0xff]  ;;  %2756 = vst [vmem:[#allocation2 + $0xd0] sm:$0xff] %v2715_v50  ;;  %v2388_v19 = vadd.f32 %v2313_v43, %v2149_v20  ;;  %2978 = vmatmul.f32.gmra.mxu1 %v2856_v57  ;;  %v3939_v50 = vld [vmem:[#allocation6 + $0x750] sm:$0xff] }
 0x3d2   : > { %3118 = vmatmul.f32.gmra.mxu2 %v2798_v9  ;;  %2360 = vmatmul.f32.gmra.mxu0 %v2206_v2  ;;  %v11159_v20 = vld [vmem:[#allocation40_spill] sm:$0xff]  ;;  %v11160_v9 = vld [vmem:[#allocation43_spill] sm:$0xff] }
 0x3d3   : > { %v2429_v15 = vmax.f32 %v2388_v19, 0.0  ;;  %3244 = vmatmul.f32.vlgmr.msrb.gmra.mxu3 %v3170_v16  ;;  %3950 = vmatpush.msrb.mxu2 %v3939_v50  ;;  %v1673_v2 = vadd.f32 %v11159_v20, %v1434_v51  ;;  %v8753_v19 = vpop.permute.xlu1 %2614  ;;  %v8762_v50 = vpop.permute.xlu2 %2619 }
 0x3d4   : > { %11161 = vst [vmem:[#allocation13_spill] sm:$0xff] %v8753_v19 }
 0x3d5   : > { %v3071_v28 = vpop.f32.mrf.mxu2  ;;  %v2470_v52 = vmin.f32 %v2429_v15, 6.0  ;;  %v1912_v16 = vadd.f32 %v11160_v9, %v1673_v2  ;;  %11166 = vst [vmem:[#allocation36_spill] sm:$0xff] %v8762_v50  ;;  %v11167_v9 = vld [vmem:[#allocation18_spill] sm:$0xff] }
 0x3d6   : > { %v8746_v44 = vadd.f32 %v3071_v28, %v2931_v29  ;;  %v2077_v14 = vpop.f32.mrf.mxu3  ;;  %v2934_v7 = vpop.f32.mrf.mxu1  ;;  %v3409_v29 = vld [vmem:[#allocation2 + $0x17] sm:$0xff] }
 0x3d7   : > { %v2716_v10 = vmul.f32 %v8744_v18, %v2470_v52  ;;  %v2150_v13 = vadd.f32 %v2077_v14, %v1911_v5  ;;  %v2316_v47 = vpop.f32.mrf.mxu0  ;;  %v11163_v5 = vld [vmem:[#allocation17_spill] sm:$0xff]  ;;  %v3654_v18 = vld [vmem:[#allocation2 + $0x48] sm:$0xff] }
 0x3d8   : > { %v2857_v31 = vld [vmem:[#allocation2 + $0xce] sm:$0xff]  ;;  %v1435_v52 = vadd.f32 %v11163_v5, %v11162_v26 }
 0x3d9   : > { %v2799_v34 = vld [vmem:[#allocation2 + $0xcd] sm:$0xff]  ;;  %2757 = vst [vmem:[#allocation2 + $0xd8] sm:$0xff] %v2716_v10  ;;  %v2389_v4 = vadd.f32 %v2316_v47, %v2150_v13  ;;  %2981 = vmatmul.f32.gmra.mxu1 %v2857_v31  ;;  %v3410_v47 = vld [vmem:[#allocation2 + $0x1f] sm:$0xff] }
 0x3da   : > { %3121 = vmatmul.f32.gmra.mxu2 %v2799_v34  ;;  %3483 = vmatmul.f32.vlgmr.msrb.gmra.mxu0 %v3409_v29  ;;  %v11164_v31 = vld [vmem:[#allocation46_spill] sm:$0xff] }
 0x3db   : > { %v2430_v43 = vmax.f32 %v2389_v4, 0.0  ;;  %3247 = vmatmul.f32.gmra.mxu3 %v3171_v27  ;;  %v1674_v34 = vadd.f32 %v11164_v31, %v1435_v52  ;;  %v11165_v4 = vld [vmem:[#allocation51_spill] sm:$0xff]  ;;  %v11170_v31 = vld [vmem:[#allocation57_spill] sm:$0xff] }
 0x3dd   : > { %v3074_v57 = vpop.f32.mrf.mxu2  ;;  %v2471_v53 = vmin.f32 %v2430_v43, 6.0  ;;  %v1913_v59 = vadd.f32 %v11165_v4, %v1674_v34 }
 0x3de   : > { %v8755_v1 = vadd.f32 %v3074_v57, %v2934_v7  ;;  %v2080_v15 = vpop.f32.mrf.mxu3  ;;  %v2937_v28 = vpop.f32.mrf.mxu1 }
 0x3df   : > { %v2717_v14 = vmul.f32 %v8753_v19, %v2471_v53  ;;  %v2151_v24 = vadd.f32 %v2080_v15, %v1912_v16  ;;  %v2319_v37 = vpop.f32.mrf.mxu0  ;;  %v11168_v16 = vld [vmem:[#allocation19_spill] sm:$0xff] }
 0x3e0   : > { %v2858_v51 = vld [vmem:[#allocation2 + $0xd6] sm:$0xff]  ;;  %v1436_v53 = vadd.f32 %v11168_v16, %v11167_v9 }
 0x3e1   : > { %v2800_v10 = vld [vmem:[#allocation2 + $0xd5] sm:$0xff]  ;;  %2758 = vst [vmem:[#allocation2 + $0xe0] sm:$0xff] %v2717_v14  ;;  %v2390_v13 = vadd.f32 %v2319_v37, %v2151_v24  ;;  %2984 = vmatmul.f32.gmra.mxu1 %v2858_v51  ;;  %v3693_v24 = vld [vmem:[#allocation6 + $0x698] sm:$0xff] }
 0x3e2   : > { %3124 = vmatmul.f32.gmra.mxu2 %v2800_v10  ;;  %3486 = vmatmul.f32.gmra.mxu0 %v3410_v47  ;;  %v3411_v37 = vld [vmem:[#allocation2 + $0x27] sm:$0xff]  ;;  %v11173_v9 = vld [vmem:[#allocation20_spill] sm:$0xff] }
 0x3e3   : > { %v2431_v7 = vmax.f32 %v2390_v13, 0.0  ;;  %3250 = vmatmul.f32.gmra.mxu3 %v3409_v29  ;;  %3718 = vmatpush.msrb.mxu1 %v3693_v24 }
 0x3e5   : > { %v3077_v27 = vpop.f32.mrf.mxu2  ;;  %v2472_v20 = vmin.f32 %v2431_v7, 6.0  ;;  %v8771_v7 = vpop.permute.xlu0 %2624 }
 0x3e6   : > { %v8764_v2 = vadd.f32 %v3077_v27, %v2937_v28  ;;  %v2083_v43 = vpop.f32.mrf.mxu3  ;;  %v2940_v57 = vpop.f32.mrf.mxu1  ;;  %v11169_v28 = vld [vmem:[#allocation55_spill] sm:$0xff]  ;;  %11171 = vst [vmem:[#allocation39_spill] sm:$0xff] %v8771_v7 }
 0x3e7   : > { %v2718_v15 = vmul.f32 %v8762_v50, %v2472_v20  ;;  %v2152_v26 = vadd.f32 %v2083_v43, %v1913_v59  ;;  %v2322_v5 = vpop.f32.mrf.mxu0  ;;  %v1675_v51 = vadd.f32 %v11169_v28, %v1436_v53  ;;  %v11172_v43 = vld [vmem:[#allocation26_spill] sm:$0xff] }
 0x3e8   : > { %v2859_v52 = vld [vmem:[#allocation2 + $0xde] sm:$0xff]  ;;  %v1437_v16 = vadd.f32 %v11173_v9, %v11172_v43  ;;  %v11176_v43 = vld [vmem:[#allocation22_spill] sm:$0xff] }
 0x3e9   : > { %v2801_v29 = vld [vmem:[#allocation2 + $0xdd] sm:$0xff]  ;;  %2759 = vst [vmem:[#allocation2 + $0xe8] sm:$0xff] %v2718_v15  ;;  %v2391_v14 = vadd.f32 %v2322_v5, %v2152_v26  ;;  %2987 = vmatmul.f32.gmra.mxu1 %v2859_v52  ;;  %v1914_v34 = vadd.f32 %v11170_v31, %v1675_v51 }
 0x3ea   : > { %3127 = vmatmul.f32.gmra.mxu2 %v2801_v29  ;;  %3489 = vmatmul.f32.gmra.mxu0 %v3411_v37  ;;  %v3938_v29 = vld [vmem:[#allocation6 + $0x748] sm:$0xff]  ;;  %v8936_v50 = vld [vmem:[#allocation2 + $0x41] sm:$0xff]  ;;  %11220 = vst [vmem:[#allocation22_spill] sm:$0xff] %v8946_v56 }
 0x3eb   : > { %v2432_v10 = vmax.f32 %v2391_v14, 0.0  ;;  %3253 = vmatmul.f32.gmra.mxu3 %v3410_v47  ;;  %v3412_v14 = vld [vmem:[#allocation2 + $0x2f] sm:$0xff]  ;;  %3951 = vmatpush.msrb.mxu2 %v3938_v29  ;;  %v11178_v29 = vld [vmem:[#allocation65_spill] sm:$0xff] }
 0x3ec   : > { %11222 = vst [vmem:[#allocation65_spill] sm:$0xff] %v8956_v49 }
 0x3ed   : > { %v3080_v13 = vpop.f32.mrf.mxu2  ;;  %v2473_v27 = vmin.f32 %v2432_v10, 6.0  ;;  %v8780_v10 = vpop.permute.xlu1 %2629 }
 0x3ee   : > { %v8773_v4 = vadd.f32 %v3080_v13, %v2940_v57  ;;  %v2086_v59 = vpop.f32.mrf.mxu3  ;;  %v2943_v20 = vpop.f32.mrf.mxu1  ;;  %v1676_v57 = vadd.f32 %v8554_v0, %v1437_v16  ;;  %11174 = vst [vmem:[#allocation14_spill] sm:$0xff] %v8780_v10 }
 0x3ef   : > { %v2719_v15 = vmul.f32 %v8771_v7, %v2473_v27  ;;  %v2153_v26 = vadd.f32 %v2086_v59, %v1914_v34  ;;  %v2325_v53 = vpop.f32.mrf.mxu0  ;;  %v11175_v59 = vld [vmem:[#allocation21_spill] sm:$0xff] }
 0x3f0   : > { %v2860_v5 = vld [vmem:[#allocation2 + $0xe6] sm:$0xff]  ;;  %v1915_v51 = vadd.f32 %v8558_v8, %v1676_v57  ;;  %v1438_v9 = vadd.f32 %v11176_v43, %v11175_v59  ;;  %v3413_v8 = vld [vmem:[#allocation2 + $0x37] sm:$0xff] }
 0x3f1   : > { %v2802_v47 = vld [vmem:[#allocation2 + $0xe5] sm:$0xff]  ;;  %2760 = vst [vmem:[#allocation2 + $0xf0] sm:$0xff] %v2719_v15  ;;  %v2392_v52 = vadd.f32 %v2325_v53, %v2153_v26  ;;  %2990 = vmatmul.f32.gmra.mxu1 %v2860_v5  ;;  %v11177_v5 = vld [vmem:[#allocation63_spill] sm:$0xff]  ;;  %v11181_v43 = vld [vmem:[#allocation24_spill] sm:$0xff] }
 0x3f2   : > { %3130 = vmatmul.f32.gmra.mxu2 %v2802_v47  ;;  %3492 = vmatmul.f32.gmra.mxu0 %v3412_v14  ;;  %v1677_v47 = vadd.f32 %v11177_v5, %v1438_v9  ;;  %v11180_v59 = vld [vmem:[#allocation23_spill] sm:$0xff]  ;;  %v3937_v5 = vld [vmem:[#allocation6 + $0x740] sm:$0xff]  ;;  %v3653_v7 = vld [vmem:[#allocation2 + $0x40] sm:$0xff]  ;;  %11224 = vst [vmem:[#allocation24_spill] sm:$0xff] %v8966_v62 }
 0x3f3   : > { %v2433_v24 = vmax.f32 %v2392_v52, 0.0  ;;  %3256 = vmatmul.f32.gmra.mxu3 %v3411_v37  ;;  %3952 = vmatpush.msrb.mxu2 %v3937_v5 }
 0x3f4   : > { %v1916_v57 = vadd.f32 %v11178_v29, %v1677_v47  ;;  %v3414_v47 = vld [vmem:[#allocation2 + $0x3f] sm:$0xff] }
 0x3f5   : > { %v3083_v28 = vpop.f32.mrf.mxu2  ;;  %v2474_v13 = vmin.f32 %v2433_v24, 6.0  ;;  %v8789_v24 = vpop.permute.xlu2 %2634 }
 0x3f6   : > { %v8782_v31 = vadd.f32 %v3083_v28, %v2943_v20  ;;  %v2089_v34 = vpop.f32.mrf.mxu3  ;;  %v2946_v27 = vpop.f32.mrf.mxu1  ;;  %11179 = vst [vmem:[#allocation15_spill] sm:$0xff] %v8789_v24 }
 0x3f7   : > { %v2720_v15 = vmul.f32 %v8780_v10, %v2474_v13  ;;  %v2154_v26 = vadd.f32 %v2089_v34, %v1915_v51  ;;  %v2328_v0 = vpop.f32.mrf.mxu0 }
 0x3f8   : > { %v2861_v16 = vld [vmem:[#allocation2 + $0xee] sm:$0xff] }
 0x3f9   : > { %v2803_v37 = vld [vmem:[#allocation2 + $0xed] sm:$0xff]  ;;  %2761 = vst [vmem:[#allocation2 + $0xf8] sm:$0xff] %v2720_v15  ;;  %v2393_v53 = vadd.f32 %v2328_v0, %v2154_v26  ;;  %2993 = vmatmul.f32.gmra.mxu1 %v2861_v16  ;;  %v1439_v15 = vadd.f32 %v11181_v43, %v11180_v59 }
 0x3fa   : > { %3133 = vmatmul.f32.gmra.mxu2 %v2803_v37  ;;  %3495 = vmatmul.f32.gmra.mxu0 %v3413_v8 }
 0x3fb   : > { %v2434_v20 = vmax.f32 %v2393_v53, 0.0  ;;  %3259 = vmatmul.f32.gmra.mxu3 %v3412_v14  ;;  %v3692_v53 = vld [vmem:[#allocation6 + $0x690] sm:$0xff] }
 0x3fc   : > { %3719 = vmatpush.msrb.mxu1 %v3692_v53 }
 0x3fd   : > { %v3086_v52 = vpop.f32.mrf.mxu2  ;;  %v2475_v28 = vmin.f32 %v2434_v20, 6.0 }
 0x3fe   : > { %v8791_v51 = vadd.f32 %v3086_v52, %v2946_v27  ;;  %v2092_v13 = vpop.f32.mrf.mxu3  ;;  %v2949_v34 = vpop.f32.mrf.mxu1  ;;  %v11182_v27 = vld [vmem:[#allocation67_spill] sm:$0xff] }
 0x3ff   : > { %v2721_v26 = vmul.f32 %v8789_v24, %v2475_v28  ;;  %v2155_v0 = vadd.f32 %v2092_v13, %v1916_v57  ;;  %v2331_v9 = vpop.f32.mrf.mxu0  ;;  %v1678_v20 = vadd.f32 %v11182_v27, %v1439_v15  ;;  %v8798_v28 = vpop.permute.xlu0 %2639  ;;  %v11186_v27 = vld [vmem:[#allocation69_spill] sm:$0xff]  ;;  %v3652_v24 = vld [vmem:[#allocation2 + $0x38] sm:$0xff] }
 0x400   : > { %v2862_v16 = vld [vmem:[#allocation2 + $0xf6] sm:$0xff]  ;;  %11183 = vst [vmem:[#allocation40_spill] sm:$0xff] %v8798_v28 }
 0x401   : > { %v2804_v14 = vld [vmem:[#allocation2 + $0xf5] sm:$0xff]  ;;  %2762 = vst [vmem:[#allocation2 + $0x100] sm:$0xff] %v2721_v26  ;;  %v2394_v37 = vadd.f32 %v2331_v9, %v2155_v0  ;;  %2996 = vmatmul.f32.gmra.mxu1 %v2862_v16  ;;  %v1917_v57 = vadd.f32 %v8578_v12, %v1678_v20  ;;  %v11184_v0 = vld [vmem:[#allocation25_spill] sm:$0xff] }
 0x402   : > { %3136 = vmatmul.f32.gmra.mxu2 %v2804_v14  ;;  %3498 = vmatmul.f32.gmra.mxu0 %v3414_v47  ;;  %v11185_v9 = vld [vmem:[#allocation27_spill] sm:$0xff]  ;;  %v3415_v12 = vld [vmem:[#allocation2 + $0x47] sm:$0xff] }
 0x403   : > { %v2435_v52 = vmax.f32 %v2394_v37, 0.0  ;;  %3262 = vmatmul.f32.gmra.mxu3 %v3413_v8  ;;  %v1440_v16 = vadd.f32 %v11185_v9, %v11184_v0  ;;  %v8807_v0 = vpop.permute.xlu1 %2644 }
 0x404   : > { %11187 = vst [vmem:[#allocation43_spill] sm:$0xff] %v8807_v0 }
 0x405   : > { %v3089_v29 = vpop.f32.mrf.mxu2  ;;  %v2476_v13 = vmin.f32 %v2435_v52, 6.0  ;;  %v1679_v20 = vadd.f32 %v11186_v27, %v1440_v16 }
 0x406   : > { %v8800_v59 = vadd.f32 %v3089_v29, %v2949_v34  ;;  %v2095_v43 = vpop.f32.mrf.mxu3  ;;  %v2952_v26 = vpop.f32.mrf.mxu1 }
 0x407   : > { %v2722_v14 = vmul.f32 %v8798_v28, %v2476_v13  ;;  %v2156_v53 = vadd.f32 %v2095_v43, %v1917_v57  ;;  %v2334_v15 = vpop.f32.mrf.mxu0  ;;  %v1918_v29 = vadd.f32 %v8586_v54, %v1679_v20  ;;  %v3416_v54 = vld [vmem:[#allocation2 + $0x4f] sm:$0xff] }
 0x408   : > { %v2863_v37 = vld [vmem:[#allocation2 + $0xfe] sm:$0xff] }
 0x409   : > { %v2805_v8 = vld [vmem:[#allocation2 + $0xfd] sm:$0xff]  ;;  %2763 = vst [vmem:[#allocation2 + $0x108] sm:$0xff] %v2722_v14  ;;  %v2395_v5 = vadd.f32 %v2334_v15, %v2156_v53  ;;  %2999 = vmatmul.f32.gmra.mxu1 %v2863_v37 }
 0x40a   : > { %3139 = vmatmul.f32.gmra.mxu2 %v2805_v8  ;;  %3501 = vmatmul.f32.gmra.mxu0 %v3415_v12  ;;  %v11188_v14 = vld [vmem:[#allocation28_spill] sm:$0xff]  ;;  %v11189_v53 = vld [vmem:[#allocation29_spill] sm:$0xff] }
 0x40b   : > { %v2436_v34 = vmax.f32 %v2395_v5, 0.0  ;;  %3265 = vmatmul.f32.gmra.mxu3 %v3414_v47  ;;  %v1441_v15 = vadd.f32 %v11189_v53, %v11188_v14  ;;  %v8816_v14 = vpop.permute.xlu2 %2649 }
 0x40c   : > { %11190 = vst [vmem:[#allocation16_spill] sm:$0xff] %v8816_v14 }
 0x40d   : > { %v3092_v52 = vpop.f32.mrf.mxu2  ;;  %v2477_v13 = vmin.f32 %v2436_v34, 6.0  ;;  %v1680_v20 = vadd.f32 %v8588_v36, %v1441_v15 }
 0x40e   : > { %v8809_v57 = vadd.f32 %v3092_v52, %v2952_v26  ;;  %v2098_v43 = vpop.f32.mrf.mxu3  ;;  %v2955_v9 = vpop.f32.mrf.mxu1 }
 0x40f   : > { %v2723_v37 = vmul.f32 %v8807_v0, %v2477_v13  ;;  %v2157_v8 = vadd.f32 %v2098_v43, %v1918_v29  ;;  %v2337_v16 = vpop.f32.mrf.mxu0  ;;  %v1919_v52 = vadd.f32 %v8594_v35, %v1680_v20  ;;  %v3691_v35 = vld [vmem:[#allocation6 + $0x688] sm:$0xff]  ;;  %v3936_v20 = vld [vmem:[#allocation6 + $0x738] sm:$0xff] }
 0x410   : > { %v2864_v5 = vld [vmem:[#allocation2 + $0x106] sm:$0xff]  ;;  %3720 = vmatpush.msrb.mxu1 %v3691_v35  ;;  %3953 = vmatpush.msrb.mxu2 %v3936_v20 }
 0x411   : > { %v2806_v47 = vld [vmem:[#allocation2 + $0x105] sm:$0xff]  ;;  %2764 = vst [vmem:[#allocation2 + $0x110] sm:$0xff] %v2723_v37  ;;  %v2396_v27 = vadd.f32 %v2337_v16, %v2157_v8  ;;  %3002 = vmatmul.f32.gmra.mxu1 %v2864_v5  ;;  %v11192_v8 = vld [vmem:[#allocation31_spill] sm:$0xff] }
 0x412   : > { %3142 = vmatmul.f32.gmra.mxu2 %v2806_v47  ;;  %3504 = vmatmul.f32.gmra.mxu0 %v3416_v54  ;;  %v11191_v37 = vld [vmem:[#allocation30_spill] sm:$0xff] }
 0x413   : > { %v2437_v26 = vmax.f32 %v2396_v27, 0.0  ;;  %3268 = vmatmul.f32.gmra.mxu3 %v3415_v12  ;;  %v1442_v16 = vadd.f32 %v11192_v8, %v11191_v37 }
 0x415   : > { %v3095_v34 = vpop.f32.mrf.mxu2  ;;  %v2478_v13 = vmin.f32 %v2437_v26, 6.0  ;;  %v3417_v26 = vld [vmem:[#allocation2 + $0x57] sm:$0xff] }
 0x416   : > { %v8818_v29 = vadd.f32 %v3095_v34, %v2955_v9  ;;  %v2101_v43 = vpop.f32.mrf.mxu3  ;;  %v2958_v53 = vpop.f32.mrf.mxu1  ;;  %v1681_v9 = vadd.f32 %v8598_v61, %v1442_v16 }
 0x417   : > { %v2724_v5 = vmul.f32 %v8816_v14, %v2478_v13  ;;  %v2158_v47 = vadd.f32 %v2101_v43, %v1919_v52  ;;  %v2340_v36 = vpop.f32.mrf.mxu0  ;;  %v11193_v13 = vld [vmem:[#allocation52_spill] sm:$0xff]  ;;  %v8825_v43 = vpop.permute.xlu0 %2654 }
 0x418   : > { %v2865_v15 = vld [vmem:[#allocation2 + $0x10e] sm:$0xff]  ;;  %v1920_v52 = vadd.f32 %v11193_v13, %v1681_v9  ;;  %11194 = vst [vmem:[#allocation17_spill] sm:$0xff] %v8825_v43  ;;  %v3418_v9 = vld [vmem:[#allocation2 + $0x5f] sm:$0xff] }
 0x419   : > { %v2807_v12 = vld [vmem:[#allocation2 + $0x10d] sm:$0xff]  ;;  %2765 = vst [vmem:[#allocation2 + $0x118] sm:$0xff] %v2724_v5  ;;  %v2397_v27 = vadd.f32 %v2340_v36, %v2158_v47  ;;  %3005 = vmatmul.f32.gmra.mxu1 %v2865_v15  ;;  %v11195_v15 = vld [vmem:[#allocation32_spill] sm:$0xff] }
 0x41a   : > { %3145 = vmatmul.f32.gmra.mxu2 %v2807_v12  ;;  %3507 = vmatmul.f32.gmra.mxu0 %v3417_v26  ;;  %v11196_v12 = vld [vmem:[#allocation33_spill] sm:$0xff]  ;;  %v11197_v13 = vld [vmem:[#allocation54_spill] sm:$0xff] }
 0x41b   : > { %v2438_v34 = vmax.f32 %v2397_v27, 0.0  ;;  %3271 = vmatmul.f32.gmra.mxu3 %v3416_v54  ;;  %v1443_v14 = vadd.f32 %v11196_v12, %v11195_v15  ;;  %v8834_v15 = vpop.permute.xlu1 %2659 }
 0x41c   : > { %11198 = vst [vmem:[#allocation46_spill] sm:$0xff] %v8834_v15 }
 0x41d   : > { %v3098_v37 = vpop.f32.mrf.mxu2  ;;  %v2479_v8 = vmin.f32 %v2438_v34, 6.0  ;;  %v1682_v34 = vadd.f32 %v11197_v13, %v1443_v14 }
 0x41e   : > { %v8827_v5 = vadd.f32 %v3098_v37, %v2958_v53  ;;  %v2104_v47 = vpop.f32.mrf.mxu3  ;;  %v2961_v36 = vpop.f32.mrf.mxu1 }
 0x41f   : > { %v2725_v35 = vmul.f32 %v8825_v43, %v2479_v8  ;;  %v2159_v20 = vadd.f32 %v2104_v47, %v1920_v52  ;;  %v2343_v61 = vpop.f32.mrf.mxu0  ;;  %v1921_v0 = vadd.f32 %v8614_v45, %v1682_v34  ;;  %v3690_v45 = vld [vmem:[#allocation6 + $0x680] sm:$0xff] }
 0x420   : > { %v2866_v16 = vld [vmem:[#allocation2 + $0x116] sm:$0xff]  ;;  %v3419_v34 = vld [vmem:[#allocation2 + $0x67] sm:$0xff]  ;;  %3721 = vmatpush.msrb.mxu1 %v3690_v45 }
 0x421   : > { %v2808_v54 = vld [vmem:[#allocation2 + $0x115] sm:$0xff]  ;;  %2766 = vst [vmem:[#allocation2 + $0x120] sm:$0xff] %v2725_v35  ;;  %v2398_v27 = vadd.f32 %v2343_v61, %v2159_v20  ;;  %3008 = vmatmul.f32.gmra.mxu1 %v2866_v16  ;;  %v11199_v35 = vld [vmem:[#allocation34_spill] sm:$0xff] }
 0x422   : > { %3148 = vmatmul.f32.gmra.mxu2 %v2808_v54  ;;  %3510 = vmatmul.f32.gmra.mxu0 %v3418_v9  ;;  %v11200_v20 = vld [vmem:[#allocation35_spill] sm:$0xff] }
 0x423   : > { %v2439_v53 = vmax.f32 %v2398_v27, 0.0  ;;  %3274 = vmatmul.f32.gmra.mxu3 %v3417_v26  ;;  %v1444_v61 = vadd.f32 %v11200_v20, %v11199_v35  ;;  %v3935_v20 = vld [vmem:[#allocation6 + $0x730] sm:$0xff] }
 0x424   : > { %3954 = vmatpush.msrb.mxu2 %v3935_v20 }
 0x425   : > { %v3101_v37 = vpop.f32.mrf.mxu2  ;;  %v2480_v8 = vmin.f32 %v2439_v53, 6.0 }
 0x426   : > { %v8836_v52 = vadd.f32 %v3101_v37, %v2961_v36  ;;  %v2107_v47 = vpop.f32.mrf.mxu3  ;;  %v2964_v12 = vpop.f32.mrf.mxu1  ;;  %v1683_v36 = vadd.f32 %v8616_v21, %v1444_v61 }
 0x427   : > { %v2726_v16 = vmul.f32 %v8834_v15, %v2480_v8  ;;  %v2160_v54 = vadd.f32 %v2107_v47, %v1921_v0  ;;  %v2346_v14 = vpop.f32.mrf.mxu0  ;;  %v8843_v8 = vpop.permute.xlu2 %2664 }
 0x428   : > { %v2867_v27 = vld [vmem:[#allocation2 + $0x11e] sm:$0xff]  ;;  %v1922_v35 = vadd.f32 %v8622_v41, %v1683_v36  ;;  %11201 = vst [vmem:[#allocation51_spill] sm:$0xff] %v8843_v8  ;;  %v3933_v36 = vld [vmem:[#allocation6 + $0x720] sm:$0xff] }
 0x429   : > { %v2809_v26 = vld [vmem:[#allocation2 + $0x11d] sm:$0xff]  ;;  %2767 = vst [vmem:[#allocation2 + $0x128] sm:$0xff] %v2726_v16  ;;  %v2399_v13 = vadd.f32 %v2346_v14, %v2160_v54  ;;  %3011 = vmatmul.f32.gmra.mxu1 %v2867_v27  ;;  %v11203_v27 = vld [vmem:[#allocation38_spill] sm:$0xff] }
 0x42a   : > { %3151 = vmatmul.f32.gmra.mxu2 %v2809_v26  ;;  %3513 = vmatmul.f32.gmra.mxu0 %v3419_v34  ;;  %v11202_v14 = vld [vmem:[#allocation37_spill] sm:$0xff] }
 0x42b   : > { %v2440_v53 = vmax.f32 %v2399_v13, 0.0  ;;  %3277 = vmatmul.f32.gmra.mxu3 %v3418_v9  ;;  %v1445_v26 = vadd.f32 %v11203_v27, %v11202_v14  ;;  %v3934_v9 = vld [vmem:[#allocation6 + $0x728] sm:$0xff]  ;;  %v8852_v27 = vpop.permute.xlu0 %2669 }
 0x42c   : > { %3955 = vmatpush.msrb.mxu2 %v3934_v9  ;;  %11205 = vst [vmem:[#allocation18_spill] sm:$0xff] %v8852_v27 }
 0x42d   : > { %v3104_v37 = vpop.f32.mrf.mxu2  ;;  %v2481_v0 = vmin.f32 %v2440_v53, 6.0  ;;  %v3420_v53 = vld [vmem:[#allocation2 + $0x6f] sm:$0xff] }
 0x42e   : > { %v8845_v47 = vadd.f32 %v3104_v37, %v2964_v12  ;;  %v2110_v16 = vpop.f32.mrf.mxu3  ;;  %v2967_v54 = vpop.f32.mrf.mxu1  ;;  %v4183_v12 = vld [vmem:[#allocation6 + $0x7f8] sm:$0xff]  ;;  %3956 = vmatpush.msrb.mxu2 %v3933_v36  ;;  %v1684_v37 = vadd.f32 %v8624_v11, %v1445_v26 }
 0x42f   : > { %v2727_v21 = vmul.f32 %v8843_v8, %v2481_v0  ;;  %v2161_v61 = vadd.f32 %v2110_v16, %v1922_v35  ;;  %v2349_v13 = vpop.f32.mrf.mxu0  ;;  %4184 = vmatpush.msra.mxu3 %v4183_v12  ;;  %v3932_v35 = vld [vmem:[#allocation6 + $0x718] sm:$0xff]  ;;  %v11204_v16 = vld [vmem:[#allocation62_spill] sm:$0xff] }
 0x430   : > { %v2868_v45 = vld [vmem:[#allocation2 + $0x126] sm:$0xff]  ;;  %3957 = vmatpush.msrb.mxu2 %v3932_v35  ;;  %v1923_v14 = vadd.f32 %v11204_v16, %v1684_v37  ;;  %v3421_v16 = vld [vmem:[#allocation2 + $0x77] sm:$0xff] }
 0x431   : > { %v2810_v15 = vld [vmem:[#allocation2 + $0x125] sm:$0xff]  ;;  %2768 = vst [vmem:[#allocation2 + $0x130] sm:$0xff] %v2727_v21  ;;  %v2400_v41 = vadd.f32 %v2349_v13, %v2161_v61  ;;  %3014 = vmatmul.f32.gmra.mxu1 %v2868_v45 }
 0x432   : > { %3154 = vmatmul.f32.gmra.mxu2 %v2810_v15  ;;  %3516 = vmatmul.f32.gmra.mxu0 %v3420_v53  ;;  %v3931_v15 = vld [vmem:[#allocation6 + $0x710] sm:$0xff]  ;;  %v11206_v45 = vld [vmem:[#allocation41_spill] sm:$0xff]  ;;  %v11207_v12 = vld [vmem:[#allocation42_spill] sm:$0xff] }
 0x433   : > { %v2441_v20 = vmax.f32 %v2400_v41, 0.0  ;;  %3280 = vmatmul.f32.gmra.mxu3 %v3419_v34  ;;  %3958 = vmatpush.msrb.mxu2 %v3931_v15  ;;  %v1446_v11 = vadd.f32 %v11207_v12, %v11206_v45  ;;  %v3930_v41 = vld [vmem:[#allocation6 + $0x708] sm:$0xff]  ;;  %v8861_v12 = vpop.permute.xlu1 %2674 }
 0x434   : > { %11209 = vst [vmem:[#allocation19_spill] sm:$0xff] %v8861_v12 }
 0x435   : > { %v3107_v0 = vpop.f32.mrf.mxu2  ;;  %v2482_v21 = vmin.f32 %v2441_v20, 6.0  ;;  %3959 = vmatpush.msrb.mxu2 %v3930_v41  ;;  %v3929_v20 = vld [vmem:[#allocation6 + $0x700] sm:$0xff]  ;;  %v1685_v15 = vadd.f32 %v8634_v58, %v1446_v11 }
 0x436   : > { %v8854_v61 = vadd.f32 %v3107_v0, %v2967_v54  ;;  %v2113_v9 = vpop.f32.mrf.mxu3  ;;  %v2970_v13 = vpop.f32.mrf.mxu1  ;;  %v4422_v54 = vld [vmem:[#allocation6 + $0x878] sm:$0xff] }
 0x437   : > { %v2728_v34 = vmul.f32 %v8852_v27, %v2482_v21  ;;  %v2162_v26 = vadd.f32 %v2113_v9, %v1923_v14  ;;  %v2352_v36 = vpop.f32.mrf.mxu0  ;;  %v4661_v0 = vld [vmem:[#allocation6 + $0x8f8] sm:$0xff]  ;;  %4423 = vmatpush.msra.mxu0 %v4422_v54  ;;  %3960 = vmatpush.msrb.mxu2 %v3929_v20  ;;  %v11208_v21 = vld [vmem:[#allocation72_spill] sm:$0xff] }
 0x438   : > { %v2869_v35 = vld [vmem:[#allocation2 + $0x12e] sm:$0xff]  ;;  %4662 = vmatpush.msra.mxu1 %v4661_v0  ;;  %v1924_v9 = vadd.f32 %v11208_v21, %v1685_v15  ;;  %v3422_v15 = vld [vmem:[#allocation2 + $0x7f] sm:$0xff] }
 0x439   : > { %v2811_v8 = vld [vmem:[#allocation2 + $0x12d] sm:$0xff]  ;;  %2769 = vst [vmem:[#allocation2 + $0x138] sm:$0xff] %v2728_v34  ;;  %v2401_v37 = vadd.f32 %v2352_v36, %v2162_v26  ;;  %3017 = vmatmul.f32.gmra.mxu1 %v2869_v35  ;;  %v11210_v36 = vld [vmem:[#allocation44_spill] sm:$0xff]  ;;  %v11212_v21 = vld [vmem:[#allocation73_spill] sm:$0xff] }
 0x43a   : > { %3157 = vmatmul.f32.gmra.mxu2 %v2811_v8  ;;  %3519 = vmatmul.f32.gmra.mxu0 %v3421_v16  ;;  %v11211_v35 = vld [vmem:[#allocation48_spill] sm:$0xff] }
 0x43b   : > { %v2442_v45 = vmax.f32 %v2401_v37, 0.0  ;;  %3283 = vmatmul.f32.gmra.mxu3 %v3420_v53  ;;  %v1447_v54 = vadd.f32 %v11211_v35, %v11210_v36  ;;  %v8870_v36 = vpop.permute.xlu2 %2679 }
 0x43c   : > { %11213 = vst [vmem:[#allocation55_spill] sm:$0xff] %v8870_v36 }
 0x43d   : > { %v3110_v14 = vpop.f32.mrf.mxu2  ;;  %v2483_v34 = vmin.f32 %v2442_v45, 6.0  ;;  %v1686_v45 = vadd.f32 %v11212_v21, %v1447_v54 }
 0x43e   : > { %v8863_v26 = vadd.f32 %v3110_v14, %v2970_v13  ;;  %v2116_v8 = vpop.f32.mrf.mxu3  ;;  %v2973_v41 = vpop.f32.mrf.mxu1 }
 0x43f   : > { %v2729_v20 = vmul.f32 %v8861_v12, %v2483_v34  ;;  %v2163_v58 = vadd.f32 %v2116_v8, %v1924_v9  ;;  %v2355_v11 = vpop.f32.mrf.mxu0  ;;  %v1925_v27 = vadd.f32 %v8650_v42, %v1686_v45  ;;  %v4182_v8 = vld [vmem:[#allocation6 + $0x7f0] sm:$0xff]  ;;  %v3423_v45 = vld [vmem:[#allocation2 + $0x87] sm:$0xff] }
 0x440   : > { %v2870_v53 = vld [vmem:[#allocation2 + $0x136] sm:$0xff]  ;;  %4185 = vmatpush.msra.mxu3 %v4182_v8 }
 0x441   : > { %v2812_v37 = vld [vmem:[#allocation2 + $0x135] sm:$0xff]  ;;  %2770 = vst [vmem:[#allocation2 + $0x140] sm:$0xff] %v2729_v20  ;;  %v2402_v0 = vadd.f32 %v2355_v11, %v2163_v58  ;;  %3020 = vmatmul.f32.gmra.mxu1 %v2870_v53  ;;  %v11214_v58 = vld [vmem:[#allocation49_spill] sm:$0xff] }
 0x442   : > { %3160 = vmatmul.f32.gmra.mxu2 %v2812_v37  ;;  %3522 = vmatmul.f32.gmra.mxu0 %v3422_v15  ;;  %v11215_v11 = vld [vmem:[#allocation53_spill] sm:$0xff]  ;;  %v8916_v12 = vld [vmem:[#allocation2 + $0x31] sm:$0xff] }
 0x443   : > { %v2443_v13 = vmax.f32 %v2402_v0, 0.0  ;;  %3286 = vmatmul.f32.gmra.mxu3 %v3421_v16  ;;  %v1448_v53 = vadd.f32 %v11215_v11, %v11214_v58  ;;  %v8879_v58 = vpop.permute.xlu0 %2684 }
 0x444   : > { %11216 = vst [vmem:[#allocation57_spill] sm:$0xff] %v8879_v58 }
 0x445   : > { %v3113_v14 = vpop.f32.mrf.mxu2  ;;  %v2484_v34 = vmin.f32 %v2443_v13, 6.0 }
 0x446   : > { %v8872_v9 = vadd.f32 %v3113_v14, %v2973_v41  ;;  %v2119_v35 = vpop.f32.mrf.mxu3  ;;  %v2976_v20 = vpop.f32.mrf.mxu1  ;;  %v1687_v41 = vadd.f32 %v8652_v6, %v1448_v53 }
 0x447   : > { %v2730_v54 = vmul.f32 %v8870_v36, %v2484_v34  ;;  %v2164_v37 = vadd.f32 %v2119_v35, %v1925_v27  ;;  %v2358_v16 = vpop.f32.mrf.mxu0  ;;  %v4421_v35 = vld [vmem:[#allocation6 + $0x870] sm:$0xff]  ;;  %v3651_v36 = vld [vmem:[#allocation2 + $0x30] sm:$0xff] }
 0x448   : > { %v2871_v0 = vld [vmem:[#allocation2 + $0x13e] sm:$0xff]  ;;  %v1926_v8 = vadd.f32 %v8658_v25, %v1687_v41  ;;  %4424 = vmatpush.msra.mxu0 %v4421_v35  ;;  %v3424_v25 = vld [vmem:[#allocation2 + $0x8f] sm:$0xff]  ;;  %v8884_v41 = vpop.permute.xlu1 %2689 }
 0x449   : > { %v2813_v21 = vld [vmem:[#allocation2 + $0x13d] sm:$0xff]  ;;  %2771 = vst [vmem:[#allocation2 + $0x148] sm:$0xff] %v2730_v54  ;;  %v2403_v42 = vadd.f32 %v2358_v16, %v2164_v37  ;;  %3023 = vmatmul.f32.gmra.mxu1 %v2871_v0 }
 0x44a   : > { %3163 = vmatmul.f32.gmra.mxu2 %v2813_v21  ;;  %3525 = vmatmul.f32.gmra.mxu0 %v3423_v45  ;;  %v4660_v0 = vld [vmem:[#allocation6 + $0x8f0] sm:$0xff]  ;;  %11217 = vst [vmem:[#allocation26_spill] sm:$0xff] %v8884_v41 }
 0x44b   : > { %v2444_v13 = vmax.f32 %v2403_v42, 0.0  ;;  %3289 = vmatmul.f32.gmra.mxu3 %v3422_v15  ;;  %4663 = vmatpush.msra.mxu1 %v4660_v0  ;;  %v3425_v0 = vld [vmem:[#allocation2 + $0x97] sm:$0xff] }
 0x44d   : > { %v3116_v14 = vpop.f32.mrf.mxu2  ;;  %v2485_v34 = vmin.f32 %v2444_v13, 6.0 }
 0x44e   : > { %v8881_v27 = vadd.f32 %v3116_v14, %v2976_v20  ;;  %v2122_v11 = vpop.f32.mrf.mxu3  ;;  %v2979_v54 = vpop.f32.mrf.mxu1 }
 0x44f   : > { %v2731_v37 = vmul.f32 %v8879_v58, %v2485_v34  ;;  %v2165_v16 = vadd.f32 %v2122_v11, %v1926_v8  ;;  %v2361_v6 = vpop.f32.mrf.mxu0  ;;  %v3650_v58 = vld [vmem:[#allocation2 + $0x28] sm:$0xff] }
 0x450   : > { %v2872_v53 = vld [vmem:[#allocation2 + $0x146] sm:$0xff] }
 0x451   : > { %v2814_v15 = vld [vmem:[#allocation2 + $0x145] sm:$0xff]  ;;  %2772 = vst [vmem:[#allocation2 + $0x150] sm:$0xff] %v2731_v37  ;;  %v2404_v21 = vadd.f32 %v2361_v6, %v2165_v16  ;;  %3026 = vmatmul.f32.gmra.mxu1 %v2872_v53  ;;  %v3648_v37 = vld [vmem:[#allocation2 + $0x18] sm:$0xff] }
 0x452   : > { %3166 = vmatmul.f32.gmra.mxu2 %v2814_v15  ;;  %3528 = vmatmul.f32.gmra.mxu0 %v3424_v25  ;;  %v3887_v16 = vld [vmem:[#allocation2 + $0x19] sm:$0xff] }
 0x453   : > { %v2445_v42 = vmax.f32 %v2404_v21, 0.0  ;;  %3292 = vmatmul.f32.gmra.mxu3 %v3423_v45  ;;  %v4181_v45 = vld [vmem:[#allocation6 + $0x7e8] sm:$0xff] }
 0x454   : > { %4186 = vmatpush.msra.mxu3 %v4181_v45 }
 0x455   : > { %v3119_v20 = vpop.f32.mrf.mxu2  ;;  %v2486_v13 = vmin.f32 %v2445_v42, 6.0  ;;  %v3649_v42 = vld [vmem:[#allocation2 + $0x20] sm:$0xff] }
 0x456   : > { %v8886_v14 = vadd.f32 %v3119_v20, %v2979_v54  ;;  %v2982_v8 = vpop.f32.mrf.mxu1  ;;  %v8888_v34 = vpop.f32.mrf.mxu3  ;;  %v3888_v20 = vld [vmem:[#allocation2 + $0x21] sm:$0xff] }
 0x457   : > { %v2732_v35 = vmul.f32 %v8884_v41, %v2486_v13  ;;  %v8891_v11 = vpop.f32.mrf.mxu0  ;;  %v4420_v13 = vld [vmem:[#allocation6 + $0x868] sm:$0xff] }
 0x458   : > { %4425 = vmatpush.msra.mxu0 %v4420_v13 }
 0x459   : > { %2773 = vst [vmem:[#allocation2 + $0x158] sm:$0xff] %v2732_v35  ;;  %3722 = vmatmul.f32.vlgmr.msrb.gmra.mxu1 %v3648_v37  ;;  %v4659_v35 = vld [vmem:[#allocation6 + $0x8e8] sm:$0xff]  ;;  %v3426_v37 = vld [vmem:[#allocation2 + $0x9f] sm:$0xff] }
 0x45a   : > { %3961 = vmatmul.f32.vlgmr.msrb.gmra.mxu2 %v3887_v16  ;;  %3531 = vmatmul.f32.gmra.mxu0 %v3425_v0 }
 0x45b   : > { %3295 = vmatmul.f32.gmra.mxu3 %v3424_v25  ;;  %4664 = vmatpush.msra.mxu1 %v4659_v35 }
 0x45d   : > { %v3122_v6 = vpop.f32.mrf.mxu2 }
 0x45e   : > { %v8893_v54 = vadd.f32 %v3122_v6, %v2982_v8  ;;  %v2985_v53 = vpop.f32.mrf.mxu1  ;;  %v8895_v15 = vpop.f32.mrf.mxu3 }
 0x45f   : > { %v8897_v21 = vpop.f32.mrf.mxu0 }
 0x461   : > { %3725 = vmatmul.f32.gmra.mxu1 %v3649_v42  ;;  %v8906_v42 = vld [vmem:[#allocation2 + $0x29] sm:$0xff] }
 0x462   : > { %3964 = vmatmul.f32.gmra.mxu2 %v3888_v20  ;;  %3534 = vmatmul.f32.gmra.mxu0 %v3426_v37  ;;  %v3427_v20 = vld [vmem:[#allocation2 + $0xa7] sm:$0xff] }
 0x463   : > { %3298 = vmatmul.f32.gmra.mxu3 %v3425_v0 }
 0x465   : > { %v3125_v25 = vpop.f32.mrf.mxu2 }
 0x466   : > { %v8899_v16 = vadd.f32 %v3125_v25, %v2985_v53  ;;  %v2988_v8 = vpop.f32.mrf.mxu1  ;;  %v3251_v45 = vpop.f32.mrf.mxu3  ;;  %v4180_v53 = vld [vmem:[#allocation6 + $0x7e0] sm:$0xff] }
 0x467   : > { %v8902_v6 = vadd.f32 %v3251_v45, %v8692_v17  ;;  %v8904_v41 = vpop.f32.mrf.mxu0  ;;  %4187 = vmatpush.msra.mxu3 %v4180_v53 }
 0x469   : > { %3728 = vmatmul.f32.gmra.mxu1 %v3650_v58  ;;  %v3428_v58 = vld [vmem:[#allocation2 + $0xaf] sm:$0xff] }
 0x46a   : > { %3967 = vmatmul.f32.gmra.mxu2 %v8906_v42  ;;  %3537 = vmatmul.f32.gmra.mxu0 %v3427_v20 }
 0x46b   : > { %3301 = vmatmul.f32.gmra.mxu3 %v3426_v37 }
 0x46d   : > { %v3128_v0 = vpop.f32.mrf.mxu2 }
 0x46e   : > { %v8909_v13 = vadd.f32 %v3128_v0, %v2988_v8  ;;  %v2991_v35 = vpop.f32.mrf.mxu1  ;;  %v3254_v25 = vpop.f32.mrf.mxu3  ;;  %v4419_v0 = vld [vmem:[#allocation6 + $0x860] sm:$0xff] }
 0x46f   : > { %v8912_v17 = vadd.f32 %v3254_v25, %v8701_v48  ;;  %v8914_v45 = vpop.f32.mrf.mxu0  ;;  %4426 = vmatpush.msra.mxu0 %v4419_v0  ;;  %v4658_v25 = vld [vmem:[#allocation6 + $0x8e0] sm:$0xff] }
 0x470   : > { %4665 = vmatpush.msra.mxu1 %v4658_v25  ;;  %v3430_v25 = vld [vmem:[#allocation2 + $0xbf] sm:$0xff] }
 0x471   : > { %3731 = vmatmul.f32.gmra.mxu1 %v3651_v36  ;;  %v8926_v36 = vld [vmem:[#allocation2 + $0x39] sm:$0xff] }
 0x472   : > { %3970 = vmatmul.f32.gmra.mxu2 %v8916_v12  ;;  %3540 = vmatmul.f32.gmra.mxu0 %v3428_v58 }
 0x473   : > { %3304 = vmatmul.f32.gmra.mxu3 %v3427_v20  ;;  %v3429_v20 = vld [vmem:[#allocation2 + $0xb7] sm:$0xff] }
 0x475   : > { %v3131_v37 = vpop.f32.mrf.mxu2 }
 0x476   : > { %v8919_v8 = vadd.f32 %v3131_v37, %v2991_v35  ;;  %v2994_v43 = vpop.f32.mrf.mxu1  ;;  %v3257_v53 = vpop.f32.mrf.mxu3 }
 0x477   : > { %v8922_v48 = vadd.f32 %v3257_v53, %v8710_v22  ;;  %v8924_v28 = vpop.f32.mrf.mxu0 }
 0x479   : > { %3734 = vmatmul.f32.gmra.mxu1 %v3652_v24  ;;  %v4179_v24 = vld [vmem:[#allocation6 + $0x7d8] sm:$0xff] }
 0x47a   : > { %3973 = vmatmul.f32.gmra.mxu2 %v8926_v36  ;;  %3543 = vmatmul.f32.gmra.mxu0 %v3429_v20 }
 0x47b   : > { %3307 = vmatmul.f32.gmra.mxu3 %v3428_v58 }
 0x47c   : > { %4188 = vmatpush.msra.mxu3 %v4179_v24  ;;  %v3431_v24 = vld [vmem:[#allocation2 + $0xc7] sm:$0xff] }
 0x47d   : > { %v3134_v35 = vpop.f32.mrf.mxu2 }
 0x47e   : > { %v8929_v37 = vadd.f32 %v3134_v35, %v2994_v43  ;;  %v2997_v0 = vpop.f32.mrf.mxu1  ;;  %v3260_v10 = vpop.f32.mrf.mxu3 }
 0x47f   : > { %v8932_v22 = vadd.f32 %v3260_v10, %v8719_v3  ;;  %v8934_v53 = vpop.f32.mrf.mxu0 }
 0x480   : > { %11218 = vst [vmem:[#allocation20_spill] sm:$0xff] %v8929_v37  ;;  %v3661_v37 = vld [vmem:[#allocation2 + $0x80] sm:$0xff] }
 0x481   : > { %3737 = vmatmul.f32.gmra.mxu1 %v3653_v7  ;;  %v4418_v7 = vld [vmem:[#allocation6 + $0x858] sm:$0xff] }
 0x482   : > { %3976 = vmatmul.f32.gmra.mxu2 %v8936_v50  ;;  %3546 = vmatmul.f32.gmra.mxu0 %v3430_v25 }
 0x483   : > { %3310 = vmatmul.f32.gmra.mxu3 %v3429_v20  ;;  %4427 = vmatpush.msra.mxu0 %v4418_v7  ;;  %v4657_v20 = vld [vmem:[#allocation6 + $0x8d8] sm:$0xff] }
 0x484   : > { %4666 = vmatpush.msra.mxu1 %v4657_v20 }
 0x485   : > { %v3137_v43 = vpop.f32.mrf.mxu2 }
 0x486   : > { %v8939_v58 = vadd.f32 %v3137_v43, %v2997_v0  ;;  %v3000_v35 = vpop.f32.mrf.mxu1  ;;  %v3263_v19 = vpop.f32.mrf.mxu3 }
 0x487   : > { %v8942_v3 = vadd.f32 %v3263_v19, %v8728_v55  ;;  %v8944_v10 = vpop.f32.mrf.mxu0 }
 0x488   : > { %11219 = vst [vmem:[#allocation21_spill] sm:$0xff] %v8939_v58  ;;  %v8996_v58 = vld [vmem:[#allocation2 + $0x71] sm:$0xff] }
 0x489   : > { %3740 = vmatmul.f32.gmra.mxu1 %v3654_v18  ;;  %v3655_v18 = vld [vmem:[#allocation2 + $0x50] sm:$0xff]  ;;  %11230 = vst [vmem:[#allocation29_spill] sm:$0xff] %v8996_v58 }
 0x48a   : > { %3979 = vmatmul.f32.gmra.mxu2 %v8946_v56  ;;  %3549 = vmatmul.f32.gmra.mxu0 %v3431_v24  ;;  %v9016_v56 = vld [vmem:[#allocation2 + $0x81] sm:$0xff] }
 0x48b   : > { %3313 = vmatmul.f32.gmra.mxu3 %v3430_v25  ;;  %v3432_v25 = vld [vmem:[#allocation2 + $0xcf] sm:$0xff]  ;;  %11235 = vst [vmem:[#allocation33_spill] sm:$0xff] %v9016_v56 }
 0x48d   : > { %v3140_v0 = vpop.f32.mrf.mxu2 }
 0x48e   : > { %v8949_v43 = vadd.f32 %v3140_v0, %v3000_v35  ;;  %v3003_v55 = vpop.f32.mrf.mxu1  ;;  %v3266_v19 = vpop.f32.mrf.mxu3 }
 0x48f   : > { %v8952_v40 = vadd.f32 %v3266_v19, %v8737_v60  ;;  %v8954_v32 = vpop.f32.mrf.mxu0  ;;  %v4178_v60 = vld [vmem:[#allocation6 + $0x7d0] sm:$0xff] }
 0x490   : > { %11221 = vst [vmem:[#allocation63_spill] sm:$0xff] %v8949_v43  ;;  %4189 = vmatpush.msra.mxu3 %v4178_v60  ;;  %v8976_v43 = vld [vmem:[#allocation2 + $0x61] sm:$0xff] }
 0x491   : > { %3743 = vmatmul.f32.gmra.mxu1 %v3655_v18  ;;  %11226 = vst [vmem:[#allocation25_spill] sm:$0xff] %v8976_v43 }
 0x492   : > { %3982 = vmatmul.f32.gmra.mxu2 %v8956_v49  ;;  %3552 = vmatmul.f32.gmra.mxu0 %v3432_v25 }
 0x493   : > { %3316 = vmatmul.f32.gmra.mxu3 %v3431_v24  ;;  %v3433_v24 = vld [vmem:[#allocation2 + $0xd7] sm:$0xff] }
 0x495   : > { %v3143_v7 = vpop.f32.mrf.mxu2 }
 0x496   : > { %v8959_v20 = vadd.f32 %v3143_v7, %v3003_v55  ;;  %v3006_v35 = vpop.f32.mrf.mxu1  ;;  %v3269_v0 = vpop.f32.mrf.mxu3 }
 0x497   : > { %v8962_v23 = vadd.f32 %v3269_v0, %v8746_v44  ;;  %v8964_v19 = vpop.f32.mrf.mxu0  ;;  %v4417_v0 = vld [vmem:[#allocation6 + $0x850] sm:$0xff] }
 0x498   : > { %11223 = vst [vmem:[#allocation23_spill] sm:$0xff] %v8959_v20  ;;  %v3657_v20 = vld [vmem:[#allocation2 + $0x60] sm:$0xff]  ;;  %4428 = vmatpush.msra.mxu0 %v4417_v0  ;;  %v8986_v0 = vld [vmem:[#allocation2 + $0x69] sm:$0xff] }
 0x499   : > { %3746 = vmatmul.f32.gmra.mxu1 %v3656_v63  ;;  %v4656_v63 = vld [vmem:[#allocation6 + $0x8d0] sm:$0xff]  ;;  %11228 = vst [vmem:[#allocation69_spill] sm:$0xff] %v8986_v0 }
 0x49a   : > { %3985 = vmatmul.f32.gmra.mxu2 %v8966_v62  ;;  %3555 = vmatmul.f32.gmra.mxu0 %v3433_v24  ;;  %v3658_v62 = vld [vmem:[#allocation2 + $0x68] sm:$0xff] }
 0x49b   : > { %3319 = vmatmul.f32.gmra.mxu3 %v3432_v25  ;;  %v3434_v25 = vld [vmem:[#allocation2 + $0xdf] sm:$0xff]  ;;  %4667 = vmatpush.msra.mxu1 %v4656_v63  ;;  %v3435_v63 = vld [vmem:[#allocation2 + $0xe7] sm:$0xff] }
 0x49d   : > { %v3146_v55 = vpop.f32.mrf.mxu2 }
 0x49e   : > { %v8969_v18 = vadd.f32 %v3146_v55, %v3006_v35  ;;  %v3009_v7 = vpop.f32.mrf.mxu1  ;;  %v3272_v30 = vpop.f32.mrf.mxu3 }
 0x49f   : > { %v8972_v44 = vadd.f32 %v3272_v30, %v8755_v1  ;;  %v8974_v39 = vpop.f32.mrf.mxu0 }
 0x4a0   : > { %11225 = vst [vmem:[#allocation67_spill] sm:$0xff] %v8969_v18 }
 0x4a1   : > { %3749 = vmatmul.f32.gmra.mxu1 %v3657_v20  ;;  %v4177_v20 = vld [vmem:[#allocation6 + $0x7c8] sm:$0xff] }
 0x4a2   : > { %3988 = vmatmul.f32.gmra.mxu2 %v8976_v43  ;;  %3558 = vmatmul.f32.gmra.mxu0 %v3434_v25  ;;  %v3659_v43 = vld [vmem:[#allocation2 + $0x70] sm:$0xff] }
 0x4a3   : > { %3322 = vmatmul.f32.gmra.mxu3 %v3433_v24 }
 0x4a4   : > { %4190 = vmatpush.msra.mxu3 %v4177_v20  ;;  %v3436_v20 = vld [vmem:[#allocation2 + $0xef] sm:$0xff] }
 0x4a5   : > { %v3149_v35 = vpop.f32.mrf.mxu2 }
 0x4a6   : > { %v8979_v60 = vadd.f32 %v3149_v35, %v3009_v7  ;;  %v3012_v30 = vpop.f32.mrf.mxu1  ;;  %v3275_v1 = vpop.f32.mrf.mxu3 }
 0x4a7   : > { %v8982_v55 = vadd.f32 %v3275_v1, %v8764_v2  ;;  %v8984_v18 = vpop.f32.mrf.mxu0 }
 0x4a8   : > { %11227 = vst [vmem:[#allocation27_spill] sm:$0xff] %v8979_v60 }
 0x4a9   : > { %3752 = vmatmul.f32.gmra.mxu1 %v3658_v62  ;;  %v4416_v62 = vld [vmem:[#allocation6 + $0x848] sm:$0xff] }
 0x4aa   : > { %3991 = vmatmul.f32.gmra.mxu2 %v8986_v0  ;;  %3561 = vmatmul.f32.gmra.mxu0 %v3435_v63  ;;  %v5122_v0 = vld [vmem:[#allocation6 + $0x9f8] sm:$0xff] }
 0x4ab   : > { %3325 = vmatmul.f32.gmra.mxu3 %v3434_v25  ;;  %4429 = vmatpush.msra.mxu0 %v4416_v62 }
 0x4ac   : > { %5123 = vmatpush.msra.mxu2 %v5122_v0  ;;  %v3438_v0 = vld [vmem:[#allocation2 + $0xff] sm:$0xff] }
 0x4ad   : > { %v3152_v24 = vpop.f32.mrf.mxu2 }
 0x4ae   : > { %v8989_v7 = vadd.f32 %v3152_v24, %v3012_v30  ;;  %v3015_v35 = vpop.f32.mrf.mxu1  ;;  %v3278_v60 = vpop.f32.mrf.mxu3  ;;  %v4655_v24 = vld [vmem:[#allocation6 + $0x8c8] sm:$0xff] }
 0x4af   : > { %v8992_v2 = vadd.f32 %v3278_v60, %v8773_v4  ;;  %v8994_v1 = vpop.f32.mrf.mxu0  ;;  %4668 = vmatpush.msra.mxu1 %v4655_v24 }
 0x4b0   : > { %11229 = vst [vmem:[#allocation28_spill] sm:$0xff] %v8989_v7 }
 0x4b1   : > { %3755 = vmatmul.f32.gmra.mxu1 %v3659_v43  ;;  %v3660_v43 = vld [vmem:[#allocation2 + $0x78] sm:$0xff] }
 0x4b2   : > { %3994 = vmatmul.f32.gmra.mxu2 %v8996_v58  ;;  %3564 = vmatmul.f32.gmra.mxu0 %v3436_v20  ;;  %v9006_v58 = vld [vmem:[#allocation2 + $0x79] sm:$0xff] }
 0x4b3   : > { %3328 = vmatmul.f32.gmra.mxu3 %v3435_v63  ;;  %11232 = vst [vmem:[#allocation31_spill] sm:$0xff] %v9006_v58  ;;  %v3437_v63 = vld [vmem:[#allocation2 + $0xf7] sm:$0xff] }
 0x4b5   : > { %v3155_v25 = vpop.f32.mrf.mxu2 }
 0x4b6   : > { %v8999_v30 = vadd.f32 %v3155_v25, %v3015_v35  ;;  %v3018_v7 = vpop.f32.mrf.mxu1  ;;  %v3281_v4 = vpop.f32.mrf.mxu3 }
 0x4b7   : > { %v9002_v60 = vadd.f32 %v3281_v4, %v8782_v31  ;;  %v9004_v49 = vpop.f32.mrf.mxu0  ;;  %v4176_v4 = vld [vmem:[#allocation6 + $0x7c0] sm:$0xff] }
 0x4b8   : > { %11231 = vst [vmem:[#allocation30_spill] sm:$0xff] %v8999_v30  ;;  %4191 = vmatpush.msra.mxu3 %v4176_v4 }
 0x4b9   : > { %3758 = vmatmul.f32.gmra.mxu1 %v3660_v43 }
 0x4ba   : > { %3997 = vmatmul.f32.gmra.mxu2 %v9006_v58  ;;  %3567 = vmatmul.f32.gmra.mxu0 %v3437_v63  ;;  %v3662_v58 = vld [vmem:[#allocation2 + $0x88] sm:$0xff] }
 0x4bb   : > { %3331 = vmatmul.f32.gmra.mxu3 %v3436_v20 }
 0x4bd   : > { %v3158_v35 = vpop.f32.mrf.mxu2 }
 0x4be   : > { %v9009_v62 = vadd.f32 %v3158_v35, %v3018_v7  ;;  %v3021_v25 = vpop.f32.mrf.mxu1  ;;  %v3284_v24 = vpop.f32.mrf.mxu3 }
 0x4bf   : > { %v9012_v31 = vadd.f32 %v3284_v24, %v8791_v51  ;;  %v9014_v30 = vpop.f32.mrf.mxu0  ;;  %v4415_v24 = vld [vmem:[#allocation6 + $0x840] sm:$0xff] }
 0x4c0   : > { %11233 = vst [vmem:[#allocation52_spill] sm:$0xff] %v9009_v62  ;;  %4430 = vmatpush.msra.mxu0 %v4415_v24  ;;  %v9036_v24 = vld [vmem:[#allocation2 + $0x91] sm:$0xff] }
 0x4c1   : > { %11234 = vst [vmem:[#allocation32_spill] sm:$0xff] %v9014_v30  ;;  %3761 = vmatmul.f32.gmra.mxu1 %v3661_v37  ;;  %v9026_v30 = vld [vmem:[#allocation2 + $0x89] sm:$0xff] }
 0x4c2   : > { %4000 = vmatmul.f32.gmra.mxu2 %v9016_v56  ;;  %3570 = vmatmul.f32.gmra.mxu0 %v3438_v0  ;;  %11237 = vst [vmem:[#allocation34_spill] sm:$0xff] %v9026_v30  ;;  %v4654_v37 = vld [vmem:[#allocation6 + $0x8c0] sm:$0xff] }
 0x4c3   : > { %3334 = vmatmul.f32.gmra.mxu3 %v3437_v63  ;;  %v3439_v63 = vld [vmem:[#allocation2 + $0x107] sm:$0xff]  ;;  %4669 = vmatpush.msra.mxu1 %v4654_v37  ;;  %11241 = vst [vmem:[#allocation62_spill] sm:$0xff] %v9036_v24  ;;  %v11242_v37 = vld [vmem:[#allocation76_spill] sm:$0xff] }
 0x4c5   : > { %v3161_v7 = vpop.f32.mrf.mxu2 }
 0x4c6   : > { %v9019_v20 = vadd.f32 %v3161_v7, %v3021_v25  ;;  %v3024_v43 = vpop.f32.mrf.mxu1  ;;  %v3287_v35 = vpop.f32.mrf.mxu3 }
 0x4c7   : > { %v9022_v51 = vadd.f32 %v3287_v35, %v8800_v59  ;;  %v9024_v62 = vpop.f32.mrf.mxu0  ;;  %v5121_v59 = vld [vmem:[#allocation6 + $0x9f0] sm:$0xff] }
 0x4c8   : > { %11236 = vst [vmem:[#allocation54_spill] sm:$0xff] %v9019_v20  ;;  %5124 = vmatpush.msra.mxu2 %v5121_v59 }
 0x4c9   : > { %3764 = vmatmul.f32.gmra.mxu1 %v3662_v58  ;;  %v3663_v58 = vld [vmem:[#allocation2 + $0x90] sm:$0xff] }
 0x4ca   : > { %4003 = vmatmul.f32.gmra.mxu2 %v9026_v30  ;;  %3573 = vmatmul.f32.gmra.mxu0 %v3439_v63 }
 0x4cb   : > { %3337 = vmatmul.f32.gmra.mxu3 %v3438_v0  ;;  %v3440_v0 = vld [vmem:[#allocation2 + $0x10f] sm:$0xff] }
 0x4cd   : > { %v3164_v25 = vpop.f32.mrf.mxu2 }
 0x4ce   : > { %v9029_v4 = vadd.f32 %v3164_v25, %v3024_v43  ;;  %v3027_v7 = vpop.f32.mrf.mxu1  ;;  %v3290_v35 = vpop.f32.mrf.mxu3  ;;  %v3048_v43 = vadd.f32 %v8668_v33, %v11242_v37  ;;  %v4175_v25 = vld [vmem:[#allocation6 + $0x7b8] sm:$0xff] }
 0x4cf   : > { %v9032_v20 = vadd.f32 %v3290_v35, %v8809_v57  ;;  %v9034_v56 = vpop.f32.mrf.mxu0  ;;  %4192 = vmatpush.msra.mxu3 %v4175_v25  ;;  %v4653_v25 = vld [vmem:[#allocation6 + $0x8b8] sm:$0xff] }
 0x4d0   : > { %11238 = vst [vmem:[#allocation35_spill] sm:$0xff] %v9029_v4  ;;  %v3368_v57 = vadd.f32 %v8888_v34, %v3048_v43  ;;  %v3051_v34 = vadd.f32 %v8680_v46, %v8671_v38  ;;  %4670 = vmatpush.msra.mxu1 %v4653_v25  ;;  %v3665_v38 = vld [vmem:[#allocation2 + $0xa0] sm:$0xff] }
 0x4d1   : > { %11239 = vst [vmem:[#allocation37_spill] sm:$0xff] %v9032_v20  ;;  %3767 = vmatmul.f32.gmra.mxu1 %v3663_v58  ;;  %v9049_v20 = vld [vmem:[#allocation2 + $0x99] sm:$0xff]  ;;  %v9063_v46 = vld [vmem:[#allocation2 + $0xa1] sm:$0xff] }
 0x4d2   : > { %11240 = vst [vmem:[#allocation38_spill] sm:$0xff] %v9034_v56  ;;  %4006 = vmatmul.f32.gmra.mxu2 %v9036_v24  ;;  %3576 = vmatmul.f32.gmra.mxu0 %v3440_v0  ;;  %v3664_v24 = vld [vmem:[#allocation2 + $0x98] sm:$0xff]  ;;  %v3607_v33 = vadd.f32 %v8891_v11, %v3368_v57  ;;  %v3369_v37 = vadd.f32 %v8895_v15, %v3051_v34  ;;  %v5120_v15 = vld [vmem:[#allocation6 + $0x9e8] sm:$0xff] }
 0x4d3   : > { %3340 = vmatmul.f32.gmra.mxu3 %v3439_v63  ;;  %v3441_v63 = vld [vmem:[#allocation2 + $0x117] sm:$0xff]  ;;  %5125 = vmatpush.msra.mxu2 %v5120_v15 }
 0x4d5   : > { %v3167_v4 = vpop.f32.mrf.mxu2 }
 0x4d6   : > { %v9042_v59 = vadd.f32 %v3167_v4, %v3027_v7  ;;  %v3293_v35 = vpop.f32.mrf.mxu3  ;;  %v3723_v30 = vpop.f32.mrf.mxu1  ;;  %v4414_v7 = vld [vmem:[#allocation6 + $0x838] sm:$0xff] }
 0x4d7   : > { %v9045_v56 = vadd.f32 %v3293_v35, %v8818_v29  ;;  %v9047_v58 = vpop.f32.mrf.mxu0  ;;  %v3846_v4 = vadd.f32 %v3723_v30, %v3607_v33  ;;  %4431 = vmatpush.msra.mxu0 %v4414_v7  ;;  %v3608_v30 = vadd.f32 %v8897_v21, %v3369_v37  ;;  %v3666_v21 = vld [vmem:[#allocation2 + $0xa8] sm:$0xff] }
 0x4d8   : > { %v9074_v37 = vld [vmem:[#allocation2 + $0xa9] sm:$0xff] }
 0x4d9   : > { %3770 = vmatmul.f32.gmra.mxu1 %v3664_v24 }
 0x4da   : > { %4009 = vmatmul.f32.gmra.mxu2 %v9049_v20  ;;  %3579 = vmatmul.f32.gmra.mxu0 %v3441_v63 }
 0x4db   : > { %3343 = vmatmul.f32.gmra.mxu3 %v3440_v0  ;;  %v3442_v0 = vld [vmem:[#allocation2 + $0x11f] sm:$0xff] }
 0x4dd   : > { %v3962_v29 = vpop.f32.mrf.mxu2 }
 0x4de   : > { %v9056_v43 = vadd.f32 %v3962_v29, %v3846_v4  ;;  %v3296_v35 = vpop.f32.mrf.mxu3  ;;  %v3726_v11 = vpop.f32.mrf.mxu1 }
 0x4df   : > { %v9059_v24 = vadd.f32 %v3296_v35, %v8827_v5  ;;  %v9061_v57 = vpop.f32.mrf.mxu0  ;;  %v3847_v33 = vadd.f32 %v3726_v11, %v3608_v30  ;;  %v3609_v35 = vadd.f32 %v8904_v41, %v8902_v6  ;;  %v3443_v11 = vld [vmem:[#allocation2 + $0x127] sm:$0xff]  ;;  %v3667_v41 = vld [vmem:[#allocation2 + $0xb0] sm:$0xff] }
 0x4e0   : > { %11244 = vst [vmem:[#allocation42_spill] sm:$0xff] %v9061_v57  ;;  %v9086_v6 = vld [vmem:[#allocation2 + $0xb1] sm:$0xff] }
 0x4e1   : > { %11243 = vst [vmem:[#allocation41_spill] sm:$0xff] %v9059_v24  ;;  %3773 = vmatmul.f32.gmra.mxu1 %v3665_v38 }
 0x4e2   : > { %4012 = vmatmul.f32.gmra.mxu2 %v9063_v46  ;;  %3582 = vmatmul.f32.gmra.mxu0 %v3442_v0 }
 0x4e3   : > { %3346 = vmatmul.f32.gmra.mxu3 %v3441_v63  ;;  %v4174_v63 = vld [vmem:[#allocation6 + $0x7b0] sm:$0xff] }
 0x4e4   : > { %4193 = vmatpush.msra.mxu3 %v4174_v63  ;;  %v3444_v63 = vld [vmem:[#allocation2 + $0x12f] sm:$0xff] }
 0x4e5   : > { %v3965_v34 = vpop.f32.mrf.mxu2 }
 0x4e6   : > { %v9067_v4 = vadd.f32 %v3965_v34, %v3847_v33  ;;  %v3299_v5 = vpop.f32.mrf.mxu3  ;;  %v3729_v7 = vpop.f32.mrf.mxu1 }
 0x4e7   : > { %v9070_v29 = vadd.f32 %v3299_v5, %v8836_v52  ;;  %v9072_v25 = vpop.f32.mrf.mxu0  ;;  %v3848_v38 = vadd.f32 %v3729_v7, %v3609_v35  ;;  %v4413_v7 = vld [vmem:[#allocation6 + $0x830] sm:$0xff]  ;;  %v4172_v35 = vld [vmem:[#allocation6 + $0x7a0] sm:$0xff] }
 0x4e8   : > { %11246 = vst [vmem:[#allocation44_spill] sm:$0xff] %v9072_v25  ;;  %4432 = vmatpush.msra.mxu0 %v4413_v7  ;;  %v4391_v25 = vld [vmem:[#allocation2 + $0xfa] sm:$0xff] }
 0x4e9   : > { %11245 = vst [vmem:[#allocation72_spill] sm:$0xff] %v9070_v29  ;;  %3776 = vmatmul.f32.gmra.mxu1 %v3666_v21  ;;  %v3610_v21 = vadd.f32 %v8914_v45, %v8912_v17  ;;  %v5119_v17 = vld [vmem:[#allocation6 + $0x9e0] sm:$0xff] }
 0x4ea   : > { %4015 = vmatmul.f32.gmra.mxu2 %v9074_v37  ;;  %3585 = vmatmul.f32.gmra.mxu0 %v3443_v11  ;;  %v4392_v29 = vld [vmem:[#allocation2 + $0x102] sm:$0xff] }
 0x4eb   : > { %3349 = vmatmul.f32.gmra.mxu3 %v3442_v0  ;;  %v4173_v0 = vld [vmem:[#allocation6 + $0x7a8] sm:$0xff]  ;;  %5126 = vmatpush.msra.mxu2 %v5119_v17 }
 0x4ec   : > { %4194 = vmatpush.msra.mxu3 %v4173_v0  ;;  %v4170_v0 = vld [vmem:[#allocation6 + $0x790] sm:$0xff] }
 0x4ed   : > { %v3968_v30 = vpop.f32.mrf.mxu2 }
 0x4ee   : > { %v9079_v52 = vadd.f32 %v3968_v30, %v3848_v38  ;;  %v3302_v15 = vpop.f32.mrf.mxu3  ;;  %v3732_v33 = vpop.f32.mrf.mxu1  ;;  %v4652_v38 = vld [vmem:[#allocation6 + $0x8b0] sm:$0xff]  ;;  %4195 = vmatpush.msra.mxu3 %v4172_v35  ;;  %v4169_v35 = vld [vmem:[#allocation6 + $0x788] sm:$0xff] }
 0x4ef   : > { %v9082_v34 = vadd.f32 %v3302_v15, %v8845_v47  ;;  %v9084_v5 = vpop.f32.mrf.mxu0  ;;  %v3849_v47 = vadd.f32 %v3732_v33, %v3610_v21  ;;  %4671 = vmatpush.msra.mxu1 %v4652_v38  ;;  %v3668_v33 = vld [vmem:[#allocation2 + $0xb8] sm:$0xff]  ;;  %v3611_v21 = vadd.f32 %v8924_v28, %v8922_v48  ;;  %v4412_v38 = vld [vmem:[#allocation6 + $0x828] sm:$0xff] }
 0x4f0   : > { %11248 = vst [vmem:[#allocation73_spill] sm:$0xff] %v9084_v5  ;;  %v4171_v5 = vld [vmem:[#allocation6 + $0x798] sm:$0xff]  ;;  %4433 = vmatpush.msra.mxu0 %v4412_v38 }
 0x4f1   : > { %11247 = vst [vmem:[#allocation48_spill] sm:$0xff] %v9082_v34  ;;  %3779 = vmatmul.f32.gmra.mxu1 %v3667_v41  ;;  %4196 = vmatpush.msra.mxu3 %v4171_v5  ;;  %v4168_v5 = vld [vmem:[#allocation6 + $0x780] sm:$0xff] }
 0x4f2   : > { %4018 = vmatmul.f32.gmra.mxu2 %v9086_v6  ;;  %3588 = vmatmul.f32.gmra.mxu0 %v3444_v63  ;;  %v9110_v38 = vld [vmem:[#allocation2 + $0xc1] sm:$0xff] }
 0x4f3   : > { %3352 = vmatmul.f32.gmra.mxu3 %v3443_v11  ;;  %v9098_v11 = vld [vmem:[#allocation2 + $0xb9] sm:$0xff] }
 0x4f4   : > { %4197 = vmatpush.msra.mxu3 %v4170_v0  ;;  %v4410_v0 = vld [vmem:[#allocation6 + $0x818] sm:$0xff] }
 0x4f5   : > { %v3971_v30 = vpop.f32.mrf.mxu2 }
 0x4f6   : > { %v9091_v15 = vadd.f32 %v3971_v30, %v3849_v47  ;;  %v3305_v45 = vpop.f32.mrf.mxu3  ;;  %v3735_v41 = vpop.f32.mrf.mxu1  ;;  %v3445_v47 = vld [vmem:[#allocation2 + $0x137] sm:$0xff]  ;;  %4198 = vmatpush.msra.mxu3 %v4169_v35  ;;  %v3669_v35 = vld [vmem:[#allocation2 + $0xc0] sm:$0xff] }
 0x4f7   : > { %v9094_v34 = vadd.f32 %v3305_v45, %v8854_v61  ;;  %v9096_v7 = vpop.f32.mrf.mxu0  ;;  %v4411_v61 = vld [vmem:[#allocation6 + $0x820] sm:$0xff]  ;;  %v3850_v30 = vadd.f32 %v3735_v41, %v3611_v21  ;;  %v4408_v41 = vld [vmem:[#allocation6 + $0x808] sm:$0xff] }
 0x4f8   : > { %11250 = vst [vmem:[#allocation53_spill] sm:$0xff] %v9096_v7  ;;  %4199 = vmatpush.msra.mxu3 %v4168_v5  ;;  %4434 = vmatpush.msra.mxu0 %v4411_v61  ;;  %v4409_v7 = vld [vmem:[#allocation6 + $0x810] sm:$0xff]  ;;  %v4407_v21 = vld [vmem:[#allocation6 + $0x800] sm:$0xff] }
 0x4f9   : > { %11249 = vst [vmem:[#allocation49_spill] sm:$0xff] %v9094_v34  ;;  %3782 = vmatmul.f32.gmra.mxu1 %v3668_v33  ;;  %v3446_v5 = vld [vmem:[#allocation2 + $0x13f] sm:$0xff] }
 0x4fa   : > { %4021 = vmatmul.f32.gmra.mxu2 %v9098_v11  ;;  %3591 = vmatmul.f32.gmra.mxu0 %v3445_v47 }
 0x4fb   : > { %3355 = vmatmul.f32.gmra.mxu3 %v3444_v63  ;;  %4435 = vmatpush.msra.mxu0 %v4410_v0  ;;  %v3612_v63 = vadd.f32 %v8934_v53, %v8932_v22  ;;  %v4651_v22 = vld [vmem:[#allocation6 + $0x8a8] sm:$0xff] }
 0x4fc   : > { %4672 = vmatpush.msra.mxu1 %v4651_v22 }
 0x4fd   : > { %v3974_v17 = vpop.f32.mrf.mxu2  ;;  %4436 = vmatpush.msra.mxu0 %v4409_v7 }
 0x4fe   : > { %v9103_v45 = vadd.f32 %v3974_v17, %v3850_v30  ;;  %v3308_v28 = vpop.f32.mrf.mxu3  ;;  %v3738_v48 = vpop.f32.mrf.mxu1 }
 0x4ff   : > { %v9106_v33 = vadd.f32 %v3308_v28, %v8863_v26  ;;  %v9108_v34 = vpop.f32.mrf.mxu0  ;;  %4437 = vmatpush.msra.mxu0 %v4408_v41  ;;  %v3851_v61 = vadd.f32 %v3738_v48, %v3612_v63  ;;  %v3670_v28 = vld [vmem:[#allocation2 + $0xc8] sm:$0xff]  ;;  %v5118_v48 = vld [vmem:[#allocation6 + $0x9d8] sm:$0xff] }
 0x500   : > { %11252 = vst [vmem:[#allocation86_spill] sm:$0xff] %v9108_v34  ;;  %v3447_v63 = vld [vmem:[#allocation2 + $0x147] sm:$0xff]  ;;  %5127 = vmatpush.msra.mxu2 %v5118_v48 }
 0x501   : > { %11251 = vst [vmem:[#allocation76_spill] sm:$0xff] %v9106_v33  ;;  %3785 = vmatmul.f32.gmra.mxu1 %v3669_v35  ;;  %4438 = vmatpush.msra.mxu0 %v4407_v21  ;;  %v9122_v35 = vld [vmem:[#allocation2 + $0xc9] sm:$0xff]  ;;  %v4386_v33 = vld [vmem:[#allocation2 + $0xd2] sm:$0xff] }
 0x502   : > { %4024 = vmatmul.f32.gmra.mxu2 %v9110_v38  ;;  %3594 = vmatmul.f32.gmra.mxu0 %v3446_v5 }
 0x503   : > { %3358 = vmatmul.f32.gmra.mxu3 %v3445_v47  ;;  %v3613_v47 = vadd.f32 %v8944_v10, %v8942_v3  ;;  %v3671_v3 = vld [vmem:[#allocation2 + $0xd0] sm:$0xff] }
 0x504   : > { %v9134_v10 = vld [vmem:[#allocation2 + $0xd1] sm:$0xff] }
 0x505   : > { %v3977_v26 = vpop.f32.mrf.mxu2 }
 0x506   : > { %v9115_v30 = vadd.f32 %v3977_v26, %v3851_v61  ;;  %v3311_v17 = vpop.f32.mrf.mxu3  ;;  %v3741_v0 = vpop.f32.mrf.mxu1 }
 0x507   : > { %v9118_v7 = vadd.f32 %v3311_v17, %v8872_v9  ;;  %v9120_v53 = vpop.f32.mrf.mxu0  ;;  %v3852_v41 = vadd.f32 %v3741_v0, %v3613_v47 }
 0x508   : > { %11254 = vst [vmem:[#allocation88_spill] sm:$0xff] %v9120_v53 }
 0x509   : > { %11253 = vst [vmem:[#allocation87_spill] sm:$0xff] %v9118_v7  ;;  %3788 = vmatmul.f32.gmra.mxu1 %v3670_v28  ;;  %v3614_v28 = vadd.f32 %v8954_v32, %v8952_v40  ;;  %v3615_v32 = vadd.f32 %v8964_v19, %v8962_v23  ;;  %v3449_v40 = vld [vmem:[#allocation2 + $0x157] sm:$0xff]  ;;  %v3673_v19 = vld [vmem:[#allocation2 + $0xe0] sm:$0xff] }
 0x50a   : > { %4027 = vmatmul.f32.gmra.mxu2 %v9122_v35  ;;  %3597 = vmatmul.f32.gmra.mxu0 %v3447_v63 }
 0x50b   : > { %3361 = vmatmul.f32.gmra.mxu3 %v3446_v5  ;;  %v3448_v5 = vld [vmem:[#allocation2 + $0x14f] sm:$0xff] }
 0x50d   : > { %v3980_v9 = vpop.f32.mrf.mxu2 }
 0x50e   : > { %v9127_v21 = vadd.f32 %v3980_v9, %v3852_v41  ;;  %v3314_v61 = vpop.f32.mrf.mxu3  ;;  %v3744_v26 = vpop.f32.mrf.mxu1 }
 0x50f   : > { %v9130_v17 = vadd.f32 %v3314_v61, %v8881_v27  ;;  %v9132_v22 = vpop.f32.mrf.mxu0  ;;  %v3853_v0 = vadd.f32 %v3744_v26, %v3614_v28  ;;  %v4650_v26 = vld [vmem:[#allocation6 + $0x8a0] sm:$0xff] }
 0x510   : > { %11256 = vst [vmem:[#allocation90_spill] sm:$0xff] %v9132_v22  ;;  %v3672_v22 = vld [vmem:[#allocation2 + $0xd8] sm:$0xff]  ;;  %4673 = vmatpush.msra.mxu1 %v4650_v26 }
 0x511   : > { %11255 = vst [vmem:[#allocation89_spill] sm:$0xff] %v9130_v17  ;;  %3791 = vmatmul.f32.gmra.mxu1 %v3671_v3  ;;  %v9146_v17 = vld [vmem:[#allocation2 + $0xd9] sm:$0xff] }
 0x512   : > { %4030 = vmatmul.f32.gmra.mxu2 %v9134_v10  ;;  %3600 = vmatmul.f32.gmra.mxu0 %v3448_v5 }
 0x513   : > { %3364 = vmatmul.f32.gmra.mxu3 %v3447_v63 }
 0x515   : > { %v3983_v47 = vpop.f32.mrf.mxu2 }
 0x516   : > { %v9139_v48 = vadd.f32 %v3983_v47, %v3853_v0  ;;  %v3317_v27 = vpop.f32.mrf.mxu3  ;;  %v3747_v41 = vpop.f32.mrf.mxu1  ;;  %v5117_v47 = vld [vmem:[#allocation6 + $0x9d0] sm:$0xff] }
 0x517   : > { %v9142_v9 = vadd.f32 %v3317_v27, %v8886_v14  ;;  %v9144_v61 = vpop.f32.mrf.mxu0  ;;  %v3854_v63 = vadd.f32 %v3747_v41, %v3615_v32  ;;  %5128 = vmatpush.msra.mxu2 %v5117_v47  ;;  %v4365_v27 = vld [vmem:[#allocation2 + $0x2a] sm:$0xff] }
 0x518   : > { %11258 = vst [vmem:[#allocation92_spill] sm:$0xff] %v9144_v61 }
 0x519   : > { %11257 = vst [vmem:[#allocation91_spill] sm:$0xff] %v9142_v9  ;;  %3794 = vmatmul.f32.gmra.mxu1 %v3672_v22  ;;  %v9159_v22 = vld [vmem:[#allocation2 + $0xe1] sm:$0xff] }
 0x51a   : > { %4033 = vmatmul.f32.gmra.mxu2 %v9146_v17  ;;  %3603 = vmatmul.f32.gmra.mxu0 %v3449_v40  ;;  %v11315_v9 = vld [vmem:[#allocation54_spill] sm:$0xff] }
 0x51b   : > { %4200 = vmatmul.f32.vlgmr.msra.gmra.mxu3 %v8906_v42  ;;  %v3616_v42 = vadd.f32 %v8974_v39, %v8972_v44  ;;  %v9172_v39 = vld [vmem:[#allocation2 + $0xe9] sm:$0xff]  ;;  %v3617_v44 = vadd.f32 %v8984_v18, %v8982_v55  ;;  %v9185_v55 = vld [vmem:[#allocation2 + $0xf1] sm:$0xff] }
 0x51c   : > { %v3675_v18 = vld [vmem:[#allocation2 + $0xf0] sm:$0xff] }
 0x51d   : > { %v3986_v3 = vpop.f32.mrf.mxu2 }
 0x51e   : > { %v9152_v14 = vadd.f32 %v3986_v3, %v3854_v63  ;;  %v3320_v28 = vpop.f32.mrf.mxu3  ;;  %v3750_v5 = vpop.f32.mrf.mxu1 }
 0x51f   : > { %v9155_v0 = vadd.f32 %v3320_v28, %v8893_v54  ;;  %v9157_v23 = vpop.f32.mrf.mxu0  ;;  %v3855_v41 = vadd.f32 %v3750_v5, %v3616_v42  ;;  %v3674_v28 = vld [vmem:[#allocation2 + $0xe8] sm:$0xff] }
 0x520   : > { %11260 = vst [vmem:[#allocation94_spill] sm:$0xff] %v9157_v23  ;;  %v11308_v23 = vld [vmem:[#allocation34_spill] sm:$0xff] }
 0x521   : > { %11259 = vst [vmem:[#allocation93_spill] sm:$0xff] %v9155_v0  ;;  %3797 = vmatmul.f32.gmra.mxu1 %v3673_v19 }
 0x522   : > { %4036 = vmatmul.f32.gmra.mxu2 %v9159_v22  ;;  %4439 = vmatmul.f32.vlgmr.msra.gmra.mxu0 %v4365_v27 }
 0x523   : > { %4203 = vmatmul.f32.gmra.mxu3 %v8916_v12  ;;  %v4366_v12 = vld [vmem:[#allocation2 + $0x32] sm:$0xff] }
 0x525   : > { %v3989_v54 = vpop.f32.mrf.mxu2 }
 0x526   : > { %v9165_v32 = vadd.f32 %v3989_v54, %v3855_v41  ;;  %v3323_v40 = vpop.f32.mrf.mxu3  ;;  %v3753_v63 = vpop.f32.mrf.mxu1  ;;  %v4649_v41 = vld [vmem:[#allocation6 + $0x898] sm:$0xff] }
 0x527   : > { %v9168_v26 = vadd.f32 %v3323_v40, %v8899_v16  ;;  %v9170_v3 = vpop.f32.mrf.mxu0  ;;  %v3856_v5 = vadd.f32 %v3753_v63, %v3617_v44  ;;  %4674 = vmatpush.msra.mxu1 %v4649_v41  ;;  %v3618_v40 = vadd.f32 %v8994_v1, %v8992_v2  ;;  %v4367_v63 = vld [vmem:[#allocation2 + $0x3a] sm:$0xff]  ;;  %v3619_v41 = vadd.f32 %v9004_v49, %v9002_v60 }
 0x528   : > { %11262 = vst [vmem:[#allocation96_spill] sm:$0xff] %v9170_v3  ;;  %v3676_v2 = vld [vmem:[#allocation2 + $0xf8] sm:$0xff]  ;;  %v9211_v49 = vld [vmem:[#allocation2 + $0x101] sm:$0xff] }
 0x529   : > { %11261 = vst [vmem:[#allocation95_spill] sm:$0xff] %v9168_v26  ;;  %3800 = vmatmul.f32.gmra.mxu1 %v3674_v28  ;;  %v9198_v1 = vld [vmem:[#allocation2 + $0xf9] sm:$0xff] }
 0x52a   : > { %4039 = vmatmul.f32.gmra.mxu2 %v9172_v39  ;;  %4442 = vmatmul.f32.gmra.mxu0 %v4366_v12  ;;  %v11271_v60 = vld [vmem:[#allocation32_spill] sm:$0xff] }
 0x52b   : > { %4206 = vmatmul.f32.gmra.mxu3 %v8926_v36  ;;  %v5116_v36 = vld [vmem:[#allocation6 + $0x9c8] sm:$0xff]  ;;  %v4375_v3 = vld [vmem:[#allocation2 + $0x7a] sm:$0xff] }
 0x52c   : > { %5129 = vmatpush.msra.mxu2 %v5116_v36 }
 0x52d   : > { %v3992_v47 = vpop.f32.mrf.mxu2 }
 0x52e   : > { %v9178_v19 = vadd.f32 %v3992_v47, %v3856_v5  ;;  %v3326_v16 = vpop.f32.mrf.mxu3  ;;  %v3756_v42 = vpop.f32.mrf.mxu1 }
 0x52f   : > { %v9181_v27 = vadd.f32 %v3326_v16, %v8909_v13  ;;  %v9183_v54 = vpop.f32.mrf.mxu0  ;;  %v3857_v28 = vadd.f32 %v3756_v42, %v3618_v40 }
 0x530   : > { %11264 = vst [vmem:[#allocation98_spill] sm:$0xff] %v9183_v54 }
 0x531   : > { %11263 = vst [vmem:[#allocation97_spill] sm:$0xff] %v9181_v27  ;;  %3803 = vmatmul.f32.gmra.mxu1 %v3675_v18  ;;  %v11267_v18 = vld [vmem:[#allocation22_spill] sm:$0xff]  ;;  %v3680_v27 = vld [vmem:[#allocation2 + $0x118] sm:$0xff] }
 0x532   : > { %4042 = vmatmul.f32.gmra.mxu2 %v9185_v55  ;;  %4445 = vmatmul.f32.gmra.mxu0 %v4367_v63 }
 0x533   : > { %4209 = vmatmul.f32.gmra.mxu3 %v8936_v50  ;;  %v4368_v50 = vld [vmem:[#allocation2 + $0x42] sm:$0xff] }
 0x535   : > { %v3995_v13 = vpop.f32.mrf.mxu2 }
 0x536   : > { %v9191_v44 = vadd.f32 %v3995_v13, %v3857_v28  ;;  %v3329_v12 = vpop.f32.mrf.mxu3  ;;  %v3759_v5 = vpop.f32.mrf.mxu1  ;;  %v11268_v28 = vld [vmem:[#allocation20_spill] sm:$0xff] }
 0x537   : > { %v9194_v47 = vadd.f32 %v3329_v12, %v8919_v8  ;;  %v9196_v16 = vpop.f32.mrf.mxu0  ;;  %v3858_v42 = vadd.f32 %v3759_v5, %v3619_v41  ;;  %v4369_v5 = vld [vmem:[#allocation2 + $0x4a] sm:$0xff] }
 0x538   : > { %11266 = vst [vmem:[#allocation100_spill] sm:$0xff] %v9196_v16  ;;  %v3677_v16 = vld [vmem:[#allocation2 + $0x100] sm:$0xff] }
 0x539   : > { %11265 = vst [vmem:[#allocation99_spill] sm:$0xff] %v9194_v47  ;;  %3806 = vmatmul.f32.gmra.mxu1 %v3676_v2  ;;  %v3620_v2 = vadd.f32 %v11271_v60, %v9012_v31  ;;  %v5115_v47 = vld [vmem:[#allocation6 + $0x9c0] sm:$0xff] }
 0x53a   : > { %4045 = vmatmul.f32.gmra.mxu2 %v9198_v1  ;;  %4448 = vmatmul.f32.gmra.mxu0 %v4368_v50  ;;  %v11272_v50 = vld [vmem:[#allocation65_spill] sm:$0xff]  ;;  %v9224_v60 = vld [vmem:[#allocation2 + $0x109] sm:$0xff] }
 0x53b   : > { %4212 = vmatmul.f32.gmra.mxu3 %v11267_v18  ;;  %5130 = vmatpush.msra.mxu2 %v5115_v47 }
 0x53d   : > { %v3998_v40 = vpop.f32.mrf.mxu2 }
 0x53e   : > { %v9204_v36 = vadd.f32 %v3998_v40, %v3858_v42  ;;  %v3332_v8 = vpop.f32.mrf.mxu3  ;;  %v3762_v63 = vpop.f32.mrf.mxu1  ;;  %v4648_v40 = vld [vmem:[#allocation6 + $0x890] sm:$0xff] }
 0x53f   : > { %v9207_v13 = vadd.f32 %v3332_v8, %v11268_v28  ;;  %v9209_v12 = vpop.f32.mrf.mxu0  ;;  %v3859_v41 = vadd.f32 %v3762_v63, %v3620_v2  ;;  %4675 = vmatpush.msra.mxu1 %v4648_v40  ;;  %v3621_v63 = vadd.f32 %v9024_v62, %v9022_v51  ;;  %v4370_v2 = vld [vmem:[#allocation2 + $0x52] sm:$0xff]  ;;  %v11280_v51 = vld [vmem:[#allocation37_spill] sm:$0xff] }
 0x540   : > { %11270 = vst [vmem:[#allocation20_spill] sm:$0xff] %v9209_v12  ;;  %v11273_v12 = vld [vmem:[#allocation21_spill] sm:$0xff]  ;;  %v9237_v62 = vld [vmem:[#allocation2 + $0x111] sm:$0xff] }
 0x541   : > { %11269 = vst [vmem:[#allocation22_spill] sm:$0xff] %v9207_v13  ;;  %3809 = vmatmul.f32.gmra.mxu1 %v3677_v16  ;;  %v3678_v16 = vld [vmem:[#allocation2 + $0x108] sm:$0xff] }
 0x542   : > { %4048 = vmatmul.f32.gmra.mxu2 %v9211_v49  ;;  %4451 = vmatmul.f32.gmra.mxu0 %v4369_v5 }
 0x543   : > { %4215 = vmatmul.f32.gmra.mxu3 %v11272_v50 }
 0x545   : > { %v4001_v42 = vpop.f32.mrf.mxu2 }
 0x546   : > { %v9217_v18 = vadd.f32 %v4001_v42, %v3859_v41  ;;  %v3335_v8 = vpop.f32.mrf.mxu3  ;;  %v3765_v28 = vpop.f32.mrf.mxu1  ;;  %v11276_v41 = vld [vmem:[#allocation24_spill] sm:$0xff] }
 0x547   : > { %v9220_v13 = vadd.f32 %v3335_v8, %v11273_v12  ;;  %v9222_v31 = vpop.f32.mrf.mxu0  ;;  %v3860_v5 = vadd.f32 %v3765_v28, %v3621_v63  ;;  %v11277_v8 = vld [vmem:[#allocation63_spill] sm:$0xff]  ;;  %v4371_v28 = vld [vmem:[#allocation2 + $0x5a] sm:$0xff] }
 0x548   : > { %11275 = vst [vmem:[#allocation65_spill] sm:$0xff] %v9222_v31 }
 0x549   : > { %11274 = vst [vmem:[#allocation32_spill] sm:$0xff] %v9220_v13  ;;  %3812 = vmatmul.f32.gmra.mxu1 %v3678_v16  ;;  %v3679_v13 = vld [vmem:[#allocation2 + $0x110] sm:$0xff]  ;;  %v11281_v16 = vld [vmem:[#allocation38_spill] sm:$0xff] }
 0x54a   : > { %4051 = vmatmul.f32.gmra.mxu2 %v9224_v60  ;;  %4454 = vmatmul.f32.gmra.mxu0 %v4370_v2  ;;  %v3622_v54 = vadd.f32 %v11281_v16, %v11280_v51  ;;  %v11282_v2 = vld [vmem:[#allocation25_spill] sm:$0xff] }
 0x54b   : > { %4218 = vmatmul.f32.gmra.mxu3 %v11276_v41  ;;  %v9250_v51 = vld [vmem:[#allocation2 + $0x119] sm:$0xff] }
 0x54d   : > { %v4004_v12 = vpop.f32.mrf.mxu2 }
 0x54e   : > { %v9230_v50 = vadd.f32 %v4004_v12, %v3860_v5  ;;  %v3338_v42 = vpop.f32.mrf.mxu3  ;;  %v3768_v40 = vpop.f32.mrf.mxu1 }
 0x54f   : > { %v9233_v31 = vadd.f32 %v3338_v42, %v11277_v8  ;;  %v9235_v47 = vpop.f32.mrf.mxu0  ;;  %v3861_v63 = vadd.f32 %v3768_v40, %v3622_v54  ;;  %v11284_v8 = vld [vmem:[#allocation23_spill] sm:$0xff]  ;;  %v4372_v40 = vld [vmem:[#allocation2 + $0x62] sm:$0xff] }
 0x550   : > { %11279 = vst [vmem:[#allocation24_spill] sm:$0xff] %v9235_v47  ;;  %v4647_v54 = vld [vmem:[#allocation6 + $0x888] sm:$0xff] }
 0x551   : > { %11278 = vst [vmem:[#allocation21_spill] sm:$0xff] %v9233_v31  ;;  %3815 = vmatmul.f32.gmra.mxu1 %v3679_v13  ;;  %v3623_v13 = vadd.f32 %v9047_v58, %v9045_v56 }
 0x552   : > { %4054 = vmatmul.f32.gmra.mxu2 %v9237_v62  ;;  %4457 = vmatmul.f32.gmra.mxu0 %v4371_v28  ;;  %v11287_v28 = vld [vmem:[#allocation69_spill] sm:$0xff] }
 0x553   : > { %4221 = vmatmul.f32.gmra.mxu3 %v11282_v2  ;;  %4676 = vmatpush.msra.mxu1 %v4647_v54 }
 0x555   : > { %v4007_v5 = vpop.f32.mrf.mxu2 }
 0x556   : > { %v9243_v41 = vadd.f32 %v4007_v5, %v3861_v63  ;;  %v3341_v12 = vpop.f32.mrf.mxu3  ;;  %v3771_v42 = vpop.f32.mrf.mxu1  ;;  %v5114_v63 = vld [vmem:[#allocation6 + $0x9b8] sm:$0xff] }
 0x557   : > { %v9246_v47 = vadd.f32 %v3341_v12, %v11284_v8  ;;  %v9248_v31 = vpop.f32.mrf.mxu0  ;;  %v3862_v16 = vadd.f32 %v3771_v42, %v3623_v13  ;;  %5131 = vmatpush.msra.mxu2 %v5114_v63  ;;  %v4373_v42 = vld [vmem:[#allocation2 + $0x6a] sm:$0xff]  ;;  %v11293_v13 = vld [vmem:[#allocation29_spill] sm:$0xff] }
 0x558   : > { %11283 = vst [vmem:[#allocation63_spill] sm:$0xff] %v9243_v41  ;;  %v3682_v63 = vld [vmem:[#allocation2 + $0x128] sm:$0xff]  ;;  %v5698_v41 = vld [vmem:[#allocation6 + $0xaf0] sm:$0xff] }
 0x559   : > { %11285 = vst [vmem:[#allocation37_spill] sm:$0xff] %v9246_v47  ;;  %3818 = vmatmul.f32.gmra.mxu1 %v3680_v27  ;;  %v3681_v27 = vld [vmem:[#allocation2 + $0x120] sm:$0xff] }
 0x55a   : > { %11286 = vst [vmem:[#allocation38_spill] sm:$0xff] %v9248_v31  ;;  %4057 = vmatmul.f32.gmra.mxu2 %v9250_v51  ;;  %4460 = vmatmul.f32.gmra.mxu0 %v4372_v40  ;;  %v11290_v31 = vld [vmem:[#allocation67_spill] sm:$0xff]  ;;  %v9265_v47 = vld [vmem:[#allocation2 + $0x121] sm:$0xff] }
 0x55b   : > { %4224 = vmatmul.f32.gmra.mxu3 %v11287_v28 }
 0x55d   : > { %v4010_v2 = vpop.f32.mrf.mxu2 }
 0x55e   : > { %v9256_v5 = vadd.f32 %v4010_v2, %v3862_v16  ;;  %v3344_v12 = vpop.f32.mrf.mxu3  ;;  %v9258_v8 = vpop.f32.mrf.mxu1  ;;  %v11295_v16 = vld [vmem:[#allocation27_spill] sm:$0xff] }
 0x55f   : > { %11289 = vst [vmem:[#allocation23_spill] sm:$0xff] %v9258_v8  ;;  %v9261_v56 = vadd.f32 %v3344_v12, %v11290_v31  ;;  %v9263_v58 = vpop.f32.mrf.mxu0  ;;  %v9276_v2 = vld [vmem:[#allocation2 + $0x129] sm:$0xff]  ;;  %v4374_v12 = vld [vmem:[#allocation2 + $0x72] sm:$0xff] }
 0x560   : > { %11288 = vst [vmem:[#allocation25_spill] sm:$0xff] %v9256_v5  ;;  %v5065_v8 = vld [vmem:[#allocation2 + $0x6] sm:$0xff]  ;;  %v4618_v5 = vld [vmem:[#allocation2 + $0x9b] sm:$0xff] }
 0x561   : > { %11291 = vst [vmem:[#allocation69_spill] sm:$0xff] %v9261_v56  ;;  %3821 = vmatmul.f32.gmra.mxu1 %v3681_v27  ;;  %v11298_v27 = vld [vmem:[#allocation31_spill] sm:$0xff]  ;;  %v11300_v56 = vld [vmem:[#allocation28_spill] sm:$0xff] }
 0x562   : > { %11292 = vst [vmem:[#allocation67_spill] sm:$0xff] %v9263_v58  ;;  %4060 = vmatmul.f32.gmra.mxu2 %v9265_v47  ;;  %4463 = vmatmul.f32.gmra.mxu0 %v4373_v42 }
 0x563   : > { %4227 = vmatmul.f32.gmra.mxu3 %v11293_v13  ;;  %v4646_v13 = vld [vmem:[#allocation6 + $0x880] sm:$0xff] }
 0x564   : > { %4677 = vmatpush.msra.mxu1 %v4646_v13  ;;  %v11305_v13 = vld [vmem:[#allocation30_spill] sm:$0xff] }
 0x566   : > { %v3347_v54 = vpop.f32.mrf.mxu3  ;;  %v9269_v40 = vpop.f32.mrf.mxu1 }
 0x567   : > { %11294 = vst [vmem:[#allocation29_spill] sm:$0xff] %v9269_v40  ;;  %v9272_v28 = vadd.f32 %v3347_v54, %v11295_v16  ;;  %v9274_v31 = vpop.f32.mrf.mxu0 }
 0x568   : > { %11297 = vst [vmem:[#allocation101_spill] sm:$0xff] %v9274_v31  ;;  %v3683_v31 = vld [vmem:[#allocation2 + $0x130] sm:$0xff] }
 0x569   : > { %11296 = vst [vmem:[#allocation27_spill] sm:$0xff] %v9272_v28  ;;  %3824 = vmatmul.f32.gmra.mxu1 %v3682_v63  ;;  %v9287_v28 = vld [vmem:[#allocation2 + $0x131] sm:$0xff] }
 0x56a   : > { %4063 = vmatmul.f32.gmra.mxu2 %v9276_v2  ;;  %4466 = vmatmul.f32.gmra.mxu0 %v4374_v12  ;;  %v5113_v63 = vld [vmem:[#allocation6 + $0x9b0] sm:$0xff]  ;;  %v11303_v12 = vld [vmem:[#allocation33_spill] sm:$0xff] }
 0x56b   : > { %4230 = vmatmul.f32.gmra.mxu3 %v11298_v27  ;;  %5132 = vmatpush.msra.mxu2 %v5113_v63 }
 0x56e   : > { %v3350_v42 = vpop.f32.mrf.mxu3  ;;  %v9280_v58 = vpop.f32.mrf.mxu1 }
 0x56f   : > { %11299 = vst [vmem:[#allocation31_spill] sm:$0xff] %v9280_v58  ;;  %v9283_v54 = vadd.f32 %v3350_v42, %v11300_v56  ;;  %v9285_v16 = vpop.f32.mrf.mxu0  ;;  %v4388_v58 = vld [vmem:[#allocation2 + $0xe2] sm:$0xff] }
 0x570   : > { %11302 = vst [vmem:[#allocation102_spill] sm:$0xff] %v9285_v16  ;;  %v3684_v16 = vld [vmem:[#allocation2 + $0x138] sm:$0xff] }
 0x571   : > { %11301 = vst [vmem:[#allocation28_spill] sm:$0xff] %v9283_v54  ;;  %3827 = vmatmul.f32.gmra.mxu1 %v3683_v31  ;;  %v9298_v54 = vld [vmem:[#allocation2 + $0x139] sm:$0xff]  ;;  %v4376_v31 = vld [vmem:[#allocation2 + $0x82] sm:$0xff] }
 0x572   : > { %4066 = vmatmul.f32.gmra.mxu2 %v9287_v28  ;;  %4469 = vmatmul.f32.gmra.mxu0 %v4375_v3 }
 0x573   : > { %4233 = vmatmul.f32.gmra.mxu3 %v11303_v12  ;;  %v11310_v12 = vld [vmem:[#allocation52_spill] sm:$0xff] }
 0x576   : > { %v3353_v27 = vpop.f32.mrf.mxu3  ;;  %v9291_v26 = vpop.f32.mrf.mxu1 }
 0x577   : > { %11304 = vst [vmem:[#allocation33_spill] sm:$0xff] %v9291_v26  ;;  %v9294_v56 = vadd.f32 %v3353_v27, %v11305_v13  ;;  %v9296_v42 = vpop.f32.mrf.mxu0  ;;  %v3685_v13 = vld [vmem:[#allocation2 + $0x140] sm:$0xff] }
 0x578   : > { %11307 = vst [vmem:[#allocation103_spill] sm:$0xff] %v9296_v42  ;;  %v9309_v42 = vld [vmem:[#allocation2 + $0x141] sm:$0xff] }
 0x579   : > { %11306 = vst [vmem:[#allocation30_spill] sm:$0xff] %v9294_v56  ;;  %3830 = vmatmul.f32.gmra.mxu1 %v3684_v16  ;;  %v4377_v16 = vld [vmem:[#allocation2 + $0x8a] sm:$0xff] }
 0x57a   : > { %4069 = vmatmul.f32.gmra.mxu2 %v9298_v54  ;;  %4472 = vmatmul.f32.gmra.mxu0 %v4376_v31  ;;  %v11313_v56 = vld [vmem:[#allocation62_spill] sm:$0xff] }
 0x57b   : > { %4236 = vmatmul.f32.gmra.mxu3 %v11308_v23  ;;  %v5112_v23 = vld [vmem:[#allocation6 + $0x9a8] sm:$0xff] }
 0x57c   : > { %5133 = vmatpush.msra.mxu2 %v5112_v23 }
 0x57e   : > { %v3356_v63 = vpop.f32.mrf.mxu3  ;;  %v9302_v3 = vpop.f32.mrf.mxu1 }
 0x57f   : > { %11309 = vst [vmem:[#allocation34_spill] sm:$0xff] %v9302_v3  ;;  %v9305_v0 = vadd.f32 %v3356_v63, %v11310_v12  ;;  %v9307_v27 = vpop.f32.mrf.mxu0  ;;  %v4385_v3 = vld [vmem:[#allocation2 + $0xca] sm:$0xff] }
 0x580   : > { %11312 = vst [vmem:[#allocation104_spill] sm:$0xff] %v9307_v27  ;;  %v3686_v27 = vld [vmem:[#allocation2 + $0x148] sm:$0xff] }
 0x581   : > { %11311 = vst [vmem:[#allocation52_spill] sm:$0xff] %v9305_v0  ;;  %3833 = vmatmul.f32.gmra.mxu1 %v3685_v13  ;;  %v9320_v0 = vld [vmem:[#allocation2 + $0x149] sm:$0xff]  ;;  %v4378_v13 = vld [vmem:[#allocation2 + $0x92] sm:$0xff] }
 0x582   : > { %4072 = vmatmul.f32.gmra.mxu2 %v9309_v42  ;;  %4475 = vmatmul.f32.gmra.mxu0 %v4377_v16 }
 0x583   : > { %4239 = vmatmul.f32.gmra.mxu3 %v11313_v56 }
 0x586   : > { %v3359_v31 = vpop.f32.mrf.mxu3  ;;  %v9313_v61 = vpop.f32.mrf.mxu1 }
 0x587   : > { %11314 = vst [vmem:[#allocation62_spill] sm:$0xff] %v9313_v61  ;;  %v9316_v63 = vadd.f32 %v3359_v31, %v11315_v9  ;;  %v9318_v12 = vpop.f32.mrf.mxu0  ;;  %v11319_v61 = vld [vmem:[#allocation35_spill] sm:$0xff] }
 0x588   : > { %11317 = vst [vmem:[#allocation105_spill] sm:$0xff] %v9318_v12  ;;  %v3687_v31 = vld [vmem:[#allocation2 + $0x150] sm:$0xff] }
 0x589   : > { %11316 = vst [vmem:[#allocation54_spill] sm:$0xff] %v9316_v63  ;;  %3836 = vmatmul.f32.gmra.mxu1 %v3686_v27  ;;  %v9331_v12 = vld [vmem:[#allocation2 + $0x151] sm:$0xff]  ;;  %v4379_v27 = vld [vmem:[#allocation2 + $0x9a] sm:$0xff] }
 0x58a   : > { %4075 = vmatmul.f32.gmra.mxu2 %v9320_v0  ;;  %4478 = vmatmul.f32.gmra.mxu0 %v4378_v13 }
 0x58b   : > { %4242 = vmatmul.f32.gmra.mxu3 %v9049_v20 }
 0x58e   : > { %v3362_v56 = vpop.f32.mrf.mxu3  ;;  %v9324_v16 = vpop.f32.mrf.mxu1 }
 0x58f   : > { %11318 = vst [vmem:[#allocation106_spill] sm:$0xff] %v9324_v16  ;;  %v9327_v23 = vadd.f32 %v3362_v56, %v11319_v61  ;;  %v9329_v9 = vpop.f32.mrf.mxu0  ;;  %v3688_v56 = vld [vmem:[#allocation2 + $0x158] sm:$0xff] }
 0x590   : > { %11321 = vst [vmem:[#allocation107_spill] sm:$0xff] %v9329_v9  ;;  %v9342_v9 = vld [vmem:[#allocation2 + $0x159] sm:$0xff] }
 0x591   : > { %11320 = vst [vmem:[#allocation35_spill] sm:$0xff] %v9327_v23  ;;  %3839 = vmatmul.f32.gmra.mxu1 %v3687_v31  ;;  %v5111_v31 = vld [vmem:[#allocation6 + $0x9a0] sm:$0xff]  ;;  %v4383_v16 = vld [vmem:[#allocation2 + $0xba] sm:$0xff] }
 0x592   : > { %4078 = vmatmul.f32.gmra.mxu2 %v9331_v12  ;;  %4481 = vmatmul.f32.gmra.mxu0 %v4379_v27  ;;  %v4380_v23 = vld [vmem:[#allocation2 + $0xa2] sm:$0xff] }
 0x593   : > { %4245 = vmatmul.f32.gmra.mxu3 %v9063_v46  ;;  %5134 = vmatpush.msra.mxu2 %v5111_v31 }
 0x596   : > { %v3365_v20 = vpop.f32.mrf.mxu3  ;;  %v9335_v13 = vpop.f32.mrf.mxu1 }
 0x597   : > { %11322 = vst [vmem:[#allocation108_spill] sm:$0xff] %v9335_v13  ;;  %v9338_v63 = vadd.f32 %v3365_v20, %v9042_v59  ;;  %v9340_v61 = vpop.f32.mrf.mxu0  ;;  %v4604_v20 = vld [vmem:[#allocation2 + $0x2b] sm:$0xff] }
 0x598   : > { %11324 = vst [vmem:[#allocation110_spill] sm:$0xff] %v9340_v61  ;;  %v4381_v61 = vld [vmem:[#allocation2 + $0xaa] sm:$0xff] }
 0x599   : > { %11323 = vst [vmem:[#allocation109_spill] sm:$0xff] %v9338_v63  ;;  %3842 = vmatmul.f32.gmra.mxu1 %v3688_v56 }
 0x59a   : > { %4081 = vmatmul.f32.gmra.mxu2 %v9342_v9  ;;  %4484 = vmatmul.f32.gmra.mxu0 %v4380_v23  ;;  %v4382_v23 = vld [vmem:[#allocation2 + $0xb2] sm:$0xff] }
 0x59b   : > { %4248 = vmatmul.f32.gmra.mxu3 %v9074_v37  ;;  %v4605_v37 = vld [vmem:[#allocation2 + $0x33] sm:$0xff] }
 0x59e   : > { %v9346_v46 = vpop.f32.mrf.mxu1  ;;  %v9348_v27 = vpop.f32.mrf.mxu3 }
 0x59f   : > { %11325 = vst [vmem:[#allocation111_spill] sm:$0xff] %v9346_v46  ;;  %v9350_v59 = vpop.f32.mrf.mxu0  ;;  %v5110_v46 = vld [vmem:[#allocation6 + $0x998] sm:$0xff] }
 0x5a0   : > { %5135 = vmatpush.msra.mxu2 %v5110_v46  ;;  %v4384_v46 = vld [vmem:[#allocation2 + $0xc2] sm:$0xff] }
 0x5a1   : > { %4678 = vmatmul.f32.vlgmr.msra.gmra.mxu1 %v4604_v20 }
 0x5a2   : > { %4487 = vmatmul.f32.gmra.mxu0 %v4381_v61 }
 0x5a3   : > { %4251 = vmatmul.f32.gmra.mxu3 %v9086_v6  ;;  %v9364_v6 = vpop.f32.mrf.mxu2 }
 0x5a4   : > { %11328 = vst [vmem:[#allocation114_spill] sm:$0xff] %v9364_v6  ;;  %v4393_v6 = vld [vmem:[#allocation2 + $0x10a] sm:$0xff] }
 0x5a6   : > { %v9353_v56 = vpop.f32.mrf.mxu1  ;;  %v9355_v63 = vpop.f32.mrf.mxu3 }
 0x5a7   : > { %11326 = vst [vmem:[#allocation112_spill] sm:$0xff] %v9353_v56  ;;  %v9357_v31 = vpop.f32.mrf.mxu0  ;;  %v4606_v56 = vld [vmem:[#allocation2 + $0x3b] sm:$0xff] }
 0x5a9   : > { %4681 = vmatmul.f32.gmra.mxu1 %v4605_v37 }
 0x5aa   : > { %4490 = vmatmul.f32.gmra.mxu0 %v4382_v23 }
 0x5ab   : > { %4254 = vmatmul.f32.gmra.mxu3 %v9098_v11  ;;  %v9375_v53 = vpop.f32.mrf.mxu2 }
 0x5ac   : > { %11330 = vst [vmem:[#allocation116_spill] sm:$0xff] %v9375_v53 }
 0x5ae   : > { %v9360_v13 = vpop.f32.mrf.mxu1  ;;  %v9362_v20 = vpop.f32.mrf.mxu3 }
 0x5af   : > { %11327 = vst [vmem:[#allocation113_spill] sm:$0xff] %v9360_v13  ;;  %v9366_v61 = vpop.f32.mrf.mxu0  ;;  %v4607_v13 = vld [vmem:[#allocation2 + $0x43] sm:$0xff] }
 0x5b1   : > { %4684 = vmatmul.f32.gmra.mxu1 %v4606_v56 }
 0x5b2   : > { %4493 = vmatmul.f32.gmra.mxu0 %v4383_v16  ;;  %v4608_v16 = vld [vmem:[#allocation2 + $0x4b] sm:$0xff] }
 0x5b3   : > { %4257 = vmatmul.f32.gmra.mxu3 %v9110_v38  ;;  %v9384_v34 = vpop.f32.mrf.mxu2 }
 0x5b4   : > { %11332 = vst [vmem:[#allocation118_spill] sm:$0xff] %v9384_v34 }
 0x5b6   : > { %v9369_v37 = vpop.f32.mrf.mxu1  ;;  %v9371_v11 = vpop.f32.mrf.mxu3 }
 0x5b7   : > { %11329 = vst [vmem:[#allocation115_spill] sm:$0xff] %v9369_v37  ;;  %v9373_v23 = vpop.f32.mrf.mxu0  ;;  %v5109_v37 = vld [vmem:[#allocation6 + $0x990] sm:$0xff] }
 0x5b8   : > { %5136 = vmatpush.msra.mxu2 %v5109_v37 }
 0x5b9   : > { %4687 = vmatmul.f32.gmra.mxu1 %v4607_v13 }
 0x5ba   : > { %4496 = vmatmul.f32.gmra.mxu0 %v4384_v46 }
 0x5bb   : > { %4260 = vmatmul.f32.gmra.mxu3 %v9122_v35 }
 0x5be   : > { %v9378_v7 = vpop.f32.mrf.mxu1  ;;  %v9380_v56 = vpop.f32.mrf.mxu3 }
 0x5bf   : > { %11331 = vst [vmem:[#allocation117_spill] sm:$0xff] %v9378_v7  ;;  %v9382_v38 = vpop.f32.mrf.mxu0  ;;  %v4609_v7 = vld [vmem:[#allocation2 + $0x53] sm:$0xff] }
 0x5c1   : > { %4690 = vmatmul.f32.gmra.mxu1 %v4608_v16  ;;  %v9394_v16 = vpop.f32.mrf.mxu2 }
 0x5c2   : > { %4499 = vmatmul.f32.gmra.mxu0 %v4385_v3  ;;  %11334 = vst [vmem:[#allocation120_spill] sm:$0xff] %v9394_v16  ;;  %v4610_v3 = vld [vmem:[#allocation2 + $0x5b] sm:$0xff] }
 0x5c3   : > { %4263 = vmatmul.f32.gmra.mxu3 %v9134_v10 }
 0x5c6   : > { %v9387_v13 = vpop.f32.mrf.mxu1  ;;  %v9389_v35 = vpop.f32.mrf.mxu3 }
 0x5c7   : > { %11333 = vst [vmem:[#allocation119_spill] sm:$0xff] %v9387_v13  ;;  %v9391_v46 = vpop.f32.mrf.mxu0  ;;  %v4387_v13 = vld [vmem:[#allocation2 + $0xda] sm:$0xff] }
 0x5c9   : > { %4693 = vmatmul.f32.gmra.mxu1 %v4609_v7 }
 0x5ca   : > { %4502 = vmatmul.f32.gmra.mxu0 %v4386_v33  ;;  %v5108_v33 = vld [vmem:[#allocation6 + $0x988] sm:$0xff] }
 0x5cb   : > { %4266 = vmatmul.f32.gmra.mxu3 %v9146_v17  ;;  %v9407_v17 = vpop.f32.mrf.mxu2  ;;  %5137 = vmatpush.msra.mxu2 %v5108_v33 }
 0x5cc   : > { %11337 = vst [vmem:[#allocation123_spill] sm:$0xff] %v9407_v17  ;;  %v4389_v17 = vld [vmem:[#allocation2 + $0xea] sm:$0xff] }
 0x5ce   : > { %v9396_v37 = vpop.f32.mrf.mxu1  ;;  %v9398_v26 = vpop.f32.mrf.mxu3 }
 0x5cf   : > { %11335 = vst [vmem:[#allocation121_spill] sm:$0xff] %v9396_v37  ;;  %v9400_v10 = vpop.f32.mrf.mxu0  ;;  %v4611_v37 = vld [vmem:[#allocation2 + $0x63] sm:$0xff] }
 0x5d1   : > { %4696 = vmatmul.f32.gmra.mxu1 %v4610_v3 }
 0x5d2   : > { %4505 = vmatmul.f32.gmra.mxu0 %v4387_v13 }
 0x5d3   : > { %4269 = vmatmul.f32.gmra.mxu3 %v9159_v22  ;;  %v9418_v53 = vpop.f32.mrf.mxu2 }
 0x5d4   : > { %11339 = vst [vmem:[#allocation125_spill] sm:$0xff] %v9418_v53  ;;  %v5107_v53 = vld [vmem:[#allocation6 + $0x980] sm:$0xff] }
 0x5d5   : > { %5138 = vmatpush.msra.mxu2 %v5107_v53  ;;  %v4615_v53 = vld [vmem:[#allocation2 + $0x83] sm:$0xff] }
 0x5d6   : > { %v9403_v34 = vpop.f32.mrf.mxu1  ;;  %v9405_v7 = vpop.f32.mrf.mxu3  ;;  %5139 = vmatmul.f32.vlgmr.msra.gmra.mxu2 %v5065_v8 }
 0x5d7   : > { %11336 = vst [vmem:[#allocation122_spill] sm:$0xff] %v9403_v34  ;;  %v9409_v16 = vpop.f32.mrf.mxu0  ;;  %v4612_v34 = vld [vmem:[#allocation2 + $0x6b] sm:$0xff] }
 0x5d9   : > { %4699 = vmatmul.f32.gmra.mxu1 %v4611_v37 }
 0x5da   : > { %4508 = vmatmul.f32.gmra.mxu0 %v4388_v58  ;;  %v4613_v58 = vld [vmem:[#allocation2 + $0x73] sm:$0xff] }
 0x5db   : > { %4272 = vmatmul.f32.gmra.mxu3 %v9172_v39  ;;  %v9427_v40 = vpop.f32.mrf.mxu2 }
 0x5dc   : > { %11341 = vst [vmem:[#allocation127_spill] sm:$0xff] %v9427_v40 }
 0x5de   : > { %v9412_v3 = vpop.f32.mrf.mxu1  ;;  %v9414_v22 = vpop.f32.mrf.mxu3 }
 0x5df   : > { %11338 = vst [vmem:[#allocation124_spill] sm:$0xff] %v9412_v3  ;;  %v9416_v13 = vpop.f32.mrf.mxu0  ;;  %v4390_v3 = vld [vmem:[#allocation2 + $0xf2] sm:$0xff] }
 0x5e1   : > { %4702 = vmatmul.f32.gmra.mxu1 %v4612_v34 }
 0x5e2   : > { %4511 = vmatmul.f32.gmra.mxu0 %v4389_v17 }
 0x5e3   : > { %4275 = vmatmul.f32.gmra.mxu3 %v9185_v55 }
 0x5e6   : > { %v9421_v33 = vpop.f32.mrf.mxu1  ;;  %v9423_v37 = vpop.f32.mrf.mxu3 }
 0x5e7   : > { %11340 = vst [vmem:[#allocation126_spill] sm:$0xff] %v9421_v33  ;;  %v9425_v39 = vpop.f32.mrf.mxu0  ;;  %v4614_v33 = vld [vmem:[#allocation2 + $0x7b] sm:$0xff] }
 0x5e9   : > { %4705 = vmatmul.f32.gmra.mxu1 %v4613_v58  ;;  %v9437_v58 = vpop.f32.mrf.mxu2 }
 0x5ea   : > { %4514 = vmatmul.f32.gmra.mxu0 %v4390_v3  ;;  %11343 = vst [vmem:[#allocation129_spill] sm:$0xff] %v9437_v58 }
 0x5eb   : > { %4278 = vmatmul.f32.gmra.mxu3 %v9198_v1 }
 0x5ee   : > { %v9430_v34 = vpop.f32.mrf.mxu1  ;;  %v9432_v55 = vpop.f32.mrf.mxu3 }
 0x5ef   : > { %11342 = vst [vmem:[#allocation128_spill] sm:$0xff] %v9430_v34  ;;  %v9434_v17 = vpop.f32.mrf.mxu0  ;;  %v5064_v34 = vld [vmem:[#allocation6 + $0x978] sm:$0xff] }
 0x5f0   : > { %5263 = vmatpush.msrb.mxu3 %v5064_v34 }
 0x5f1   : > { %4708 = vmatmul.f32.gmra.mxu1 %v4614_v33 }
 0x5f2   : > { %4517 = vmatmul.f32.gmra.mxu0 %v4391_v25  ;;  %v9450_v25 = vpop.f32.mrf.mxu2 }
 0x5f3   : > { %4281 = vmatmul.f32.gmra.mxu3 %v9211_v49  ;;  %11346 = vst [vmem:[#allocation132_spill] sm:$0xff] %v9450_v25  ;;  %v4617_v25 = vld [vmem:[#allocation2 + $0x93] sm:$0xff] }
 0x5f6   : > { %v9439_v40 = vpop.f32.mrf.mxu1  ;;  %v9441_v1 = vpop.f32.mrf.mxu3 }
 0x5f7   : > { %11344 = vst [vmem:[#allocation130_spill] sm:$0xff] %v9439_v40  ;;  %v9443_v3 = vpop.f32.mrf.mxu0  ;;  %v4616_v40 = vld [vmem:[#allocation2 + $0x8b] sm:$0xff] }
 0x5f9   : > { %4711 = vmatmul.f32.gmra.mxu1 %v4615_v53  ;;  %v5460_v53 = vld [vmem:[#allocation6 + $0xa78] sm:$0xff] }
 0x5fa   : > { %4520 = vmatmul.f32.gmra.mxu0 %v4392_v29  ;;  %v5938_v29 = vld [vmem:[#allocation6 + $0xb78] sm:$0xff]  ;;  %v9461_v24 = vpop.f32.mrf.mxu2 }
 0x5fb   : > { %4284 = vmatmul.f32.gmra.mxu3 %v9224_v60  ;;  %5939 = vmatpush.msrb.mxu2 %v5938_v29  ;;  %11348 = vst [vmem:[#allocation134_spill] sm:$0xff] %v9461_v24  ;;  %v4395_v29 = vld [vmem:[#allocation2 + $0x11a] sm:$0xff]  ;;  %v4396_v24 = vld [vmem:[#allocation2 + $0x122] sm:$0xff] }
 0x5fc   : > { %5461 = vmatpush.msrb.mxu0 %v5460_v53 }
 0x5fe   : > { %v9446_v33 = vpop.f32.mrf.mxu1  ;;  %v9448_v49 = vpop.f32.mrf.mxu3 }
 0x5ff   : > { %11345 = vst [vmem:[#allocation131_spill] sm:$0xff] %v9446_v33  ;;  %v9452_v58 = vpop.f32.mrf.mxu0  ;;  %v5699_v33 = vld [vmem:[#allocation6 + $0xaf8] sm:$0xff] }
 0x600   : > { %5700 = vmatpush.msrb.mxu1 %v5699_v33 }
 0x601   : > { %4714 = vmatmul.f32.gmra.mxu1 %v4616_v40  ;;  %v4394_v40 = vld [vmem:[#allocation2 + $0x112] sm:$0xff] }
 0x602   : > { %4523 = vmatmul.f32.gmra.mxu0 %v4393_v6  ;;  %v9470_v53 = vpop.f32.mrf.mxu2  ;;  %5701 = vmatpush.msrb.mxu1 %v5698_v41 }
 0x603   : > { %4287 = vmatmul.f32.gmra.mxu3 %v9237_v62  ;;  %v5066_v62 = vld [vmem:[#allocation2 + $0xe] sm:$0xff]  ;;  %11350 = vst [vmem:[#allocation136_spill] sm:$0xff] %v9470_v53 }
 0x604   : > { %5142 = vmatmul.f32.gmra.mxu2 %v5066_v62 }
 0x606   : > { %v9455_v34 = vpop.f32.mrf.mxu1  ;;  %v9457_v60 = vpop.f32.mrf.mxu3 }
 0x607   : > { %11347 = vst [vmem:[#allocation133_spill] sm:$0xff] %v9455_v34  ;;  %v9459_v57 = vpop.f32.mrf.mxu0 }
 0x609   : > { %4717 = vmatmul.f32.gmra.mxu1 %v4617_v25 }
 0x60a   : > { %4526 = vmatmul.f32.gmra.mxu0 %v4394_v40  ;;  %v5937_v40 = vld [vmem:[#allocation6 + $0xb70] sm:$0xff] }
 0x60b   : > { %4290 = vmatmul.f32.gmra.mxu3 %v9250_v51  ;;  %v5063_v51 = vld [vmem:[#allocation6 + $0x970] sm:$0xff]  ;;  %5940 = vmatpush.msrb.mxu2 %v5937_v40  ;;  %v4620_v40 = vld [vmem:[#allocation2 + $0xab] sm:$0xff] }
 0x60c   : > { %5264 = vmatpush.msrb.mxu3 %v5063_v51 }
 0x60e   : > { %v9464_v8 = vpop.f32.mrf.mxu1  ;;  %v9466_v6 = vpop.f32.mrf.mxu3 }
 0x60f   : > { %11349 = vst [vmem:[#allocation135_spill] sm:$0xff] %v9464_v8  ;;  %v9468_v34 = vpop.f32.mrf.mxu0  ;;  %v4619_v8 = vld [vmem:[#allocation2 + $0xa3] sm:$0xff] }
 0x611   : > { %4720 = vmatmul.f32.gmra.mxu1 %v4618_v5  ;;  %v4324_v5 = vadd.f32 %v9348_v27, %v9056_v43  ;;  %v4325_v43 = vadd.f32 %v9355_v63, %v9067_v4  ;;  %v4621_v63 = vld [vmem:[#allocation2 + $0xb3] sm:$0xff] }
 0x612   : > { %4529 = vmatmul.f32.gmra.mxu0 %v4395_v29  ;;  %v9483_v29 = vpop.f32.mrf.mxu2 }
 0x613   : > { %4293 = vmatmul.f32.gmra.mxu3 %v9265_v47  ;;  %v4563_v47 = vadd.f32 %v9350_v59, %v4324_v5  ;;  %11354 = vst [vmem:[#allocation140_spill] sm:$0xff] %v9483_v29  ;;  %v4564_v59 = vadd.f32 %v9357_v31, %v4325_v43  ;;  %v4398_v31 = vld [vmem:[#allocation2 + $0x132] sm:$0xff] }
 0x616   : > { %v9473_v33 = vpop.f32.mrf.mxu1  ;;  %v9475_v25 = vpop.f32.mrf.mxu3 }
 0x617   : > { %11351 = vst [vmem:[#allocation137_spill] sm:$0xff] %v9473_v33  ;;  %v9477_v62 = vpop.f32.mrf.mxu0 }
 0x618   : > { %11352 = vst [vmem:[#allocation138_spill] sm:$0xff] %v9475_v25 }
 0x619   : > { %11353 = vst [vmem:[#allocation139_spill] sm:$0xff] %v9477_v62  ;;  %4723 = vmatmul.f32.gmra.mxu1 %v4619_v8  ;;  %v5459_v62 = vld [vmem:[#allocation6 + $0xa70] sm:$0xff]  ;;  %v11355_v8 = vld [vmem:[#allocation59_spill] sm:$0xff] }
 0x61a   : > { %4532 = vmatmul.f32.gmra.mxu0 %v4396_v24  ;;  %v4397_v24 = vld [vmem:[#allocation2 + $0x12a] sm:$0xff]  ;;  %v9496_v29 = vpop.f32.mrf.mxu2 }
 0x61b   : > { %4296 = vmatmul.f32.gmra.mxu3 %v9276_v2  ;;  %5462 = vmatpush.msrb.mxu0 %v5459_v62  ;;  %v5062_v62 = vld [vmem:[#allocation6 + $0x968] sm:$0xff] }
 0x61c   : > { %5265 = vmatpush.msrb.mxu3 %v5062_v62 }
 0x61e   : > { %v9485_v33 = vpop.f32.mrf.mxu3  ;;  %v4679_v53 = vpop.f32.mrf.mxu1 }
 0x61f   : > { %v4802_v25 = vadd.f32 %v4679_v53, %v4563_v47  ;;  %v9487_v51 = vpop.f32.mrf.mxu0 }
 0x621   : > { %v4843_v2 = vmax.f32 %v4802_v25, 0.0  ;;  %4726 = vmatmul.f32.gmra.mxu1 %v4620_v40 }
 0x622   : > { %4535 = vmatmul.f32.gmra.mxu0 %v4397_v24 }
 0x623   : > { %v4884_v27 = vmin.f32 %v4843_v2, 6.0  ;;  %4299 = vmatmul.f32.gmra.mxu3 %v9287_v28  ;;  %v4326_v28 = vadd.f32 %v9362_v20, %v9079_v52  ;;  %v11356_v2 = vld [vmem:[#allocation61_spill] sm:$0xff]  ;;  %v5936_v52 = vld [vmem:[#allocation6 + $0xb68] sm:$0xff] }
 0x624   : > { %v5458_v20 = vld [vmem:[#allocation6 + $0xa68] sm:$0xff]  ;;  %5941 = vmatpush.msrb.mxu2 %v5936_v52 }
 0x625   : > { %v4925_v53 = vmul.f32 %v4884_v27, %v11355_v8  ;;  %v4565_v43 = vadd.f32 %v9366_v61, %v4326_v28  ;;  %v5061_v27 = vld [vmem:[#allocation6 + $0x960] sm:$0xff]  ;;  %5463 = vmatpush.msrb.mxu0 %v5458_v20  ;;  %v5697_v61 = vld [vmem:[#allocation6 + $0xae8] sm:$0xff]  ;;  %v9511_v28 = vpop.f32.mrf.mxu2 }
 0x626   : > { %v9494_v5 = vpop.f32.mrf.mxu3  ;;  %v4682_v47 = vpop.f32.mrf.mxu1  ;;  %5266 = vmatpush.msrb.mxu3 %v5061_v27  ;;  %5702 = vmatpush.msrb.mxu1 %v5697_v61  ;;  %v11357_v27 = vld [vmem:[#allocation64_spill] sm:$0xff]  ;;  %v4623_v61 = vld [vmem:[#allocation2 + $0xc3] sm:$0xff] }
 0x627   : > { %4966 = vst [vmem:[#allocation2 + $0x18] sm:$0xff] %v4925_v53  ;;  %v4803_v41 = vadd.f32 %v4682_v47, %v4564_v59  ;;  %v9498_v4 = vpop.f32.mrf.mxu0 }
 0x629   : > { %v4844_v25 = vmax.f32 %v4803_v41, 0.0  ;;  %4729 = vmatmul.f32.gmra.mxu1 %v4621_v63  ;;  %v5060_v41 = vld [vmem:[#allocation6 + $0x958] sm:$0xff]  ;;  %v4327_v63 = vadd.f32 %v9371_v11, %v9091_v15  ;;  %v5457_v15 = vld [vmem:[#allocation6 + $0xa60] sm:$0xff] }
 0x62a   : > { %4538 = vmatmul.f32.gmra.mxu0 %v4398_v31  ;;  %5267 = vmatpush.msrb.mxu3 %v5060_v41  ;;  %v5059_v31 = vld [vmem:[#allocation6 + $0x950] sm:$0xff]  ;;  %v5056_v41 = vld [vmem:[#allocation6 + $0x938] sm:$0xff] }
 0x62b   : > { %v4885_v40 = vmin.f32 %v4844_v25, 6.0  ;;  %4302 = vmatmul.f32.gmra.mxu3 %v9298_v54  ;;  %v4622_v54 = vld [vmem:[#allocation2 + $0xbb] sm:$0xff]  ;;  %5464 = vmatpush.msrb.mxu0 %v5457_v15  ;;  %v5453_v15 = vld [vmem:[#allocation6 + $0xa40] sm:$0xff] }
 0x62c   : > { %5268 = vmatpush.msrb.mxu3 %v5059_v31  ;;  %v5455_v31 = vld [vmem:[#allocation6 + $0xa50] sm:$0xff] }
 0x62d   : > { %v4926_v24 = vmul.f32 %v4885_v40, %v11356_v2  ;;  %v4399_v40 = vld [vmem:[#allocation2 + $0x13a] sm:$0xff]  ;;  %v5058_v2 = vld [vmem:[#allocation6 + $0x948] sm:$0xff] }
 0x62e   : > { %v9505_v59 = vpop.f32.mrf.mxu3  ;;  %v4685_v8 = vpop.f32.mrf.mxu1  ;;  %v5067_v53 = vld [vmem:[#allocation2 + $0x16] sm:$0xff]  ;;  %5269 = vmatpush.msrb.mxu3 %v5058_v2 }
 0x62f   : > { %4967 = vst [vmem:[#allocation2 + $0x20] sm:$0xff] %v4926_v24  ;;  %v4804_v47 = vadd.f32 %v4685_v8, %v4565_v43  ;;  %5145 = vmatmul.f32.gmra.mxu2 %v5067_v53  ;;  %v9507_v62 = vpop.f32.mrf.mxu0  ;;  %v4566_v24 = vadd.f32 %v9373_v23, %v4327_v63  ;;  %v5057_v53 = vld [vmem:[#allocation6 + $0x940] sm:$0xff]  ;;  %v4328_v23 = vadd.f32 %v9380_v56, %v9103_v45  ;;  %v11358_v45 = vld [vmem:[#allocation68_spill] sm:$0xff] }
 0x630   : > { %5270 = vmatpush.msrb.mxu3 %v5057_v53  ;;  %v5053_v53 = vld [vmem:[#allocation6 + $0x920] sm:$0xff] }
 0x631   : > { %v4845_v25 = vmax.f32 %v4804_v47, 0.0  ;;  %4732 = vmatmul.f32.gmra.mxu1 %v4622_v54 }
 0x632   : > { %4541 = vmatmul.f32.gmra.mxu0 %v4399_v40  ;;  %v4400_v40 = vld [vmem:[#allocation2 + $0x142] sm:$0xff]  ;;  %5271 = vmatpush.msrb.mxu3 %v5056_v41 }
 0x633   : > { %v4886_v43 = vmin.f32 %v4845_v25, 6.0  ;;  %4305 = vmatmul.f32.gmra.mxu3 %v9309_v42  ;;  %v5456_v42 = vld [vmem:[#allocation6 + $0xa58] sm:$0xff]  ;;  %v5055_v25 = vld [vmem:[#allocation6 + $0x930] sm:$0xff] }
 0x634   : > { %5465 = vmatpush.msrb.mxu0 %v5456_v42  ;;  %5272 = vmatpush.msrb.mxu3 %v5055_v25  ;;  %v5452_v42 = vld [vmem:[#allocation6 + $0xa38] sm:$0xff]  ;;  %v4624_v25 = vld [vmem:[#allocation2 + $0xcb] sm:$0xff] }
 0x635   : > { %v4927_v8 = vmul.f32 %v4886_v43, %v11357_v27  ;;  %v9522_v43 = vpop.f32.mrf.mxu2  ;;  %v5454_v27 = vld [vmem:[#allocation6 + $0xa48] sm:$0xff] }
 0x636   : > { %v9516_v11 = vpop.f32.mrf.mxu3  ;;  %v4688_v47 = vpop.f32.mrf.mxu1  ;;  %v5068_v52 = vld [vmem:[#allocation2 + $0x1e] sm:$0xff]  ;;  %5466 = vmatpush.msrb.mxu0 %v5455_v31 }
 0x637   : > { %4968 = vst [vmem:[#allocation2 + $0x28] sm:$0xff] %v4927_v8  ;;  %v4805_v20 = vadd.f32 %v4688_v47, %v4566_v24  ;;  %5148 = vmatmul.f32.gmra.mxu2 %v5068_v52  ;;  %v9518_v54 = vpop.f32.mrf.mxu0  ;;  %v5054_v24 = vld [vmem:[#allocation6 + $0x928] sm:$0xff]  ;;  %v4567_v8 = vadd.f32 %v9382_v38, %v4328_v23  ;;  %v4329_v38 = vadd.f32 %v9389_v35, %v9115_v30  ;;  %v5051_v31 = vld [vmem:[#allocation6 + $0x910] sm:$0xff]  ;;  %v11359_v30 = vld [vmem:[#allocation70_spill] sm:$0xff] }
 0x638   : > { %5467 = vmatpush.msrb.mxu0 %v5454_v27  ;;  %5273 = vmatpush.msrb.mxu3 %v5054_v24  ;;  %v5050_v27 = vld [vmem:[#allocation6 + $0x908] sm:$0xff] }
 0x639   : > { %v4846_v63 = vmax.f32 %v4805_v20, 0.0  ;;  %4735 = vmatmul.f32.gmra.mxu1 %v4623_v61  ;;  %v5935_v61 = vld [vmem:[#allocation6 + $0xb60] sm:$0xff] }
 0x63a   : > { %4544 = vmatmul.f32.gmra.mxu0 %v4400_v40  ;;  %5274 = vmatpush.msrb.mxu3 %v5053_v53  ;;  %v5451_v40 = vld [vmem:[#allocation6 + $0xa30] sm:$0xff]  ;;  %v5049_v53 = vld [vmem:[#allocation6 + $0x900] sm:$0xff] }
 0x63b   : > { %v4887_v2 = vmin.f32 %v4846_v63, 6.0  ;;  %4308 = vmatmul.f32.gmra.mxu3 %v9320_v0  ;;  %5468 = vmatpush.msrb.mxu0 %v5453_v15  ;;  %v5052_v0 = vld [vmem:[#allocation6 + $0x918] sm:$0xff]  ;;  %v5449_v15 = vld [vmem:[#allocation6 + $0xa20] sm:$0xff] }
 0x63c   : > { %5942 = vmatpush.msrb.mxu2 %v5935_v61  ;;  %5275 = vmatpush.msrb.mxu3 %v5052_v0  ;;  %v5696_v0 = vld [vmem:[#allocation6 + $0xae0] sm:$0xff] }
 0x63d   : > { %v4928_v56 = vmul.f32 %v4887_v2, %v11358_v45  ;;  %5469 = vmatpush.msrb.mxu0 %v5452_v42  ;;  %v4401_v2 = vld [vmem:[#allocation2 + $0x14a] sm:$0xff]  ;;  %v4568_v45 = vadd.f32 %v9391_v46, %v4329_v38  ;;  %v5448_v42 = vld [vmem:[#allocation6 + $0xa18] sm:$0xff]  ;;  %v4625_v46 = vld [vmem:[#allocation2 + $0xd3] sm:$0xff]  ;;  %5703 = vmatpush.msrb.mxu1 %v5696_v0 }
 0x63e   : > { %v9527_v47 = vpop.f32.mrf.mxu3  ;;  %v4691_v52 = vpop.f32.mrf.mxu1  ;;  %v5069_v20 = vld [vmem:[#allocation2 + $0x26] sm:$0xff]  ;;  %5276 = vmatpush.msrb.mxu3 %v5051_v31  ;;  %v4402_v31 = vld [vmem:[#allocation2 + $0x152] sm:$0xff] }
 0x63f   : > { %4969 = vst [vmem:[#allocation2 + $0x30] sm:$0xff] %v4928_v56  ;;  %v4806_v41 = vadd.f32 %v4691_v52, %v4567_v8  ;;  %5151 = vmatmul.f32.gmra.mxu2 %v5069_v20  ;;  %v9529_v63 = vpop.f32.mrf.mxu0  ;;  %5470 = vmatpush.msrb.mxu0 %v5451_v40  ;;  %v5450_v8 = vld [vmem:[#allocation6 + $0xa28] sm:$0xff]  ;;  %v9535_v56 = vpop.f32.mrf.mxu2 }
 0x640   : > { %5277 = vmatpush.msrb.mxu3 %v5050_v27  ;;  %v11360_v27 = vld [vmem:[#allocation45_spill] sm:$0xff] }
 0x641   : > { %v4847_v23 = vmax.f32 %v4806_v41, 0.0  ;;  %4738 = vmatmul.f32.gmra.mxu1 %v4624_v25  ;;  %5471 = vmatpush.msrb.mxu0 %v5450_v8  ;;  %v4330_v25 = vadd.f32 %v9398_v26, %v9127_v21 }
 0x642   : > { %4547 = vmatmul.f32.gmra.mxu0 %v4401_v2  ;;  %5278 = vmatpush.msrb.mxu3 %v5049_v53  ;;  %v5446_v2 = vld [vmem:[#allocation6 + $0xa08] sm:$0xff] }
 0x643   : > { %v4888_v24 = vmin.f32 %v4847_v23, 6.0  ;;  %4311 = vmatmul.f32.gmra.mxu3 %v9331_v12  ;;  %5472 = vmatpush.msrb.mxu0 %v5449_v15  ;;  %v5447_v23 = vld [vmem:[#allocation6 + $0xa10] sm:$0xff] }
 0x645   : > { %v4929_v35 = vmul.f32 %v4888_v24, %v11359_v30  ;;  %5473 = vmatpush.msrb.mxu0 %v5448_v42  ;;  %v4569_v24 = vadd.f32 %v9400_v10, %v4330_v25  ;;  %v4331_v10 = vadd.f32 %v9405_v7, %v9139_v48  ;;  %v4627_v7 = vld [vmem:[#allocation2 + $0xe3] sm:$0xff] }
 0x646   : > { %v9538_v52 = vpop.f32.mrf.mxu3  ;;  %v4694_v20 = vpop.f32.mrf.mxu1  ;;  %v5070_v41 = vld [vmem:[#allocation2 + $0x2e] sm:$0xff] }
 0x647   : > { %4970 = vst [vmem:[#allocation2 + $0x38] sm:$0xff] %v4929_v35  ;;  %v4807_v12 = vadd.f32 %v4694_v20, %v4568_v45  ;;  %5154 = vmatmul.f32.gmra.mxu2 %v5070_v41  ;;  %v9540_v61 = vpop.f32.mrf.mxu0  ;;  %5474 = vmatpush.msrb.mxu0 %v5447_v23  ;;  %v5445_v45 = vld [vmem:[#allocation6 + $0xa00] sm:$0xff]  ;;  %v9549_v26 = vpop.f32.mrf.mxu2  ;;  %v4570_v42 = vadd.f32 %v9409_v16, %v4331_v10 }
 0x648   : > { %v4165_v20 = vld [vmem:[#allocation2 + $0x161] sm:$0xff]  ;;  %v4332_v16 = vadd.f32 %v9414_v22, %v9152_v14  ;;  %v4628_v14 = vld [vmem:[#allocation2 + $0xeb] sm:$0xff] }
 0x649   : > { %v4848_v38 = vmax.f32 %v4807_v12, 0.0  ;;  %4741 = vmatmul.f32.gmra.mxu1 %v4625_v46  ;;  %5475 = vmatpush.msrb.mxu0 %v5446_v2  ;;  %v4403_v12 = vld [vmem:[#allocation2 + $0x15a] sm:$0xff]  ;;  %v11361_v46 = vld [vmem:[#allocation47_spill] sm:$0xff] }
 0x64a   : > { %4550 = vmatmul.f32.gmra.mxu0 %v4402_v31  ;;  %v5934_v2 = vld [vmem:[#allocation6 + $0xb58] sm:$0xff]  ;;  %v4405_v22 = vld [vmem:[#allocation2 + $0x16a] sm:$0xff] }
 0x64b   : > { %v4889_v40 = vmin.f32 %v4848_v38, 6.0  ;;  %4314 = vmatmul.f32.gmra.mxu3 %v9342_v9  ;;  %v4626_v9 = vld [vmem:[#allocation2 + $0xdb] sm:$0xff]  ;;  %5476 = vmatpush.msrb.mxu0 %v5445_v45 }
 0x64c   : > { %5943 = vmatpush.msrb.mxu2 %v5934_v2  ;;  %v11364_v2 = vld [vmem:[#allocation56_spill] sm:$0xff] }
 0x64d   : > { %v4930_v8 = vmul.f32 %v4889_v40, %v11360_v27  ;;  %v4166_v27 = vld [vmem:[#allocation2 + $0x169] sm:$0xff] }
 0x64e   : > { %v9547_v30 = vpop.f32.mrf.mxu3  ;;  %v4697_v35 = vpop.f32.mrf.mxu1  ;;  %v5071_v21 = vld [vmem:[#allocation2 + $0x36] sm:$0xff] }
 0x64f   : > { %4971 = vst [vmem:[#allocation2 + $0x40] sm:$0xff] %v4930_v8  ;;  %v4808_v53 = vadd.f32 %v4697_v35, %v4569_v24  ;;  %5157 = vmatmul.f32.gmra.mxu2 %v5071_v21  ;;  %v9551_v15 = vpop.f32.mrf.mxu0  ;;  %v5695_v24 = vld [vmem:[#allocation6 + $0xad8] sm:$0xff]  ;;  %v9563_v45 = vpop.f32.mrf.mxu2 }
 0x650   : > { %v4404_v8 = vld [vmem:[#allocation2 + $0x162] sm:$0xff]  ;;  %5704 = vmatpush.msrb.mxu1 %v5695_v24 }
 0x651   : > { %v4849_v41 = vmax.f32 %v4808_v53, 0.0  ;;  %4744 = vmatmul.f32.gmra.mxu1 %v4626_v9  ;;  %v4571_v53 = vadd.f32 %v9416_v13, %v4332_v16  ;;  %v11362_v9 = vld [vmem:[#allocation50_spill] sm:$0xff] }
 0x652   : > { %4553 = vmatmul.f32.gmra.mxu0 %v4403_v12 }
 0x653   : > { %v4890_v0 = vmin.f32 %v4849_v41, 6.0  ;;  %4317 = vmatmul.f32.gmra.mxu3 %v4165_v20 }
 0x655   : > { %v4931_v25 = vmul.f32 %v4890_v0, %v11361_v46  ;;  %v5007_v46 = vld [vmem:[#allocation2 + $0x5] sm:$0xff] }
 0x656   : > { %v9557_v38 = vpop.f32.mrf.mxu3  ;;  %v4700_v23 = vpop.f32.mrf.mxu1  ;;  %v5072_v31 = vld [vmem:[#allocation2 + $0x3e] sm:$0xff] }
 0x657   : > { %4972 = vst [vmem:[#allocation2 + $0x48] sm:$0xff] %v4931_v25  ;;  %v4809_v40 = vadd.f32 %v4700_v23, %v4570_v42  ;;  %5160 = vmatmul.f32.gmra.mxu2 %v5072_v31  ;;  %v9559_v48 = vpop.f32.mrf.mxu0  ;;  %v4333_v25 = vadd.f32 %v9423_v37, %v9165_v32  ;;  %v9573_v13 = vpop.f32.mrf.mxu2  ;;  %v4629_v32 = vld [vmem:[#allocation2 + $0xf3] sm:$0xff] }
 0x658   : > { %11363 = vst [vmem:[#allocation59_spill] sm:$0xff] %v9573_v13  ;;  %v5008_v37 = vld [vmem:[#allocation2 + $0xd] sm:$0xff] }
 0x659   : > { %v4850_v35 = vmax.f32 %v4809_v40, 0.0  ;;  %4747 = vmatmul.f32.gmra.mxu1 %v4627_v7  ;;  %v4572_v40 = vadd.f32 %v9425_v39, %v4333_v25 }
 0x65a   : > { %4556 = vmatmul.f32.gmra.mxu0 %v4404_v8 }
 0x65b   : > { %v4891_v21 = vmin.f32 %v4850_v35, 6.0  ;;  %4320 = vmatmul.f32.gmra.mxu3 %v4166_v27 }
 0x65d   : > { %v4932_v20 = vmul.f32 %v4891_v21, %v11362_v9  ;;  %v5403_v21 = vld [vmem:[#allocation2 + $0x7] sm:$0xff] }
 0x65e   : > { %v9567_v10 = vpop.f32.mrf.mxu3  ;;  %v4703_v41 = vpop.f32.mrf.mxu1  ;;  %v5073_v12 = vld [vmem:[#allocation2 + $0x46] sm:$0xff] }
 0x65f   : > { %4973 = vst [vmem:[#allocation2 + $0x50] sm:$0xff] %v4932_v20  ;;  %v4810_v0 = vadd.f32 %v4703_v41, %v4571_v53  ;;  %5163 = vmatmul.f32.gmra.mxu2 %v5073_v12  ;;  %v9569_v42 = vpop.f32.mrf.mxu0  ;;  %v4334_v53 = vadd.f32 %v9432_v55, %v9178_v19  ;;  %v9584_v41 = vpop.f32.mrf.mxu2  ;;  %v11366_v12 = vld [vmem:[#allocation58_spill] sm:$0xff]  ;;  %v5694_v19 = vld [vmem:[#allocation6 + $0xad0] sm:$0xff] }
 0x660   : > { %11365 = vst [vmem:[#allocation61_spill] sm:$0xff] %v9584_v41  ;;  %5705 = vmatpush.msrb.mxu1 %v5694_v19 }
 0x661   : > { %v4851_v23 = vmax.f32 %v4810_v0, 0.0  ;;  %4750 = vmatmul.f32.gmra.mxu1 %v4628_v14  ;;  %v4573_v20 = vadd.f32 %v9434_v17, %v4334_v53  ;;  %v4335_v17 = vadd.f32 %v9441_v1, %v9191_v44  ;;  %v4631_v1 = vld [vmem:[#allocation2 + $0x103] sm:$0xff] }
 0x662   : > { %4559 = vmatmul.f32.gmra.mxu0 %v4405_v22 }
 0x663   : > { %v4892_v31 = vmin.f32 %v4851_v23, 6.0  ;;  %5279 = vmatmul.f32.vlgmr.msrb.gmra.mxu3 %v5007_v46  ;;  %v5933_v23 = vld [vmem:[#allocation6 + $0xb50] sm:$0xff] }
 0x664   : > { %5944 = vmatpush.msrb.mxu2 %v5933_v23 }
 0x665   : > { %v4933_v24 = vmul.f32 %v4892_v31, %v11364_v2  ;;  %v4630_v31 = vld [vmem:[#allocation2 + $0xfb] sm:$0xff] }
 0x666   : > { %v9577_v7 = vpop.f32.mrf.mxu3  ;;  %v4706_v27 = vpop.f32.mrf.mxu1  ;;  %v5074_v8 = vld [vmem:[#allocation2 + $0x4e] sm:$0xff] }
 0x667   : > { %4974 = vst [vmem:[#allocation2 + $0x58] sm:$0xff] %v4933_v24  ;;  %v4811_v16 = vadd.f32 %v4706_v27, %v4572_v40  ;;  %5166 = vmatmul.f32.gmra.mxu2 %v5074_v8  ;;  %v9579_v35 = vpop.f32.mrf.mxu0  ;;  %v5404_v40 = vld [vmem:[#allocation2 + $0xf] sm:$0xff]  ;;  %v4574_v8 = vadd.f32 %v9443_v3, %v4335_v17  ;;  %v5010_v3 = vld [vmem:[#allocation2 + $0x1d] sm:$0xff] }
 0x668   : > { %v5009_v24 = vld [vmem:[#allocation2 + $0x15] sm:$0xff] }
 0x669   : > { %v4852_v9 = vmax.f32 %v4811_v16, 0.0  ;;  %4753 = vmatmul.f32.gmra.mxu1 %v4629_v32  ;;  %v11367_v16 = vld [vmem:[#allocation60_spill] sm:$0xff] }
 0x66a   : > { %5477 = vmatmul.f32.vlgmr.msrb.gmra.mxu0 %v5403_v21 }
 0x66b   : > { %v4893_v39 = vmin.f32 %v4852_v9, 6.0  ;;  %5282 = vmatmul.f32.gmra.mxu3 %v5008_v37  ;;  %v9597_v9 = vpop.f32.mrf.mxu2 }
 0x66c   : > { %11368 = vst [vmem:[#allocation64_spill] sm:$0xff] %v9597_v9 }
 0x66d   : > { %v4934_v0 = vmul.f32 %v4893_v39, %v11366_v12 }
 0x66e   : > { %v9587_v14 = vpop.f32.mrf.mxu3  ;;  %v4709_v22 = vpop.f32.mrf.mxu1  ;;  %v5075_v46 = vld [vmem:[#allocation2 + $0x56] sm:$0xff] }
 0x66f   : > { %4975 = vst [vmem:[#allocation2 + $0x60] sm:$0xff] %v4934_v0  ;;  %v4812_v25 = vadd.f32 %v4709_v22, %v4573_v20  ;;  %5169 = vmatmul.f32.gmra.mxu2 %v5075_v46  ;;  %v9589_v55 = vpop.f32.mrf.mxu0  ;;  %v4336_v20 = vadd.f32 %v9448_v49, %v9204_v36  ;;  %v9603_v0 = vld [vmem:[#allocation2 + $0x17] sm:$0xff] }
 0x670   : > { %v5932_v36 = vld [vmem:[#allocation6 + $0xb48] sm:$0xff] }
 0x671   : > { %v4853_v2 = vmax.f32 %v4812_v25, 0.0  ;;  %4756 = vmatmul.f32.gmra.mxu1 %v4630_v31  ;;  %v4575_v46 = vadd.f32 %v9452_v58, %v4336_v20  ;;  %v11369_v25 = vld [vmem:[#allocation66_spill] sm:$0xff]  ;;  %5945 = vmatpush.msrb.mxu2 %v5932_v36 }
 0x672   : > { %5480 = vmatmul.f32.gmra.mxu0 %v5404_v40  ;;  %v11373_v36 = vld [vmem:[#allocation74_spill] sm:$0xff] }
 0x673   : > { %v4894_v27 = vmin.f32 %v4853_v2, 6.0  ;;  %5285 = vmatmul.f32.gmra.mxu3 %v5009_v24  ;;  %v4632_v2 = vld [vmem:[#allocation2 + $0x10b] sm:$0xff]  ;;  %v4337_v24 = vadd.f32 %v9457_v60, %v9217_v18 }
 0x674   : > { %v5693_v60 = vld [vmem:[#allocation6 + $0xac8] sm:$0xff] }
 0x675   : > { %v4935_v32 = vmul.f32 %v4894_v27, %v11367_v16  ;;  %v9614_v27 = vpop.f32.mrf.mxu2  ;;  %v9616_v16 = vld [vmem:[#allocation2 + $0x1f] sm:$0xff]  ;;  %5706 = vmatpush.msrb.mxu1 %v5693_v60  ;;  %v11376_v60 = vld [vmem:[#allocation139_spill] sm:$0xff] }
 0x676   : > { %v9595_v37 = vpop.f32.mrf.mxu3  ;;  %v4712_v21 = vpop.f32.mrf.mxu1  ;;  %v5076_v53 = vld [vmem:[#allocation2 + $0x5e] sm:$0xff]  ;;  %11370 = vst [vmem:[#allocation68_spill] sm:$0xff] %v9614_v27 }
 0x677   : > { %4976 = vst [vmem:[#allocation2 + $0x68] sm:$0xff] %v4935_v32  ;;  %v4813_v39 = vadd.f32 %v4712_v21, %v4574_v8  ;;  %5172 = vmatmul.f32.gmra.mxu2 %v5076_v53  ;;  %v9599_v44 = vpop.f32.mrf.mxu0  ;;  %v5011_v8 = vld [vmem:[#allocation2 + $0x25] sm:$0xff]  ;;  %v4576_v21 = vadd.f32 %v9459_v57, %v4337_v24  ;;  %v11371_v53 = vld [vmem:[#allocation71_spill] sm:$0xff] }
 0x678   : > { %v5012_v57 = vld [vmem:[#allocation2 + $0x2d] sm:$0xff] }
 0x679   : > { %v4854_v12 = vmax.f32 %v4813_v39, 0.0  ;;  %4759 = vmatmul.f32.gmra.mxu1 %v4631_v1 }
 0x67a   : > { %5483 = vmatmul.f32.gmra.mxu0 %v9603_v0 }
 0x67b   : > { %v4895_v22 = vmin.f32 %v4854_v12, 6.0  ;;  %5288 = vmatmul.f32.gmra.mxu3 %v5010_v3 }
 0x67d   : > { %v4936_v23 = vmul.f32 %v4895_v22, %v11369_v25  ;;  %v4633_v22 = vld [vmem:[#allocation2 + $0x113] sm:$0xff] }
 0x67e   : > { %v9608_v19 = vpop.f32.mrf.mxu3  ;;  %v4715_v31 = vpop.f32.mrf.mxu1  ;;  %v5077_v40 = vld [vmem:[#allocation2 + $0x66] sm:$0xff] }
 0x67f   : > { %4977 = vst [vmem:[#allocation2 + $0x70] sm:$0xff] %v4936_v23  ;;  %v4814_v17 = vadd.f32 %v4715_v31, %v4575_v46  ;;  %5175 = vmatmul.f32.gmra.mxu2 %v5077_v40  ;;  %v9610_v49 = vpop.f32.mrf.mxu0  ;;  %v4338_v46 = vadd.f32 %v9466_v6, %v9230_v50  ;;  %v9627_v23 = vld [vmem:[#allocation2 + $0x27] sm:$0xff]  ;;  %v9629_v31 = vpop.f32.mrf.mxu2 }
 0x680   : > { %11372 = vst [vmem:[#allocation70_spill] sm:$0xff] %v9629_v31 }
 0x681   : > { %v4855_v58 = vmax.f32 %v4814_v17, 0.0  ;;  %4762 = vmatmul.f32.gmra.mxu1 %v4632_v2  ;;  %v4577_v17 = vadd.f32 %v9468_v34, %v4338_v46 }
 0x682   : > { %5486 = vmatmul.f32.gmra.mxu0 %v9616_v16 }
 0x683   : > { %v4896_v32 = vmin.f32 %v4855_v58, 6.0  ;;  %5291 = vmatmul.f32.gmra.mxu3 %v5011_v8 }
 0x685   : > { %v4937_v39 = vmul.f32 %v4896_v32, %v11371_v53  ;;  %v4634_v32 = vld [vmem:[#allocation2 + $0x11b] sm:$0xff]  ;;  %v11375_v53 = vld [vmem:[#allocation138_spill] sm:$0xff] }
 0x686   : > { %v9621_v1 = vpop.f32.mrf.mxu3  ;;  %v4718_v20 = vpop.f32.mrf.mxu1  ;;  %v5078_v12 = vld [vmem:[#allocation2 + $0x6e] sm:$0xff] }
 0x687   : > { %4978 = vst [vmem:[#allocation2 + $0x78] sm:$0xff] %v4937_v39  ;;  %v4815_v18 = vadd.f32 %v4718_v20, %v4576_v21  ;;  %5178 = vmatmul.f32.gmra.mxu2 %v5078_v12  ;;  %v9623_v3 = vpop.f32.mrf.mxu0  ;;  %v11374_v21 = vld [vmem:[#allocation63_spill] sm:$0xff]  ;;  %v9644_v46 = vpop.f32.mrf.mxu2 }
 0x688   : > { %v4339_v39 = vadd.f32 %v11375_v53, %v11374_v21  ;;  %v5013_v12 = vld [vmem:[#allocation2 + $0x35] sm:$0xff]  ;;  %11377 = vst [vmem:[#allocation45_spill] sm:$0xff] %v9644_v46  ;;  %v11379_v21 = vld [vmem:[#allocation25_spill] sm:$0xff] }
 0x689   : > { %v4856_v25 = vmax.f32 %v4815_v18, 0.0  ;;  %4765 = vmatmul.f32.gmra.mxu1 %v4633_v22  ;;  %v9640_v18 = vld [vmem:[#allocation2 + $0x2f] sm:$0xff]  ;;  %v4340_v53 = vadd.f32 %v9485_v33, %v11379_v21 }
 0x68a   : > { %5489 = vmatmul.f32.gmra.mxu0 %v9627_v23  ;;  %v4578_v22 = vadd.f32 %v11376_v60, %v4339_v39  ;;  %v11381_v60 = vld [vmem:[#allocation42_spill] sm:$0xff] }
 0x68b   : > { %v4897_v40 = vmin.f32 %v4856_v25, 6.0  ;;  %5294 = vmatmul.f32.gmra.mxu3 %v5012_v57  ;;  %v11378_v25 = vld [vmem:[#allocation75_spill] sm:$0xff]  ;;  %v11385_v21 = vld [vmem:[#allocation114_spill] sm:$0xff] }
 0x68d   : > { %v4938_v2 = vmul.f32 %v4897_v40, %v11373_v36 }
 0x68e   : > { %v9634_v24 = vpop.f32.mrf.mxu3  ;;  %v4721_v58 = vpop.f32.mrf.mxu1  ;;  %v5079_v8 = vld [vmem:[#allocation2 + $0x76] sm:$0xff] }
 0x68f   : > { %4979 = vst [vmem:[#allocation2 + $0x80] sm:$0xff] %v4938_v2  ;;  %v4816_v50 = vadd.f32 %v4721_v58, %v4577_v17  ;;  %5181 = vmatmul.f32.gmra.mxu2 %v5079_v8  ;;  %v9636_v6 = vpop.f32.mrf.mxu0  ;;  %v5931_v58 = vld [vmem:[#allocation6 + $0xb40] sm:$0xff]  ;;  %v9661_v46 = vpop.f32.mrf.mxu2 }
 0x690   : > { %v5692_v8 = vld [vmem:[#allocation6 + $0xac0] sm:$0xff]  ;;  %5946 = vmatpush.msrb.mxu2 %v5931_v58  ;;  %v11383_v58 = vld [vmem:[#allocation77_spill] sm:$0xff]  ;;  %11384 = vst [vmem:[#allocation47_spill] sm:$0xff] %v9661_v46 }
 0x691   : > { %v4857_v20 = vmax.f32 %v4816_v50, 0.0  ;;  %4768 = vmatmul.f32.gmra.mxu1 %v4634_v32  ;;  %v4635_v32 = vld [vmem:[#allocation2 + $0x123] sm:$0xff] }
 0x692   : > { %5492 = vmatmul.f32.gmra.mxu0 %v9640_v18  ;;  %5707 = vmatpush.msrb.mxu1 %v5692_v8 }
 0x693   : > { %v4898_v34 = vmin.f32 %v4857_v20, 6.0  ;;  %5297 = vmatmul.f32.gmra.mxu3 %v5013_v12  ;;  %v5014_v20 = vld [vmem:[#allocation2 + $0x3d] sm:$0xff] }
 0x694   : > { %v9653_v12 = vld [vmem:[#allocation2 + $0x37] sm:$0xff] }
 0x695   : > { %v4939_v57 = vmul.f32 %v4898_v34, %v11378_v25  ;;  %v11380_v34 = vld [vmem:[#allocation41_spill] sm:$0xff] }
 0x696   : > { %v9647_v40 = vpop.f32.mrf.mxu3  ;;  %v4724_v17 = vpop.f32.mrf.mxu1  ;;  %v5080_v36 = vld [vmem:[#allocation2 + $0x7e] sm:$0xff]  ;;  %v3624_v25 = vadd.f32 %v11381_v60, %v11380_v34 }
 0x697   : > { %4980 = vst [vmem:[#allocation2 + $0x88] sm:$0xff] %v4939_v57  ;;  %v4817_v2 = vadd.f32 %v4724_v17, %v4578_v22  ;;  %5184 = vmatmul.f32.gmra.mxu2 %v5080_v36  ;;  %v9649_v50 = vpop.f32.mrf.mxu0  ;;  %v11382_v57 = vld [vmem:[#allocation23_spill] sm:$0xff]  ;;  %v4579_v36 = vadd.f32 %v9487_v51, %v4340_v53  ;;  %v5015_v51 = vld [vmem:[#allocation2 + $0x45] sm:$0xff] }
 0x698   : > { %v3863_v17 = vadd.f32 %v11382_v57, %v3624_v25  ;;  %v9669_v53 = vld [vmem:[#allocation2 + $0x3f] sm:$0xff] }
 0x699   : > { %v4858_v39 = vmax.f32 %v4817_v2, 0.0  ;;  %4771 = vmatmul.f32.gmra.mxu1 %v4635_v32  ;;  %v11387_v57 = vld [vmem:[#allocation44_spill] sm:$0xff] }
 0x69a   : > { %5495 = vmatmul.f32.gmra.mxu0 %v9653_v12  ;;  %v4102_v31 = vadd.f32 %v11385_v21, %v3863_v17  ;;  %v11388_v17 = vld [vmem:[#allocation29_spill] sm:$0xff] }
 0x69b   : > { %v4899_v22 = vmin.f32 %v4858_v39, 6.0  ;;  %5300 = vmatmul.f32.gmra.mxu3 %v5014_v20  ;;  %v4636_v20 = vld [vmem:[#allocation2 + $0x12b] sm:$0xff] }
 0x69c   : > { %v4341_v60 = vadd.f32 %v9494_v5, %v4102_v31 }
 0x69d   : > { %v4940_v8 = vmul.f32 %v4899_v22, %v11383_v58  ;;  %v11386_v22 = vld [vmem:[#allocation72_spill] sm:$0xff] }
 0x69e   : > { %v9663_v33 = vpop.f32.mrf.mxu3  ;;  %v4727_v2 = vpop.f32.mrf.mxu1  ;;  %v5081_v32 = vld [vmem:[#allocation2 + $0x86] sm:$0xff]  ;;  %v3625_v58 = vadd.f32 %v11387_v57, %v11386_v22 }
 0x69f   : > { %4981 = vst [vmem:[#allocation2 + $0x90] sm:$0xff] %v4940_v8  ;;  %v4818_v34 = vadd.f32 %v4727_v2, %v4579_v36  ;;  %5187 = vmatmul.f32.gmra.mxu2 %v5081_v32  ;;  %v9666_v39 = vpop.f32.mrf.mxu0  ;;  %v4580_v8 = vadd.f32 %v9498_v4, %v4341_v60  ;;  %v11389_v2 = vld [vmem:[#allocation78_spill] sm:$0xff]  ;;  %v5930_v22 = vld [vmem:[#allocation6 + $0xb38] sm:$0xff]  ;;  %v9682_v57 = vpop.f32.mrf.mxu2 }
 0x6a0   : > { %v3864_v36 = vadd.f32 %v11388_v17, %v3625_v58  ;;  %5947 = vmatpush.msrb.mxu2 %v5930_v22  ;;  %v9685_v58 = vld [vmem:[#allocation2 + $0x47] sm:$0xff]  ;;  %v11391_v17 = vld [vmem:[#allocation48_spill] sm:$0xff] }
 0x6a1   : > { %v4859_v25 = vmax.f32 %v4818_v34, 0.0  ;;  %4774 = vmatmul.f32.gmra.mxu1 %v4636_v20  ;;  %v11390_v34 = vld [vmem:[#allocation116_spill] sm:$0xff] }
 0x6a2   : > { %5498 = vmatmul.f32.gmra.mxu0 %v9669_v53  ;;  %v4103_v20 = vadd.f32 %v11390_v34, %v3864_v36  ;;  %v11394_v34 = vld [vmem:[#allocation79_spill] sm:$0xff] }
 0x6a3   : > { %v4900_v46 = vmin.f32 %v4859_v25, 6.0  ;;  %5303 = vmatmul.f32.gmra.mxu3 %v5015_v51  ;;  %v4637_v51 = vld [vmem:[#allocation2 + $0x133] sm:$0xff] }
 0x6a4   : > { %v4342_v4 = vadd.f32 %v9505_v59, %v4103_v20  ;;  %v11395_v20 = vld [vmem:[#allocation118_spill] sm:$0xff] }
 0x6a5   : > { %v4941_v32 = vmul.f32 %v4900_v46, %v11389_v2  ;;  %v5016_v46 = vld [vmem:[#allocation2 + $0x4d] sm:$0xff]  ;;  %v11392_v2 = vld [vmem:[#allocation73_spill] sm:$0xff] }
 0x6a6   : > { %v9677_v21 = vpop.f32.mrf.mxu3  ;;  %v4730_v5 = vpop.f32.mrf.mxu1  ;;  %v5082_v31 = vld [vmem:[#allocation2 + $0x8e] sm:$0xff]  ;;  %v3626_v36 = vadd.f32 %v11392_v2, %v11391_v17  ;;  %v5691_v17 = vld [vmem:[#allocation6 + $0xab8] sm:$0xff] }
 0x6a7   : > { %4982 = vst [vmem:[#allocation2 + $0x98] sm:$0xff] %v4941_v32  ;;  %v4819_v27 = vadd.f32 %v4730_v5, %v4580_v8  ;;  %5190 = vmatmul.f32.gmra.mxu2 %v5082_v31  ;;  %v9680_v25 = vpop.f32.mrf.mxu0  ;;  %v11393_v8 = vld [vmem:[#allocation31_spill] sm:$0xff]  ;;  %v4581_v31 = vadd.f32 %v9507_v62, %v4342_v4  ;;  %5708 = vmatpush.msrb.mxu1 %v5691_v17 }
 0x6a8   : > { %v3865_v5 = vadd.f32 %v11393_v8, %v3626_v36  ;;  %v5017_v4 = vld [vmem:[#allocation2 + $0x55] sm:$0xff]  ;;  %v11397_v8 = vld [vmem:[#allocation49_spill] sm:$0xff] }
 0x6a9   : > { %v4860_v60 = vmax.f32 %v4819_v27, 0.0  ;;  %4777 = vmatmul.f32.gmra.mxu1 %v4637_v51 }
 0x6aa   : > { %5501 = vmatmul.f32.gmra.mxu0 %v9685_v58  ;;  %v4104_v51 = vadd.f32 %v11395_v20, %v3865_v5  ;;  %v11400_v20 = vld [vmem:[#allocation80_spill] sm:$0xff] }
 0x6ab   : > { %v4901_v32 = vmin.f32 %v4860_v60, 6.0  ;;  %5306 = vmatmul.f32.gmra.mxu3 %v5016_v46  ;;  %v4638_v46 = vld [vmem:[#allocation2 + $0x13b] sm:$0xff] }
 0x6ac   : > { %v4343_v2 = vadd.f32 %v9516_v11, %v4104_v51 }
 0x6ad   : > { %v4942_v22 = vmul.f32 %v4901_v32, %v11394_v34  ;;  %v9701_v32 = vld [vmem:[#allocation2 + $0x4f] sm:$0xff]  ;;  %v11398_v34 = vld [vmem:[#allocation53_spill] sm:$0xff] }
 0x6ae   : > { %v9693_v9 = vpop.f32.mrf.mxu3  ;;  %v4733_v59 = vpop.f32.mrf.mxu1  ;;  %v5083_v27 = vld [vmem:[#allocation2 + $0x96] sm:$0xff]  ;;  %v3627_v5 = vadd.f32 %v11398_v34, %v11397_v8 }
 0x6af   : > { %4983 = vst [vmem:[#allocation2 + $0xa0] sm:$0xff] %v4942_v22  ;;  %v4820_v41 = vadd.f32 %v4733_v59, %v4581_v31  ;;  %5193 = vmatmul.f32.gmra.mxu2 %v5083_v27  ;;  %v9696_v60 = vpop.f32.mrf.mxu0  ;;  %v11399_v31 = vld [vmem:[#allocation33_spill] sm:$0xff]  ;;  %v4582_v27 = vadd.f32 %v9518_v54, %v4343_v2  ;;  %v9717_v2 = vld [vmem:[#allocation2 + $0x57] sm:$0xff] }
 0x6b0   : > { %11396 = vst [vmem:[#allocation50_spill] sm:$0xff] %v9696_v60  ;;  %v3866_v59 = vadd.f32 %v11399_v31, %v3627_v5  ;;  %v5018_v54 = vld [vmem:[#allocation2 + $0x5d] sm:$0xff]  ;;  %v11405_v31 = vld [vmem:[#allocation86_spill] sm:$0xff] }
 0x6b1   : > { %v4861_v36 = vmax.f32 %v4820_v41, 0.0  ;;  %4780 = vmatmul.f32.gmra.mxu1 %v4638_v46  ;;  %v11402_v46 = vld [vmem:[#allocation120_spill] sm:$0xff] }
 0x6b2   : > { %v9699_v62 = vpop.f32.mrf.mxu2  ;;  %5504 = vmatmul.f32.gmra.mxu0 %v9701_v32  ;;  %v4105_v13 = vadd.f32 %v11402_v46, %v3866_v59  ;;  %v11406_v59 = vld [vmem:[#allocation34_spill] sm:$0xff]  ;;  %v11409_v46 = vld [vmem:[#allocation123_spill] sm:$0xff] }
 0x6b3   : > { %v4902_v22 = vmin.f32 %v4861_v36, 6.0  ;;  %5309 = vmatmul.f32.gmra.mxu3 %v5017_v4  ;;  %v4639_v36 = vld [vmem:[#allocation2 + $0x143] sm:$0xff] }
 0x6b4   : > { %v4344_v4 = vadd.f32 %v9527_v47, %v4105_v13 }
 0x6b5   : > { %v4943_v11 = vmul.f32 %v4902_v22, %v11400_v20  ;;  %v11404_v22 = vld [vmem:[#allocation76_spill] sm:$0xff] }
 0x6b6   : > { %v9709_v41 = vpop.f32.mrf.mxu3  ;;  %v4736_v51 = vpop.f32.mrf.mxu1  ;;  %v5084_v17 = vld [vmem:[#allocation2 + $0x9e] sm:$0xff]  ;;  %v3628_v20 = vadd.f32 %v11405_v31, %v11404_v22  ;;  %v4640_v31 = vld [vmem:[#allocation2 + $0x14b] sm:$0xff] }
 0x6b7   : > { %11401 = vst [vmem:[#allocation56_spill] sm:$0xff] %v9709_v41  ;;  %v4821_v60 = vadd.f32 %v4736_v51, %v4582_v27  ;;  %5196 = vmatmul.f32.gmra.mxu2 %v5084_v17  ;;  %v9712_v8 = vpop.f32.mrf.mxu0  ;;  %v11407_v51 = vld [vmem:[#allocation81_spill] sm:$0xff]  ;;  %v5929_v22 = vld [vmem:[#allocation6 + $0xb30] sm:$0xff] }
 0x6b8   : > { %4984 = vst [vmem:[#allocation2 + $0xa8] sm:$0xff] %v4943_v11  ;;  %v3867_v27 = vadd.f32 %v11406_v59, %v3628_v20  ;;  %v4583_v11 = vadd.f32 %v9529_v63, %v4344_v4  ;;  %5948 = vmatpush.msrb.mxu2 %v5929_v22  ;;  %v5019_v59 = vld [vmem:[#allocation2 + $0x65] sm:$0xff] }
 0x6b9   : > { %11403 = vst [vmem:[#allocation58_spill] sm:$0xff] %v9712_v8  ;;  %v4862_v34 = vmax.f32 %v4821_v60, 0.0  ;;  %4783 = vmatmul.f32.gmra.mxu1 %v4639_v36 }
 0x6ba   : > { %v9715_v5 = vpop.f32.mrf.mxu2  ;;  %5507 = vmatmul.f32.gmra.mxu0 %v9717_v2  ;;  %v4106_v36 = vadd.f32 %v11409_v46, %v3867_v27  ;;  %v11411_v27 = vld [vmem:[#allocation87_spill] sm:$0xff]  ;;  %v11413_v46 = vld [vmem:[#allocation62_spill] sm:$0xff] }
 0x6bb   : > { %v4903_v41 = vmin.f32 %v4862_v34, 6.0  ;;  %5312 = vmatmul.f32.gmra.mxu3 %v5018_v54  ;;  %v5690_v34 = vld [vmem:[#allocation6 + $0xab0] sm:$0xff] }
 0x6bc   : > { %5709 = vmatpush.msrb.mxu1 %v5690_v34  ;;  %v4345_v63 = vadd.f32 %v9538_v52, %v4106_v36  ;;  %v11414_v36 = vld [vmem:[#allocation82_spill] sm:$0xff]  ;;  %v5687_v34 = vld [vmem:[#allocation6 + $0xa98] sm:$0xff] }
 0x6bd   : > { %v4944_v47 = vmul.f32 %v4903_v41, %v11407_v51  ;;  %v5689_v41 = vld [vmem:[#allocation6 + $0xaa8] sm:$0xff]  ;;  %v9733_v51 = vld [vmem:[#allocation2 + $0x5f] sm:$0xff] }
 0x6be   : > { %v9725_v13 = vpop.f32.mrf.mxu3  ;;  %v4739_v60 = vpop.f32.mrf.mxu1  ;;  %5710 = vmatpush.msrb.mxu1 %v5689_v41 }
 0x6bf   : > { %11408 = vst [vmem:[#allocation60_spill] sm:$0xff] %v9725_v13  ;;  %v5085_v17 = vld [vmem:[#allocation2 + $0xa6] sm:$0xff]  ;;  %v4822_v8 = vadd.f32 %v4739_v60, %v4583_v11  ;;  %v9728_v54 = vpop.f32.mrf.mxu0  ;;  %v11412_v11 = vld [vmem:[#allocation88_spill] sm:$0xff] }
 0x6c0   : > { %4985 = vst [vmem:[#allocation2 + $0xb0] sm:$0xff] %v4944_v47  ;;  %5199 = vmatmul.f32.gmra.mxu2 %v5085_v17  ;;  %v3629_v47 = vadd.f32 %v11412_v11, %v11411_v27  ;;  %v5688_v17 = vld [vmem:[#allocation6 + $0xaa0] sm:$0xff]  ;;  %v11416_v13 = vld [vmem:[#allocation125_spill] sm:$0xff] }
 0x6c1   : > { %11410 = vst [vmem:[#allocation66_spill] sm:$0xff] %v9728_v54  ;;  %v4863_v4 = vmax.f32 %v4822_v8, 0.0  ;;  %4786 = vmatmul.f32.gmra.mxu1 %v4640_v31  ;;  %v4584_v8 = vadd.f32 %v9540_v61, %v4345_v63 }
 0x6c2   : > { %v9731_v20 = vpop.f32.mrf.mxu2  ;;  %5510 = vmatmul.f32.gmra.mxu0 %v9733_v51  ;;  %5711 = vmatpush.msrb.mxu1 %v5688_v17  ;;  %v3868_v52 = vadd.f32 %v11413_v46, %v3629_v47  ;;  %v4641_v17 = vld [vmem:[#allocation2 + $0x153] sm:$0xff] }
 0x6c3   : > { %v4904_v60 = vmin.f32 %v4863_v4, 6.0  ;;  %5315 = vmatmul.f32.gmra.mxu3 %v5019_v59  ;;  %v5686_v59 = vld [vmem:[#allocation6 + $0xa90] sm:$0xff]  ;;  %v5685_v47 = vld [vmem:[#allocation6 + $0xa88] sm:$0xff] }
 0x6c4   : > { %5712 = vmatpush.msrb.mxu1 %v5687_v34  ;;  %v4107_v27 = vadd.f32 %v11416_v13, %v3868_v52  ;;  %v5020_v46 = vld [vmem:[#allocation2 + $0x6d] sm:$0xff]  ;;  %v11419_v13 = vld [vmem:[#allocation89_spill] sm:$0xff] }
 0x6c5   : > { %v4945_v22 = vmul.f32 %v4904_v60, %v11414_v36  ;;  %v9749_v36 = vld [vmem:[#allocation2 + $0x67] sm:$0xff] }
 0x6c6   : > { %v9741_v31 = vpop.f32.mrf.mxu3  ;;  %v4742_v54 = vpop.f32.mrf.mxu1  ;;  %5713 = vmatpush.msrb.mxu1 %v5686_v59  ;;  %v4346_v61 = vadd.f32 %v9547_v30, %v4107_v27  ;;  %11418 = vst [vmem:[#allocation63_spill] sm:$0xff] %v9749_v36  ;;  %v11420_v52 = vld [vmem:[#allocation90_spill] sm:$0xff]  ;;  %v11422_v27 = vld [vmem:[#allocation83_spill] sm:$0xff] }
 0x6c7   : > { %11415 = vst [vmem:[#allocation71_spill] sm:$0xff] %v9741_v31  ;;  %v5086_v41 = vld [vmem:[#allocation2 + $0xae] sm:$0xff]  ;;  %v4823_v4 = vadd.f32 %v4742_v54, %v4584_v8  ;;  %v9744_v11 = vpop.f32.mrf.mxu0  ;;  %v3630_v54 = vadd.f32 %v11420_v52, %v11419_v13  ;;  %v4642_v52 = vld [vmem:[#allocation2 + $0x15b] sm:$0xff] }
 0x6c8   : > { %4986 = vst [vmem:[#allocation2 + $0xb8] sm:$0xff] %v4945_v22  ;;  %5202 = vmatmul.f32.gmra.mxu2 %v5086_v41  ;;  %5714 = vmatpush.msrb.mxu1 %v5685_v47  ;;  %v5684_v22 = vld [vmem:[#allocation6 + $0xa80] sm:$0xff]  ;;  %v4585_v41 = vadd.f32 %v9551_v15, %v4346_v61  ;;  %v11424_v47 = vld [vmem:[#allocation127_spill] sm:$0xff] }
 0x6c9   : > { %11417 = vst [vmem:[#allocation74_spill] sm:$0xff] %v9744_v11  ;;  %v4864_v63 = vmax.f32 %v4823_v4, 0.0  ;;  %4789 = vmatmul.f32.gmra.mxu1 %v4641_v17  ;;  %v11421_v34 = vld [vmem:[#allocation106_spill] sm:$0xff]  ;;  %v5021_v61 = vld [vmem:[#allocation2 + $0x75] sm:$0xff] }
 0x6ca   : > { %v9747_v60 = vpop.f32.mrf.mxu2  ;;  %5513 = vmatmul.f32.gmra.mxu0 %v9749_v36  ;;  %5715 = vmatpush.msrb.mxu1 %v5684_v22  ;;  %v3869_v30 = vadd.f32 %v11421_v34, %v3630_v54  ;;  %v11426_v34 = vld [vmem:[#allocation91_spill] sm:$0xff] }
 0x6cb   : > { %v4905_v8 = vmin.f32 %v4864_v63, 6.0  ;;  %5318 = vmatmul.f32.gmra.mxu3 %v5020_v46  ;;  %v5928_v63 = vld [vmem:[#allocation6 + $0xb28] sm:$0xff] }
 0x6cc   : > { %v4108_v31 = vadd.f32 %v11424_v47, %v3869_v30  ;;  %5949 = vmatpush.msrb.mxu2 %v5928_v63  ;;  %v11429_v47 = vld [vmem:[#allocation84_spill] sm:$0xff] }
 0x6cd   : > { %v4946_v4 = vmul.f32 %v4905_v8, %v11422_v27  ;;  %v9765_v8 = vld [vmem:[#allocation2 + $0x6f] sm:$0xff]  ;;  %v11427_v27 = vld [vmem:[#allocation92_spill] sm:$0xff] }
 0x6ce   : > { %v9757_v59 = vpop.f32.mrf.mxu3  ;;  %v4745_v17 = vpop.f32.mrf.mxu1  ;;  %v4347_v54 = vadd.f32 %v9557_v38, %v4108_v31  ;;  %v3631_v30 = vadd.f32 %v11427_v27, %v11426_v34 }
 0x6cf   : > { %11423 = vst [vmem:[#allocation138_spill] sm:$0xff] %v9757_v59  ;;  %v5087_v11 = vld [vmem:[#allocation2 + $0xb6] sm:$0xff]  ;;  %v4824_v13 = vadd.f32 %v4745_v17, %v4585_v41  ;;  %v9760_v46 = vpop.f32.mrf.mxu0 }
 0x6d0   : > { %4987 = vst [vmem:[#allocation2 + $0xc0] sm:$0xff] %v4946_v4  ;;  %5205 = vmatmul.f32.gmra.mxu2 %v5087_v11  ;;  %v11428_v11 = vld [vmem:[#allocation108_spill] sm:$0xff]  ;;  %v4586_v17 = vadd.f32 %v9559_v48, %v4347_v54 }
 0x6d1   : > { %11425 = vst [vmem:[#allocation139_spill] sm:$0xff] %v9760_v46  ;;  %v4865_v22 = vmax.f32 %v4824_v13, 0.0  ;;  %4792 = vmatmul.f32.gmra.mxu1 %v4642_v52  ;;  %v3870_v41 = vadd.f32 %v11428_v11, %v3631_v30  ;;  %v4643_v52 = vld [vmem:[#allocation2 + $0x163] sm:$0xff]  ;;  %v9781_v54 = vld [vmem:[#allocation2 + $0x77] sm:$0xff] }
 0x6d2   : > { %v9763_v15 = vpop.f32.mrf.mxu2  ;;  %5516 = vmatmul.f32.gmra.mxu0 %v9765_v8  ;;  %v11431_v46 = vld [vmem:[#allocation129_spill] sm:$0xff] }
 0x6d3   : > { %v4906_v4 = vmin.f32 %v4865_v22, 6.0  ;;  %5321 = vmatmul.f32.gmra.mxu3 %v5021_v61  ;;  %v4109_v59 = vadd.f32 %v11431_v46, %v3870_v41  ;;  %v5022_v48 = vld [vmem:[#allocation2 + $0x7d] sm:$0xff]  ;;  %v11435_v46 = vld [vmem:[#allocation111_spill] sm:$0xff] }
 0x6d4   : > { %v11433_v30 = vld [vmem:[#allocation93_spill] sm:$0xff] }
 0x6d5   : > { %v4947_v38 = vmul.f32 %v4906_v4, %v11429_v47  ;;  %v4348_v61 = vadd.f32 %v9567_v10, %v4109_v59  ;;  %v11434_v4 = vld [vmem:[#allocation94_spill] sm:$0xff] }
 0x6d6   : > { %v9773_v31 = vpop.f32.mrf.mxu3  ;;  %v4748_v13 = vpop.f32.mrf.mxu1  ;;  %v3632_v11 = vadd.f32 %v11434_v4, %v11433_v30 }
 0x6d7   : > { %11430 = vst [vmem:[#allocation75_spill] sm:$0xff] %v9773_v31  ;;  %v5088_v63 = vld [vmem:[#allocation2 + $0xbe] sm:$0xff]  ;;  %v4825_v36 = vadd.f32 %v4748_v13, %v4586_v17  ;;  %v9776_v22 = vpop.f32.mrf.mxu0  ;;  %v4587_v17 = vadd.f32 %v9569_v42, %v4348_v61 }
 0x6d8   : > { %4988 = vst [vmem:[#allocation2 + $0xc8] sm:$0xff] %v4947_v38  ;;  %5208 = vmatmul.f32.gmra.mxu2 %v5088_v63  ;;  %v3871_v41 = vadd.f32 %v11435_v46, %v3632_v11  ;;  %v11436_v38 = vld [vmem:[#allocation85_spill] sm:$0xff]  ;;  %v4644_v63 = vld [vmem:[#allocation2 + $0x16b] sm:$0xff] }
 0x6d9   : > { %11432 = vst [vmem:[#allocation25_spill] sm:$0xff] %v9776_v22  ;;  %v4866_v34 = vmax.f32 %v4825_v36, 0.0  ;;  %4795 = vmatmul.f32.gmra.mxu1 %v4643_v52  ;;  %v11437_v52 = vld [vmem:[#allocation132_spill] sm:$0xff]  ;;  %v5023_v42 = vld [vmem:[#allocation2 + $0x85] sm:$0xff]  ;;  %v11439_v11 = vld [vmem:[#allocation95_spill] sm:$0xff] }
 0x6da   : > { %v9779_v27 = vpop.f32.mrf.mxu2  ;;  %5519 = vmatmul.f32.gmra.mxu0 %v9781_v54  ;;  %v4110_v22 = vadd.f32 %v11437_v52, %v3871_v41  ;;  %v9797_v61 = vld [vmem:[#allocation2 + $0x7f] sm:$0xff] }
 0x6db   : > { %v4907_v47 = vmin.f32 %v4866_v34, 6.0  ;;  %5324 = vmatmul.f32.gmra.mxu3 %v5022_v48  ;;  %v11441_v41 = vld [vmem:[#allocation112_spill] sm:$0xff] }
 0x6dc   : > { %v4349_v48 = vadd.f32 %v9577_v7, %v4110_v22 }
 0x6dd   : > { %v4948_v10 = vmul.f32 %v4907_v47, %v11436_v38  ;;  %v11440_v47 = vld [vmem:[#allocation96_spill] sm:$0xff] }
 0x6de   : > { %v9789_v36 = vpop.f32.mrf.mxu3  ;;  %v4751_v59 = vpop.f32.mrf.mxu1  ;;  %v3633_v46 = vadd.f32 %v11440_v47, %v11439_v11  ;;  %v5927_v11 = vld [vmem:[#allocation6 + $0xb20] sm:$0xff] }
 0x6df   : > { %v5089_v13 = vld [vmem:[#allocation2 + $0xc6] sm:$0xff]  ;;  %4989 = vst [vmem:[#allocation2 + $0xd0] sm:$0xff] %v4948_v10  ;;  %v4826_v31 = vadd.f32 %v4751_v59, %v4587_v17  ;;  %v9792_v34 = vpop.f32.mrf.mxu0  ;;  %v4588_v10 = vadd.f32 %v9579_v35, %v4349_v48  ;;  %v11442_v59 = vld [vmem:[#allocation12_spill] sm:$0xff]  ;;  %5950 = vmatpush.msrb.mxu2 %v5927_v11 }
 0x6e0   : > { %5211 = vmatmul.f32.gmra.mxu2 %v5089_v13  ;;  %11438 = vst [vmem:[#allocation41_spill] sm:$0xff] %v9792_v34  ;;  %v3872_v17 = vadd.f32 %v11441_v41, %v3633_v46  ;;  %v5024_v48 = vld [vmem:[#allocation2 + $0x8d] sm:$0xff] }
 0x6e1   : > { %v4867_v30 = vmax.f32 %v4826_v31, 0.0  ;;  %4798 = vmatmul.f32.gmra.mxu1 %v4644_v63  ;;  %v11444_v63 = vld [vmem:[#allocation134_spill] sm:$0xff] }
 0x6e2   : > { %v9795_v4 = vpop.f32.mrf.mxu2  ;;  %5522 = vmatmul.f32.gmra.mxu0 %v9797_v61  ;;  %v4111_v52 = vadd.f32 %v11444_v63, %v3872_v17  ;;  %v9814_v46 = vld [vmem:[#allocation2 + $0x87] sm:$0xff] }
 0x6e3   : > { %v4908_v38 = vmin.f32 %v4867_v30, 6.0  ;;  %5327 = vmatmul.f32.gmra.mxu3 %v5023_v42  ;;  %v11447_v41 = vld [vmem:[#allocation98_spill] sm:$0xff] }
 0x6e4   : > { %v4350_v42 = vadd.f32 %v9587_v14, %v4111_v52  ;;  %v11449_v14 = vld [vmem:[#allocation13_spill] sm:$0xff]  ;;  %v11450_v52 = vld [vmem:[#allocation136_spill] sm:$0xff] }
 0x6e5   : > { %v4949_v7 = vmul.f32 %v4908_v38, %v11442_v59  ;;  %v11446_v38 = vld [vmem:[#allocation97_spill] sm:$0xff] }
 0x6e6   : > { %v4754_v31 = vpop.f32.mrf.mxu1  ;;  %v9805_v22 = vpop.f32.mrf.mxu3  ;;  %v5090_v13 = vld [vmem:[#allocation2 + $0xce] sm:$0xff]  ;;  %v3634_v17 = vadd.f32 %v11447_v41, %v11446_v38 }
 0x6e7   : > { %11443 = vst [vmem:[#allocation42_spill] sm:$0xff] %v9805_v22  ;;  %v4827_v34 = vadd.f32 %v4754_v31, %v4588_v10  ;;  %v9808_v30 = vpop.f32.mrf.mxu0  ;;  %v11448_v10 = vld [vmem:[#allocation113_spill] sm:$0xff]  ;;  %v4589_v31 = vadd.f32 %v9589_v55, %v4350_v42  ;;  %v5025_v42 = vld [vmem:[#allocation2 + $0x95] sm:$0xff] }
 0x6e8   : > { %4990 = vst [vmem:[#allocation2 + $0xd8] sm:$0xff] %v4949_v7  ;;  %5214 = vmatmul.f32.gmra.mxu2 %v5090_v13  ;;  %v3873_v7 = vadd.f32 %v11448_v10, %v3634_v17  ;;  %v9832_v41 = vld [vmem:[#allocation2 + $0x8f] sm:$0xff] }
 0x6e9   : > { %11445 = vst [vmem:[#allocation23_spill] sm:$0xff] %v9808_v30  ;;  %v4868_v47 = vmax.f32 %v4827_v34, 0.0  ;;  %5716 = vmatmul.f32.vlgmr.msrb.gmra.mxu1 %v9603_v0  ;;  %v11451_v17 = vld [vmem:[#allocation99_spill] sm:$0xff] }
 0x6ea   : > { %v9812_v35 = vpop.f32.mrf.mxu2  ;;  %5525 = vmatmul.f32.gmra.mxu0 %v9814_v46  ;;  %v4112_v11 = vadd.f32 %v11450_v52, %v3873_v7 }
 0x6eb   : > { %v4909_v59 = vmin.f32 %v4868_v47, 6.0  ;;  %5330 = vmatmul.f32.gmra.mxu3 %v5024_v48 }
 0x6ec   : > { %v4351_v48 = vadd.f32 %v9595_v37, %v4112_v11  ;;  %v11454_v37 = vld [vmem:[#allocation36_spill] sm:$0xff] }
 0x6ed   : > { %v4950_v34 = vmul.f32 %v4909_v59, %v11449_v14  ;;  %v11452_v59 = vld [vmem:[#allocation100_spill] sm:$0xff] }
 0x6ee   : > { %v4757_v13 = vpop.f32.mrf.mxu1  ;;  %v5283_v0 = vpop.f32.mrf.mxu3  ;;  %v3635_v10 = vadd.f32 %v11452_v59, %v11451_v17  ;;  %v4590_v14 = vadd.f32 %v9599_v44, %v4351_v48  ;;  %v5026_v59 = vld [vmem:[#allocation2 + $0x9d] sm:$0xff] }
 0x6ef   : > { %v5091_v63 = vld [vmem:[#allocation2 + $0xd6] sm:$0xff]  ;;  %4991 = vst [vmem:[#allocation2 + $0xe0] sm:$0xff] %v4950_v34  ;;  %v4828_v30 = vadd.f32 %v4757_v13, %v4589_v31  ;;  %v9824_v22 = vadd.f32 %v5283_v0, %v9682_v57  ;;  %v9826_v47 = vpop.f32.mrf.mxu0 }
 0x6f0   : > { %5217 = vmatmul.f32.gmra.mxu2 %v5091_v63  ;;  %v11453_v57 = vld [vmem:[#allocation115_spill] sm:$0xff]  ;;  %v11455_v0 = vld [vmem:[#allocation140_spill] sm:$0xff] }
 0x6f1   : > { %v4869_v38 = vmax.f32 %v4828_v30, 0.0  ;;  %5719 = vmatmul.f32.gmra.mxu1 %v9616_v16  ;;  %v3874_v31 = vadd.f32 %v11453_v57, %v3635_v10  ;;  %v9850_v10 = vld [vmem:[#allocation2 + $0x97] sm:$0xff] }
 0x6f2   : > { %v9830_v55 = vpop.f32.mrf.mxu2  ;;  %5528 = vmatmul.f32.gmra.mxu0 %v9832_v41  ;;  %v11457_v57 = vld [vmem:[#allocation20_spill] sm:$0xff] }
 0x6f3   : > { %v4910_v7 = vmin.f32 %v4869_v38, 6.0  ;;  %5333 = vmatmul.f32.gmra.mxu3 %v5025_v42  ;;  %v4113_v63 = vadd.f32 %v11455_v0, %v3874_v31  ;;  %v5926_v38 = vld [vmem:[#allocation6 + $0xb18] sm:$0xff] }
 0x6f4   : > { %5951 = vmatpush.msrb.mxu2 %v5926_v38 }
 0x6f5   : > { %v4951_v30 = vmul.f32 %v4910_v7, %v11454_v37  ;;  %v4352_v17 = vadd.f32 %v9608_v19, %v4113_v63  ;;  %v11456_v7 = vld [vmem:[#allocation22_spill] sm:$0xff]  ;;  %v11459_v19 = vld [vmem:[#allocation39_spill] sm:$0xff] }
 0x6f6   : > { %v4760_v34 = vpop.f32.mrf.mxu1  ;;  %v5286_v16 = vpop.f32.mrf.mxu3  ;;  %v5092_v13 = vld [vmem:[#allocation2 + $0xde] sm:$0xff]  ;;  %v3636_v31 = vadd.f32 %v11457_v57, %v11456_v7 }
 0x6f7   : > { %4992 = vst [vmem:[#allocation2 + $0xe8] sm:$0xff] %v4951_v30  ;;  %v4829_v52 = vadd.f32 %v4760_v34, %v4590_v14  ;;  %v9842_v11 = vadd.f32 %v5286_v16, %v9699_v62  ;;  %v9844_v42 = vpop.f32.mrf.mxu0  ;;  %v11458_v14 = vld [vmem:[#allocation117_spill] sm:$0xff]  ;;  %v4591_v30 = vadd.f32 %v9610_v49, %v4352_v17  ;;  %v11460_v57 = vld [vmem:[#allocation32_spill] sm:$0xff] }
 0x6f8   : > { %5220 = vmatmul.f32.gmra.mxu2 %v5092_v13  ;;  %v3875_v37 = vadd.f32 %v11458_v14, %v3636_v31  ;;  %v5027_v17 = vld [vmem:[#allocation2 + $0xa5] sm:$0xff] }
 0x6f9   : > { %v4870_v44 = vmax.f32 %v4829_v52, 0.0  ;;  %5722 = vmatmul.f32.gmra.mxu1 %v9627_v23  ;;  %v9868_v7 = vld [vmem:[#allocation2 + $0x9f] sm:$0xff] }
 0x6fa   : > { %v9848_v48 = vpop.f32.mrf.mxu2  ;;  %5531 = vmatmul.f32.gmra.mxu0 %v9850_v10  ;;  %v4114_v0 = vadd.f32 %v9496_v29, %v3875_v37  ;;  %v11461_v29 = vld [vmem:[#allocation65_spill] sm:$0xff] }
 0x6fb   : > { %v4911_v62 = vmin.f32 %v4870_v44, 6.0  ;;  %5336 = vmatmul.f32.gmra.mxu3 %v5026_v59  ;;  %v3637_v31 = vadd.f32 %v11461_v29, %v11460_v57  ;;  %v11464_v57 = vld [vmem:[#allocation21_spill] sm:$0xff] }
 0x6fc   : > { %v4353_v44 = vadd.f32 %v9621_v1, %v4114_v0  ;;  %v11463_v1 = vld [vmem:[#allocation14_spill] sm:$0xff] }
 0x6fd   : > { %v4952_v34 = vmul.f32 %v4911_v62, %v11459_v19 }
 0x6fe   : > { %v4763_v16 = vpop.f32.mrf.mxu1  ;;  %v5289_v23 = vpop.f32.mrf.mxu3  ;;  %v5093_v13 = vld [vmem:[#allocation2 + $0xe6] sm:$0xff]  ;;  %v4592_v37 = vadd.f32 %v9623_v3, %v4353_v44 }
 0x6ff   : > { %4993 = vst [vmem:[#allocation2 + $0xf0] sm:$0xff] %v4952_v34  ;;  %v4830_v63 = vadd.f32 %v4763_v16, %v4591_v30  ;;  %v9860_v52 = vadd.f32 %v5289_v23, %v9715_v5  ;;  %v9862_v38 = vpop.f32.mrf.mxu0  ;;  %v11462_v5 = vld [vmem:[#allocation119_spill] sm:$0xff] }
 0x700   : > { %5223 = vmatmul.f32.gmra.mxu2 %v5093_v13  ;;  %v3876_v14 = vadd.f32 %v11462_v5, %v3637_v31  ;;  %v5028_v44 = vld [vmem:[#allocation2 + $0xad] sm:$0xff] }
 0x701   : > { %v4871_v59 = vmax.f32 %v4830_v63, 0.0  ;;  %5725 = vmatmul.f32.gmra.mxu1 %v9640_v18 }
 0x702   : > { %v9866_v49 = vpop.f32.mrf.mxu2  ;;  %5534 = vmatmul.f32.gmra.mxu0 %v9868_v7  ;;  %v4115_v16 = vadd.f32 %v9511_v28, %v3876_v14  ;;  %v11465_v28 = vld [vmem:[#allocation24_spill] sm:$0xff] }
 0x703   : > { %v4912_v62 = vmin.f32 %v4871_v59, 6.0  ;;  %5339 = vmatmul.f32.gmra.mxu3 %v5027_v17  ;;  %v9886_v17 = vld [vmem:[#allocation2 + $0xa7] sm:$0xff]  ;;  %v3638_v29 = vadd.f32 %v11465_v28, %v11464_v57 }
 0x704   : > { %v4354_v63 = vadd.f32 %v9634_v24, %v4115_v16  ;;  %v11467_v24 = vld [vmem:[#allocation15_spill] sm:$0xff]  ;;  %v11469_v57 = vld [vmem:[#allocation38_spill] sm:$0xff] }
 0x705   : > { %v4953_v30 = vmul.f32 %v4912_v62, %v11463_v1 }
 0x706   : > { %v4766_v19 = vpop.f32.mrf.mxu1  ;;  %v5292_v18 = vpop.f32.mrf.mxu3  ;;  %v5094_v34 = vld [vmem:[#allocation2 + $0xee] sm:$0xff]  ;;  %v4593_v5 = vadd.f32 %v9636_v6, %v4354_v63 }
 0x707   : > { %4994 = vst [vmem:[#allocation2 + $0xf8] sm:$0xff] %v4953_v30  ;;  %v4831_v23 = vadd.f32 %v4766_v19, %v4592_v37  ;;  %v9878_v13 = vadd.f32 %v5292_v18, %v9731_v20  ;;  %v9880_v0 = vpop.f32.mrf.mxu0  ;;  %v11466_v20 = vld [vmem:[#allocation121_spill] sm:$0xff] }
 0x708   : > { %5226 = vmatmul.f32.gmra.mxu2 %v5094_v34  ;;  %v3877_v62 = vadd.f32 %v11466_v20, %v3638_v29  ;;  %v5925_v34 = vld [vmem:[#allocation6 + $0xb10] sm:$0xff]  ;;  %v11470_v29 = vld [vmem:[#allocation122_spill] sm:$0xff] }
 0x709   : > { %v4872_v59 = vmax.f32 %v4831_v23, 0.0  ;;  %5728 = vmatmul.f32.gmra.mxu1 %v9653_v12  ;;  %5952 = vmatpush.msrb.mxu2 %v5925_v34  ;;  %v5030_v34 = vld [vmem:[#allocation2 + $0xbd] sm:$0xff] }
 0x70a   : > { %v9884_v3 = vpop.f32.mrf.mxu2  ;;  %5537 = vmatmul.f32.gmra.mxu0 %v9886_v17  ;;  %v4116_v30 = vadd.f32 %v9522_v43, %v3877_v62  ;;  %v11468_v43 = vld [vmem:[#allocation37_spill] sm:$0xff] }
 0x70b   : > { %v4913_v31 = vmin.f32 %v4872_v59, 6.0  ;;  %5342 = vmatmul.f32.gmra.mxu3 %v5028_v44  ;;  %v5029_v59 = vld [vmem:[#allocation2 + $0xb5] sm:$0xff]  ;;  %v3639_v28 = vadd.f32 %v11469_v57, %v11468_v43 }
 0x70c   : > { %v4355_v23 = vadd.f32 %v9647_v40, %v4116_v30  ;;  %v9904_v44 = vld [vmem:[#allocation2 + $0xaf] sm:$0xff]  ;;  %v11471_v40 = vld [vmem:[#allocation40_spill] sm:$0xff] }
 0x70d   : > { %v4954_v14 = vmul.f32 %v4913_v31, %v11467_v24  ;;  %v3878_v31 = vadd.f32 %v11470_v29, %v3639_v28 }
 0x70e   : > { %v4769_v37 = vpop.f32.mrf.mxu1  ;;  %v5295_v12 = vpop.f32.mrf.mxu3  ;;  %v5095_v1 = vld [vmem:[#allocation2 + $0xf6] sm:$0xff]  ;;  %v4594_v20 = vadd.f32 %v9649_v50, %v4355_v23 }
 0x70f   : > { %4995 = vst [vmem:[#allocation2 + $0x100] sm:$0xff] %v4954_v14  ;;  %v4832_v19 = vadd.f32 %v4769_v37, %v4593_v5  ;;  %v9896_v18 = vadd.f32 %v5295_v12, %v9747_v60  ;;  %v9898_v16 = vpop.f32.mrf.mxu0  ;;  %v4117_v14 = vadd.f32 %v9535_v56, %v3878_v31  ;;  %v9922_v23 = vld [vmem:[#allocation2 + $0xb7] sm:$0xff] }
 0x710   : > { %5229 = vmatmul.f32.gmra.mxu2 %v5095_v1  ;;  %v11473_v56 = vld [vmem:[#allocation67_spill] sm:$0xff] }
 0x711   : > { %v4873_v6 = vmax.f32 %v4832_v19, 0.0  ;;  %5731 = vmatmul.f32.gmra.mxu1 %v9669_v53  ;;  %v4356_v30 = vadd.f32 %v9663_v33, %v4117_v14  ;;  %v11475_v33 = vld [vmem:[#allocation43_spill] sm:$0xff]  ;;  %v5031_v14 = vld [vmem:[#allocation2 + $0xc5] sm:$0xff] }
 0x712   : > { %v9902_v63 = vpop.f32.mrf.mxu2  ;;  %5540 = vmatmul.f32.gmra.mxu0 %v9904_v44 }
 0x713   : > { %v4914_v60 = vmin.f32 %v4873_v6, 6.0  ;;  %5345 = vmatmul.f32.gmra.mxu3 %v5029_v59  ;;  %v11472_v6 = vld [vmem:[#allocation69_spill] sm:$0xff]  ;;  %v4595_v28 = vadd.f32 %v9666_v39, %v4356_v30  ;;  %v11476_v30 = vld [vmem:[#allocation27_spill] sm:$0xff] }
 0x714   : > { %v3640_v59 = vadd.f32 %v11473_v56, %v11472_v6 }
 0x715   : > { %v4955_v62 = vmul.f32 %v4914_v60, %v11471_v40 }
 0x716   : > { %v4772_v5 = vpop.f32.mrf.mxu1  ;;  %v5298_v53 = vpop.f32.mrf.mxu3  ;;  %v5096_v24 = vld [vmem:[#allocation2 + $0xfe] sm:$0xff] }
 0x717   : > { %4996 = vst [vmem:[#allocation2 + $0x108] sm:$0xff] %v4955_v62  ;;  %v4833_v37 = vadd.f32 %v4772_v5, %v4594_v20  ;;  %v9914_v12 = vadd.f32 %v5298_v53, %v9763_v15  ;;  %v9916_v1 = vpop.f32.mrf.mxu0  ;;  %v11474_v15 = vld [vmem:[#allocation124_spill] sm:$0xff] }
 0x718   : > { %5232 = vmatmul.f32.gmra.mxu2 %v5096_v24  ;;  %v3879_v57 = vadd.f32 %v11474_v15, %v3640_v59 }
 0x719   : > { %v4874_v19 = vmax.f32 %v4833_v37, 0.0  ;;  %5734 = vmatmul.f32.gmra.mxu1 %v9685_v58  ;;  %v9940_v37 = vld [vmem:[#allocation2 + $0xbf] sm:$0xff] }
 0x71a   : > { %v9920_v50 = vpop.f32.mrf.mxu2  ;;  %5543 = vmatmul.f32.gmra.mxu0 %v9922_v23  ;;  %v4118_v20 = vadd.f32 %v9549_v26, %v3879_v57  ;;  %v11477_v26 = vld [vmem:[#allocation101_spill] sm:$0xff] }
 0x71b   : > { %v4915_v43 = vmin.f32 %v4874_v19, 6.0  ;;  %5348 = vmatmul.f32.gmra.mxu3 %v5030_v34  ;;  %v3641_v19 = vadd.f32 %v11477_v26, %v11476_v30  ;;  %v11483_v26 = vld [vmem:[#allocation50_spill] sm:$0xff] }
 0x71c   : > { %v4357_v53 = vadd.f32 %v9677_v21, %v4118_v20  ;;  %v11479_v21 = vld [vmem:[#allocation16_spill] sm:$0xff]  ;;  %v5032_v20 = vld [vmem:[#allocation2 + $0xcd] sm:$0xff] }
 0x71d   : > { %v4956_v60 = vmul.f32 %v4915_v43, %v11475_v33 }
 0x71e   : > { %v4775_v29 = vpop.f32.mrf.mxu1  ;;  %v5301_v58 = vpop.f32.mrf.mxu3  ;;  %v5097_v31 = vld [vmem:[#allocation2 + $0x106] sm:$0xff]  ;;  %v4596_v56 = vadd.f32 %v9680_v25, %v4357_v53 }
 0x71f   : > { %4997 = vst [vmem:[#allocation2 + $0x110] sm:$0xff] %v4956_v60  ;;  %v4834_v40 = vadd.f32 %v4775_v29, %v4595_v28  ;;  %v9932_v62 = vadd.f32 %v5301_v58, %v9779_v27  ;;  %v9934_v5 = vpop.f32.mrf.mxu0  ;;  %v11478_v27 = vld [vmem:[#allocation126_spill] sm:$0xff]  ;;  %v5924_v60 = vld [vmem:[#allocation6 + $0xb08] sm:$0xff] }
 0x720   : > { %5235 = vmatmul.f32.gmra.mxu2 %v5097_v31  ;;  %v3880_v6 = vadd.f32 %v11478_v27, %v3641_v19  ;;  %v11481_v53 = vld [vmem:[#allocation102_spill] sm:$0xff] }
 0x721   : > { %v4875_v24 = vmax.f32 %v4834_v40, 0.0  ;;  %5737 = vmatmul.f32.gmra.mxu1 %v9701_v32  ;;  %5953 = vmatpush.msrb.mxu2 %v5924_v60  ;;  %v9958_v40 = vld [vmem:[#allocation2 + $0xc7] sm:$0xff] }
 0x722   : > { %v9938_v39 = vpop.f32.mrf.mxu2  ;;  %5546 = vmatmul.f32.gmra.mxu0 %v9940_v37  ;;  %v4119_v57 = vadd.f32 %v9563_v45, %v3880_v6  ;;  %v11480_v45 = vld [vmem:[#allocation28_spill] sm:$0xff] }
 0x723   : > { %v4916_v34 = vmin.f32 %v4875_v24, 6.0  ;;  %5351 = vmatmul.f32.gmra.mxu3 %v5031_v14  ;;  %v3642_v24 = vadd.f32 %v11481_v53, %v11480_v45  ;;  %v11482_v14 = vld [vmem:[#allocation128_spill] sm:$0xff]  ;;  %v11488_v45 = vld [vmem:[#allocation103_spill] sm:$0xff] }
 0x724   : > { %v4358_v58 = vadd.f32 %v9693_v9, %v4119_v57  ;;  %v11484_v9 = vld [vmem:[#allocation17_spill] sm:$0xff] }
 0x725   : > { %v4957_v59 = vmul.f32 %v4916_v34, %v11479_v21  ;;  %v3881_v30 = vadd.f32 %v11482_v14, %v3642_v24  ;;  %v11490_v14 = vld [vmem:[#allocation58_spill] sm:$0xff] }
 0x726   : > { %v4778_v43 = vpop.f32.mrf.mxu1  ;;  %v5304_v32 = vpop.f32.mrf.mxu3  ;;  %v5098_v15 = vld [vmem:[#allocation2 + $0x10e] sm:$0xff]  ;;  %v4597_v19 = vadd.f32 %v11483_v26, %v4358_v58 }
 0x727   : > { %4998 = vst [vmem:[#allocation2 + $0x118] sm:$0xff] %v4957_v59  ;;  %v4835_v28 = vadd.f32 %v4778_v43, %v4596_v56  ;;  %v9950_v33 = vadd.f32 %v5304_v32, %v9795_v4  ;;  %v9952_v29 = vpop.f32.mrf.mxu0  ;;  %v11485_v56 = vld [vmem:[#allocation59_spill] sm:$0xff]  ;;  %v11491_v26 = vld [vmem:[#allocation46_spill] sm:$0xff] }
 0x728   : > { %5238 = vmatmul.f32.gmra.mxu2 %v5098_v15  ;;  %v4120_v21 = vadd.f32 %v11485_v56, %v3881_v30  ;;  %v11486_v15 = vld [vmem:[#allocation56_spill] sm:$0xff] }
 0x729   : > { %v4876_v25 = vmax.f32 %v4835_v28, 0.0  ;;  %5740 = vmatmul.f32.gmra.mxu1 %v9717_v2  ;;  %v5033_v58 = vld [vmem:[#allocation2 + $0xd5] sm:$0xff] }
 0x72a   : > { %v9956_v31 = vpop.f32.mrf.mxu2  ;;  %5549 = vmatmul.f32.gmra.mxu0 %v9958_v40  ;;  %v4359_v57 = vadd.f32 %v11486_v15, %v4120_v21  ;;  %v5923_v21 = vld [vmem:[#allocation6 + $0xb00] sm:$0xff]  ;;  %v11493_v15 = vld [vmem:[#allocation60_spill] sm:$0xff] }
 0x72b   : > { %v4917_v4 = vmin.f32 %v4876_v25, 6.0  ;;  %5354 = vmatmul.f32.gmra.mxu3 %v5032_v20  ;;  %v9976_v25 = vld [vmem:[#allocation2 + $0xcf] sm:$0xff]  ;;  %5954 = vmatpush.msrb.mxu2 %v5923_v21 }
 0x72c   : > { %v11487_v20 = vld [vmem:[#allocation30_spill] sm:$0xff]  ;;  %v4598_v30 = vadd.f32 %v11490_v14, %v4359_v57  ;;  %v11497_v14 = vld [vmem:[#allocation131_spill] sm:$0xff] }
 0x72d   : > { %v4958_v34 = vmul.f32 %v4917_v4, %v11484_v9  ;;  %v3643_v53 = vadd.f32 %v11488_v45, %v11487_v20  ;;  %v5034_v45 = vld [vmem:[#allocation2 + $0xdd] sm:$0xff] }
 0x72e   : > { %v4781_v27 = vpop.f32.mrf.mxu1  ;;  %v5307_v2 = vpop.f32.mrf.mxu3  ;;  %v5099_v6 = vld [vmem:[#allocation2 + $0x116] sm:$0xff] }
 0x72f   : > { %4999 = vst [vmem:[#allocation2 + $0x120] sm:$0xff] %v4958_v34  ;;  %v4836_v59 = vadd.f32 %v4781_v27, %v4597_v19  ;;  %v9968_v43 = vadd.f32 %v5307_v2, %v9812_v35  ;;  %v9970_v32 = vpop.f32.mrf.mxu0  ;;  %v11489_v35 = vld [vmem:[#allocation130_spill] sm:$0xff]  ;;  %v11492_v27 = vld [vmem:[#allocation61_spill] sm:$0xff] }
 0x730   : > { %5241 = vmatmul.f32.gmra.mxu2 %v5099_v6  ;;  %v3882_v4 = vadd.f32 %v11489_v35, %v3643_v53  ;;  %v9994_v53 = vld [vmem:[#allocation2 + $0xd7] sm:$0xff] }
 0x731   : > { %v4877_v28 = vmax.f32 %v4836_v59, 0.0  ;;  %5743 = vmatmul.f32.gmra.mxu1 %v9733_v51  ;;  %v11496_v35 = vld [vmem:[#allocation104_spill] sm:$0xff] }
 0x732   : > { %v9974_v60 = vpop.f32.mrf.mxu2  ;;  %5552 = vmatmul.f32.gmra.mxu0 %v9976_v25  ;;  %v4121_v2 = vadd.f32 %v11492_v27, %v3882_v4 }
 0x733   : > { %v4918_v24 = vmin.f32 %v4877_v28, 6.0  ;;  %5357 = vmatmul.f32.gmra.mxu3 %v5033_v58  ;;  %v11494_v58 = vld [vmem:[#allocation63_spill] sm:$0xff] }
 0x734   : > { %v4360_v28 = vadd.f32 %v11493_v15, %v4121_v2 }
 0x735   : > { %v4959_v19 = vmul.f32 %v4918_v24, %v11491_v26  ;;  %v11495_v24 = vld [vmem:[#allocation52_spill] sm:$0xff]  ;;  %v11498_v26 = vld [vmem:[#allocation66_spill] sm:$0xff] }
 0x736   : > { %v4784_v9 = vpop.f32.mrf.mxu1  ;;  %v5310_v51 = vpop.f32.mrf.mxu3  ;;  %v5100_v34 = vld [vmem:[#allocation2 + $0x11e] sm:$0xff]  ;;  %v3644_v4 = vadd.f32 %v11496_v35, %v11495_v24 }
 0x737   : > { %5000 = vst [vmem:[#allocation2 + $0x128] sm:$0xff] %v4959_v19  ;;  %v4837_v6 = vadd.f32 %v4784_v9, %v4598_v30  ;;  %v9986_v56 = vadd.f32 %v5310_v51, %v9830_v55  ;;  %v9988_v59 = vpop.f32.mrf.mxu0  ;;  %v4599_v19 = vadd.f32 %v11498_v26, %v4360_v28  ;;  %v11499_v9 = vld [vmem:[#allocation51_spill] sm:$0xff] }
 0x738   : > { %5244 = vmatmul.f32.gmra.mxu2 %v5100_v34  ;;  %v3883_v30 = vadd.f32 %v11497_v14, %v3644_v4  ;;  %v5035_v4 = vld [vmem:[#allocation2 + $0xe5] sm:$0xff] }
 0x739   : > { %v4878_v57 = vmax.f32 %v4837_v6, 0.0  ;;  %5746 = vmatmul.f32.gmra.mxu1 %v11494_v58  ;;  %v11500_v6 = vld [vmem:[#allocation64_spill] sm:$0xff]  ;;  %v11504_v14 = vld [vmem:[#allocation54_spill] sm:$0xff] }
 0x73a   : > { %v9992_v20 = vpop.f32.mrf.mxu2  ;;  %5555 = vmatmul.f32.gmra.mxu0 %v9994_v53  ;;  %v4122_v21 = vadd.f32 %v11500_v6, %v3883_v30  ;;  %v11505_v30 = vld [vmem:[#allocation105_spill] sm:$0xff] }
 0x73b   : > { %v4919_v55 = vmin.f32 %v4878_v57, 6.0  ;;  %5360 = vmatmul.f32.gmra.mxu3 %v5034_v45  ;;  %v11503_v45 = vld [vmem:[#allocation71_spill] sm:$0xff]  ;;  %v3645_v26 = vadd.f32 %v11505_v30, %v11504_v14 }
 0x73c   : > { %v4361_v24 = vadd.f32 %v11503_v45, %v4122_v21 }
 0x73d   : > { %v4960_v51 = vmul.f32 %v4919_v55, %v11499_v9  ;;  %v10012_v55 = vld [vmem:[#allocation2 + $0xdf] sm:$0xff] }
 0x73e   : > { %v4787_v34 = vpop.f32.mrf.mxu1  ;;  %v5313_v27 = vpop.f32.mrf.mxu3  ;;  %v5101_v2 = vld [vmem:[#allocation2 + $0x126] sm:$0xff] }
 0x73f   : > { %5001 = vst [vmem:[#allocation2 + $0x130] sm:$0xff] %v4960_v51  ;;  %v4838_v15 = vadd.f32 %v4787_v34, %v4599_v19  ;;  %v10004_v58 = vadd.f32 %v5313_v27, %v9848_v48  ;;  %v10006_v57 = vpop.f32.mrf.mxu0  ;;  %v11506_v48 = vld [vmem:[#allocation133_spill] sm:$0xff]  ;;  %v11507_v51 = vld [vmem:[#allocation74_spill] sm:$0xff] }
 0x740   : > { %5247 = vmatmul.f32.gmra.mxu2 %v5101_v2  ;;  %11502 = vst [vmem:[#allocation114_spill] sm:$0xff] %v10006_v57  ;;  %v3884_v9 = vadd.f32 %v11506_v48, %v3645_v26  ;;  %v4600_v34 = vadd.f32 %v11507_v51, %v4361_v24  ;;  %v11508_v27 = vld [vmem:[#allocation18_spill] sm:$0xff] }
 0x741   : > { %11501 = vst [vmem:[#allocation77_spill] sm:$0xff] %v10004_v58  ;;  %v4879_v35 = vmax.f32 %v4838_v15, 0.0  ;;  %5749 = vmatmul.f32.gmra.mxu1 %v9765_v8  ;;  %v11509_v15 = vld [vmem:[#allocation68_spill] sm:$0xff]  ;;  %v11512_v24 = vld [vmem:[#allocation138_spill] sm:$0xff] }
 0x742   : > { %5558 = vmatmul.f32.gmra.mxu0 %v10012_v55  ;;  %v4123_v45 = vadd.f32 %v11509_v15, %v3884_v9  ;;  %v5036_v9 = vld [vmem:[#allocation2 + $0xed] sm:$0xff] }
 0x743   : > { %v10010_v28 = vpop.f32.mrf.mxu2  ;;  %v4920_v19 = vmin.f32 %v4879_v35, 6.0  ;;  %5363 = vmatmul.f32.gmra.mxu3 %v5035_v4  ;;  %v6177_v35 = vld [vmem:[#allocation6 + $0xbf8] sm:$0xff]  ;;  %v11517_v15 = vld [vmem:[#allocation19_spill] sm:$0xff] }
 0x744   : > { %v6894_v4 = vld [vmem:[#allocation6 + $0xd78] sm:$0xff]  ;;  %6178 = vmatpush.msra.mxu3 %v6177_v35  ;;  %v4362_v30 = vadd.f32 %v11512_v24, %v4123_v45 }
 0x745   : > { %v4961_v2 = vmul.f32 %v4920_v19, %v11508_v27  ;;  %6895 = vmatpush.msra.mxu2 %v6894_v4  ;;  %v6416_v19 = vld [vmem:[#allocation6 + $0xc78] sm:$0xff] }
 0x746   : > { %v4790_v6 = vpop.f32.mrf.mxu1  ;;  %v5316_v8 = vpop.f32.mrf.mxu3  ;;  %v5102_v21 = vld [vmem:[#allocation2 + $0x12e] sm:$0xff]  ;;  %6417 = vmatpush.msra.mxu0 %v6416_v19 }
 0x747   : > { %5002 = vst [vmem:[#allocation2 + $0x138] sm:$0xff] %v4961_v2  ;;  %v4839_v57 = vadd.f32 %v4790_v6, %v4600_v34  ;;  %v10022_v58 = vadd.f32 %v5316_v8, %v9866_v49  ;;  %v10024_v14 = vpop.f32.mrf.mxu0  ;;  %v10030_v51 = vld [vmem:[#allocation2 + $0xe7] sm:$0xff]  ;;  %v11513_v49 = vld [vmem:[#allocation35_spill] sm:$0xff] }
 0x748   : > { %5250 = vmatmul.f32.gmra.mxu2 %v5102_v21  ;;  %11511 = vst [vmem:[#allocation44_spill] sm:$0xff] %v10024_v14  ;;  %v11514_v34 = vld [vmem:[#allocation107_spill] sm:$0xff]  ;;  %v6655_v6 = vld [vmem:[#allocation6 + $0xcf8] sm:$0xff]  ;;  %v11518_v14 = vld [vmem:[#allocation70_spill] sm:$0xff] }
 0x749   : > { %11510 = vst [vmem:[#allocation72_spill] sm:$0xff] %v10022_v58  ;;  %v4880_v26 = vmax.f32 %v4839_v57, 0.0  ;;  %5752 = vmatmul.f32.gmra.mxu1 %v9781_v54  ;;  %v3646_v27 = vadd.f32 %v11514_v34, %v11513_v49  ;;  %v11515_v8 = vld [vmem:[#allocation135_spill] sm:$0xff] }
 0x74a   : > { %5561 = vmatmul.f32.gmra.mxu0 %v10030_v51  ;;  %6656 = vmatpush.msra.mxu1 %v6655_v6  ;;  %v11516_v21 = vld [vmem:[#allocation139_spill] sm:$0xff] }
 0x74b   : > { %v10028_v48 = vpop.f32.mrf.mxu2  ;;  %v4921_v2 = vmin.f32 %v4880_v26, 6.0  ;;  %5366 = vmatmul.f32.gmra.mxu3 %v5036_v9  ;;  %v3885_v57 = vadd.f32 %v11515_v8, %v3646_v27  ;;  %v4601_v54 = vadd.f32 %v11516_v21, %v4362_v30  ;;  %v11521_v49 = vld [vmem:[#allocation75_spill] sm:$0xff]  ;;  %v11522_v8 = vld [vmem:[#allocation109_spill] sm:$0xff] }
 0x74c   : > { %v10048_v6 = vld [vmem:[#allocation2 + $0xef] sm:$0xff] }
 0x74d   : > { %v4962_v45 = vmul.f32 %v4921_v2, %v11517_v15  ;;  %v4124_v19 = vadd.f32 %v11518_v14, %v3885_v57  ;;  %v5037_v2 = vld [vmem:[#allocation2 + $0xf5] sm:$0xff]  ;;  %v11523_v14 = vld [vmem:[#allocation110_spill] sm:$0xff]  ;;  %v11525_v15 = vld [vmem:[#allocation25_spill] sm:$0xff] }
 0x74e   : > { %v4793_v35 = vpop.f32.mrf.mxu1  ;;  %v5319_v4 = vpop.f32.mrf.mxu3  ;;  %v5103_v24 = vld [vmem:[#allocation2 + $0x136] sm:$0xff]  ;;  %v3647_v57 = vadd.f32 %v11523_v14, %v11522_v8 }
 0x74f   : > { %5003 = vst [vmem:[#allocation2 + $0x140] sm:$0xff] %v4962_v45  ;;  %v4840_v58 = vadd.f32 %v4793_v35, %v4601_v54  ;;  %v10040_v26 = vadd.f32 %v5319_v4, %v9884_v3  ;;  %v10042_v9 = vpop.f32.mrf.mxu0  ;;  %v4363_v34 = vadd.f32 %v11521_v49, %v4124_v19  ;;  %v11524_v3 = vld [vmem:[#allocation137_spill] sm:$0xff]  ;;  %v11526_v35 = vld [vmem:[#allocation55_spill] sm:$0xff] }
 0x750   : > { %5253 = vmatmul.f32.gmra.mxu2 %v5103_v24  ;;  %11520 = vst [vmem:[#allocation78_spill] sm:$0xff] %v10042_v9  ;;  %v3886_v54 = vadd.f32 %v11524_v3, %v3647_v57  ;;  %v11527_v19 = vld [vmem:[#allocation45_spill] sm:$0xff] }
 0x751   : > { %11519 = vst [vmem:[#allocation29_spill] sm:$0xff] %v10040_v26  ;;  %v4881_v27 = vmax.f32 %v4840_v58, 0.0  ;;  %5755 = vmatmul.f32.gmra.mxu1 %v9797_v61  ;;  %v4602_v45 = vadd.f32 %v11525_v15, %v4363_v34  ;;  %v5038_v57 = vld [vmem:[#allocation2 + $0xfd] sm:$0xff] }
 0x752   : > { %5564 = vmatmul.f32.gmra.mxu0 %v10048_v6  ;;  %v4125_v49 = vadd.f32 %v11527_v19, %v3886_v54  ;;  %v11530_v54 = vld [vmem:[#allocation41_spill] sm:$0xff] }
 0x753   : > { %v10046_v30 = vpop.f32.mrf.mxu2  ;;  %v4922_v21 = vmin.f32 %v4881_v27, 6.0  ;;  %5369 = vmatmul.f32.gmra.mxu3 %v5037_v2  ;;  %v6176_v27 = vld [vmem:[#allocation6 + $0xbf0] sm:$0xff] }
 0x754   : > { %6179 = vmatpush.msra.mxu3 %v6176_v27  ;;  %v4364_v8 = vadd.f32 %v9789_v36, %v4125_v49  ;;  %v6654_v49 = vld [vmem:[#allocation6 + $0xcf0] sm:$0xff] }
 0x755   : > { %v4963_v58 = vmul.f32 %v4922_v21, %v11526_v35  ;;  %v10066_v21 = vld [vmem:[#allocation2 + $0xf7] sm:$0xff]  ;;  %6657 = vmatpush.msra.mxu1 %v6654_v49 }
 0x756   : > { %v4796_v4 = vpop.f32.mrf.mxu1  ;;  %v5322_v61 = vpop.f32.mrf.mxu3  ;;  %v5104_v24 = vld [vmem:[#allocation2 + $0x13e] sm:$0xff]  ;;  %v4603_v15 = vadd.f32 %v11530_v54, %v4364_v8 }
 0x757   : > { %5004 = vst [vmem:[#allocation2 + $0x148] sm:$0xff] %v4963_v58  ;;  %v4841_v9 = vadd.f32 %v4796_v4, %v4602_v45  ;;  %v10058_v26 = vadd.f32 %v5322_v61, %v9902_v63  ;;  %v10060_v2 = vpop.f32.mrf.mxu0  ;;  %v6893_v63 = vld [vmem:[#allocation6 + $0xd70] sm:$0xff]  ;;  %v11531_v45 = vld [vmem:[#allocation57_spill] sm:$0xff] }
 0x758   : > { %5256 = vmatmul.f32.gmra.mxu2 %v5104_v24  ;;  %11529 = vst [vmem:[#allocation48_spill] sm:$0xff] %v10060_v2  ;;  %v6415_v61 = vld [vmem:[#allocation6 + $0xc70] sm:$0xff]  ;;  %v5039_v8 = vld [vmem:[#allocation2 + $0x105] sm:$0xff] }
 0x759   : > { %11528 = vst [vmem:[#allocation116_spill] sm:$0xff] %v10058_v26  ;;  %v4882_v34 = vmax.f32 %v4841_v9, 0.0  ;;  %5758 = vmatmul.f32.gmra.mxu1 %v9814_v46  ;;  %6896 = vmatpush.msra.mxu2 %v6893_v63 }
 0x75a   : > { %5567 = vmatmul.f32.gmra.mxu0 %v10066_v21 }
 0x75b   : > { %v10064_v14 = vpop.f32.mrf.mxu2  ;;  %v4923_v3 = vmin.f32 %v4882_v34, 6.0  ;;  %5372 = vmatmul.f32.gmra.mxu3 %v5038_v57  ;;  %6418 = vmatpush.msra.mxu0 %v6415_v61  ;;  %v10079_v34 = vld [vmem:[#allocation2 + $0xff] sm:$0xff] }
 0x75d   : > { %v4964_v35 = vmul.f32 %v4923_v3, %v11531_v45 }
 0x75e   : > { %v4799_v58 = vpop.f32.mrf.mxu1  ;;  %v5325_v36 = vpop.f32.mrf.mxu3  ;;  %v5105_v9 = vld [vmem:[#allocation2 + $0x146] sm:$0xff] }
 0x75f   : > { %5005 = vst [vmem:[#allocation2 + $0x150] sm:$0xff] %v4964_v35  ;;  %v4842_v46 = vadd.f32 %v4799_v58, %v4603_v15  ;;  %v10072_v4 = vadd.f32 %v5325_v36, %v9920_v50  ;;  %v10074_v24 = vpop.f32.mrf.mxu0  ;;  %v11534_v50 = vld [vmem:[#allocation26_spill] sm:$0xff]  ;;  %v5881_v15 = vld [vmem:[#allocation2 + $0x18] sm:$0xff] }
 0x760   : > { %5259 = vmatmul.f32.gmra.mxu2 %v5105_v9  ;;  %11533 = vst [vmem:[#allocation31_spill] sm:$0xff] %v10074_v24  ;;  %v5040_v58 = vld [vmem:[#allocation2 + $0x10d] sm:$0xff] }
 0x761   : > { %11532 = vst [vmem:[#allocation73_spill] sm:$0xff] %v10072_v4  ;;  %v4883_v19 = vmax.f32 %v4842_v46, 0.0  ;;  %5761 = vmatmul.f32.gmra.mxu1 %v9832_v41  ;;  %v10093_v36 = vld [vmem:[#allocation2 + $0x107] sm:$0xff]  ;;  %v6175_v9 = vld [vmem:[#allocation6 + $0xbe8] sm:$0xff] }
 0x762   : > { %5570 = vmatmul.f32.gmra.mxu0 %v10079_v34  ;;  %6180 = vmatpush.msra.mxu3 %v6175_v9  ;;  %v5890_v4 = vld [vmem:[#allocation2 + $0x60] sm:$0xff] }
 0x763   : > { %v10077_v27 = vpop.f32.mrf.mxu2  ;;  %v4924_v57 = vmin.f32 %v4883_v19, 6.0  ;;  %5375 = vmatmul.f32.gmra.mxu3 %v5039_v8  ;;  %v6892_v8 = vld [vmem:[#allocation6 + $0xd68] sm:$0xff] }
 0x764   : > { %6897 = vmatpush.msra.mxu2 %v6892_v8 }
 0x765   : > { %v4965_v3 = vmul.f32 %v4924_v57, %v11534_v50  ;;  %v5041_v50 = vld [vmem:[#allocation2 + $0x115] sm:$0xff] }
 0x766   : > { %v5328_v63 = vpop.f32.mrf.mxu3  ;;  %v10083_v54 = vpop.f32.mrf.mxu1 }
 0x767   : > { %5006 = vst [vmem:[#allocation2 + $0x158] sm:$0xff] %v4965_v3  ;;  %v10086_v41 = vadd.f32 %v5328_v63, %v9938_v39  ;;  %v10088_v45 = vpop.f32.mrf.mxu0  ;;  %v5882_v39 = vld [vmem:[#allocation2 + $0x20] sm:$0xff]  ;;  %v6174_v3 = vld [vmem:[#allocation6 + $0xbe0] sm:$0xff]  ;;  %v6414_v63 = vld [vmem:[#allocation6 + $0xc68] sm:$0xff] }
 0x768   : > { %5955 = vmatmul.f32.vlgmr.msrb.gmra.mxu2 %v5881_v15  ;;  %11536 = vst [vmem:[#allocation118_spill] sm:$0xff] %v10088_v45  ;;  %v6173_v15 = vld [vmem:[#allocation6 + $0xbd8] sm:$0xff]  ;;  %6181 = vmatpush.msra.mxu3 %v6174_v3  ;;  %v6171_v3 = vld [vmem:[#allocation6 + $0xbc8] sm:$0xff] }
 0x769   : > { %11535 = vst [vmem:[#allocation79_spill] sm:$0xff] %v10086_v41  ;;  %5764 = vmatmul.f32.gmra.mxu1 %v9850_v10  ;;  %v10104_v10 = vld [vmem:[#allocation2 + $0x10f] sm:$0xff]  ;;  %6419 = vmatpush.msra.mxu0 %v6414_v63  ;;  %v10142_v41 = vld [vmem:[#allocation2 + $0x127] sm:$0xff] }
 0x76a   : > { %5573 = vmatmul.f32.gmra.mxu0 %v10093_v36  ;;  %6182 = vmatpush.msra.mxu3 %v6173_v15  ;;  %v6412_v15 = vld [vmem:[#allocation6 + $0xc58] sm:$0xff] }
 0x76b   : > { %v10091_v35 = vpop.f32.mrf.mxu2  ;;  %5378 = vmatmul.f32.gmra.mxu3 %v5040_v58 }
 0x76e   : > { %v5331_v46 = vpop.f32.mrf.mxu3  ;;  %v10096_v61 = vpop.f32.mrf.mxu1 }
 0x76f   : > { %v10099_v19 = vadd.f32 %v5331_v46, %v9956_v31  ;;  %v10101_v49 = vpop.f32.mrf.mxu0  ;;  %v6653_v31 = vld [vmem:[#allocation6 + $0xce8] sm:$0xff] }
 0x770   : > { %5958 = vmatmul.f32.gmra.mxu2 %v5882_v39  ;;  %11538 = vst [vmem:[#allocation53_spill] sm:$0xff] %v10101_v49  ;;  %6658 = vmatpush.msra.mxu1 %v6653_v31  ;;  %v6172_v39 = vld [vmem:[#allocation6 + $0xbd0] sm:$0xff]  ;;  %v6170_v49 = vld [vmem:[#allocation6 + $0xbc0] sm:$0xff] }
 0x771   : > { %11537 = vst [vmem:[#allocation49_spill] sm:$0xff] %v10099_v19  ;;  %5767 = vmatmul.f32.gmra.mxu1 %v9868_v7  ;;  %v5883_v7 = vld [vmem:[#allocation2 + $0x28] sm:$0xff]  ;;  %6183 = vmatpush.msra.mxu3 %v6172_v39  ;;  %v5042_v31 = vld [vmem:[#allocation2 + $0x11d] sm:$0xff] }
 0x772   : > { %5576 = vmatmul.f32.gmra.mxu0 %v10104_v10  ;;  %v6413_v19 = vld [vmem:[#allocation6 + $0xc60] sm:$0xff] }
 0x773   : > { %v10106_v57 = vpop.f32.mrf.mxu2  ;;  %5381 = vmatmul.f32.gmra.mxu3 %v5041_v50  ;;  %v10117_v50 = vld [vmem:[#allocation2 + $0x117] sm:$0xff]  ;;  %6420 = vmatpush.msra.mxu0 %v6413_v19 }
 0x774   : > { %6184 = vmatpush.msra.mxu3 %v6171_v3  ;;  %v6168_v3 = vld [vmem:[#allocation6 + $0xbb0] sm:$0xff]  ;;  %v6167_v19 = vld [vmem:[#allocation6 + $0xba8] sm:$0xff] }
 0x775   : > { %6421 = vmatpush.msra.mxu0 %v6412_v15  ;;  %v6409_v15 = vld [vmem:[#allocation6 + $0xc40] sm:$0xff] }
 0x776   : > { %v5334_v58 = vpop.f32.mrf.mxu3  ;;  %v10109_v9 = vpop.f32.mrf.mxu1  ;;  %6185 = vmatpush.msra.mxu3 %v6170_v49  ;;  %v10130_v49 = vld [vmem:[#allocation2 + $0x11f] sm:$0xff] }
 0x777   : > { %v10112_v46 = vadd.f32 %v5334_v58, %v9974_v60  ;;  %v10114_v8 = vpop.f32.mrf.mxu0  ;;  %v6169_v60 = vld [vmem:[#allocation6 + $0xbb8] sm:$0xff] }
 0x778   : > { %5961 = vmatmul.f32.gmra.mxu2 %v5883_v7  ;;  %11540 = vst [vmem:[#allocation80_spill] sm:$0xff] %v10114_v8  ;;  %6186 = vmatpush.msra.mxu3 %v6169_v60  ;;  %v6411_v8 = vld [vmem:[#allocation6 + $0xc50] sm:$0xff]  ;;  %v5043_v60 = vld [vmem:[#allocation2 + $0x125] sm:$0xff] }
 0x779   : > { %11539 = vst [vmem:[#allocation33_spill] sm:$0xff] %v10112_v46  ;;  %5770 = vmatmul.f32.gmra.mxu1 %v9886_v17  ;;  %v5884_v17 = vld [vmem:[#allocation2 + $0x30] sm:$0xff]  ;;  %6422 = vmatpush.msra.mxu0 %v6411_v8 }
 0x77a   : > { %5579 = vmatmul.f32.gmra.mxu0 %v10117_v50  ;;  %6187 = vmatpush.msra.mxu3 %v6168_v3  ;;  %v6891_v3 = vld [vmem:[#allocation6 + $0xd60] sm:$0xff] }
 0x77b   : > { %v10119_v63 = vpop.f32.mrf.mxu2  ;;  %5384 = vmatmul.f32.gmra.mxu3 %v5042_v31  ;;  %v6410_v31 = vld [vmem:[#allocation6 + $0xc48] sm:$0xff]  ;;  %6898 = vmatpush.msra.mxu2 %v6891_v3  ;;  %v6652_v3 = vld [vmem:[#allocation6 + $0xce0] sm:$0xff] }
 0x77c   : > { %6188 = vmatpush.msra.mxu3 %v6167_v19  ;;  %6423 = vmatpush.msra.mxu0 %v6410_v31  ;;  %v6164_v31 = vld [vmem:[#allocation6 + $0xb90] sm:$0xff] }
 0x77d   : > { %6659 = vmatpush.msra.mxu1 %v6652_v3 }
 0x77e   : > { %v5337_v58 = vpop.f32.mrf.mxu3  ;;  %v10122_v7 = vpop.f32.mrf.mxu1  ;;  %6424 = vmatpush.msra.mxu0 %v6409_v15  ;;  %v6406_v15 = vld [vmem:[#allocation6 + $0xc28] sm:$0xff] }
 0x77f   : > { %v10125_v39 = vadd.f32 %v5337_v58, %v9992_v20  ;;  %v10127_v46 = vpop.f32.mrf.mxu0  ;;  %v6166_v20 = vld [vmem:[#allocation6 + $0xba0] sm:$0xff]  ;;  %v6165_v58 = vld [vmem:[#allocation6 + $0xb98] sm:$0xff] }
 0x780   : > { %5964 = vmatmul.f32.gmra.mxu2 %v5884_v17  ;;  %11542 = vst [vmem:[#allocation76_spill] sm:$0xff] %v10127_v46  ;;  %v6408_v17 = vld [vmem:[#allocation6 + $0xc38] sm:$0xff]  ;;  %6189 = vmatpush.msra.mxu3 %v6166_v20  ;;  %v5885_v46 = vld [vmem:[#allocation2 + $0x38] sm:$0xff]  ;;  %v6163_v20 = vld [vmem:[#allocation6 + $0xb88] sm:$0xff] }
 0x781   : > { %11541 = vst [vmem:[#allocation120_spill] sm:$0xff] %v10125_v39  ;;  %5773 = vmatmul.f32.gmra.mxu1 %v9904_v44  ;;  %6425 = vmatpush.msra.mxu0 %v6408_v17  ;;  %v6404_v17 = vld [vmem:[#allocation6 + $0xc18] sm:$0xff] }
 0x782   : > { %5582 = vmatmul.f32.gmra.mxu0 %v10130_v49  ;;  %6190 = vmatpush.msra.mxu3 %v6165_v58  ;;  %v5044_v58 = vld [vmem:[#allocation2 + $0x12d] sm:$0xff] }
 0x783   : > { %v10132_v45 = vpop.f32.mrf.mxu2  ;;  %5387 = vmatmul.f32.gmra.mxu3 %v5043_v60  ;;  %v6407_v60 = vld [vmem:[#allocation6 + $0xc30] sm:$0xff] }
 0x784   : > { %6191 = vmatpush.msra.mxu3 %v6164_v31  ;;  %6426 = vmatpush.msra.mxu0 %v6407_v60 }
 0x786   : > { %v5340_v44 = vpop.f32.mrf.mxu3  ;;  %v10135_v8 = vpop.f32.mrf.mxu1  ;;  %6192 = vmatpush.msra.mxu3 %v6163_v20  ;;  %6427 = vmatpush.msra.mxu0 %v6406_v15  ;;  %v6403_v20 = vld [vmem:[#allocation6 + $0xc10] sm:$0xff] }
 0x787   : > { %v10138_v19 = vadd.f32 %v5340_v44, %v10010_v28  ;;  %v10140_v39 = vpop.f32.mrf.mxu0  ;;  %v6162_v28 = vld [vmem:[#allocation6 + $0xb80] sm:$0xff] }
 0x788   : > { %5967 = vmatmul.f32.gmra.mxu2 %v5885_v46  ;;  %11544 = vst [vmem:[#allocation34_spill] sm:$0xff] %v10140_v39  ;;  %v6405_v46 = vld [vmem:[#allocation6 + $0xc20] sm:$0xff]  ;;  %6193 = vmatpush.msra.mxu3 %v6162_v28  ;;  %v5045_v28 = vld [vmem:[#allocation2 + $0x135] sm:$0xff] }
 0x789   : > { %11543 = vst [vmem:[#allocation86_spill] sm:$0xff] %v10138_v19  ;;  %5776 = vmatmul.f32.gmra.mxu1 %v9922_v23  ;;  %6428 = vmatpush.msra.mxu0 %v6405_v46  ;;  %v5886_v23 = vld [vmem:[#allocation2 + $0x40] sm:$0xff]  ;;  %v10158_v46 = vld [vmem:[#allocation2 + $0x12f] sm:$0xff]  ;;  %v5889_v19 = vld [vmem:[#allocation2 + $0x58] sm:$0xff] }
 0x78a   : > { %5585 = vmatmul.f32.gmra.mxu0 %v10142_v41  ;;  %v6401_v39 = vld [vmem:[#allocation6 + $0xc00] sm:$0xff] }
 0x78b   : > { %v10145_v24 = vpop.f32.mrf.mxu2  ;;  %5390 = vmatmul.f32.gmra.mxu3 %v5044_v58  ;;  %6429 = vmatpush.msra.mxu0 %v6404_v17  ;;  %v6402_v58 = vld [vmem:[#allocation6 + $0xc08] sm:$0xff]  ;;  %v5887_v17 = vld [vmem:[#allocation2 + $0x48] sm:$0xff] }
 0x78d   : > { %6430 = vmatpush.msra.mxu0 %v6403_v20  ;;  %v6890_v20 = vld [vmem:[#allocation6 + $0xd58] sm:$0xff] }
 0x78e   : > { %v5343_v44 = vpop.f32.mrf.mxu3  ;;  %v10148_v31 = vpop.f32.mrf.mxu1  ;;  %6899 = vmatpush.msra.mxu2 %v6890_v20  ;;  %v5047_v20 = vld [vmem:[#allocation2 + $0x145] sm:$0xff] }
 0x78f   : > { %v10151_v60 = vadd.f32 %v5343_v44, %v10028_v48  ;;  %v10153_v15 = vpop.f32.mrf.mxu0  ;;  %6431 = vmatpush.msra.mxu0 %v6402_v58  ;;  %v6651_v58 = vld [vmem:[#allocation6 + $0xcd8] sm:$0xff] }
 0x790   : > { %5970 = vmatmul.f32.gmra.mxu2 %v5886_v23  ;;  %11546 = vst [vmem:[#allocation123_spill] sm:$0xff] %v10153_v15  ;;  %6660 = vmatpush.msra.mxu1 %v6651_v58 }
 0x791   : > { %11545 = vst [vmem:[#allocation81_spill] sm:$0xff] %v10151_v60  ;;  %5779 = vmatmul.f32.gmra.mxu1 %v9940_v37  ;;  %6432 = vmatpush.msra.mxu0 %v6401_v39  ;;  %v10171_v60 = vld [vmem:[#allocation2 + $0x137] sm:$0xff] }
 0x792   : > { %5588 = vmatmul.f32.gmra.mxu0 %v10158_v46 }
 0x793   : > { %v10156_v3 = vpop.f32.mrf.mxu2  ;;  %5393 = vmatmul.f32.gmra.mxu3 %v5045_v28  ;;  %v5046_v28 = vld [vmem:[#allocation2 + $0x13d] sm:$0xff] }
 0x796   : > { %v5346_v48 = vpop.f32.mrf.mxu3  ;;  %v10161_v44 = vpop.f32.mrf.mxu1 }
 0x797   : > { %v10164_v23 = vadd.f32 %v5346_v48, %v10046_v30  ;;  %v10166_v37 = vpop.f32.mrf.mxu0  ;;  %v5888_v48 = vld [vmem:[#allocation2 + $0x50] sm:$0xff] }
 0x798   : > { %5973 = vmatmul.f32.gmra.mxu2 %v5887_v17  ;;  %11548 = vst [vmem:[#allocation88_spill] sm:$0xff] %v10166_v37 }
 0x799   : > { %11547 = vst [vmem:[#allocation87_spill] sm:$0xff] %v10164_v23  ;;  %5782 = vmatmul.f32.gmra.mxu1 %v9958_v40 }
 0x79a   : > { %5591 = vmatmul.f32.gmra.mxu0 %v10171_v60 }
 0x79b   : > { %v10169_v15 = vpop.f32.mrf.mxu2  ;;  %5396 = vmatmul.f32.gmra.mxu3 %v5046_v28  ;;  %v10184_v28 = vld [vmem:[#allocation2 + $0x13f] sm:$0xff] }
 0x79e   : > { %v5349_v39 = vpop.f32.mrf.mxu3  ;;  %v10174_v30 = vpop.f32.mrf.mxu1 }
 0x79f   : > { %v10177_v17 = vadd.f32 %v5349_v39, %v10064_v14  ;;  %v10179_v40 = vpop.f32.mrf.mxu0 }
 0x7a0   : > { %5976 = vmatmul.f32.gmra.mxu2 %v5888_v48  ;;  %11550 = vst [vmem:[#allocation82_spill] sm:$0xff] %v10179_v40  ;;  %v10197_v48 = vld [vmem:[#allocation2 + $0x147] sm:$0xff]  ;;  %v6120_v40 = vld [vmem:[#allocation2 + $0x19] sm:$0xff] }
 0x7a1   : > { %11549 = vst [vmem:[#allocation62_spill] sm:$0xff] %v10177_v17  ;;  %5785 = vmatmul.f32.gmra.mxu1 %v9976_v25 }
 0x7a2   : > { %5594 = vmatmul.f32.gmra.mxu0 %v10184_v28 }
 0x7a3   : > { %v10182_v37 = vpop.f32.mrf.mxu2  ;;  %5399 = vmatmul.f32.gmra.mxu3 %v5047_v20 }
 0x7a6   : > { %v5352_v58 = vpop.f32.mrf.mxu3  ;;  %v10187_v23 = vpop.f32.mrf.mxu1 }
 0x7a7   : > { %v10190_v14 = vadd.f32 %v5352_v58, %v10077_v27  ;;  %v10192_v39 = vpop.f32.mrf.mxu0  ;;  %v6121_v58 = vld [vmem:[#allocation2 + $0x21] sm:$0xff] }
 0x7a8   : > { %5979 = vmatmul.f32.gmra.mxu2 %v5889_v19  ;;  %11552 = vst [vmem:[#allocation89_spill] sm:$0xff] %v10192_v39  ;;  %v6889_v19 = vld [vmem:[#allocation6 + $0xd50] sm:$0xff]  ;;  %v6359_v39 = vld [vmem:[#allocation2 + $0x29] sm:$0xff] }
 0x7a9   : > { %11551 = vst [vmem:[#allocation125_spill] sm:$0xff] %v10190_v14  ;;  %5788 = vmatmul.f32.gmra.mxu1 %v9994_v53  ;;  %6900 = vmatpush.msra.mxu2 %v6889_v19  ;;  %v6650_v14 = vld [vmem:[#allocation6 + $0xcd0] sm:$0xff] }
 0x7aa   : > { %5597 = vmatmul.f32.gmra.mxu0 %v10197_v48  ;;  %6661 = vmatpush.msra.mxu1 %v6650_v14  ;;  %v5892_v14 = vld [vmem:[#allocation2 + $0x70] sm:$0xff] }
 0x7ab   : > { %v10195_v25 = vpop.f32.mrf.mxu2  ;;  %6194 = vmatmul.f32.vlgmr.msra.gmra.mxu3 %v6120_v40 }
 0x7ae   : > { %v5355_v20 = vpop.f32.mrf.mxu3  ;;  %v10200_v17 = vpop.f32.mrf.mxu1 }
 0x7af   : > { %v10203_v27 = vadd.f32 %v5355_v20, %v10091_v35  ;;  %v10208_v2 = vpop.f32.mrf.mxu0  ;;  %v5891_v35 = vld [vmem:[#allocation2 + $0x68] sm:$0xff]  ;;  %v6360_v20 = vld [vmem:[#allocation2 + $0x31] sm:$0xff] }
 0x7b0   : > { %5982 = vmatmul.f32.gmra.mxu2 %v5890_v4  ;;  %11554 = vst [vmem:[#allocation106_spill] sm:$0xff] %v10208_v2 }
 0x7b1   : > { %11553 = vst [vmem:[#allocation90_spill] sm:$0xff] %v10203_v27  ;;  %5791 = vmatmul.f32.gmra.mxu1 %v10012_v55 }
 0x7b2   : > { %6433 = vmatmul.f32.vlgmr.msra.gmra.mxu0 %v6359_v39 }
 0x7b3   : > { %v10206_v53 = vpop.f32.mrf.mxu2  ;;  %6197 = vmatmul.f32.gmra.mxu3 %v6121_v58 }
 0x7b6   : > { %v5358_v40 = vpop.f32.mrf.mxu3  ;;  %v10210_v26 = vpop.f32.mrf.mxu1 }
 0x7b7   : > { %v10213_v4 = vadd.f32 %v5358_v40, %v10106_v57  ;;  %v10218_v19 = vpop.f32.mrf.mxu0  ;;  %v6888_v40 = vld [vmem:[#allocation6 + $0xd48] sm:$0xff] }
 0x7b8   : > { %5985 = vmatmul.f32.gmra.mxu2 %v5891_v35  ;;  %11556 = vst [vmem:[#allocation127_spill] sm:$0xff] %v10218_v19  ;;  %v5893_v19 = vld [vmem:[#allocation2 + $0x78] sm:$0xff] }
 0x7b9   : > { %11555 = vst [vmem:[#allocation83_spill] sm:$0xff] %v10213_v4  ;;  %5794 = vmatmul.f32.gmra.mxu1 %v10030_v51  ;;  %v6361_v51 = vld [vmem:[#allocation2 + $0x39] sm:$0xff]  ;;  %6901 = vmatpush.msra.mxu2 %v6888_v40 }
 0x7ba   : > { %6436 = vmatmul.f32.gmra.mxu0 %v6360_v20  ;;  %v5894_v40 = vld [vmem:[#allocation2 + $0x80] sm:$0xff] }
 0x7bb   : > { %v10216_v55 = vpop.f32.mrf.mxu2  ;;  %6200 = vmatmul.f32.gmra.mxu3 %v6359_v39 }
 0x7be   : > { %v5361_v58 = vpop.f32.mrf.mxu3  ;;  %v10220_v2 = vpop.f32.mrf.mxu1 }
 0x7bf   : > { %11557 = vst [vmem:[#allocation91_spill] sm:$0xff] %v10220_v2  ;;  %v10223_v27 = vadd.f32 %v5361_v58, %v10119_v63  ;;  %v10230_v4 = vpop.f32.mrf.mxu0  ;;  %v6649_v63 = vld [vmem:[#allocation6 + $0xcc8] sm:$0xff]  ;;  %v6362_v58 = vld [vmem:[#allocation2 + $0x41] sm:$0xff] }
 0x7c0   : > { %5988 = vmatmul.f32.gmra.mxu2 %v5892_v14  ;;  %11559 = vst [vmem:[#allocation108_spill] sm:$0xff] %v10230_v4  ;;  %6662 = vmatpush.msra.mxu1 %v6649_v63  ;;  %v5895_v63 = vld [vmem:[#allocation2 + $0x88] sm:$0xff]  ;;  %v5896_v4 = vld [vmem:[#allocation2 + $0x90] sm:$0xff] }
 0x7c1   : > { %11558 = vst [vmem:[#allocation92_spill] sm:$0xff] %v10223_v27  ;;  %5797 = vmatmul.f32.gmra.mxu1 %v10048_v6 }
 0x7c2   : > { %6439 = vmatmul.f32.gmra.mxu0 %v6361_v51 }
 0x7c3   : > { %v10226_v57 = vpop.f32.mrf.mxu2  ;;  %6203 = vmatmul.f32.gmra.mxu3 %v6360_v20 }
 0x7c6   : > { %v5364_v39 = vpop.f32.mrf.mxu3  ;;  %v10228_v35 = vpop.f32.mrf.mxu1 }
 0x7c7   : > { %v10233_v2 = vadd.f32 %v5364_v39, %v10132_v45  ;;  %v10243_v45 = vpop.f32.mrf.mxu0 }
 0x7c8   : > { %5991 = vmatmul.f32.gmra.mxu2 %v5893_v19  ;;  %11562 = vst [vmem:[#allocation93_spill] sm:$0xff] %v10243_v45 }
 0x7c9   : > { %11560 = vst [vmem:[#allocation84_spill] sm:$0xff] %v10233_v2  ;;  %5800 = vmatmul.f32.gmra.mxu1 %v10066_v21  ;;  %v6363_v21 = vld [vmem:[#allocation2 + $0x49] sm:$0xff] }
 0x7ca   : > { %6442 = vmatmul.f32.gmra.mxu0 %v6362_v58 }
 0x7cb   : > { %v10236_v6 = vpop.f32.mrf.mxu2  ;;  %6206 = vmatmul.f32.gmra.mxu3 %v6361_v51 }
 0x7ce   : > { %v5367_v20 = vpop.f32.mrf.mxu3  ;;  %v10238_v14 = vpop.f32.mrf.mxu1 }
 0x7cf   : > { %v10241_v27 = vadd.f32 %v5367_v20, %v10145_v24  ;;  %v6887_v24 = vld [vmem:[#allocation6 + $0xd40] sm:$0xff] }
 0x7d0   : > { %5994 = vmatmul.f32.gmra.mxu2 %v5894_v40  ;;  %v10256_v40 = vpop.f32.mrf.mxu0 }
 0x7d1   : > { %11561 = vst [vmem:[#allocation129_spill] sm:$0xff] %v10241_v27  ;;  %5803 = vmatmul.f32.gmra.mxu1 %v10079_v34  ;;  %6902 = vmatpush.msra.mxu2 %v6887_v24  ;;  %v6364_v34 = vld [vmem:[#allocation2 + $0x51] sm:$0xff]  ;;  %v11569_v24 = vld [vmem:[#allocation42_spill] sm:$0xff] }
 0x7d2   : > { %6445 = vmatmul.f32.gmra.mxu0 %v6363_v21  ;;  %11565 = vst [vmem:[#allocation85_spill] sm:$0xff] %v10256_v40 }
 0x7d3   : > { %v10246_v19 = vpop.f32.mrf.mxu2  ;;  %6209 = vmatmul.f32.gmra.mxu3 %v6362_v58  ;;  %v6648_v58 = vld [vmem:[#allocation6 + $0xcc0] sm:$0xff] }
 0x7d4   : > { %6663 = vmatpush.msra.mxu1 %v6648_v58 }
 0x7d6   : > { %v5370_v39 = vpop.f32.mrf.mxu3  ;;  %v10248_v51 = vpop.f32.mrf.mxu1 }
 0x7d7   : > { %11563 = vst [vmem:[#allocation94_spill] sm:$0xff] %v10248_v51  ;;  %v10251_v2 = vadd.f32 %v5370_v39, %v10156_v3  ;;  %v6365_v39 = vld [vmem:[#allocation2 + $0x59] sm:$0xff]  ;;  %v11571_v51 = vld [vmem:[#allocation23_spill] sm:$0xff] }
 0x7d8   : > { %5997 = vmatmul.f32.gmra.mxu2 %v5895_v63  ;;  %v11568_v63 = vld [vmem:[#allocation47_spill] sm:$0xff] }
 0x7d9   : > { %11564 = vst [vmem:[#allocation111_spill] sm:$0xff] %v10251_v2  ;;  %5806 = vmatmul.f32.gmra.mxu1 %v10093_v36  ;;  %v5281_v2 = vadd.f32 %v11569_v24, %v11568_v63  ;;  %v6366_v63 = vld [vmem:[#allocation2 + $0x61] sm:$0xff] }
 0x7da   : > { %6448 = vmatmul.f32.gmra.mxu0 %v6364_v34  ;;  %v6886_v24 = vld [vmem:[#allocation6 + $0xd38] sm:$0xff] }
 0x7db   : > { %v10254_v20 = vpop.f32.mrf.mxu2  ;;  %6212 = vmatmul.f32.gmra.mxu3 %v6363_v21  ;;  %v10268_v21 = vpop.f32.mrf.mxu0  ;;  %6903 = vmatpush.msra.mxu2 %v6886_v24 }
 0x7dc   : > { %11570 = vst [vmem:[#allocation96_spill] sm:$0xff] %v10268_v21 }
 0x7de   : > { %v5373_v27 = vpop.f32.mrf.mxu3  ;;  %v10258_v45 = vpop.f32.mrf.mxu1 }
 0x7df   : > { %11566 = vst [vmem:[#allocation132_spill] sm:$0xff] %v10258_v45  ;;  %v10261_v3 = vadd.f32 %v5373_v27, %v10169_v15  ;;  %v5897_v45 = vld [vmem:[#allocation2 + $0x98] sm:$0xff]  ;;  %v5601_v15 = vadd.f32 %v11571_v51, %v5281_v2  ;;  %v5898_v2 = vld [vmem:[#allocation2 + $0xa0] sm:$0xff] }
 0x7e0   : > { %6000 = vmatmul.f32.gmra.mxu2 %v5896_v4 }
 0x7e1   : > { %11567 = vst [vmem:[#allocation95_spill] sm:$0xff] %v10261_v3  ;;  %5809 = vmatmul.f32.gmra.mxu1 %v10104_v10  ;;  %v5840_v10 = vadd.f32 %v10083_v54, %v5601_v15 }
 0x7e2   : > { %6451 = vmatmul.f32.gmra.mxu0 %v6365_v39 }
 0x7e3   : > { %v10264_v36 = vpop.f32.mrf.mxu2  ;;  %6215 = vmatmul.f32.gmra.mxu3 %v6364_v34 }
 0x7e6   : > { %v5376_v58 = vpop.f32.mrf.mxu3  ;;  %v10270_v40 = vpop.f32.mrf.mxu1 }
 0x7e7   : > { %v10274_v27 = vadd.f32 %v5376_v58, %v10182_v37  ;;  %v5602_v37 = vadd.f32 %v9826_v47, %v9824_v22  ;;  %v6367_v58 = vld [vmem:[#allocation2 + $0x69] sm:$0xff] }
 0x7e8   : > { %6003 = vmatmul.f32.gmra.mxu2 %v5897_v45  ;;  %v10284_v45 = vpop.f32.mrf.mxu0  ;;  %v5899_v47 = vld [vmem:[#allocation2 + $0xa8] sm:$0xff] }
 0x7e9   : > { %5812 = vmatmul.f32.gmra.mxu1 %v10117_v50  ;;  %v6647_v50 = vld [vmem:[#allocation6 + $0xcb8] sm:$0xff]  ;;  %v5841_v51 = vadd.f32 %v10096_v61, %v5602_v37 }
 0x7ea   : > { %6454 = vmatmul.f32.gmra.mxu0 %v6366_v63  ;;  %6664 = vmatpush.msra.mxu1 %v6647_v50 }
 0x7eb   : > { %v5956_v4 = vpop.f32.mrf.mxu2  ;;  %6218 = vmatmul.f32.gmra.mxu3 %v6365_v39 }
 0x7ec   : > { %v10278_v34 = vadd.f32 %v5956_v4, %v5840_v10 }
 0x7ee   : > { %v5379_v3 = vpop.f32.mrf.mxu3  ;;  %v10280_v21 = vpop.f32.mrf.mxu1 }
 0x7ef   : > { %v10287_v54 = vadd.f32 %v5379_v3, %v10195_v25  ;;  %v5603_v25 = vadd.f32 %v9844_v42, %v9842_v11  ;;  %v5900_v11 = vld [vmem:[#allocation2 + $0xb0] sm:$0xff]  ;;  %v5604_v42 = vadd.f32 %v9862_v38, %v9860_v52 }
 0x7f0   : > { %6006 = vmatmul.f32.gmra.mxu2 %v5898_v2 }
 0x7f1   : > { %5815 = vmatmul.f32.gmra.mxu1 %v10130_v49  ;;  %v5842_v61 = vadd.f32 %v10109_v9, %v5603_v25  ;;  %v10301_v49 = vpop.f32.mrf.mxu0  ;;  %v5843_v9 = vadd.f32 %v10122_v7, %v5604_v42  ;;  %v5605_v7 = vadd.f32 %v9880_v0, %v9878_v13  ;;  %v6642_v13 = vld [vmem:[#allocation6 + $0xc90] sm:$0xff] }
 0x7f2   : > { %6457 = vmatmul.f32.gmra.mxu0 %v6367_v58 }
 0x7f3   : > { %v5959_v39 = vpop.f32.mrf.mxu2  ;;  %6221 = vmatmul.f32.gmra.mxu3 %v6366_v63  ;;  %v6368_v63 = vld [vmem:[#allocation2 + $0x71] sm:$0xff]  ;;  %v5844_v25 = vadd.f32 %v10135_v8, %v5605_v7  ;;  %v5606_v8 = vadd.f32 %v9898_v16, %v9896_v18 }
 0x7f4   : > { %v10291_v15 = vadd.f32 %v5959_v39, %v5841_v51  ;;  %v6369_v51 = vld [vmem:[#allocation2 + $0x79] sm:$0xff]  ;;  %v6884_v7 = vld [vmem:[#allocation6 + $0xd28] sm:$0xff] }
 0x7f6   : > { %v5382_v10 = vpop.f32.mrf.mxu3  ;;  %v10293_v22 = vpop.f32.mrf.mxu1 }
 0x7f7   : > { %v10298_v3 = vadd.f32 %v5382_v10, %v10206_v53  ;;  %v6646_v10 = vld [vmem:[#allocation6 + $0xcb0] sm:$0xff] }
 0x7f8   : > { %6009 = vmatmul.f32.gmra.mxu2 %v5899_v47  ;;  %6665 = vmatpush.msra.mxu1 %v6646_v10  ;;  %v6645_v47 = vld [vmem:[#allocation6 + $0xca8] sm:$0xff] }
 0x7f9   : > { %5818 = vmatmul.f32.gmra.mxu1 %v10142_v41  ;;  %v6885_v41 = vld [vmem:[#allocation6 + $0xd30] sm:$0xff]  ;;  %v10315_v39 = vpop.f32.mrf.mxu0 }
 0x7fa   : > { %6460 = vmatmul.f32.gmra.mxu0 %v6368_v63  ;;  %6904 = vmatpush.msra.mxu2 %v6885_v41  ;;  %v6641_v41 = vld [vmem:[#allocation6 + $0xc88] sm:$0xff] }
 0x7fb   : > { %v5962_v4 = vpop.f32.mrf.mxu2  ;;  %6224 = vmatmul.f32.gmra.mxu3 %v6367_v58  ;;  %6666 = vmatpush.msra.mxu1 %v6645_v47  ;;  %v5607_v47 = vadd.f32 %v9916_v1, %v9914_v12  ;;  %v5904_v12 = vld [vmem:[#allocation2 + $0xd0] sm:$0xff]  ;;  %v5608_v1 = vadd.f32 %v9934_v5, %v9932_v62  ;;  %v5609_v62 = vadd.f32 %v9952_v29, %v9950_v33  ;;  %v5906_v29 = vld [vmem:[#allocation2 + $0xe0] sm:$0xff] }
 0x7fc   : > { %v10304_v24 = vadd.f32 %v5962_v4, %v5842_v61  ;;  %v6644_v61 = vld [vmem:[#allocation6 + $0xca0] sm:$0xff]  ;;  %6905 = vmatpush.msra.mxu2 %v6884_v7 }
 0x7fd   : > { %6667 = vmatpush.msra.mxu1 %v6644_v61 }
 0x7fe   : > { %v5385_v2 = vpop.f32.mrf.mxu3  ;;  %v10306_v37 = vpop.f32.mrf.mxu1 }
 0x7ff   : > { %v10311_v53 = vadd.f32 %v5385_v2, %v10216_v55  ;;  %v5901_v55 = vld [vmem:[#allocation2 + $0xb8] sm:$0xff] }
 0x800   : > { %6012 = vmatmul.f32.gmra.mxu2 %v5900_v11  ;;  %v6643_v11 = vld [vmem:[#allocation6 + $0xc98] sm:$0xff] }
 0x801   : > { %5821 = vmatmul.f32.gmra.mxu1 %v10158_v46  ;;  %v10330_v0 = vpop.f32.mrf.mxu0 }
 0x802   : > { %6463 = vmatmul.f32.gmra.mxu0 %v6369_v51  ;;  %6668 = vmatpush.msra.mxu1 %v6643_v11 }
 0x803   : > { %v5965_v50 = vpop.f32.mrf.mxu2  ;;  %6227 = vmatmul.f32.gmra.mxu3 %v6368_v63  ;;  %v6370_v63 = vld [vmem:[#allocation2 + $0x81] sm:$0xff] }
 0x804   : > { %v10317_v58 = vadd.f32 %v5965_v50, %v5843_v9  ;;  %v5902_v9 = vld [vmem:[#allocation2 + $0xc0] sm:$0xff]  ;;  %6669 = vmatpush.msra.mxu1 %v6642_v13  ;;  %v5845_v50 = vadd.f32 %v10148_v31, %v5606_v8 }
 0x805   : > { %v6373_v8 = vld [vmem:[#allocation2 + $0x99] sm:$0xff] }
 0x806   : > { %v5388_v52 = vpop.f32.mrf.mxu3  ;;  %v10319_v38 = vpop.f32.mrf.mxu1  ;;  %6670 = vmatpush.msra.mxu1 %v6641_v41 }
 0x807   : > { %v10324_v46 = vadd.f32 %v5388_v52, %v10226_v57  ;;  %v6371_v52 = vld [vmem:[#allocation2 + $0x89] sm:$0xff] }
 0x808   : > { %6015 = vmatmul.f32.gmra.mxu2 %v5901_v55 }
 0x809   : > { %5824 = vmatmul.f32.gmra.mxu1 %v10171_v60  ;;  %v10347_v31 = vpop.f32.mrf.mxu0 }
 0x80a   : > { %6466 = vmatmul.f32.gmra.mxu0 %v6370_v63 }
 0x80b   : > { %v5968_v4 = vpop.f32.mrf.mxu2  ;;  %6230 = vmatmul.f32.gmra.mxu3 %v6369_v51  ;;  %v6640_v51 = vld [vmem:[#allocation6 + $0xc80] sm:$0xff] }
 0x80c   : > { %v10328_v2 = vadd.f32 %v5968_v4, %v5844_v25  ;;  %6671 = vmatpush.msra.mxu1 %v6640_v51  ;;  %v5846_v25 = vadd.f32 %v10161_v44, %v5607_v47  ;;  %v6372_v4 = vld [vmem:[#allocation2 + $0x91] sm:$0xff] }
 0x80d   : > { %v5681_v44 = vld [vmem:[#allocation2 + $0x14f] sm:$0xff]  ;;  %v5905_v51 = vld [vmem:[#allocation2 + $0xd8] sm:$0xff] }
 0x80e   : > { %v5391_v57 = vpop.f32.mrf.mxu3  ;;  %v10332_v42 = vpop.f32.mrf.mxu1 }
 0x80f   : > { %v10337_v60 = vadd.f32 %v5391_v57, %v10236_v6  ;;  %v5903_v6 = vld [vmem:[#allocation2 + $0xc8] sm:$0xff] }
 0x810   : > { %6018 = vmatmul.f32.gmra.mxu2 %v5902_v9 }
 0x811   : > { %5827 = vmatmul.f32.gmra.mxu1 %v10184_v28  ;;  %v10364_v57 = vpop.f32.mrf.mxu0 }
 0x812   : > { %6469 = vmatmul.f32.gmra.mxu0 %v6371_v52 }
 0x813   : > { %v5971_v10 = vpop.f32.mrf.mxu2  ;;  %6233 = vmatmul.f32.gmra.mxu3 %v6370_v63 }
 0x814   : > { %v10341_v55 = vadd.f32 %v5971_v10, %v5845_v50  ;;  %v5848_v10 = vadd.f32 %v10187_v23, %v5609_v62  ;;  %v6598_v23 = vld [vmem:[#allocation2 + $0x2a] sm:$0xff] }
 0x816   : > { %v5394_v18 = vpop.f32.mrf.mxu3  ;;  %v10343_v16 = vpop.f32.mrf.mxu1 }
 0x817   : > { %v10350_v28 = vadd.f32 %v5394_v18, %v10246_v19  ;;  %v6374_v18 = vld [vmem:[#allocation2 + $0xa1] sm:$0xff] }
 0x818   : > { %6021 = vmatmul.f32.gmra.mxu2 %v5903_v6 }
 0x819   : > { %5830 = vmatmul.f32.gmra.mxu1 %v10197_v48  ;;  %v5847_v48 = vadd.f32 %v10174_v30, %v5608_v1  ;;  %v5682_v30 = vld [vmem:[#allocation2 + $0x157] sm:$0xff]  ;;  %v10376_v6 = vpop.f32.mrf.mxu0 }
 0x81a   : > { %6472 = vmatmul.f32.gmra.mxu0 %v6372_v4 }
 0x81b   : > { %v5974_v61 = vpop.f32.mrf.mxu2  ;;  %6236 = vmatmul.f32.gmra.mxu3 %v6371_v52  ;;  %v6883_v52 = vld [vmem:[#allocation6 + $0xd20] sm:$0xff] }
 0x81c   : > { %v10354_v63 = vadd.f32 %v5974_v61, %v5846_v25  ;;  %6906 = vmatpush.msra.mxu2 %v6883_v52 }
 0x81e   : > { %v5397_v11 = vpop.f32.mrf.mxu3  ;;  %v10356_v13 = vpop.f32.mrf.mxu1 }
 0x81f   : > { %v10361_v19 = vadd.f32 %v5397_v11, %v10254_v20 }
 0x820   : > { %6024 = vmatmul.f32.gmra.mxu2 %v5904_v12  ;;  %v6375_v12 = vld [vmem:[#allocation2 + $0xa9] sm:$0xff] }
 0x821   : > { %5833 = vmatmul.f32.gmra.mxu1 %v5681_v44  ;;  %v10390_v44 = vpop.f32.mrf.mxu0 }
 0x822   : > { %6475 = vmatmul.f32.gmra.mxu0 %v6373_v8 }
 0x823   : > { %v5977_v9 = vpop.f32.mrf.mxu2  ;;  %6239 = vmatmul.f32.gmra.mxu3 %v6372_v4 }
 0x824   : > { %v10366_v41 = vadd.f32 %v5977_v9, %v5847_v48 }
 0x826   : > { %v5400_v50 = vpop.f32.mrf.mxu3  ;;  %v10373_v20 = vpop.f32.mrf.mxu1 }
 0x827   : > { %v10371_v5 = vadd.f32 %v5400_v50, %v10264_v36  ;;  %v5610_v36 = vadd.f32 %v9970_v32, %v9968_v43  ;;  %v5907_v43 = vld [vmem:[#allocation2 + $0xe8] sm:$0xff]  ;;  %v5611_v32 = vadd.f32 %v9988_v59, %v9986_v56  ;;  %v6376_v50 = vld [vmem:[#allocation2 + $0xb1] sm:$0xff]  ;;  %v11572_v59 = vld [vmem:[#allocation77_spill] sm:$0xff] }
 0x828   : > { %6027 = vmatmul.f32.gmra.mxu2 %v5905_v51  ;;  %v5908_v56 = vld [vmem:[#allocation2 + $0xf0] sm:$0xff] }
 0x829   : > { %5836 = vmatmul.f32.gmra.mxu1 %v5682_v30  ;;  %v5849_v61 = vadd.f32 %v10200_v17, %v5610_v36  ;;  %v6599_v17 = vld [vmem:[#allocation2 + $0x32] sm:$0xff]  ;;  %v5850_v9 = vadd.f32 %v10210_v26, %v5611_v32  ;;  %v6882_v30 = vld [vmem:[#allocation6 + $0xd18] sm:$0xff] }
 0x82a   : > { %6478 = vmatmul.f32.gmra.mxu0 %v6374_v18  ;;  %6907 = vmatpush.msra.mxu2 %v6882_v30  ;;  %v11576_v32 = vld [vmem:[#allocation44_spill] sm:$0xff] }
 0x82b   : > { %v5980_v7 = vpop.f32.mrf.mxu2  ;;  %6242 = vmatmul.f32.gmra.mxu3 %v6373_v8 }
 0x82c   : > { %v10378_v47 = vadd.f32 %v5980_v7, %v5848_v10  ;;  %v10404_v7 = vpop.f32.mrf.mxu0 }
 0x82e   : > { %v6195_v33 = vpop.f32.mrf.mxu3  ;;  %v10386_v4 = vpop.f32.mrf.mxu1 }
 0x82f   : > { %v10383_v25 = vadd.f32 %v6195_v33, %v10278_v34  ;;  %v11574_v33 = vld [vmem:[#allocation91_spill] sm:$0xff] }
 0x830   : > { %6030 = vmatmul.f32.gmra.mxu2 %v5906_v29 }
 0x831   : > { %6672 = vmatmul.f32.vlgmr.msra.gmra.mxu1 %v6598_v23  ;;  %v6377_v23 = vld [vmem:[#allocation2 + $0xb9] sm:$0xff] }
 0x832   : > { %6481 = vmatmul.f32.gmra.mxu0 %v6375_v12 }
 0x833   : > { %v5983_v11 = vpop.f32.mrf.mxu2  ;;  %6245 = vmatmul.f32.gmra.mxu3 %v6374_v18  ;;  %v6600_v18 = vld [vmem:[#allocation2 + $0x3a] sm:$0xff] }
 0x834   : > { %v10388_v1 = vadd.f32 %v5983_v11, %v5849_v61  ;;  %v10420_v30 = vpop.f32.mrf.mxu0 }
 0x836   : > { %v6198_v48 = vpop.f32.mrf.mxu3  ;;  %v10398_v51 = vpop.f32.mrf.mxu1 }
 0x837   : > { %v10395_v34 = vadd.f32 %v6198_v48, %v10291_v15  ;;  %v11573_v15 = vld [vmem:[#allocation114_spill] sm:$0xff]  ;;  %v5909_v48 = vld [vmem:[#allocation2 + $0xf8] sm:$0xff] }
 0x838   : > { %6033 = vmatmul.f32.gmra.mxu2 %v5907_v43  ;;  %v5612_v52 = vadd.f32 %v11573_v15, %v11572_v59  ;;  %v11575_v43 = vld [vmem:[#allocation72_spill] sm:$0xff]  ;;  %v5910_v15 = vld [vmem:[#allocation2 + $0x100] sm:$0xff] }
 0x839   : > { %6675 = vmatmul.f32.gmra.mxu1 %v6599_v17  ;;  %v5613_v17 = vadd.f32 %v11576_v32, %v11575_v43  ;;  %v6881_v32 = vld [vmem:[#allocation6 + $0xd10] sm:$0xff] }
 0x83a   : > { %6484 = vmatmul.f32.gmra.mxu0 %v6376_v50  ;;  %v5851_v29 = vadd.f32 %v11574_v33, %v5612_v52  ;;  %v11578_v52 = vld [vmem:[#allocation29_spill] sm:$0xff]  ;;  %6908 = vmatpush.msra.mxu2 %v6881_v32  ;;  %v5912_v32 = vld [vmem:[#allocation2 + $0x110] sm:$0xff] }
 0x83b   : > { %v5986_v8 = vpop.f32.mrf.mxu2  ;;  %6248 = vmatmul.f32.gmra.mxu3 %v6375_v12 }
 0x83c   : > { %v10400_v62 = vadd.f32 %v5986_v8, %v5850_v9  ;;  %v6601_v9 = vld [vmem:[#allocation2 + $0x42] sm:$0xff]  ;;  %v5852_v8 = vadd.f32 %v10228_v35, %v5613_v17  ;;  %v6602_v35 = vld [vmem:[#allocation2 + $0x4a] sm:$0xff]  ;;  %v10432_v43 = vpop.f32.mrf.mxu0 }
 0x83e   : > { %v6201_v10 = vpop.f32.mrf.mxu3  ;;  %v10412_v11 = vpop.f32.mrf.mxu1 }
 0x83f   : > { %v10407_v26 = vadd.f32 %v6201_v10, %v10304_v24 }
 0x840   : > { %6036 = vmatmul.f32.gmra.mxu2 %v5908_v56 }
 0x841   : > { %6678 = vmatmul.f32.gmra.mxu1 %v6600_v18  ;;  %v11579_v18 = vld [vmem:[#allocation78_spill] sm:$0xff] }
 0x842   : > { %6487 = vmatmul.f32.gmra.mxu0 %v6377_v23  ;;  %v5614_v33 = vadd.f32 %v11579_v18, %v11578_v52 }
 0x843   : > { %v5989_v36 = vpop.f32.mrf.mxu2  ;;  %6251 = vmatmul.f32.gmra.mxu3 %v6376_v50  ;;  %v6378_v50 = vld [vmem:[#allocation2 + $0xc1] sm:$0xff] }
 0x844   : > { %v10410_v61 = vadd.f32 %v5989_v36, %v5851_v29  ;;  %v5853_v36 = vadd.f32 %v10238_v14, %v5614_v33  ;;  %v6603_v14 = vld [vmem:[#allocation2 + $0x52] sm:$0xff] }
 0x846   : > { %v6204_v12 = vpop.f32.mrf.mxu3 }
 0x847   : > { %v10417_v24 = vadd.f32 %v6204_v12, %v10317_v58  ;;  %v10426_v58 = vpop.f32.mrf.mxu1 }
 0x848   : > { %6039 = vmatmul.f32.gmra.mxu2 %v5909_v48  ;;  %v6379_v48 = vld [vmem:[#allocation2 + $0xc9] sm:$0xff] }
 0x849   : > { %11577 = vst [vmem:[#allocation112_spill] sm:$0xff] %v10417_v24  ;;  %6681 = vmatmul.f32.gmra.mxu1 %v6601_v9  ;;  %v5911_v9 = vld [vmem:[#allocation2 + $0x108] sm:$0xff]  ;;  %v11589_v24 = vld [vmem:[#allocation79_spill] sm:$0xff] }
 0x84a   : > { %6490 = vmatmul.f32.gmra.mxu0 %v6378_v50 }
 0x84b   : > { %v5992_v10 = vpop.f32.mrf.mxu2  ;;  %6254 = vmatmul.f32.gmra.mxu3 %v6377_v23 }
 0x84c   : > { %v10422_v56 = vadd.f32 %v5992_v10, %v5852_v8  ;;  %v11581_v8 = vld [vmem:[#allocation116_spill] sm:$0xff] }
 0x84e   : > { %v6207_v59 = vpop.f32.mrf.mxu3 }
 0x84f   : > { %v10429_v29 = vadd.f32 %v6207_v59, %v10328_v2  ;;  %v11582_v2 = vld [vmem:[#allocation48_spill] sm:$0xff]  ;;  %v10442_v18 = vpop.f32.mrf.mxu1 }
 0x850   : > { %6042 = vmatmul.f32.gmra.mxu2 %v5910_v15  ;;  %v5615_v10 = vadd.f32 %v11582_v2, %v11581_v8  ;;  %v11584_v15 = vld [vmem:[#allocation94_spill] sm:$0xff]  ;;  %v11585_v8 = vld [vmem:[#allocation73_spill] sm:$0xff] }
 0x851   : > { %11580 = vst [vmem:[#allocation12_spill] sm:$0xff] %v10429_v29  ;;  %6684 = vmatmul.f32.gmra.mxu1 %v6602_v35  ;;  %v6604_v2 = vld [vmem:[#allocation2 + $0x5a] sm:$0xff] }
 0x852   : > { %6493 = vmatmul.f32.gmra.mxu0 %v6379_v48  ;;  %v5854_v52 = vadd.f32 %v11584_v15, %v5615_v10  ;;  %v11588_v10 = vld [vmem:[#allocation132_spill] sm:$0xff] }
 0x853   : > { %v5995_v12 = vpop.f32.mrf.mxu2  ;;  %6257 = vmatmul.f32.gmra.mxu3 %v6378_v50  ;;  %v6380_v50 = vld [vmem:[#allocation2 + $0xd1] sm:$0xff] }
 0x854   : > { %v10434_v23 = vadd.f32 %v5995_v12, %v5853_v36  ;;  %v10446_v36 = vpop.f32.mrf.mxu0  ;;  %v5913_v29 = vld [vmem:[#allocation2 + $0x118] sm:$0xff] }
 0x856   : > { %v6210_v17 = vpop.f32.mrf.mxu3 }
 0x857   : > { %v10439_v59 = vadd.f32 %v6210_v17, %v10341_v55  ;;  %v11586_v55 = vld [vmem:[#allocation31_spill] sm:$0xff] }
 0x858   : > { %6045 = vmatmul.f32.gmra.mxu2 %v5911_v9  ;;  %v5616_v17 = vadd.f32 %v11586_v55, %v11585_v8  ;;  %v11590_v8 = vld [vmem:[#allocation118_spill] sm:$0xff] }
 0x859   : > { %11583 = vst [vmem:[#allocation134_spill] sm:$0xff] %v10439_v59  ;;  %6687 = vmatmul.f32.gmra.mxu1 %v6603_v14  ;;  %v5617_v55 = vadd.f32 %v11590_v8, %v11589_v24  ;;  %v5914_v8 = vld [vmem:[#allocation2 + $0x120] sm:$0xff] }
 0x85a   : > { %6496 = vmatmul.f32.gmra.mxu0 %v6380_v50  ;;  %v5855_v14 = vadd.f32 %v11588_v10, %v5616_v17  ;;  %v6605_v17 = vld [vmem:[#allocation2 + $0x62] sm:$0xff] }
 0x85b   : > { %v5998_v33 = vpop.f32.mrf.mxu2  ;;  %6260 = vmatmul.f32.gmra.mxu3 %v6379_v48 }
 0x85c   : > { %v10444_v35 = vadd.f32 %v5998_v33, %v5854_v52  ;;  %v6381_v52 = vld [vmem:[#allocation2 + $0xd9] sm:$0xff]  ;;  %v10454_v33 = vpop.f32.mrf.mxu1 }
 0x85e   : > { %v6213_v12 = vpop.f32.mrf.mxu3 }
 0x85f   : > { %v10451_v9 = vadd.f32 %v6213_v12, %v10354_v63  ;;  %v10460_v63 = vpop.f32.mrf.mxu0 }
 0x860   : > { %6048 = vmatmul.f32.gmra.mxu2 %v5912_v32  ;;  %11591 = vst [vmem:[#allocation98_spill] sm:$0xff] %v10460_v63  ;;  %v6880_v32 = vld [vmem:[#allocation6 + $0xd08] sm:$0xff]  ;;  %v11596_v63 = vld [vmem:[#allocation33_spill] sm:$0xff] }
 0x861   : > { %11587 = vst [vmem:[#allocation97_spill] sm:$0xff] %v10451_v9  ;;  %6690 = vmatmul.f32.gmra.mxu1 %v6604_v2  ;;  %6909 = vmatpush.msra.mxu2 %v6880_v32  ;;  %v5856_v2 = vadd.f32 %v10270_v40, %v5617_v55  ;;  %v11593_v9 = vld [vmem:[#allocation49_spill] sm:$0xff]  ;;  %v6606_v32 = vld [vmem:[#allocation2 + $0x6a] sm:$0xff] }
 0x862   : > { %6499 = vmatmul.f32.gmra.mxu0 %v6381_v52 }
 0x863   : > { %v6001_v15 = vpop.f32.mrf.mxu2  ;;  %6263 = vmatmul.f32.gmra.mxu3 %v6380_v50  ;;  %v6382_v50 = vld [vmem:[#allocation2 + $0xe1] sm:$0xff] }
 0x864   : > { %v10456_v48 = vadd.f32 %v6001_v15, %v5855_v14  ;;  %v10468_v15 = vpop.f32.mrf.mxu1 }
 0x866   : > { %v6216_v59 = vpop.f32.mrf.mxu3 }
 0x867   : > { %v10463_v12 = vadd.f32 %v6216_v59, %v10366_v41  ;;  %v11594_v41 = vld [vmem:[#allocation53_spill] sm:$0xff]  ;;  %v10476_v55 = vpop.f32.mrf.mxu0 }
 0x868   : > { %6051 = vmatmul.f32.gmra.mxu2 %v5913_v29  ;;  %v5618_v59 = vadd.f32 %v11594_v41, %v11593_v9  ;;  %v11597_v9 = vld [vmem:[#allocation80_spill] sm:$0xff] }
 0x869   : > { %11592 = vst [vmem:[#allocation113_spill] sm:$0xff] %v10463_v12  ;;  %6693 = vmatmul.f32.gmra.mxu1 %v6605_v17  ;;  %v5915_v12 = vld [vmem:[#allocation2 + $0x128] sm:$0xff]  ;;  %v5619_v41 = vadd.f32 %v11597_v9, %v11596_v63  ;;  %v5916_v9 = vld [vmem:[#allocation2 + $0x130] sm:$0xff] }
 0x86a   : > { %6502 = vmatmul.f32.gmra.mxu0 %v6382_v50  ;;  %v5857_v40 = vadd.f32 %v10280_v21, %v5618_v59  ;;  %v6607_v21 = vld [vmem:[#allocation2 + $0x72] sm:$0xff] }
 0x86b   : > { %v6004_v10 = vpop.f32.mrf.mxu2  ;;  %6266 = vmatmul.f32.gmra.mxu3 %v6381_v52  ;;  %v6383_v52 = vld [vmem:[#allocation2 + $0xe9] sm:$0xff] }
 0x86c   : > { %v10466_v14 = vadd.f32 %v6004_v10, %v5856_v2 }
 0x86e   : > { %v6219_v24 = vpop.f32.mrf.mxu3 }
 0x86f   : > { %v10473_v29 = vadd.f32 %v6219_v24, %v10378_v47  ;;  %v10482_v47 = vpop.f32.mrf.mxu1 }
 0x870   : > { %6054 = vmatmul.f32.gmra.mxu2 %v5914_v8  ;;  %v5858_v8 = vadd.f32 %v10293_v22, %v5619_v41  ;;  %v6608_v22 = vld [vmem:[#allocation2 + $0x7a] sm:$0xff] }
 0x871   : > { %6696 = vmatmul.f32.gmra.mxu1 %v6606_v32  ;;  %v6384_v32 = vld [vmem:[#allocation2 + $0xf1] sm:$0xff] }
 0x872   : > { %6505 = vmatmul.f32.gmra.mxu0 %v6383_v52 }
 0x873   : > { %v6007_v17 = vpop.f32.mrf.mxu2  ;;  %6269 = vmatmul.f32.gmra.mxu3 %v6382_v50 }
 0x874   : > { %v10478_v2 = vadd.f32 %v6007_v17, %v5857_v40  ;;  %v10488_v40 = vpop.f32.mrf.mxu0  ;;  %v6879_v17 = vld [vmem:[#allocation6 + $0xd00] sm:$0xff] }
 0x875   : > { %6910 = vmatpush.msra.mxu2 %v6879_v17 }
 0x876   : > { %11595 = vst [vmem:[#allocation13_spill] sm:$0xff] %v10478_v2  ;;  %v6222_v10 = vpop.f32.mrf.mxu3  ;;  %v11600_v2 = vld [vmem:[#allocation120_spill] sm:$0xff] }
 0x877   : > { %v10485_v24 = vadd.f32 %v6222_v10, %v10388_v1  ;;  %v11601_v1 = vld [vmem:[#allocation76_spill] sm:$0xff] }
 0x878   : > { %6057 = vmatmul.f32.gmra.mxu2 %v5915_v12  ;;  %v5620_v10 = vadd.f32 %v11601_v1, %v11600_v2  ;;  %v5917_v2 = vld [vmem:[#allocation2 + $0x138] sm:$0xff]  ;;  %v11604_v1 = vld [vmem:[#allocation86_spill] sm:$0xff] }
 0x879   : > { %11598 = vst [vmem:[#allocation136_spill] sm:$0xff] %v10485_v24  ;;  %6699 = vmatmul.f32.gmra.mxu1 %v6607_v21  ;;  %v10498_v21 = vpop.f32.mrf.mxu1  ;;  %v11608_v24 = vld [vmem:[#allocation81_spill] sm:$0xff] }
 0x87a   : > { %6508 = vmatmul.f32.gmra.mxu0 %v6384_v32  ;;  %v5859_v41 = vadd.f32 %v10306_v37, %v5620_v10  ;;  %v6609_v37 = vld [vmem:[#allocation2 + $0x82] sm:$0xff] }
 0x87b   : > { %v6010_v59 = vpop.f32.mrf.mxu2  ;;  %6272 = vmatmul.f32.gmra.mxu3 %v6383_v52  ;;  %v6385_v52 = vld [vmem:[#allocation2 + $0xf9] sm:$0xff] }
 0x87c   : > { %v10490_v50 = vadd.f32 %v6010_v59, %v5858_v8  ;;  %v10502_v17 = vpop.f32.mrf.mxu0 }
 0x87e   : > { %11599 = vst [vmem:[#allocation99_spill] sm:$0xff] %v10490_v50  ;;  %v6225_v63 = vpop.f32.mrf.mxu3 }
 0x87f   : > { %v10495_v12 = vadd.f32 %v6225_v63, %v10400_v62  ;;  %v11605_v62 = vld [vmem:[#allocation34_spill] sm:$0xff] }
 0x880   : > { %6060 = vmatmul.f32.gmra.mxu2 %v5916_v9  ;;  %v5621_v63 = vadd.f32 %v11605_v62, %v11604_v1  ;;  %v11609_v1 = vld [vmem:[#allocation123_spill] sm:$0xff] }
 0x881   : > { %11602 = vst [vmem:[#allocation100_spill] sm:$0xff] %v10495_v12  ;;  %6702 = vmatmul.f32.gmra.mxu1 %v6608_v22  ;;  %v5918_v12 = vld [vmem:[#allocation2 + $0x140] sm:$0xff]  ;;  %v5622_v62 = vadd.f32 %v11609_v1, %v11608_v24  ;;  %v5919_v24 = vld [vmem:[#allocation2 + $0x148] sm:$0xff]  ;;  %v11611_v1 = vld [vmem:[#allocation87_spill] sm:$0xff] }
 0x882   : > { %6511 = vmatmul.f32.gmra.mxu0 %v6385_v52  ;;  %v5860_v10 = vadd.f32 %v10319_v38, %v5621_v63  ;;  %v6610_v38 = vld [vmem:[#allocation2 + $0x8a] sm:$0xff] }
 0x883   : > { %v6013_v8 = vpop.f32.mrf.mxu2  ;;  %6275 = vmatmul.f32.gmra.mxu3 %v6384_v32 }
 0x884   : > { %v10500_v59 = vadd.f32 %v6013_v8, %v5859_v41  ;;  %v6386_v41 = vld [vmem:[#allocation2 + $0x101] sm:$0xff]  ;;  %v10510_v8 = vpop.f32.mrf.mxu1 }
 0x886   : > { %11603 = vst [vmem:[#allocation115_spill] sm:$0xff] %v10500_v59  ;;  %v6228_v50 = vpop.f32.mrf.mxu3 }
 0x887   : > { %v10507_v9 = vadd.f32 %v6228_v50, %v10410_v61  ;;  %v10516_v61 = vpop.f32.mrf.mxu0 }
 0x888   : > { %6063 = vmatmul.f32.gmra.mxu2 %v5917_v2  ;;  %v5861_v2 = vadd.f32 %v10332_v42, %v5622_v62 }
 0x889   : > { %11606 = vst [vmem:[#allocation36_spill] sm:$0xff] %v10507_v9  ;;  %6705 = vmatmul.f32.gmra.mxu1 %v6609_v37  ;;  %v6387_v37 = vld [vmem:[#allocation2 + $0x109] sm:$0xff] }
 0x88a   : > { %6514 = vmatmul.f32.gmra.mxu0 %v6386_v41 }
 0x88b   : > { %v6016_v22 = vpop.f32.mrf.mxu2  ;;  %6278 = vmatmul.f32.gmra.mxu3 %v6385_v52 }
 0x88c   : > { %v10512_v32 = vadd.f32 %v6016_v22, %v5860_v10  ;;  %v10524_v52 = vpop.f32.mrf.mxu1 }
 0x88e   : > { %11607 = vst [vmem:[#allocation140_spill] sm:$0xff] %v10512_v32  ;;  %v6231_v59 = vpop.f32.mrf.mxu3  ;;  %v11612_v32 = vld [vmem:[#allocation88_spill] sm:$0xff] }
 0x88f   : > { %v10519_v50 = vadd.f32 %v6231_v59, %v10422_v56  ;;  %v5623_v9 = vadd.f32 %v11612_v32, %v11611_v1  ;;  %v10532_v59 = vpop.f32.mrf.mxu0  ;;  %v11616_v32 = vld [vmem:[#allocation82_spill] sm:$0xff] }
 0x890   : > { %6066 = vmatmul.f32.gmra.mxu2 %v5918_v12  ;;  %v6611_v12 = vld [vmem:[#allocation2 + $0x92] sm:$0xff] }
 0x891   : > { %6708 = vmatmul.f32.gmra.mxu1 %v6610_v38  ;;  %v5862_v42 = vadd.f32 %v10343_v16, %v5623_v9  ;;  %v6612_v16 = vld [vmem:[#allocation2 + $0x9a] sm:$0xff] }
 0x892   : > { %6517 = vmatmul.f32.gmra.mxu0 %v6387_v37 }
 0x893   : > { %v6019_v63 = vpop.f32.mrf.mxu2  ;;  %6281 = vmatmul.f32.gmra.mxu3 %v6386_v41  ;;  %v6388_v41 = vld [vmem:[#allocation2 + $0x111] sm:$0xff] }
 0x894   : > { %v10522_v10 = vadd.f32 %v6019_v63, %v5861_v2  ;;  %v5920_v63 = vld [vmem:[#allocation2 + $0x150] sm:$0xff] }
 0x896   : > { %11610 = vst [vmem:[#allocation22_spill] sm:$0xff] %v10522_v10  ;;  %v6234_v22 = vpop.f32.mrf.mxu3  ;;  %v11615_v10 = vld [vmem:[#allocation62_spill] sm:$0xff] }
 0x897   : > { %v10529_v56 = vadd.f32 %v6234_v22, %v10434_v23  ;;  %v5624_v1 = vadd.f32 %v11616_v32, %v11615_v10  ;;  %v10538_v23 = vpop.f32.mrf.mxu1  ;;  %v5921_v10 = vld [vmem:[#allocation2 + $0x158] sm:$0xff]  ;;  %v11619_v32 = vld [vmem:[#allocation125_spill] sm:$0xff] }
 0x898   : > { %6069 = vmatmul.f32.gmra.mxu2 %v5919_v24 }
 0x899   : > { %11613 = vst [vmem:[#allocation20_spill] sm:$0xff] %v10529_v56  ;;  %6711 = vmatmul.f32.gmra.mxu1 %v6611_v12  ;;  %v5863_v9 = vadd.f32 %v10356_v13, %v5624_v1  ;;  %v6389_v12 = vld [vmem:[#allocation2 + $0x119] sm:$0xff] }
 0x89a   : > { %6520 = vmatmul.f32.gmra.mxu0 %v6388_v41 }
 0x89b   : > { %v6022_v62 = vpop.f32.mrf.mxu2  ;;  %6284 = vmatmul.f32.gmra.mxu3 %v6387_v37 }
 0x89c   : > { %v10534_v38 = vadd.f32 %v6022_v62, %v5862_v42  ;;  %v10544_v42 = vpop.f32.mrf.mxu0 }
 0x89e   : > { %11614 = vst [vmem:[#allocation117_spill] sm:$0xff] %v10534_v38  ;;  %v6237_v2 = vpop.f32.mrf.mxu3  ;;  %v11620_v38 = vld [vmem:[#allocation89_spill] sm:$0xff] }
 0x89f   : > { %v10541_v22 = vadd.f32 %v6237_v2, %v10444_v35  ;;  %v5625_v56 = vadd.f32 %v11620_v38, %v11619_v32  ;;  %v6613_v2 = vld [vmem:[#allocation2 + $0xa2] sm:$0xff]  ;;  %v6837_v38 = vld [vmem:[#allocation2 + $0x2b] sm:$0xff] }
 0x8a0   : > { %6072 = vmatmul.f32.gmra.mxu2 %v5920_v63  ;;  %v10554_v63 = vpop.f32.mrf.mxu1  ;;  %v11623_v32 = vld [vmem:[#allocation90_spill] sm:$0xff] }
 0x8a1   : > { %11617 = vst [vmem:[#allocation39_spill] sm:$0xff] %v10541_v22  ;;  %6714 = vmatmul.f32.gmra.mxu1 %v6612_v16  ;;  %v5864_v13 = vadd.f32 %v10373_v20, %v5625_v56  ;;  %v6390_v16 = vld [vmem:[#allocation2 + $0x121] sm:$0xff]  ;;  %v6614_v20 = vld [vmem:[#allocation2 + $0xaa] sm:$0xff] }
 0x8a2   : > { %6523 = vmatmul.f32.gmra.mxu0 %v6389_v12 }
 0x8a3   : > { %v6025_v24 = vpop.f32.mrf.mxu2  ;;  %6287 = vmatmul.f32.gmra.mxu3 %v6388_v41 }
 0x8a4   : > { %v10546_v37 = vadd.f32 %v6025_v24, %v5863_v9  ;;  %v10558_v41 = vpop.f32.mrf.mxu0 }
 0x8a6   : > { %11618 = vst [vmem:[#allocation32_spill] sm:$0xff] %v10546_v37  ;;  %v6240_v62 = vpop.f32.mrf.mxu3  ;;  %v11627_v37 = vld [vmem:[#allocation83_spill] sm:$0xff] }
 0x8a7   : > { %v10551_v35 = vadd.f32 %v6240_v62, %v10456_v48  ;;  %v11624_v48 = vld [vmem:[#allocation106_spill] sm:$0xff] }
 0x8a8   : > { %6075 = vmatmul.f32.gmra.mxu2 %v5921_v10  ;;  %v5626_v62 = vadd.f32 %v11624_v48, %v11623_v32 }
 0x8a9   : > { %11621 = vst [vmem:[#allocation65_spill] sm:$0xff] %v10551_v35  ;;  %6717 = vmatmul.f32.gmra.mxu1 %v6613_v2  ;;  %v11628_v35 = vld [vmem:[#allocation127_spill] sm:$0xff] }
 0x8aa   : > { %6526 = vmatmul.f32.gmra.mxu0 %v6390_v16  ;;  %v5865_v56 = vadd.f32 %v10386_v4, %v5626_v62  ;;  %v5627_v32 = vadd.f32 %v11628_v35, %v11627_v37  ;;  %v6616_v37 = vld [vmem:[#allocation2 + $0xba] sm:$0xff] }
 0x8ab   : > { %v6028_v1 = vpop.f32.mrf.mxu2  ;;  %6290 = vmatmul.f32.gmra.mxu3 %v6389_v12 }
 0x8ac   : > { %v10556_v9 = vadd.f32 %v6028_v1, %v5864_v13  ;;  %v6391_v13 = vld [vmem:[#allocation2 + $0x129] sm:$0xff]  ;;  %v10566_v1 = vpop.f32.mrf.mxu1  ;;  %v10572_v48 = vpop.f32.mrf.mxu0 }
 0x8ae   : > { %11622 = vst [vmem:[#allocation119_spill] sm:$0xff] %v10556_v9  ;;  %v6243_v24 = vpop.f32.mrf.mxu3  ;;  %v6838_v9 = vld [vmem:[#allocation2 + $0x33] sm:$0xff] }
 0x8af   : > { %v10563_v10 = vadd.f32 %v6243_v24, %v10466_v14  ;;  %v6615_v14 = vld [vmem:[#allocation2 + $0xb2] sm:$0xff]  ;;  %v5866_v24 = vadd.f32 %v10398_v51, %v5627_v32 }
 0x8b0   : > { %6911 = vmatmul.f32.vlgmr.msra.gmra.mxu2 %v6837_v38  ;;  %v6392_v38 = vld [vmem:[#allocation2 + $0x131] sm:$0xff]  ;;  %v6393_v32 = vld [vmem:[#allocation2 + $0x139] sm:$0xff] }
 0x8b1   : > { %11625 = vst [vmem:[#allocation14_spill] sm:$0xff] %v10563_v10  ;;  %6720 = vmatmul.f32.gmra.mxu1 %v6614_v20 }
 0x8b2   : > { %6529 = vmatmul.f32.gmra.mxu0 %v6391_v13 }
 0x8b3   : > { %v6031_v2 = vpop.f32.mrf.mxu2  ;;  %6293 = vmatmul.f32.gmra.mxu3 %v6390_v16  ;;  %v6839_v16 = vld [vmem:[#allocation2 + $0x3b] sm:$0xff] }
 0x8b4   : > { %v10568_v12 = vadd.f32 %v6031_v2, %v5865_v56  ;;  %v10577_v20 = vpop.f32.mrf.mxu1  ;;  %v11630_v56 = vld [vmem:[#allocation92_spill] sm:$0xff] }
 0x8b5   : > { %v11631_v2 = vld [vmem:[#allocation108_spill] sm:$0xff] }
 0x8b6   : > { %11626 = vst [vmem:[#allocation21_spill] sm:$0xff] %v10568_v12  ;;  %v5628_v12 = vadd.f32 %v11631_v2, %v11630_v56 }
 0x8b8   : > { %6914 = vmatmul.f32.gmra.mxu2 %v6838_v9  ;;  %v5867_v35 = vadd.f32 %v10412_v11, %v5628_v12  ;;  %v10582_v9 = vpop.f32.mrf.mxu0  ;;  %v6394_v12 = vld [vmem:[#allocation2 + $0x141] sm:$0xff] }
 0x8b9   : > { %6723 = vmatmul.f32.gmra.mxu1 %v6615_v14 }
 0x8ba   : > { %6532 = vmatmul.f32.gmra.mxu0 %v6392_v38 }
 0x8bb   : > { %v6034_v4 = vpop.f32.mrf.mxu2  ;;  %6296 = vmatmul.f32.gmra.mxu3 %v6391_v13  ;;  %v6840_v13 = vld [vmem:[#allocation2 + $0x43] sm:$0xff] }
 0x8bc   : > { %v10575_v62 = vadd.f32 %v6034_v4, %v5866_v24  ;;  %v11633_v24 = vld [vmem:[#allocation84_spill] sm:$0xff]  ;;  %v11634_v4 = vld [vmem:[#allocation93_spill] sm:$0xff]  ;;  %v10588_v10 = vpop.f32.mrf.mxu1 }
 0x8be   : > { %11629 = vst [vmem:[#allocation24_spill] sm:$0xff] %v10575_v62  ;;  %v5629_v62 = vadd.f32 %v11634_v4, %v11633_v24  ;;  %v6618_v24 = vld [vmem:[#allocation2 + $0xca] sm:$0xff] }
 0x8c0   : > { %6917 = vmatmul.f32.gmra.mxu2 %v6839_v16  ;;  %v6617_v16 = vld [vmem:[#allocation2 + $0xc2] sm:$0xff]  ;;  %v5868_v56 = vadd.f32 %v10426_v58, %v5629_v62  ;;  %v10591_v2 = vpop.f32.mrf.mxu0 }
 0x8c1   : > { %6726 = vmatmul.f32.gmra.mxu1 %v6616_v37  ;;  %v6395_v62 = vld [vmem:[#allocation2 + $0x149] sm:$0xff] }
 0x8c2   : > { %6535 = vmatmul.f32.gmra.mxu0 %v6393_v32 }
 0x8c3   : > { %v6037_v51 = vpop.f32.mrf.mxu2  ;;  %6299 = vmatmul.f32.gmra.mxu3 %v6392_v38  ;;  %v6841_v38 = vld [vmem:[#allocation2 + $0x4b] sm:$0xff] }
 0x8c4   : > { %v10584_v14 = vadd.f32 %v6037_v51, %v5867_v35  ;;  %v11636_v35 = vld [vmem:[#allocation129_spill] sm:$0xff]  ;;  %v10598_v4 = vpop.f32.mrf.mxu1 }
 0x8c5   : > { %v11637_v51 = vld [vmem:[#allocation85_spill] sm:$0xff] }
 0x8c6   : > { %11632 = vst [vmem:[#allocation121_spill] sm:$0xff] %v10584_v14  ;;  %v5630_v14 = vadd.f32 %v11637_v51, %v11636_v35 }
 0x8c8   : > { %6920 = vmatmul.f32.gmra.mxu2 %v6840_v13  ;;  %v5869_v13 = vadd.f32 %v10442_v18, %v5630_v14  ;;  %v6396_v14 = vld [vmem:[#allocation2 + $0x151] sm:$0xff] }
 0x8c9   : > { %6729 = vmatmul.f32.gmra.mxu1 %v6617_v16 }
 0x8ca   : > { %6538 = vmatmul.f32.gmra.mxu0 %v6394_v12 }
 0x8cb   : > { %v6040_v11 = vpop.f32.mrf.mxu2  ;;  %6302 = vmatmul.f32.gmra.mxu3 %v6393_v32  ;;  %v6842_v32 = vld [vmem:[#allocation2 + $0x53] sm:$0xff] }
 0x8cc   : > { %v10593_v37 = vadd.f32 %v6040_v11, %v5868_v56  ;;  %v10602_v56 = vpop.f32.mrf.mxu0  ;;  %v11639_v11 = vld [vmem:[#allocation111_spill] sm:$0xff]  ;;  %v10607_v51 = vpop.f32.mrf.mxu1 }
 0x8ce   : > { %11635 = vst [vmem:[#allocation15_spill] sm:$0xff] %v10593_v37  ;;  %v11640_v37 = vld [vmem:[#allocation96_spill] sm:$0xff] }
 0x8cf   : > { %v5631_v22 = vadd.f32 %v11640_v37, %v11639_v11  ;;  %v6620_v37 = vld [vmem:[#allocation2 + $0xda] sm:$0xff] }
 0x8d0   : > { %6923 = vmatmul.f32.gmra.mxu2 %v6841_v38  ;;  %v6619_v38 = vld [vmem:[#allocation2 + $0xd2] sm:$0xff] }
 0x8d1   : > { %6732 = vmatmul.f32.gmra.mxu1 %v6618_v24  ;;  %v5870_v35 = vadd.f32 %v10454_v33, %v5631_v22  ;;  %v6397_v22 = vld [vmem:[#allocation2 + $0x159] sm:$0xff] }
 0x8d2   : > { %6541 = vmatmul.f32.gmra.mxu0 %v6395_v62 }
 0x8d3   : > { %v6043_v58 = vpop.f32.mrf.mxu2  ;;  %6305 = vmatmul.f32.gmra.mxu3 %v6394_v12  ;;  %v6843_v12 = vld [vmem:[#allocation2 + $0x5b] sm:$0xff] }
 0x8d4   : > { %v10600_v16 = vadd.f32 %v6043_v58, %v5869_v13  ;;  %v11641_v13 = vld [vmem:[#allocation95_spill] sm:$0xff] }
 0x8d5   : > { %v5632_v58 = vadd.f32 %v10284_v45, %v11641_v13  ;;  %v6621_v45 = vld [vmem:[#allocation2 + $0xe2] sm:$0xff] }
 0x8d6   : > { %11638 = vst [vmem:[#allocation37_spill] sm:$0xff] %v10600_v16  ;;  %v10613_v16 = vpop.f32.mrf.mxu0 }
 0x8d8   : > { %6926 = vmatmul.f32.gmra.mxu2 %v6842_v32  ;;  %v5871_v32 = vadd.f32 %v10468_v15, %v5632_v58 }
 0x8d9   : > { %6735 = vmatmul.f32.gmra.mxu1 %v6619_v38  ;;  %v10618_v38 = vpop.f32.mrf.mxu1 }
 0x8da   : > { %6544 = vmatmul.f32.gmra.mxu0 %v6396_v14 }
 0x8db   : > { %v6046_v18 = vpop.f32.mrf.mxu2  ;;  %6308 = vmatmul.f32.gmra.mxu3 %v6395_v62  ;;  %v6844_v62 = vld [vmem:[#allocation2 + $0x63] sm:$0xff] }
 0x8dc   : > { %v10609_v24 = vadd.f32 %v6046_v18, %v5870_v35  ;;  %v5633_v35 = vadd.f32 %v10301_v49, %v10274_v27  ;;  %v6398_v18 = vld [vmem:[#allocation2 + $0x161] sm:$0xff]  ;;  %v6622_v27 = vld [vmem:[#allocation2 + $0xea] sm:$0xff] }
 0x8dd   : > { %v6399_v49 = vld [vmem:[#allocation2 + $0x169] sm:$0xff] }
 0x8de   : > { %v10623_v13 = vpop.f32.mrf.mxu0 }
 0x8e0   : > { %6929 = vmatmul.f32.gmra.mxu2 %v6843_v12  ;;  %v5872_v12 = vadd.f32 %v10482_v47, %v5633_v35 }
 0x8e1   : > { %6738 = vmatmul.f32.gmra.mxu1 %v6620_v37  ;;  %v5634_v37 = vadd.f32 %v10315_v39, %v10287_v54  ;;  %v6623_v54 = vld [vmem:[#allocation2 + $0xf2] sm:$0xff] }
 0x8e2   : > { %6547 = vmatmul.f32.gmra.mxu0 %v6397_v22 }
 0x8e3   : > { %v6049_v33 = vpop.f32.mrf.mxu2  ;;  %6311 = vmatmul.f32.gmra.mxu3 %v6396_v14  ;;  %v6845_v14 = vld [vmem:[#allocation2 + $0x6b] sm:$0xff] }
 0x8e4   : > { %v10616_v11 = vadd.f32 %v6049_v33, %v5871_v32  ;;  %v10629_v32 = vpop.f32.mrf.mxu1  ;;  %v5873_v33 = vadd.f32 %v10498_v21, %v5634_v37  ;;  %v6624_v37 = vld [vmem:[#allocation2 + $0xfa] sm:$0xff] }
 0x8e8   : > { %6932 = vmatmul.f32.gmra.mxu2 %v6844_v62  ;;  %v10632_v62 = vpop.f32.mrf.mxu0 }
 0x8e9   : > { %6741 = vmatmul.f32.gmra.mxu1 %v6621_v45  ;;  %v5635_v45 = vadd.f32 %v10330_v0, %v10298_v3 }
 0x8ea   : > { %6550 = vmatmul.f32.gmra.mxu0 %v6398_v18 }
 0x8eb   : > { %v6052_v15 = vpop.f32.mrf.mxu2  ;;  %6314 = vmatmul.f32.gmra.mxu3 %v6397_v22  ;;  %v6846_v22 = vld [vmem:[#allocation2 + $0x73] sm:$0xff]  ;;  %v5874_v39 = vadd.f32 %v10510_v8, %v5635_v45  ;;  %v6848_v8 = vld [vmem:[#allocation2 + $0x83] sm:$0xff] }
 0x8ec   : > { %v10625_v58 = vadd.f32 %v6052_v15, %v5872_v12  ;;  %v10639_v18 = vpop.f32.mrf.mxu1  ;;  %v6847_v15 = vld [vmem:[#allocation2 + $0x7b] sm:$0xff] }
 0x8f0   : > { %6935 = vmatmul.f32.gmra.mxu2 %v6845_v14  ;;  %v5636_v14 = vadd.f32 %v10347_v31, %v10311_v53 }
 0x8f1   : > { %6744 = vmatmul.f32.gmra.mxu1 %v6622_v27 }
 0x8f2   : > { %6553 = vmatmul.f32.gmra.mxu0 %v6399_v49  ;;  %v5875_v27 = vadd.f32 %v10524_v52, %v5636_v14  ;;  %v6849_v52 = vld [vmem:[#allocation2 + $0x8b] sm:$0xff] }
 0x8f3   : > { %v6055_v47 = vpop.f32.mrf.mxu2 }
 0x8f4   : > { %v10634_v35 = vadd.f32 %v6055_v47, %v5873_v33  ;;  %v10646_v0 = vpop.f32.mrf.mxu1  ;;  %v5637_v33 = vadd.f32 %v10364_v57, %v10324_v46  ;;  %v6625_v47 = vld [vmem:[#allocation2 + $0x102] sm:$0xff] }
 0x8f8   : > { %6938 = vmatmul.f32.gmra.mxu2 %v6846_v22  ;;  %v5876_v22 = vadd.f32 %v10538_v23, %v5637_v33  ;;  %v5639_v23 = vadd.f32 %v10390_v44, %v10350_v28 }
 0x8f9   : > { %6747 = vmatmul.f32.gmra.mxu1 %v6623_v54  ;;  %v5638_v54 = vadd.f32 %v10376_v6, %v10337_v60 }
 0x8fb   : > { %v6058_v12 = vpop.f32.mrf.mxu2 }
 0x8fc   : > { %v10641_v21 = vadd.f32 %v6058_v12, %v5874_v39  ;;  %v10655_v45 = vpop.f32.mrf.mxu1  ;;  %v6626_v39 = vld [vmem:[#allocation2 + $0x10a] sm:$0xff]  ;;  %v5877_v12 = vadd.f32 %v10554_v63, %v5638_v54  ;;  %v5640_v63 = vadd.f32 %v10404_v7, %v10361_v19 }
 0x8fe   : > { %v5879_v33 = vadd.f32 %v10577_v20, %v5640_v63  ;;  %v6853_v20 = vld [vmem:[#allocation2 + $0xab] sm:$0xff]  ;;  %v6855_v63 = vld [vmem:[#allocation2 + $0xbb] sm:$0xff] }
 0x900   : > { %6941 = vmatmul.f32.gmra.mxu2 %v6847_v15  ;;  %v6850_v15 = vld [vmem:[#allocation2 + $0x93] sm:$0xff] }
 0x901   : > { %6750 = vmatmul.f32.gmra.mxu1 %v6624_v37  ;;  %v6627_v37 = vld [vmem:[#allocation2 + $0x112] sm:$0xff] }
 0x903   : > { %v6061_v3 = vpop.f32.mrf.mxu2 }
 0x904   : > { %v10648_v49 = vadd.f32 %v6061_v3, %v5875_v27  ;;  %v10664_v14 = vpop.f32.mrf.mxu1  ;;  %v5878_v27 = vadd.f32 %v10566_v1, %v5639_v23  ;;  %v6851_v3 = vld [vmem:[#allocation2 + $0x9b] sm:$0xff]  ;;  %v5641_v1 = vadd.f32 %v10420_v30, %v10371_v5  ;;  %v6854_v23 = vld [vmem:[#allocation2 + $0xb3] sm:$0xff] }
 0x908   : > { %6944 = vmatmul.f32.gmra.mxu2 %v6848_v8  ;;  %v6628_v8 = vld [vmem:[#allocation2 + $0x11a] sm:$0xff] }
 0x909   : > { %6753 = vmatmul.f32.gmra.mxu1 %v6625_v47 }
 0x90b   : > { %v6064_v53 = vpop.f32.mrf.mxu2 }
 0x90c   : > { %v10653_v31 = vadd.f32 %v6064_v53, %v5876_v22  ;;  %v10672_v47 = vpop.f32.mrf.mxu1  ;;  %v6852_v22 = vld [vmem:[#allocation2 + $0xa3] sm:$0xff] }
 0x90d   : > { %v6629_v53 = vld [vmem:[#allocation2 + $0x122] sm:$0xff] }
 0x910   : > { %6947 = vmatmul.f32.gmra.mxu2 %v6849_v52  ;;  %v5880_v52 = vadd.f32 %v10588_v10, %v5641_v1 }
 0x911   : > { %6756 = vmatmul.f32.gmra.mxu1 %v6626_v39  ;;  %v6557_v39 = vadd.f32 %v10432_v43, %v10383_v25 }
 0x913   : > { %v6067_v46 = vpop.f32.mrf.mxu2 }
 0x914   : > { %v10660_v57 = vadd.f32 %v6067_v46, %v5877_v12  ;;  %v10679_v7 = vpop.f32.mrf.mxu1  ;;  %v6630_v12 = vld [vmem:[#allocation2 + $0x12a] sm:$0xff]  ;;  %v6796_v46 = vadd.f32 %v10598_v4, %v6557_v39 }
 0x918   : > { %6950 = vmatmul.f32.gmra.mxu2 %v6850_v15 }
 0x919   : > { %6759 = vmatmul.f32.gmra.mxu1 %v6627_v37  ;;  %v6558_v37 = vadd.f32 %v10446_v36, %v10395_v34 }
 0x91b   : > { %v6070_v60 = vpop.f32.mrf.mxu2 }
 0x91c   : > { %v10667_v6 = vadd.f32 %v6070_v60, %v5878_v27  ;;  %v10686_v15 = vpop.f32.mrf.mxu1  ;;  %v6631_v60 = vld [vmem:[#allocation2 + $0x132] sm:$0xff] }
 0x920   : > { %6953 = vmatmul.f32.gmra.mxu2 %v6851_v3  ;;  %v6797_v3 = vadd.f32 %v10607_v51, %v6558_v37  ;;  %v6632_v51 = vld [vmem:[#allocation2 + $0x13a] sm:$0xff] }
 0x921   : > { %6762 = vmatmul.f32.gmra.mxu1 %v6628_v8  ;;  %v11642_v8 = vld [vmem:[#allocation98_spill] sm:$0xff] }
 0x923   : > { %v6073_v28 = vpop.f32.mrf.mxu2 }
 0x924   : > { %v10674_v44 = vadd.f32 %v6073_v28, %v5879_v33  ;;  %v6559_v33 = vadd.f32 %v11642_v8, %v10407_v26  ;;  %v10698_v34 = vpop.f32.mrf.mxu1  ;;  %v6633_v26 = vld [vmem:[#allocation2 + $0x142] sm:$0xff] }
 0x926   : > { %v6798_v28 = vadd.f32 %v10618_v38, %v6559_v33 }
 0x928   : > { %6956 = vmatmul.f32.gmra.mxu2 %v6852_v22 }
 0x929   : > { %6765 = vmatmul.f32.gmra.mxu1 %v6629_v53 }
 0x92b   : > { %v6076_v19 = vpop.f32.mrf.mxu2 }
 0x92c   : > { %v10681_v54 = vadd.f32 %v6076_v19, %v5880_v52  ;;  %v6856_v52 = vld [vmem:[#allocation2 + $0xc3] sm:$0xff]  ;;  %v11643_v19 = vld [vmem:[#allocation112_spill] sm:$0xff] }
 0x930   : > { %6959 = vmatmul.f32.gmra.mxu2 %v6853_v20  ;;  %v6560_v20 = vadd.f32 %v10476_v55, %v11643_v19  ;;  %v6634_v55 = vld [vmem:[#allocation2 + $0x14a] sm:$0xff] }
 0x931   : > { %6768 = vmatmul.f32.gmra.mxu1 %v6630_v12 }
 0x932   : > { %v6799_v12 = vadd.f32 %v10629_v32, %v6560_v20 }
 0x933   : > { %v6912_v5 = vpop.f32.mrf.mxu2 }
 0x934   : > { %v7035_v30 = vadd.f32 %v6912_v5, %v6796_v46  ;;  %v10705_v46 = vpop.f32.mrf.mxu1 }
 0x936   : > { %v7076_v10 = vmax.f32 %v7035_v30, 0.0 }
 0x938   : > { %v7117_v27 = vmin.f32 %v7076_v10, 6.0  ;;  %6962 = vmatmul.f32.gmra.mxu2 %v6854_v23  ;;  %v6857_v10 = vld [vmem:[#allocation2 + $0xcb] sm:$0xff]  ;;  %v11644_v23 = vld [vmem:[#allocation12_spill] sm:$0xff] }
 0x939   : > { %6771 = vmatmul.f32.gmra.mxu1 %v6631_v60  ;;  %v6561_v37 = vadd.f32 %v10488_v40, %v11644_v23  ;;  %v6635_v40 = vld [vmem:[#allocation2 + $0x152] sm:$0xff] }
 0x93a   : > { %7158 = vst [vmem:[%s10693_s17] sm:$0xff] %v7117_v27 }
 0x93b   : > { %v6915_v25 = vpop.f32.mrf.mxu2  ;;  %v6800_v60 = vadd.f32 %v10639_v18, %v6561_v37 }
 0x93c   : > { %v7036_v43 = vadd.f32 %v6915_v25, %v6797_v3  ;;  %v10712_v3 = vpop.f32.mrf.mxu1 }
 0x93e   : > { %v7077_v4 = vmax.f32 %v7036_v43, 0.0 }
 0x940   : > { %v7118_v36 = vmin.f32 %v7077_v4, 6.0  ;;  %6965 = vmatmul.f32.gmra.mxu2 %v6855_v63  ;;  %v6858_v4 = vld [vmem:[#allocation2 + $0xd3] sm:$0xff]  ;;  %v11645_v63 = vld [vmem:[#allocation134_spill] sm:$0xff] }
 0x941   : > { %6774 = vmatmul.f32.gmra.mxu1 %v6632_v51  ;;  %v6562_v8 = vadd.f32 %v10502_v17, %v11645_v63  ;;  %v6636_v17 = vld [vmem:[#allocation2 + $0x15a] sm:$0xff] }
 0x942   : > { %7159 = vst [vmem:[%s10693_s17 + $0x8] sm:$0xff] %v7118_v36 }
 0x943   : > { %v6918_v22 = vpop.f32.mrf.mxu2  ;;  %v6801_v36 = vadd.f32 %v10646_v0, %v6562_v8  ;;  %v6862_v8 = vld [vmem:[#allocation2 + $0xf3] sm:$0xff] }
 0x944   : > { %v7037_v1 = vadd.f32 %v6918_v22, %v6798_v28  ;;  %v10718_v28 = vpop.f32.mrf.mxu1 }
 0x946   : > { %v7078_v53 = vmax.f32 %v7037_v1, 0.0  ;;  %v6859_v1 = vld [vmem:[#allocation2 + $0xdb] sm:$0xff] }
 0x948   : > { %v7119_v39 = vmin.f32 %v7078_v53, 6.0  ;;  %6968 = vmatmul.f32.gmra.mxu2 %v6856_v52  ;;  %v11646_v53 = vld [vmem:[#allocation97_spill] sm:$0xff] }
 0x949   : > { %6777 = vmatmul.f32.gmra.mxu1 %v6633_v26  ;;  %v6563_v52 = vadd.f32 %v10516_v61, %v11646_v53 }
 0x94a   : > { %7160 = vst [vmem:[%s10693_s17 + $0x10] sm:$0xff] %v7119_v39 }
 0x94b   : > { %v6921_v38 = vpop.f32.mrf.mxu2  ;;  %v6802_v20 = vadd.f32 %v10655_v45, %v6563_v52 }
 0x94c   : > { %v7038_v5 = vadd.f32 %v6921_v38, %v6799_v12  ;;  %v6860_v12 = vld [vmem:[#allocation2 + $0xe3] sm:$0xff] }
 0x94d   : > { %v6637_v38 = vld [vmem:[#allocation2 + $0x162] sm:$0xff] }
 0x94e   : > { %v7079_v30 = vmax.f32 %v7038_v5, 0.0  ;;  %v11647_v5 = vld [vmem:[#allocation113_spill] sm:$0xff] }
 0x950   : > { %v7120_v27 = vmin.f32 %v7079_v30, 6.0  ;;  %6971 = vmatmul.f32.gmra.mxu2 %v6857_v10  ;;  %v6564_v30 = vadd.f32 %v10532_v59, %v11647_v5  ;;  %v10726_v10 = vpop.f32.mrf.mxu1 }
 0x951   : > { %6780 = vmatmul.f32.gmra.mxu1 %v6634_v55  ;;  %v6861_v55 = vld [vmem:[#allocation2 + $0xeb] sm:$0xff] }
 0x952   : > { %7161 = vst [vmem:[%s10693_s17 + $0x18] sm:$0xff] %v7120_v27  ;;  %v6803_v23 = vadd.f32 %v10664_v14, %v6564_v30 }
 0x953   : > { %v6924_v32 = vpop.f32.mrf.mxu2 }
 0x954   : > { %v7039_v25 = vadd.f32 %v6924_v32, %v6800_v60  ;;  %v6638_v60 = vld [vmem:[#allocation2 + $0x16a] sm:$0xff]  ;;  %v6565_v32 = vadd.f32 %v10544_v42, %v10473_v29 }
 0x956   : > { %v7080_v43 = vmax.f32 %v7039_v25, 0.0  ;;  %v6804_v59 = vadd.f32 %v10672_v47, %v6565_v32 }
 0x958   : > { %v7121_v33 = vmin.f32 %v7080_v43, 6.0  ;;  %6974 = vmatmul.f32.gmra.mxu2 %v6858_v4  ;;  %v10733_v43 = vpop.f32.mrf.mxu1 }
 0x959   : > { %6783 = vmatmul.f32.gmra.mxu1 %v6635_v40 }
 0x95a   : > { %7162 = vst [vmem:[%s10693_s17 + $0x20] sm:$0xff] %v7121_v33  ;;  %v11648_v33 = vld [vmem:[#allocation136_spill] sm:$0xff] }
 0x95b   : > { %v6927_v18 = vpop.f32.mrf.mxu2  ;;  %v6566_v40 = vadd.f32 %v10558_v41, %v11648_v33 }
 0x95c   : > { %v7040_v51 = vadd.f32 %v6927_v18, %v6801_v36 }
 0x95d   : > { %v6805_v29 = vadd.f32 %v10679_v7, %v6566_v40  ;;  %v10746_v7 = vpop.f32.mrf.mxu0 }
 0x95e   : > { %v7081_v22 = vmax.f32 %v7040_v51, 0.0  ;;  %v6863_v51 = vld [vmem:[#allocation2 + $0xfb] sm:$0xff] }
 0x960   : > { %v7122_v19 = vmin.f32 %v7081_v22, 6.0  ;;  %6977 = vmatmul.f32.gmra.mxu2 %v6859_v1  ;;  %v11649_v22 = vld [vmem:[#allocation100_spill] sm:$0xff] }
 0x961   : > { %6786 = vmatmul.f32.gmra.mxu1 %v6636_v17  ;;  %v6567_v1 = vadd.f32 %v10572_v48, %v11649_v22  ;;  %v10750_v48 = vpop.f32.mrf.mxu1 }
 0x962   : > { %7163 = vst [vmem:[%s10693_s17 + $0x28] sm:$0xff] %v7122_v19  ;;  %v10744_v19 = vpop.f32.mrf.mxu3 }
 0x963   : > { %v6930_v0 = vpop.f32.mrf.mxu2  ;;  %v6806_v52 = vadd.f32 %v10686_v15, %v6567_v1 }
 0x964   : > { %v7041_v39 = vadd.f32 %v6930_v0, %v6802_v20  ;;  %v6864_v0 = vld [vmem:[#allocation2 + $0x103] sm:$0xff] }
 0x966   : > { %v7082_v26 = vmax.f32 %v7041_v39, 0.0  ;;  %v11650_v39 = vld [vmem:[#allocation36_spill] sm:$0xff] }
 0x968   : > { %v7123_v61 = vmin.f32 %v7082_v26, 6.0  ;;  %6980 = vmatmul.f32.gmra.mxu2 %v6860_v12  ;;  %v6568_v26 = vadd.f32 %v10582_v9, %v11650_v39  ;;  %v10758_v9 = vpop.f32.mrf.mxu0 }
 0x969   : > { %6789 = vmatmul.f32.gmra.mxu1 %v6637_v38 }
 0x96a   : > { %7164 = vst [vmem:[%s10693_s17 + $0x30] sm:$0xff] %v7123_v61  ;;  %v6807_v38 = vadd.f32 %v10698_v34, %v6568_v26  ;;  %v10754_v30 = vpop.f32.mrf.mxu3 }
 0x96b   : > { %v6933_v45 = vpop.f32.mrf.mxu2 }
 0x96c   : > { %v7042_v37 = vadd.f32 %v6933_v45, %v6803_v23  ;;  %v6865_v23 = vld [vmem:[#allocation2 + $0x10b] sm:$0xff]  ;;  %v6569_v45 = vadd.f32 %v10591_v2, %v10519_v50 }
 0x96e   : > { %v7083_v27 = vmax.f32 %v7042_v37, 0.0 }
 0x970   : > { %v7124_v25 = vmin.f32 %v7083_v27, 6.0  ;;  %6983 = vmatmul.f32.gmra.mxu2 %v6861_v55  ;;  %v6808_v27 = vadd.f32 %v10705_v46, %v6569_v45  ;;  %v10762_v55 = vpop.f32.mrf.mxu1  ;;  %v11655_v45 = vld [vmem:[#allocation13_spill] sm:$0xff] }
 0x971   : > { %6792 = vmatmul.f32.gmra.mxu1 %v6638_v60 }
 0x972   : > { %7165 = vst [vmem:[%s10693_s17 + $0x38] sm:$0xff] %v7124_v25  ;;  %v10764_v25 = vpop.f32.mrf.mxu3 }
 0x973   : > { %v6936_v14 = vpop.f32.mrf.mxu2 }
 0x974   : > { %v7043_v4 = vadd.f32 %v6936_v14, %v6804_v59  ;;  %v6866_v59 = vld [vmem:[#allocation2 + $0x113] sm:$0xff] }
 0x975   : > { %v11651_v14 = vld [vmem:[#allocation20_spill] sm:$0xff] }
 0x976   : > { %v7084_v63 = vmax.f32 %v7043_v4, 0.0  ;;  %v6570_v4 = vadd.f32 %v10602_v56, %v11651_v14 }
 0x978   : > { %v7125_v36 = vmin.f32 %v7084_v63, 6.0  ;;  %6986 = vmatmul.f32.gmra.mxu2 %v6862_v8  ;;  %v6809_v2 = vadd.f32 %v10712_v3, %v6570_v4  ;;  %v10770_v63 = vpop.f32.mrf.mxu0  ;;  %v10772_v33 = vpop.f32.mrf.mxu1 }
 0x97a   : > { %7166 = vst [vmem:[%s10693_s17 + $0x40] sm:$0xff] %v7125_v36  ;;  %v6867_v36 = vld [vmem:[#allocation2 + $0x11b] sm:$0xff]  ;;  %v10776_v56 = vpop.f32.mrf.mxu3 }
 0x97b   : > { %v6939_v42 = vpop.f32.mrf.mxu2 }
 0x97c   : > { %v7044_v18 = vadd.f32 %v6939_v42, %v6805_v29  ;;  %v11652_v29 = vld [vmem:[#allocation39_spill] sm:$0xff] }
 0x97d   : > { %v6571_v42 = vadd.f32 %v10613_v16, %v11652_v29 }
 0x97e   : > { %v7085_v47 = vmax.f32 %v7044_v18, 0.0 }
 0x980   : > { %v7126_v53 = vmin.f32 %v7085_v47, 6.0  ;;  %6989 = vmatmul.f32.gmra.mxu2 %v6863_v51  ;;  %v6810_v47 = vadd.f32 %v10718_v28, %v6571_v42  ;;  %v10780_v22 = vpop.f32.mrf.mxu0 }
 0x982   : > { %7167 = vst [vmem:[%s10693_s17 + $0x48] sm:$0xff] %v7126_v53  ;;  %v10782_v53 = vpop.f32.mrf.mxu1 }
 0x983   : > { %v6942_v41 = vpop.f32.mrf.mxu2 }
 0x984   : > { %v7045_v17 = vadd.f32 %v6942_v41, %v6806_v52  ;;  %v6868_v52 = vld [vmem:[#allocation2 + $0x123] sm:$0xff] }
 0x985   : > { %v11653_v41 = vld [vmem:[#allocation65_spill] sm:$0xff] }
 0x986   : > { %v7086_v20 = vmax.f32 %v7045_v17, 0.0  ;;  %v6572_v17 = vadd.f32 %v10623_v13, %v11653_v41 }
 0x988   : > { %v7127_v12 = vmin.f32 %v7086_v20, 6.0  ;;  %6992 = vmatmul.f32.gmra.mxu2 %v6864_v0  ;;  %v6811_v20 = vadd.f32 %v10726_v10, %v6572_v17  ;;  %v10788_v0 = vpop.f32.mrf.mxu3 }
 0x98a   : > { %7168 = vst [vmem:[%s10693_s17 + $0x50] sm:$0xff] %v7127_v12  ;;  %v10790_v12 = vpop.f32.mrf.mxu0  ;;  %v10794_v13 = vpop.f32.mrf.mxu1 }
 0x98b   : > { %v6945_v15 = vpop.f32.mrf.mxu2 }
 0x98c   : > { %v7046_v5 = vadd.f32 %v6945_v15, %v6807_v38  ;;  %v6869_v38 = vld [vmem:[#allocation2 + $0x12b] sm:$0xff] }
 0x98d   : > { %v11654_v15 = vld [vmem:[#allocation14_spill] sm:$0xff] }
 0x98e   : > { %v7087_v61 = vmax.f32 %v7046_v5, 0.0  ;;  %v6573_v5 = vadd.f32 %v10632_v62, %v11654_v15  ;;  %v6873_v15 = vld [vmem:[#allocation2 + $0x14b] sm:$0xff] }
 0x990   : > { %v7128_v37 = vmin.f32 %v7087_v61, 6.0  ;;  %6995 = vmatmul.f32.gmra.mxu2 %v6865_v23  ;;  %v6812_v23 = vadd.f32 %v10733_v43, %v6573_v5 }
 0x992   : > { %7169 = vst [vmem:[%s10693_s17 + $0x58] sm:$0xff] %v7128_v37  ;;  %v6335_v37 = vadd.f32 %v10744_v19, %v11655_v45  ;;  %v6500_v62 = vpop.f32.mrf.mxu0 }
 0x993   : > { %v6948_v34 = vpop.f32.mrf.mxu2 }
 0x994   : > { %v7047_v60 = vadd.f32 %v6948_v34, %v6808_v27  ;;  %v6261_v34 = vpop.f32.mrf.mxu3 }
 0x996   : > { %v7088_v32 = vmax.f32 %v7047_v60, 0.0 }
 0x998   : > { %v7129_v50 = vmin.f32 %v7088_v32, 6.0  ;;  %6998 = vmatmul.f32.gmra.mxu2 %v6866_v59  ;;  %v6870_v32 = vld [vmem:[#allocation2 + $0x133] sm:$0xff]  ;;  %v6574_v59 = vadd.f32 %v10746_v7, %v6335_v37 }
 0x99a   : > { %7170 = vst [vmem:[%s10693_s17 + $0x60] sm:$0xff] %v7129_v50  ;;  %v6813_v4 = vadd.f32 %v10750_v48, %v6574_v59  ;;  %v6739_v50 = vpop.f32.mrf.mxu1 }
 0x99b   : > { %v6951_v46 = vpop.f32.mrf.mxu2 }
 0x99c   : > { %v7048_v8 = vadd.f32 %v6951_v46, %v6809_v2  ;;  %v11656_v2 = vld [vmem:[#allocation99_spill] sm:$0xff] }
 0x99d   : > { %v6336_v46 = vadd.f32 %v10754_v30, %v11656_v2 }
 0x99e   : > { %v7089_v40 = vmax.f32 %v7048_v8, 0.0 }
 0x99f   : > { %v6575_v29 = vadd.f32 %v10758_v9, %v6336_v46 }
 0x9a0   : > { %v7130_v18 = vmin.f32 %v7089_v40, 6.0  ;;  %7001 = vmatmul.f32.gmra.mxu2 %v6867_v36  ;;  %v6264_v40 = vpop.f32.mrf.mxu3  ;;  %v6871_v36 = vld [vmem:[#allocation2 + $0x13b] sm:$0xff] }
 0x9a1   : > { %v6814_v7 = vadd.f32 %v10762_v55, %v6575_v29 }
 0x9a2   : > { %7171 = vst [vmem:[%s10693_s17 + $0x68] sm:$0xff] %v7130_v18  ;;  %v6503_v18 = vpop.f32.mrf.mxu0 }
 0x9a3   : > { %v6954_v3 = vpop.f32.mrf.mxu2 }
 0x9a4   : > { %v7049_v51 = vadd.f32 %v6954_v3, %v6810_v47  ;;  %v11657_v47 = vld [vmem:[#allocation115_spill] sm:$0xff] }
 0x9a5   : > { %v6337_v3 = vadd.f32 %v10764_v25, %v11657_v47 }
 0x9a6   : > { %v7090_v1 = vmax.f32 %v7049_v51, 0.0 }
 0x9a7   : > { %v6576_v41 = vadd.f32 %v10770_v63, %v6337_v3  ;;  %v6876_v3 = vld [vmem:[#allocation2 + $0x163] sm:$0xff] }
 0x9a8   : > { %v7131_v16 = vmin.f32 %v7090_v1, 6.0  ;;  %7004 = vmatmul.f32.gmra.mxu2 %v6868_v52  ;;  %v6742_v1 = vpop.f32.mrf.mxu1  ;;  %v6872_v52 = vld [vmem:[#allocation2 + $0x143] sm:$0xff]  ;;  %v6267_v9 = vpop.f32.mrf.mxu3 }
 0x9aa   : > { %7172 = vst [vmem:[%s10693_s17 + $0x70] sm:$0xff] %v7131_v16  ;;  %v6815_v16 = vadd.f32 %v10772_v33, %v6576_v41 }
 0x9ab   : > { %v6957_v28 = vpop.f32.mrf.mxu2 }
 0x9ac   : > { %v7050_v39 = vadd.f32 %v6957_v28, %v6811_v20  ;;  %v11658_v20 = vld [vmem:[#allocation140_spill] sm:$0xff] }
 0x9ad   : > { %v6338_v28 = vadd.f32 %v10776_v56, %v11658_v20 }
 0x9ae   : > { %v7091_v26 = vmax.f32 %v7050_v39, 0.0 }
 0x9af   : > { %v6577_v5 = vadd.f32 %v10780_v22, %v6338_v28  ;;  %v6877_v28 = vld [vmem:[#allocation2 + $0x16b] sm:$0xff] }
 0x9b0   : > { %v7132_v61 = vmin.f32 %v7091_v26, 6.0  ;;  %7007 = vmatmul.f32.gmra.mxu2 %v6869_v38  ;;  %v6506_v26 = vpop.f32.mrf.mxu0  ;;  %v6745_v38 = vpop.f32.mrf.mxu1 }
 0x9b1   : > { %v6816_v63 = vadd.f32 %v10782_v53, %v6577_v5 }
 0x9b2   : > { %7173 = vst [vmem:[%s10693_s17 + $0x78] sm:$0xff] %v7132_v61 }
 0x9b3   : > { %v6960_v10 = vpop.f32.mrf.mxu2 }
 0x9b4   : > { %v7051_v27 = vadd.f32 %v6960_v10, %v6812_v23  ;;  %v6270_v23 = vpop.f32.mrf.mxu3  ;;  %v11659_v10 = vld [vmem:[#allocation22_spill] sm:$0xff] }
 0x9b5   : > { %v6339_v45 = vadd.f32 %v10788_v0, %v11659_v10  ;;  %v6875_v0 = vld [vmem:[#allocation2 + $0x15b] sm:$0xff] }
 0x9b6   : > { %v7092_v60 = vmax.f32 %v7051_v27, 0.0 }
 0x9b8   : > { %v7133_v14 = vmin.f32 %v7092_v60, 6.0  ;;  %7010 = vmatmul.f32.gmra.mxu2 %v6870_v32  ;;  %v6509_v27 = vpop.f32.mrf.mxu0  ;;  %v6874_v60 = vld [vmem:[#allocation2 + $0x153] sm:$0xff]  ;;  %v6578_v32 = vadd.f32 %v10790_v12, %v6339_v45  ;;  %v6748_v22 = vpop.f32.mrf.mxu1 }
 0x9ba   : > { %7174 = vst [vmem:[%s10693_s17 + $0x80] sm:$0xff] %v7133_v14  ;;  %v6817_v14 = vadd.f32 %v10794_v13, %v6578_v32 }
 0x9bb   : > { %v6963_v43 = vpop.f32.mrf.mxu2 }
 0x9bc   : > { %v7052_v8 = vadd.f32 %v6963_v43, %v6813_v4  ;;  %v11660_v4 = vld [vmem:[#allocation117_spill] sm:$0xff]  ;;  %v6273_v46 = vpop.f32.mrf.mxu3 }
 0x9bd   : > { %v6340_v43 = vadd.f32 %v6261_v34, %v11660_v4 }
 0x9be   : > { %v7093_v19 = vmax.f32 %v7052_v8, 0.0 }
 0x9c0   : > { %v7134_v42 = vmin.f32 %v7093_v19, 6.0  ;;  %7013 = vmatmul.f32.gmra.mxu2 %v6871_v36  ;;  %v6579_v19 = vadd.f32 %v6500_v62, %v6340_v43  ;;  %v6512_v29 = vpop.f32.mrf.mxu0 }
 0x9c2   : > { %7175 = vst [vmem:[%s10693_s17 + $0x88] sm:$0xff] %v7134_v42  ;;  %v6818_v12 = vadd.f32 %v6739_v50, %v6579_v19  ;;  %v6751_v42 = vpop.f32.mrf.mxu1 }
 0x9c3   : > { %v6966_v48 = vpop.f32.mrf.mxu2 }
 0x9c4   : > { %v7053_v51 = vadd.f32 %v6966_v48, %v6814_v7  ;;  %v11661_v48 = vld [vmem:[#allocation32_spill] sm:$0xff] }
 0x9c5   : > { %v6341_v47 = vadd.f32 %v6264_v40, %v11661_v48 }
 0x9c6   : > { %v7094_v30 = vmax.f32 %v7053_v51, 0.0 }
 0x9c7   : > { %v6580_v34 = vadd.f32 %v6503_v18, %v6341_v47 }
 0x9c8   : > { %v7135_v17 = vmin.f32 %v7094_v30, 6.0  ;;  %7016 = vmatmul.f32.gmra.mxu2 %v6872_v52  ;;  %v6276_v30 = vpop.f32.mrf.mxu3  ;;  %v6515_v62 = vpop.f32.mrf.mxu0 }
 0x9c9   : > { %v6819_v41 = vadd.f32 %v6742_v1, %v6580_v34 }
 0x9ca   : > { %7176 = vst [vmem:[%s10693_s17 + $0x90] sm:$0xff] %v7135_v17  ;;  %v6754_v20 = vpop.f32.mrf.mxu1 }
 0x9cb   : > { %v6969_v55 = vpop.f32.mrf.mxu2 }
 0x9cc   : > { %v7054_v39 = vadd.f32 %v6969_v55, %v6815_v16  ;;  %v11662_v16 = vld [vmem:[#allocation119_spill] sm:$0xff] }
 0x9cd   : > { %v6342_v55 = vadd.f32 %v6267_v9, %v11662_v16 }
 0x9ce   : > { %v7095_v25 = vmax.f32 %v7054_v39, 0.0 }
 0x9cf   : > { %v6581_v40 = vadd.f32 %v6506_v26, %v6342_v55  ;;  %v11664_v26 = vld [vmem:[#allocation24_spill] sm:$0xff]  ;;  %v11667_v55 = vld [vmem:[#allocation37_spill] sm:$0xff] }
 0x9d0   : > { %v7136_v61 = vmin.f32 %v7095_v25, 6.0  ;;  %7019 = vmatmul.f32.gmra.mxu2 %v6873_v15  ;;  %v6279_v15 = vpop.f32.mrf.mxu3 }
 0x9d1   : > { %v6820_v5 = vadd.f32 %v6745_v38, %v6581_v40 }
 0x9d2   : > { %7177 = vst [vmem:[%s10693_s17 + $0x98] sm:$0xff] %v7136_v61  ;;  %v11663_v61 = vld [vmem:[#allocation21_spill] sm:$0xff]  ;;  %v6757_v45 = vpop.f32.mrf.mxu1 }
 0x9d3   : > { %v6972_v33 = vpop.f32.mrf.mxu2 }
 0x9d4   : > { %v7055_v37 = vadd.f32 %v6972_v33, %v6816_v63  ;;  %v6343_v63 = vadd.f32 %v6270_v23, %v11663_v61  ;;  %v6518_v33 = vpop.f32.mrf.mxu0 }
 0x9d6   : > { %v7096_v56 = vmax.f32 %v7055_v37, 0.0  ;;  %v6582_v9 = vadd.f32 %v6509_v27, %v6343_v63 }
 0x9d8   : > { %v7137_v59 = vmin.f32 %v7096_v56, 6.0  ;;  %7022 = vmatmul.f32.gmra.mxu2 %v6874_v60  ;;  %v6821_v56 = vadd.f32 %v6748_v22, %v6582_v9  ;;  %v6282_v60 = vpop.f32.mrf.mxu3 }
 0x9da   : > { %7178 = vst [vmem:[%s10693_s17 + $0xa0] sm:$0xff] %v7137_v59  ;;  %v6344_v59 = vadd.f32 %v6273_v46, %v11664_v26  ;;  %v6760_v23 = vpop.f32.mrf.mxu1 }
 0x9db   : > { %v6975_v53 = vpop.f32.mrf.mxu2 }
 0x9dc   : > { %v7056_v2 = vadd.f32 %v6975_v53, %v6817_v14  ;;  %v6521_v38 = vpop.f32.mrf.mxu0  ;;  %v6583_v4 = vadd.f32 %v6512_v29, %v6344_v59 }
 0x9de   : > { %v7097_v8 = vmax.f32 %v7056_v2, 0.0  ;;  %v6822_v2 = vadd.f32 %v6751_v42, %v6583_v4 }
 0x9e0   : > { %v7138_v36 = vmin.f32 %v7097_v8, 6.0  ;;  %7025 = vmatmul.f32.gmra.mxu2 %v6875_v0  ;;  %v11665_v0 = vld [vmem:[#allocation121_spill] sm:$0xff] }
 0x9e1   : > { %v6345_v19 = vadd.f32 %v6276_v30, %v11665_v0 }
 0x9e2   : > { %7179 = vst [vmem:[%s10693_s17 + $0xa8] sm:$0xff] %v7138_v36  ;;  %v6285_v36 = vpop.f32.mrf.mxu3  ;;  %v6763_v47 = vpop.f32.mrf.mxu1 }
 0x9e3   : > { %v6978_v7 = vpop.f32.mrf.mxu2 }
 0x9e4   : > { %v7057_v13 = vadd.f32 %v6978_v7, %v6818_v12  ;;  %v6584_v12 = vadd.f32 %v6515_v62, %v6345_v19  ;;  %v6524_v48 = vpop.f32.mrf.mxu0  ;;  %v6347_v62 = vadd.f32 %v6282_v60, %v11667_v55 }
 0x9e6   : > { %v7098_v51 = vmax.f32 %v7057_v13, 0.0  ;;  %v6823_v46 = vadd.f32 %v6754_v20, %v6584_v12 }
 0x9e8   : > { %v7139_v52 = vmin.f32 %v7098_v51, 6.0  ;;  %7028 = vmatmul.f32.gmra.mxu2 %v6876_v3  ;;  %v11666_v3 = vld [vmem:[#allocation15_spill] sm:$0xff] }
 0x9e9   : > { %v6346_v29 = vadd.f32 %v6279_v15, %v11666_v3 }
 0x9ea   : > { %7180 = vst [vmem:[%s10693_s17 + $0xb0] sm:$0xff] %v7139_v52  ;;  %v6288_v42 = vpop.f32.mrf.mxu3 }
 0x9eb   : > { %v6981_v17 = vpop.f32.mrf.mxu2  ;;  %v6585_v52 = vadd.f32 %v6518_v33, %v6346_v29  ;;  %v6349_v60 = vadd.f32 %v6288_v42, %v10616_v11 }
 0x9ec   : > { %v7058_v50 = vadd.f32 %v6981_v17, %v6819_v41  ;;  %v6527_v17 = vpop.f32.mrf.mxu0 }
 0x9ed   : > { %v6824_v30 = vadd.f32 %v6757_v45, %v6585_v52 }
 0x9ee   : > { %v7099_v39 = vmax.f32 %v7058_v50, 0.0 }
 0x9f0   : > { %v7140_v25 = vmin.f32 %v7099_v39, 6.0  ;;  %7031 = vmatmul.f32.gmra.mxu2 %v6877_v28  ;;  %v6766_v28 = vpop.f32.mrf.mxu1  ;;  %v6586_v39 = vadd.f32 %v6521_v38, %v6347_v62 }
 0x9f2   : > { %7181 = vst [vmem:[%s10693_s17 + $0xb8] sm:$0xff] %v7140_v25  ;;  %v6291_v25 = vpop.f32.mrf.mxu3  ;;  %v6825_v15 = vadd.f32 %v6760_v23, %v6586_v39 }
 0x9f3   : > { %v6984_v18 = vpop.f32.mrf.mxu2 }
 0x9f4   : > { %v7059_v1 = vadd.f32 %v6984_v18, %v6820_v5  ;;  %v6348_v18 = vadd.f32 %v6285_v36, %v10609_v24  ;;  %v6530_v63 = vpop.f32.mrf.mxu0 }
 0x9f6   : > { %v7100_v10 = vmax.f32 %v7059_v1, 0.0 }
 0x9f8   : > { %v7141_v37 = vmin.f32 %v7100_v10, 6.0  ;;  %v6769_v33 = vpop.f32.mrf.mxu1  ;;  %v6587_v10 = vadd.f32 %v6524_v48, %v6348_v18 }
 0x9fa   : > { %7182 = vst [vmem:[%s10693_s17 + $0xc0] sm:$0xff] %v7141_v37  ;;  %v6826_v9 = vadd.f32 %v6763_v47, %v6587_v10  ;;  %v6294_v37 = vpop.f32.mrf.mxu3 }
 0x9fb   : > { %v6987_v32 = vpop.f32.mrf.mxu2  ;;  %v6351_v12 = vadd.f32 %v6294_v37, %v10634_v35 }
 0x9fc   : > { %v7060_v14 = vadd.f32 %v6987_v32, %v6821_v56  ;;  %v6533_v59 = vpop.f32.mrf.mxu0 }
 0x9fd   : > { %v6590_v47 = vadd.f32 %v6533_v59, %v6351_v12 }
 0x9fe   : > { %v7101_v53 = vmax.f32 %v7060_v14, 0.0  ;;  %v6588_v14 = vadd.f32 %v6527_v17, %v6349_v60 }
 0xa00   : > { %v7142_v43 = vmin.f32 %v7101_v53, 6.0  ;;  %v6772_v24 = vpop.f32.mrf.mxu1  ;;  %v6827_v38 = vadd.f32 %v6766_v28, %v6588_v14 }
 0xa02   : > { %7183 = vst [vmem:[%s10693_s17 + $0xc8] sm:$0xff] %v7142_v43  ;;  %v6350_v43 = vadd.f32 %v6291_v25, %v10625_v58  ;;  %v6829_v58 = vadd.f32 %v6772_v24, %v6590_v47 }
 0xa03   : > { %v6990_v8 = vpop.f32.mrf.mxu2 }
 0xa04   : > { %v7061_v27 = vadd.f32 %v6990_v8, %v6822_v2  ;;  %v6297_v2 = vpop.f32.mrf.mxu3  ;;  %v6589_v0 = vadd.f32 %v6530_v63, %v6350_v43 }
 0xa06   : > { %v7102_v22 = vmax.f32 %v7061_v27, 0.0  ;;  %v6536_v27 = vpop.f32.mrf.mxu0  ;;  %v6828_v11 = vadd.f32 %v6769_v33, %v6589_v0 }
 0xa08   : > { %v7143_v7 = vmin.f32 %v7102_v22, 6.0  ;;  %v6775_v36 = vpop.f32.mrf.mxu1 }
 0xa0a   : > { %7184 = vst [vmem:[%s10693_s17 + $0xd0] sm:$0xff] %v7143_v7 }
 0xa0b   : > { %v6993_v13 = vpop.f32.mrf.mxu2 }
 0xa0c   : > { %v7062_v51 = vadd.f32 %v6993_v13, %v6823_v46  ;;  %v6300_v46 = vpop.f32.mrf.mxu3 }
 0xa0d   : > { %v6353_v55 = vadd.f32 %v6300_v46, %v10648_v49 }
 0xa0e   : > { %v7103_v34 = vmax.f32 %v7062_v51, 0.0  ;;  %v6539_v3 = vpop.f32.mrf.mxu0  ;;  %v6352_v51 = vadd.f32 %v6297_v2, %v10641_v21 }
 0xa0f   : > { %v6592_v39 = vadd.f32 %v6539_v3, %v6353_v55 }
 0xa10   : > { %v7144_v41 = vmin.f32 %v7103_v34, 6.0  ;;  %v6778_v42 = vpop.f32.mrf.mxu1 }
 0xa11   : > { %v6831_v21 = vadd.f32 %v6778_v42, %v6592_v39 }
 0xa12   : > { %7185 = vst [vmem:[%s10693_s17 + $0xd8] sm:$0xff] %v7144_v41  ;;  %v6591_v41 = vadd.f32 %v6536_v27, %v6352_v51 }
 0xa13   : > { %v6996_v16 = vpop.f32.mrf.mxu2 }
 0xa14   : > { %v7063_v50 = vadd.f32 %v6996_v16, %v6824_v30  ;;  %v6303_v17 = vpop.f32.mrf.mxu3  ;;  %v6830_v35 = vadd.f32 %v6775_v36, %v6591_v41 }
 0xa16   : > { %v7104_v20 = vmax.f32 %v7063_v50, 0.0  ;;  %v6542_v50 = vpop.f32.mrf.mxu0 }
 0xa18   : > { %v7145_v40 = vmin.f32 %v7104_v20, 6.0  ;;  %v6781_v20 = vpop.f32.mrf.mxu1 }
 0xa1a   : > { %7186 = vst [vmem:[%s10693_s17 + $0xe0] sm:$0xff] %v7145_v40 }
 0xa1b   : > { %v6999_v5 = vpop.f32.mrf.mxu2 }
 0xa1c   : > { %v7064_v61 = vadd.f32 %v6999_v5, %v6825_v15  ;;  %v6306_v25 = vpop.f32.mrf.mxu3  ;;  %v6354_v5 = vadd.f32 %v6303_v17, %v10653_v31 }
 0xa1e   : > { %v7105_v1 = vmax.f32 %v7064_v61, 0.0  ;;  %v6545_v63 = vpop.f32.mrf.mxu0 }
 0xa20   : > { %v7146_v45 = vmin.f32 %v7105_v1, 6.0  ;;  %v6593_v1 = vadd.f32 %v6542_v50, %v6354_v5  ;;  %v6784_v49 = vpop.f32.mrf.mxu1 }
 0xa22   : > { %7187 = vst [vmem:[%s10693_s17 + $0xe8] sm:$0xff] %v7146_v45  ;;  %v6832_v10 = vadd.f32 %v6781_v20, %v6593_v1 }
 0xa23   : > { %v7002_v56 = vpop.f32.mrf.mxu2 }
 0xa24   : > { %v7065_v32 = vadd.f32 %v7002_v56, %v6826_v9  ;;  %v6355_v9 = vadd.f32 %v6306_v25, %v10660_v57  ;;  %v6309_v56 = vpop.f32.mrf.mxu3 }
 0xa25   : > { %v6356_v24 = vadd.f32 %v6309_v56, %v10667_v6 }
 0xa26   : > { %v7106_v26 = vmax.f32 %v7065_v32, 0.0  ;;  %v6594_v32 = vadd.f32 %v6545_v63, %v6355_v9  ;;  %v6548_v59 = vpop.f32.mrf.mxu0 }
 0xa28   : > { %v7147_v53 = vmin.f32 %v7106_v26, 6.0  ;;  %v6833_v31 = vadd.f32 %v6784_v49, %v6594_v32  ;;  %v6787_v14 = vpop.f32.mrf.mxu1 }
 0xa2a   : > { %7188 = vst [vmem:[%s10693_s17 + $0xf0] sm:$0xff] %v7147_v53 }
 0xa2b   : > { %v7005_v4 = vpop.f32.mrf.mxu2 }
 0xa2c   : > { %v7066_v23 = vadd.f32 %v7005_v4, %v6827_v38  ;;  %v6312_v43 = vpop.f32.mrf.mxu3 }
 0xa2e   : > { %v7107_v8 = vmax.f32 %v7066_v23, 0.0  ;;  %v6595_v23 = vadd.f32 %v6548_v59, %v6356_v24 }
 0xa30   : > { %v7148_v19 = vmin.f32 %v7107_v8, 6.0  ;;  %v6834_v57 = vadd.f32 %v6787_v14, %v6595_v23  ;;  %v6551_v8 = vpop.f32.mrf.mxu0 }
 0xa32   : > { %7189 = vst [vmem:[%s10693_s17 + $0xf8] sm:$0xff] %v7148_v19  ;;  %v6357_v19 = vadd.f32 %v6312_v43, %v10674_v44 }
 0xa33   : > { %v7008_v22 = vpop.f32.mrf.mxu2 }
 0xa34   : > { %v7067_v7 = vadd.f32 %v7008_v22, %v6828_v11  ;;  %v6790_v11 = vpop.f32.mrf.mxu1  ;;  %v6596_v22 = vadd.f32 %v6551_v8, %v6357_v19  ;;  %v6315_v6 = vpop.f32.mrf.mxu3 }
 0xa35   : > { %v6358_v46 = vadd.f32 %v6315_v6, %v10681_v54 }
 0xa36   : > { %v7108_v48 = vmax.f32 %v7067_v7, 0.0  ;;  %v6835_v7 = vadd.f32 %v6790_v11, %v6596_v22 }
 0xa38   : > { %v7149_v13 = vmin.f32 %v7108_v48, 6.0 }
 0xa3a   : > { %7190 = vst [vmem:[%s10693_s17 + $0x100] sm:$0xff] %v7149_v13  ;;  %v6554_v13 = vpop.f32.mrf.mxu0 }
 0xa3b   : > { %v7011_v29 = vpop.f32.mrf.mxu2  ;;  %v6597_v3 = vadd.f32 %v6554_v13, %v6358_v46 }
 0xa3c   : > { %v7068_v34 = vadd.f32 %v7011_v29, %v6829_v58  ;;  %v6793_v44 = vpop.f32.mrf.mxu1 }
 0xa3d   : > { %v6836_v51 = vadd.f32 %v6793_v44, %v6597_v3 }
 0xa3e   : > { %v7109_v52 = vmax.f32 %v7068_v34, 0.0 }
 0xa40   : > { %v7150_v30 = vmin.f32 %v7109_v52, 6.0 }
 0xa42   : > { %7191 = vst [vmem:[%s10693_s17 + $0x108] sm:$0xff] %v7150_v30 }
 0xa43   : > { %v7014_v16 = vpop.f32.mrf.mxu2 }
 0xa44   : > { %v7069_v62 = vadd.f32 %v7014_v16, %v6830_v35 }
 0xa46   : > { %v7110_v28 = vmax.f32 %v7069_v62, 0.0 }
 0xa48   : > { %v7151_v40 = vmin.f32 %v7110_v28, 6.0 }
 0xa4a   : > { %7192 = vst [vmem:[%s10693_s17 + $0x110] sm:$0xff] %v7151_v40 }
 0xa4b   : > { %v7017_v15 = vpop.f32.mrf.mxu2 }
 0xa4c   : > { %v7070_v18 = vadd.f32 %v7017_v15, %v6831_v21 }
 0xa4e   : > { %v7111_v61 = vmax.f32 %v7070_v18, 0.0 }
 0xa50   : > { %v7152_v33 = vmin.f32 %v7111_v61, 6.0 }
 0xa52   : > { %7193 = vst [vmem:[%s10693_s17 + $0x118] sm:$0xff] %v7152_v33 }
 0xa53   : > { %v7020_v45 = vpop.f32.mrf.mxu2 }
 0xa54   : > { %v7071_v37 = vadd.f32 %v7020_v45, %v6832_v10 }
 0xa56   : > { %v7112_v60 = vmax.f32 %v7071_v37, 0.0 }
 0xa58   : > { %v7153_v26 = vmin.f32 %v7112_v60, 6.0 }
 0xa5a   : > { %7194 = vst [vmem:[%s10693_s17 + $0x120] sm:$0xff] %v7153_v26 }
 0xa5b   : > { %v7023_v53 = vpop.f32.mrf.mxu2 }
 0xa5c   : > { %v7072_v38 = vadd.f32 %v7023_v53, %v6833_v31 }
 0xa5e   : > { %v7113_v4 = vmax.f32 %v7072_v38, 0.0 }
 0xa60   : > { %v7154_v2 = vmin.f32 %v7113_v4, 6.0 }
 0xa62   : > { %7195 = vst [vmem:[%s10693_s17 + $0x128] sm:$0xff] %v7154_v2 }
 0xa63   : > { %v7026_v0 = vpop.f32.mrf.mxu2 }
 0xa64   : > { %v7073_v27 = vadd.f32 %v7026_v0, %v6834_v57 }
 0xa66   : > { %v7114_v36 = vmax.f32 %v7073_v27, 0.0 }
 0xa68   : > { %v7155_v12 = vmin.f32 %v7114_v36, 6.0 }
 0xa6a   : > { %7196 = vst [vmem:[%s10693_s17 + $0x130] sm:$0xff] %v7155_v12 }
 0xa6b   : > { %v7029_v48 = vpop.f32.mrf.mxu2 }
 0xa6c   : > { %v7074_v47 = vadd.f32 %v7029_v48, %v6835_v7 }
 0xa6e   : > { %v7115_v58 = vmax.f32 %v7074_v47, 0.0 }
 0xa70   : > { %v7156_v29 = vmin.f32 %v7115_v58, 6.0 }
 0xa72   : > { %7197 = vst [vmem:[%s10693_s17 + $0x138] sm:$0xff] %v7156_v29 }
 0xa73   : > { %v7032_v34 = vpop.f32.mrf.mxu2 }
 0xa74   : > { %v7075_v42 = vadd.f32 %v7032_v34, %v6836_v51 }
 0xa76   : > { %v7116_v54 = vmax.f32 %v7075_v42, 0.0 }
 0xa78   : > { %v7157_v52 = vmin.f32 %v7116_v54, 6.0 }
 0xa7a   : > { %7198 = vst [vmem:[%s10693_s17 + $0x140] sm:$0xff] %v7157_v52 }
 0xa7b   : > { %7513 = shalt.err (!%p7510_p10)
}
 0xa7c   : > { %s7563_s8 = smov 128   ;;  %s7564_s18 = smov 8  }
 0xa7d   : > { %7366 = dma.vmem_to_hbm [thread:$0]  (%p7655_p7), %s7213_s25, 5248, %s7215_s29, %s7200_s16, %s7563_s8, %s7563_s8, %s7564_s18  }
 0xa7e PF: > { %s7229_s23 = sand.u32 1, %s7544_s12   ;;  %p11668_p12 = scmp.ge.s32.totalorder %s7556_s15, 2 }
 0xa7f   : > { %s7230_s28 = scalar_lea.sflag [#allocation5], %s7229_s23 }
 0xa80   : > { %p7377_p13 = pnand %p11668_p12, %p7620_p6 }
 0xa82   : > { %p7378_p0 = pneg %p7377_p13 }
 0xa84   : > { %7539 = dma.done.wait (%p7378_p0), %s7230_s28, 5248  }
 0xa85   : > { %7541 = vsyncadd (%p7378_p0), %s7230_s28, 4294962048  ;;  %p17_p3 = scmp.ge.s32.totalorder %s7638_s26, 4   ;;  %s11669_s12 = smov %s7548_s13 }
 0xa86   : > { %s11670_s13 = smov %s7552_s14  ;;  %s11671_s14 = smov %s7651_s4 }
 0xa87   : > { %s11672_s15 = smov %s7638_s26  ;;  %19 = sbr.rel (!%p17_p3) target bundleno = 6 (0x6), region = 107 }
 0xa8c   :  { %7236 = vsyncpa [#allocation4], 1 }
 0xa8d   :  { %7238 = vsyncpa [#allocation4 + $0x1], 1 }
 0xa8e   :  { %7239 = vsyncpa [#allocation7], 1 }
 0xa8f   :  { %7240 = vsyncpa [#allocation5], 1 }
 0xa90   :  { %7242 = vsyncpa [#allocation5 + $0x1], 1 }

</bundles_post_ra>
